<compile_context>
chip_gen: v5e
topology: v5e:2x2
jax: 0.10.0
libtpu: 0.0.40
codegen_flags: <defaults>
</compile_context>

<pallas_src>
import numpy as np

import jax
import jax.numpy as jnp
from jax.experimental import pallas as pl
from jax.experimental.pallas import tpu as pltpu

NGF = 8    # parameters.ngf (kept small for the demo)
NC = 3     # parameters.nc
EPS = 1e-5
_LANE = 256  # Hin*Cin == padded Hout*Cout == 256 for every carried activation

# Per deconv step (after the head): (Hin, Cin, Cout)
_STEPS = (
    (4,  NGF * 8, NGF * 4),   # ConvTranspose2d(64, 32):  4x4  -> 8x8
    (8,  NGF * 4, NGF * 2),   # ConvTranspose2d(32, 16):  8x8  -> 16x16
    (16, NGF * 2, NGF),       # ConvTranspose2d(16, 8):   16x16-> 32x32
    (32, NGF,     NC),        # ConvTranspose2d(8, 3):    32x32-> 64x64
)


# ------------------------------ fused kernel -------------------------------

def _bn_relu_deconv(x, bn, rr, w_ref, a_ref, count):
    """One BatchNorm2d(train stats)+ReLU+ConvTranspose2d(4,2,1,bias=False) block.

    x:  (Min, 256) f32, previous ConvT output; rows=(b, y), lanes=(x*Cin + c).
    bn: (2, 256) f32, [gamma, beta] tiled across x.
    rr: (256, 256) f32 0/1 channel-reduction/broadcast matrix.
    w_ref: (4, 256, 256) bf16 banded tap matrices (one per vertical tap ty).
    a_ref: (4, Mout, Min) f32 0/1 row-assembly (vertical col2im) matrices.
    """
    ones = jnp.ones((1, x.shape[0]), jnp.float32)
    s1 = jnp.dot(ones, x, preferred_element_type=jnp.float32)          # (1, 256)
    s2 = jnp.dot(ones, x * x, preferred_element_type=jnp.float32)      # (1, 256)
    inv_n = 1.0 / count
    mean = jnp.dot(s1, rr, preferred_element_type=jnp.float32) * inv_n  # per-channel, tiled
    ex2 = jnp.dot(s2, rr, preferred_element_type=jnp.float32) * inv_n
    var = jnp.maximum(ex2 - mean * mean, 0.0)        # clamp: one-pass cancellation
    inv = jax.lax.rsqrt(var + EPS)
    scale = inv * bn[0:1, :]
    shift = bn[1:2, :] - mean * scale
    xn = jnp.maximum(x * scale + shift, 0.0).astype(jnp.bfloat16)

    y = None
    for ty in range(4):
        z = jnp.dot(xn, w_ref[ty], preferred_element_type=jnp.float32)       # (Min, 256)
        c = jnp.dot(a_ref[ty], z, preferred_element_type=jnp.float32)        # (Mout, 256)
        y = c if y is None else y + c
    return y


def _generator_kernel(zy_ref, wcomb_ref, bcomb_ref, w1c_ref, csplit_ref,
                      w2_ref, a2_ref, bn1_ref, rr1_ref,
                      w3_ref, a3_ref, bn2_ref, rr2_ref,
                      w4_ref, a4_ref, bn3_ref, rr3_ref,
                      w5_ref, a5_ref, bn4_ref, rr4_ref,
                      o_ref):
    B = zy_ref.shape[0]

    # Head: the two Linears as one block-diagonal matmul + ReLU, then the
    # ConvTranspose2d(392, 64, 4, 1, 0) on a 1x1 map == one matmul.
    zy = zy_ref[...].astype(jnp.bfloat16)
    feats = jnp.dot(zy, wcomb_ref[...], preferred_element_type=jnp.float32)
    feats = jnp.maximum(feats + bcomb_ref[...], 0.0).astype(jnp.bfloat16)
    h = jnp.dot(feats, w1c_ref[...], preferred_element_type=jnp.float32)  # (B,1024) cols (oy,ox,c)

    # Re-arrange (B, 4*256) lanes -> rows (b, oy) x lanes (ox, c) via 4 tiny
    # 0/1 row-scatter matmuls (lane->sublane data movement on the MXU).
    x = None
    for oy in range(4):
        blk = h[:, oy * 256:(oy + 1) * 256]
        c = jnp.dot(csplit_ref[oy], blk, preferred_element_type=jnp.float32)   # (4B, 256)
        x = c if x is None else x + c

    x = _bn_relu_deconv(x, bn1_ref[...], rr1_ref[...], w2_ref, a2_ref, float(B * 4 * 4))
    x = _bn_relu_deconv(x, bn2_ref[...], rr2_ref[...], w3_ref, a3_ref, float(B * 8 * 8))
    x = _bn_relu_deconv(x, bn3_ref[...], rr3_ref[...], w4_ref, a4_ref, float(B * 16 * 16))
    x = _bn_relu_deconv(x, bn4_ref[...], rr4_ref[...], w5_ref, a5_ref, float(B * 32 * 32))

    o_ref[...] = jnp.tanh(x)     # final nn.Tanh fused; (B*64, 256) lane-dense store


# ------------------------------ wrapper -------------------------------------

def _full_spec(x):
    nd = x.ndim
    return pl.BlockSpec(x.shape, lambda i, _nd=nd: (0,) * _nd)


@jax.jit
def generator_forward(params, z, y):
    B = z.shape[0]
    zy = jnp.concatenate([z.reshape(B, 100).astype(jnp.float32),
                          y.astype(jnp.float32)], axis=1)              # (B, 124)

    args = [zy, params["wcomb"], params["bcomb"], params["w1c"], params["csplit"]]
    for l in range(4):
        args += [params[f"w_step{l}"], params[f"a_step{l}"],
                 params[f"bn_step{l}"], params[f"rr_step{l}"]]

    out = pl.pallas_call(
        _generator_kernel,
        out_shape=jax.ShapeDtypeStruct((B * 64, _LANE), jnp.float32),
        grid=(1,),
        in_specs=[_full_spec(a) for a in args],
        out_specs=pl.BlockSpec((B * 64, _LANE), lambda i: (0, 0)),
        compiler_params=pltpu.CompilerParams(dimension_semantics=("arbitrary",)),
    )(*args)

    # Drop the zero-padded columns, un-flatten, NCHW to match PyTorch.
    img = out[:, :64 * NC].reshape(B, 64, 64, NC)       # rows (b, oy), cols (ox, c)
    return jnp.transpose(img, (0, 3, 1, 2))


# ------------------------------ parameters ----------------------------------

def init_params(key, batch):
    """Random demo parameters, preprocessed at init time into matmul-ready
    banded / block matrices so the whole forward is pure MXU work."""
    ks = jax.random.split(key, 24)

    def rnd(k, shape, s=0.05):
        return np.asarray(s * jax.random.normal(k, shape), dtype=np.float32)

    # Raw PyTorch-layout parameters.
    wz = rnd(ks[0], (200, 100)); bz = rnd(ks[1], (200,))     # nn.Linear(100, 200)
    wy = rnd(ks[2], (192, 24));  by = rnd(ks[3], (192,))     # nn.Linear(24, 192)
    w1 = rnd(ks[4], (392, NGF * 8, 4, 4))                    # ConvT(392, 64, 4, 1, 0)
    wconv = [rnd(ks[5], (NGF * 8, NGF * 4, 4, 4)),
             rnd(ks[6], (NGF * 4, NGF * 2, 4, 4)),
             rnd(ks[7], (NGF * 2, NGF, 4, 4)),
             rnd(ks[8], (NGF, NC, 4, 4))]
    chans = [NGF * 8, NGF * 4, NGF * 2, NGF]
    gammas = [1.0 + rnd(ks[9 + i], (c,), s=0.1) for i, c in enumerate(chans)]
    betas = [rnd(ks[13 + i], (c,), s=0.1) for i, c in enumerate(chans)]

    p = {}
    # Head: block-diagonal combined Linear (cat([z, y]) order preserved).
    wcomb = np.zeros((124, 392), np.float32)
    wcomb[:100, :200] = wz.T
    wcomb[100:, 200:] = wy.T
    p["wcomb"] = jnp.asarray(wcomb, jnp.bfloat16)
    p["bcomb"] = jnp.asarray(np.concatenate([bz, by])[None, :], jnp.float32)
    # ConvT1 on a 1x1 map: (392, 16*64) with columns ordered (oy, ox, c).
    p["w1c"] = jnp.asarray(
        np.transpose(w1, (0, 2, 3, 1)).reshape(392, 4 * 4 * NGF * 8), jnp.bfloat16)

    # Lane-block -> row scatter matrices for the head output.
    csplit = np.zeros((4, 4 * batch, batch), np.float32)
    for oy in range(4):
        for b in range(batch):
            csplit[oy, b * 4 + oy, b] = 1.0
    p["csplit"] = jnp.asarray(csplit)

    for l, (hin, cin, cout) in enumerate(_STEPS):
        w = wconv[l]                      # (cin, cout, 4, 4) PyTorch ConvT layout
        hout = 2 * hin

        # Banded per-vertical-tap matrices: (x*Cin+ci) -> (ox*Cout+co),
        # ox = 2*x + tx - 1 (stride 2, padding 1).  Final layer column space
        # is zero-padded from 192 to 256 for lane-dense stores.
        wt = np.zeros((4, hin * cin, _LANE), np.float32)
        for ty in range(4):
            for xin in range(hin):
                for tx in range(4):
                    ox = 2 * xin + tx - 1
                    if 0 <= ox < hout:
                        wt[ty, xin * cin:(xin + 1) * cin,
                           ox * cout:(ox + 1) * cout] = w[:, :, ty, tx]
        p[f"w_step{l}"] = jnp.asarray(wt, jnp.bfloat16)

        # Row-assembly (vertical col2im overlap-add) matrices, per batch block.
        a = np.zeros((4, batch * hout, batch * hin), np.float32)
        for ty in range(4):
            for b in range(batch):
                for iy in range(hin):
                    oy = 2 * iy + ty - 1
                    if 0 <= oy < hout:
                        a[ty, b * hout + oy, b * hin + iy] = 1.0
        p[f"a_step{l}"] = jnp.asarray(a)

        # BN affine params tiled across x so they broadcast over the 256 lanes.
        bn = np.stack([np.tile(gammas[l], hin), np.tile(betas[l], hin)])
        p[f"bn_step{l}"] = jnp.asarray(bn, jnp.float32)

        # Channel reduction + broadcast matrix: rr[i, j] = 1 iff i%Cin == j%Cin.
        ch = np.arange(_LANE) % cin
        p[f"rr_step{l}"] = jnp.asarray((ch[:, None] == ch[None, :]).astype(np.float32))
    return p


if __name__ == "__main__":
    key = jax.random.PRNGKey(0)
    kz, ky, kp = jax.random.split(key, 3)
    B = 2
    z = jax.random.normal(kz, (B, 100, 1, 1), dtype=jnp.float32)
    y = jax.random.normal(ky, (B, 24), dtype=jnp.float32)
    params = init_params(kp, batch=B)

    out = generator_forward(params, z, y)
    out = jax.block_until_ready(out)
    assert out.shape == (B, NC, 64, 64), out.shape
    assert bool(jnp.all(jnp.isfinite(out)))
    print("KERNEL_OK")
</pallas_src>

<mosaic_0001>
module attributes {stable_mosaic.version = 11 : i64} {
  func.func @_generator_kernel(%arg0: i32, %arg1: memref<2x124xf32, #tpu.memory_space<vmem>>, %arg2: memref<124x392xbf16, #tpu.memory_space<vmem>>, %arg3: memref<1x392xf32, #tpu.memory_space<vmem>>, %arg4: memref<392x1024xbf16, #tpu.memory_space<vmem>>, %arg5: memref<4x8x2xf32, #tpu.memory_space<vmem>>, %arg6: memref<4x256x256xbf16, #tpu.memory_space<vmem>>, %arg7: memref<4x16x8xf32, #tpu.memory_space<vmem>>, %arg8: memref<2x256xf32, #tpu.memory_space<vmem>>, %arg9: memref<256x256xf32, #tpu.memory_space<vmem>>, %arg10: memref<4x256x256xbf16, #tpu.memory_space<vmem>>, %arg11: memref<4x32x16xf32, #tpu.memory_space<vmem>>, %arg12: memref<2x256xf32, #tpu.memory_space<vmem>>, %arg13: memref<256x256xf32, #tpu.memory_space<vmem>>, %arg14: memref<4x256x256xbf16, #tpu.memory_space<vmem>>, %arg15: memref<4x64x32xf32, #tpu.memory_space<vmem>>, %arg16: memref<2x256xf32, #tpu.memory_space<vmem>>, %arg17: memref<256x256xf32, #tpu.memory_space<vmem>>, %arg18: memref<4x256x256xbf16, #tpu.memory_space<vmem>>, %arg19: memref<4x128x64xf32, #tpu.memory_space<vmem>>, %arg20: memref<2x256xf32, #tpu.memory_space<vmem>>, %arg21: memref<256x256xf32, #tpu.memory_space<vmem>>, %arg22: memref<128x256xf32, #tpu.memory_space<vmem>>) attributes {dimension_semantics = [#tpu.dimension_semantics<arbitrary>], iteration_bounds = array<i64: 1>, scalar_prefetch = 0 : i64, scratch_operands = 0 : i64, tpu.core_type = #tpu.core_type<tc>, window_params = [{pipeline_mode = #tpu.pipeline_mode<synchronous>, transform_indices = @transform_0, window_bounds = array<i64: 2, 124>}, {pipeline_mode = #tpu.pipeline_mode<synchronous>, transform_indices = @transform_1, window_bounds = array<i64: 124, 392>}, {pipeline_mode = #tpu.pipeline_mode<synchronous>, transform_indices = @transform_2, window_bounds = array<i64: 1, 392>}, {pipeline_mode = #tpu.pipeline_mode<synchronous>, transform_indices = @transform_3, window_bounds = array<i64: 392, 1024>}, {pipeline_mode = #tpu.pipeline_mode<synchronous>, transform_indices = @transform_4, window_bounds = array<i64: 4, 8, 2>}, {pipeline_mode = #tpu.pipeline_mode<synchronous>, transform_indices = @transform_5, window_bounds = array<i64: 4, 256, 256>}, {pipeline_mode = #tpu.pipeline_mode<synchronous>, transform_indices = @transform_6, window_bounds = array<i64: 4, 16, 8>}, {pipeline_mode = #tpu.pipeline_mode<synchronous>, transform_indices = @transform_7, window_bounds = array<i64: 2, 256>}, {pipeline_mode = #tpu.pipeline_mode<synchronous>, transform_indices = @transform_8, window_bounds = array<i64: 256, 256>}, {pipeline_mode = #tpu.pipeline_mode<synchronous>, transform_indices = @transform_9, window_bounds = array<i64: 4, 256, 256>}, {pipeline_mode = #tpu.pipeline_mode<synchronous>, transform_indices = @transform_10, window_bounds = array<i64: 4, 32, 16>}, {pipeline_mode = #tpu.pipeline_mode<synchronous>, transform_indices = @transform_11, window_bounds = array<i64: 2, 256>}, {pipeline_mode = #tpu.pipeline_mode<synchronous>, transform_indices = @transform_12, window_bounds = array<i64: 256, 256>}, {pipeline_mode = #tpu.pipeline_mode<synchronous>, transform_indices = @transform_13, window_bounds = array<i64: 4, 256, 256>}, {pipeline_mode = #tpu.pipeline_mode<synchronous>, transform_indices = @transform_14, window_bounds = array<i64: 4, 64, 32>}, {pipeline_mode = #tpu.pipeline_mode<synchronous>, transform_indices = @transform_15, window_bounds = array<i64: 2, 256>}, {pipeline_mode = #tpu.pipeline_mode<synchronous>, transform_indices = @transform_16, window_bounds = array<i64: 256, 256>}, {pipeline_mode = #tpu.pipeline_mode<synchronous>, transform_indices = @transform_17, window_bounds = array<i64: 4, 256, 256>}, {pipeline_mode = #tpu.pipeline_mode<synchronous>, transform_indices = @transform_18, window_bounds = array<i64: 4, 128, 64>}, {pipeline_mode = #tpu.pipeline_mode<synchronous>, transform_indices = @transform_19, window_bounds = array<i64: 2, 256>}, {pipeline_mode = #tpu.pipeline_mode<synchronous>, transform_indices = @transform_20, window_bounds = array<i64: 256, 256>}, {pipeline_mode = #tpu.pipeline_mode<synchronous>, transform_indices = @transform_21, window_bounds = array<i64: 128, 256>}]} {
    %c0 = arith.constant 0 : index
    %c0_0 = arith.constant 0 : index
    %0 = vector.load %arg1[%c0, %c0_0] : memref<2x124xf32, #tpu.memory_space<vmem>>, vector<2x124xf32>
    %1 = arith.truncf %0 : vector<2x124xf32> to vector<2x124xbf16>
    %c0_1 = arith.constant 0 : index
    %c0_2 = arith.constant 0 : index
    %2 = vector.load %arg2[%c0_1, %c0_2] : memref<124x392xbf16, #tpu.memory_space<vmem>>, vector<124x392xbf16>
    %cst = arith.constant dense<0.000000e+00> : vector<2x392xf32>
    %3 = tpu.matmul %1, %2, %cst {dimension_numbers = #tpu.dot_dimension_numbers<[1], [0], [0], [1], [0, 0, 1, 1], [], []>} : vector<2x124xbf16>, vector<124x392xbf16>, vector<2x392xf32> -> vector<2x392xf32>
    %c0_3 = arith.constant 0 : index
    %c0_4 = arith.constant 0 : index
    %4 = vector.load %arg3[%c0_3, %c0_4] : memref<1x392xf32, #tpu.memory_space<vmem>>, vector<1x392xf32>
    %5 = vector.broadcast %4 : vector<1x392xf32> to vector<2x392xf32>
    %6 = arith.addf %3, %5 : vector<2x392xf32>
    %cst_5 = arith.constant 0.000000e+00 : f32
    %7 = vector.broadcast %cst_5 : f32 to vector<2x392xf32>
    %8 = arith.maximumf %6, %7 : vector<2x392xf32>
    %9 = arith.truncf %8 : vector<2x392xf32> to vector<2x392xbf16>
    %c0_6 = arith.constant 0 : index
    %c0_7 = arith.constant 0 : index
    %10 = vector.load %arg4[%c0_6, %c0_7] : memref<392x1024xbf16, #tpu.memory_space<vmem>>, vector<392x1024xbf16>
    %cst_8 = arith.constant dense<0.000000e+00> : vector<2x1024xf32>
    %11 = tpu.matmul %9, %10, %cst_8 {dimension_numbers = #tpu.dot_dimension_numbers<[1], [0], [0], [1], [0, 0, 1, 1], [], []>} : vector<2x392xbf16>, vector<392x1024xbf16>, vector<2x1024xf32> -> vector<2x1024xf32>
    %12 = vector.extract_strided_slice %11 {offsets = [0, 0], sizes = [2, 256], strides = [1, 1]} : vector<2x1024xf32> to vector<2x256xf32>
    %c0_9 = arith.constant 0 : index
    %c0_10 = arith.constant 0 : index
    %c0_11 = arith.constant 0 : index
    %13 = vector.load %arg5[%c0_9, %c0_10, %c0_11] : memref<4x8x2xf32, #tpu.memory_space<vmem>>, vector<1x8x2xf32>
    %14 = vector.shape_cast %13 : vector<1x8x2xf32> to vector<8x2xf32>
    %cst_12 = arith.constant dense<0.000000e+00> : vector<8x256xf32>
    %15 = tpu.matmul %14, %12, %cst_12 {dimension_numbers = #tpu.dot_dimension_numbers<[1], [0], [0], [1], [0, 0, 1, 1], [], []>} : vector<8x2xf32>, vector<2x256xf32>, vector<8x256xf32> -> vector<8x256xf32>
    %16 = vector.extract_strided_slice %11 {offsets = [0, 256], sizes = [2, 256], strides = [1, 1]} : vector<2x1024xf32> to vector<2x256xf32>
    %c1 = arith.constant 1 : index
    %c0_13 = arith.constant 0 : index
    %c0_14 = arith.constant 0 : index
    %17 = vector.load %arg5[%c1, %c0_13, %c0_14] : memref<4x8x2xf32, #tpu.memory_space<vmem>>, vector<1x8x2xf32>
    %18 = vector.shape_cast %17 : vector<1x8x2xf32> to vector<8x2xf32>
    %cst_15 = arith.constant dense<0.000000e+00> : vector<8x256xf32>
    %19 = tpu.matmul %18, %16, %cst_15 {dimension_numbers = #tpu.dot_dimension_numbers<[1], [0], [0], [1], [0, 0, 1, 1], [], []>} : vector<8x2xf32>, vector<2x256xf32>, vector<8x256xf32> -> vector<8x256xf32>
    %20 = arith.addf %15, %19 : vector<8x256xf32>
    %21 = vector.extract_strided_slice %11 {offsets = [0, 512], sizes = [2, 256], strides = [1, 1]} : vector<2x1024xf32> to vector<2x256xf32>
    %c2 = arith.constant 2 : index
    %c0_16 = arith.constant 0 : index
    %c0_17 = arith.constant 0 : index
    %22 = vector.load %arg5[%c2, %c0_16, %c0_17] : memref<4x8x2xf32, #tpu.memory_space<vmem>>, vector<1x8x2xf32>
    %23 = vector.shape_cast %22 : vector<1x8x2xf32> to vector<8x2xf32>
    %cst_18 = arith.constant dense<0.000000e+00> : vector<8x256xf32>
    %24 = tpu.matmul %23, %21, %cst_18 {dimension_numbers = #tpu.dot_dimension_numbers<[1], [0], [0], [1], [0, 0, 1, 1], [], []>} : vector<8x2xf32>, vector<2x256xf32>, vector<8x256xf32> -> vector<8x256xf32>
    %25 = arith.addf %20, %24 : vector<8x256xf32>
    %26 = vector.extract_strided_slice %11 {offsets = [0, 768], sizes = [2, 256], strides = [1, 1]} : vector<2x1024xf32> to vector<2x256xf32>
    %c3 = arith.constant 3 : index
    %c0_19 = arith.constant 0 : index
    %c0_20 = arith.constant 0 : index
    %27 = vector.load %arg5[%c3, %c0_19, %c0_20] : memref<4x8x2xf32, #tpu.memory_space<vmem>>, vector<1x8x2xf32>
    %28 = vector.shape_cast %27 : vector<1x8x2xf32> to vector<8x2xf32>
    %cst_21 = arith.constant dense<0.000000e+00> : vector<8x256xf32>
    %29 = tpu.matmul %28, %26, %cst_21 {dimension_numbers = #tpu.dot_dimension_numbers<[1], [0], [0], [1], [0, 0, 1, 1], [], []>} : vector<8x2xf32>, vector<2x256xf32>, vector<8x256xf32> -> vector<8x256xf32>
    %30 = arith.addf %25, %29 : vector<8x256xf32>
    %c0_22 = arith.constant 0 : index
    %c0_23 = arith.constant 0 : index
    %31 = vector.load %arg8[%c0_22, %c0_23] : memref<2x256xf32, #tpu.memory_space<vmem>>, vector<2x256xf32>
    %c0_24 = arith.constant 0 : index
    %c0_25 = arith.constant 0 : index
    %32 = vector.load %arg9[%c0_24, %c0_25] : memref<256x256xf32, #tpu.memory_space<vmem>>, vector<256x256xf32>
    %cst_26 = arith.constant 1.000000e+00 : f32
    %33 = vector.broadcast %cst_26 : f32 to vector<1x8xf32>
    %cst_27 = arith.constant dense<0.000000e+00> : vector<1x256xf32>
    %34 = tpu.matmul %33, %30, %cst_27 {dimension_numbers = #tpu.dot_dimension_numbers<[1], [0], [0], [1], [0, 0, 1, 1], [], []>} : vector<1x8xf32>, vector<8x256xf32>, vector<1x256xf32> -> vector<1x256xf32>
    %35 = arith.mulf %30, %30 : vector<8x256xf32>
    %cst_28 = arith.constant dense<0.000000e+00> : vector<1x256xf32>
    %36 = tpu.matmul %33, %35, %cst_28 {dimension_numbers = #tpu.dot_dimension_numbers<[1], [0], [0], [1], [0, 0, 1, 1], [], []>} : vector<1x8xf32>, vector<8x256xf32>, vector<1x256xf32> -> vector<1x256xf32>
    %cst_29 = arith.constant dense<0.000000e+00> : vector<1x256xf32>
    %37 = tpu.matmul %34, %32, %cst_29 {dimension_numbers = #tpu.dot_dimension_numbers<[1], [0], [0], [1], [0, 0, 1, 1], [], []>} : vector<1x256xf32>, vector<256x256xf32>, vector<1x256xf32> -> vector<1x256xf32>
    %cst_30 = arith.constant 3.125000e-02 : f32
    %38 = vector.broadcast %cst_30 : f32 to vector<1x256xf32>
    %39 = arith.mulf %37, %38 : vector<1x256xf32>
    %cst_31 = arith.constant dense<0.000000e+00> : vector<1x256xf32>
    %40 = tpu.matmul %36, %32, %cst_31 {dimension_numbers = #tpu.dot_dimension_numbers<[1], [0], [0], [1], [0, 0, 1, 1], [], []>} : vector<1x256xf32>, vector<256x256xf32>, vector<1x256xf32> -> vector<1x256xf32>
    %cst_32 = arith.constant 3.125000e-02 : f32
    %41 = vector.broadcast %cst_32 : f32 to vector<1x256xf32>
    %42 = arith.mulf %40, %41 : vector<1x256xf32>
    %43 = arith.mulf %39, %39 : vector<1x256xf32>
    %44 = arith.subf %42, %43 : vector<1x256xf32>
    %cst_33 = arith.constant 0.000000e+00 : f32
    %45 = vector.broadcast %cst_33 : f32 to vector<1x256xf32>
    %46 = arith.maximumf %44, %45 : vector<1x256xf32>
    %cst_34 = arith.constant 9.99999974E-6 : f32
    %47 = vector.broadcast %cst_34 : f32 to vector<1x256xf32>
    %48 = arith.addf %46, %47 : vector<1x256xf32>
    %49 = math.rsqrt %48 : vector<1x256xf32>
    %50 = vector.extract_strided_slice %31 {offsets = [0, 0], sizes = [1, 256], strides = [1, 1]} : vector<2x256xf32> to vector<1x256xf32>
    %51 = arith.mulf %49, %50 : vector<1x256xf32>
    %52 = vector.extract_strided_slice %31 {offsets = [1, 0], sizes = [1, 256], strides = [1, 1]} : vector<2x256xf32> to vector<1x256xf32>
    %53 = arith.mulf %39, %51 : vector<1x256xf32>
    %54 = arith.subf %52, %53 : vector<1x256xf32>
    %55 = vector.broadcast %51 : vector<1x256xf32> to vector<8x256xf32>
    %56 = arith.mulf %30, %55 : vector<8x256xf32>
    %57 = vector.broadcast %54 : vector<1x256xf32> to vector<8x256xf32>
    %58 = arith.addf %56, %57 : vector<8x256xf32>
    %cst_35 = arith.constant 0.000000e+00 : f32
    %59 = vector.broadcast %cst_35 : f32 to vector<8x256xf32>
    %60 = arith.maximumf %58, %59 : vector<8x256xf32>
    %61 = arith.truncf %60 : vector<8x256xf32> to vector<8x256xbf16>
    %c0_36 = arith.constant 0 : index
    %c0_37 = arith.constant 0 : index
    %c0_38 = arith.constant 0 : index
    %62 = vector.load %arg6[%c0_36, %c0_37, %c0_38] : memref<4x256x256xbf16, #tpu.memory_space<vmem>>, vector<1x256x256xbf16>
    %63 = vector.shape_cast %62 : vector<1x256x256xbf16> to vector<256x256xbf16>
    %cst_39 = arith.constant dense<0.000000e+00> : vector<8x256xf32>
    %64 = tpu.matmul %61, %63, %cst_39 {dimension_numbers = #tpu.dot_dimension_numbers<[1], [0], [0], [1], [0, 0, 1, 1], [], []>} : vector<8x256xbf16>, vector<256x256xbf16>, vector<8x256xf32> -> vector<8x256xf32>
    %c0_40 = arith.constant 0 : index
    %c0_41 = arith.constant 0 : index
    %c0_42 = arith.constant 0 : index
    %65 = vector.load %arg7[%c0_40, %c0_41, %c0_42] : memref<4x16x8xf32, #tpu.memory_space<vmem>>, vector<1x16x8xf32>
    %66 = vector.shape_cast %65 : vector<1x16x8xf32> to vector<16x8xf32>
    %cst_43 = arith.constant dense<0.000000e+00> : vector<16x256xf32>
    %67 = tpu.matmul %66, %64, %cst_43 {dimension_numbers = #tpu.dot_dimension_numbers<[1], [0], [0], [1], [0, 0, 1, 1], [], []>} : vector<16x8xf32>, vector<8x256xf32>, vector<16x256xf32> -> vector<16x256xf32>
    %c1_44 = arith.constant 1 : index
    %c0_45 = arith.constant 0 : index
    %c0_46 = arith.constant 0 : index
    %68 = vector.load %arg6[%c1_44, %c0_45, %c0_46] : memref<4x256x256xbf16, #tpu.memory_space<vmem>>, vector<1x256x256xbf16>
    %69 = vector.shape_cast %68 : vector<1x256x256xbf16> to vector<256x256xbf16>
    %cst_47 = arith.constant dense<0.000000e+00> : vector<8x256xf32>
    %70 = tpu.matmul %61, %69, %cst_47 {dimension_numbers = #tpu.dot_dimension_numbers<[1], [0], [0], [1], [0, 0, 1, 1], [], []>} : vector<8x256xbf16>, vector<256x256xbf16>, vector<8x256xf32> -> vector<8x256xf32>
    %c1_48 = arith.constant 1 : index
    %c0_49 = arith.constant 0 : index
    %c0_50 = arith.constant 0 : index
    %71 = vector.load %arg7[%c1_48, %c0_49, %c0_50] : memref<4x16x8xf32, #tpu.memory_space<vmem>>, vector<1x16x8xf32>
    %72 = vector.shape_cast %71 : vector<1x16x8xf32> to vector<16x8xf32>
    %cst_51 = arith.constant dense<0.000000e+00> : vector<16x256xf32>
    %73 = tpu.matmul %72, %70, %cst_51 {dimension_numbers = #tpu.dot_dimension_numbers<[1], [0], [0], [1], [0, 0, 1, 1], [], []>} : vector<16x8xf32>, vector<8x256xf32>, vector<16x256xf32> -> vector<16x256xf32>
    %74 = arith.addf %67, %73 : vector<16x256xf32>
    %c2_52 = arith.constant 2 : index
    %c0_53 = arith.constant 0 : index
    %c0_54 = arith.constant 0 : index
    %75 = vector.load %arg6[%c2_52, %c0_53, %c0_54] : memref<4x256x256xbf16, #tpu.memory_space<vmem>>, vector<1x256x256xbf16>
    %76 = vector.shape_cast %75 : vector<1x256x256xbf16> to vector<256x256xbf16>
    %cst_55 = arith.constant dense<0.000000e+00> : vector<8x256xf32>
    %77 = tpu.matmul %61, %76, %cst_55 {dimension_numbers = #tpu.dot_dimension_numbers<[1], [0], [0], [1], [0, 0, 1, 1], [], []>} : vector<8x256xbf16>, vector<256x256xbf16>, vector<8x256xf32> -> vector<8x256xf32>
    %c2_56 = arith.constant 2 : index
    %c0_57 = arith.constant 0 : index
    %c0_58 = arith.constant 0 : index
    %78 = vector.load %arg7[%c2_56, %c0_57, %c0_58] : memref<4x16x8xf32, #tpu.memory_space<vmem>>, vector<1x16x8xf32>
    %79 = vector.shape_cast %78 : vector<1x16x8xf32> to vector<16x8xf32>
    %cst_59 = arith.constant dense<0.000000e+00> : vector<16x256xf32>
    %80 = tpu.matmul %79, %77, %cst_59 {dimension_numbers = #tpu.dot_dimension_numbers<[1], [0], [0], [1], [0, 0, 1, 1], [], []>} : vector<16x8xf32>, vector<8x256xf32>, vector<16x256xf32> -> vector<16x256xf32>
    %81 = arith.addf %74, %80 : vector<16x256xf32>
    %c3_60 = arith.constant 3 : index
    %c0_61 = arith.constant 0 : index
    %c0_62 = arith.constant 0 : index
    %82 = vector.load %arg6[%c3_60, %c0_61, %c0_62] : memref<4x256x256xbf16, #tpu.memory_space<vmem>>, vector<1x256x256xbf16>
    %83 = vector.shape_cast %82 : vector<1x256x256xbf16> to vector<256x256xbf16>
    %cst_63 = arith.constant dense<0.000000e+00> : vector<8x256xf32>
    %84 = tpu.matmul %61, %83, %cst_63 {dimension_numbers = #tpu.dot_dimension_numbers<[1], [0], [0], [1], [0, 0, 1, 1], [], []>} : vector<8x256xbf16>, vector<256x256xbf16>, vector<8x256xf32> -> vector<8x256xf32>
    %c3_64 = arith.constant 3 : index
    %c0_65 = arith.constant 0 : index
    %c0_66 = arith.constant 0 : index
    %85 = vector.load %arg7[%c3_64, %c0_65, %c0_66] : memref<4x16x8xf32, #tpu.memory_space<vmem>>, vector<1x16x8xf32>
    %86 = vector.shape_cast %85 : vector<1x16x8xf32> to vector<16x8xf32>
    %cst_67 = arith.constant dense<0.000000e+00> : vector<16x256xf32>
    %87 = tpu.matmul %86, %84, %cst_67 {dimension_numbers = #tpu.dot_dimension_numbers<[1], [0], [0], [1], [0, 0, 1, 1], [], []>} : vector<16x8xf32>, vector<8x256xf32>, vector<16x256xf32> -> vector<16x256xf32>
    %88 = arith.addf %81, %87 : vector<16x256xf32>
    %c0_68 = arith.constant 0 : index
    %c0_69 = arith.constant 0 : index
    %89 = vector.load %arg12[%c0_68, %c0_69] : memref<2x256xf32, #tpu.memory_space<vmem>>, vector<2x256xf32>
    %c0_70 = arith.constant 0 : index
    %c0_71 = arith.constant 0 : index
    %90 = vector.load %arg13[%c0_70, %c0_71] : memref<256x256xf32, #tpu.memory_space<vmem>>, vector<256x256xf32>
    %cst_72 = arith.constant 1.000000e+00 : f32
    %91 = vector.broadcast %cst_72 : f32 to vector<1x16xf32>
    %cst_73 = arith.constant dense<0.000000e+00> : vector<1x256xf32>
    %92 = tpu.matmul %91, %88, %cst_73 {dimension_numbers = #tpu.dot_dimension_numbers<[1], [0], [0], [1], [0, 0, 1, 1], [], []>} : vector<1x16xf32>, vector<16x256xf32>, vector<1x256xf32> -> vector<1x256xf32>
    %93 = arith.mulf %88, %88 : vector<16x256xf32>
    %cst_74 = arith.constant dense<0.000000e+00> : vector<1x256xf32>
    %94 = tpu.matmul %91, %93, %cst_74 {dimension_numbers = #tpu.dot_dimension_numbers<[1], [0], [0], [1], [0, 0, 1, 1], [], []>} : vector<1x16xf32>, vector<16x256xf32>, vector<1x256xf32> -> vector<1x256xf32>
    %cst_75 = arith.constant dense<0.000000e+00> : vector<1x256xf32>
    %95 = tpu.matmul %92, %90, %cst_75 {dimension_numbers = #tpu.dot_dimension_numbers<[1], [0], [0], [1], [0, 0, 1, 1], [], []>} : vector<1x256xf32>, vector<256x256xf32>, vector<1x256xf32> -> vector<1x256xf32>
    %cst_76 = arith.constant 7.812500e-03 : f32
    %96 = vector.broadcast %cst_76 : f32 to vector<1x256xf32>
    %97 = arith.mulf %95, %96 : vector<1x256xf32>
    %cst_77 = arith.constant dense<0.000000e+00> : vector<1x256xf32>
    %98 = tpu.matmul %94, %90, %cst_77 {dimension_numbers = #tpu.dot_dimension_numbers<[1], [0], [0], [1], [0, 0, 1, 1], [], []>} : vector<1x256xf32>, vector<256x256xf32>, vector<1x256xf32> -> vector<1x256xf32>
    %cst_78 = arith.constant 7.812500e-03 : f32
    %99 = vector.broadcast %cst_78 : f32 to vector<1x256xf32>
    %100 = arith.mulf %98, %99 : vector<1x256xf32>
    %101 = arith.mulf %97, %97 : vector<1x256xf32>
    %102 = arith.subf %100, %101 : vector<1x256xf32>
    %cst_79 = arith.constant 0.000000e+00 : f32
    %103 = vector.broadcast %cst_79 : f32 to vector<1x256xf32>
    %104 = arith.maximumf %102, %103 : vector<1x256xf32>
    %cst_80 = arith.constant 9.99999974E-6 : f32
    %105 = vector.broadcast %cst_80 : f32 to vector<1x256xf32>
    %106 = arith.addf %104, %105 : vector<1x256xf32>
    %107 = math.rsqrt %106 : vector<1x256xf32>
    %108 = vector.extract_strided_slice %89 {offsets = [0, 0], sizes = [1, 256], strides = [1, 1]} : vector<2x256xf32> to vector<1x256xf32>
    %109 = arith.mulf %107, %108 : vector<1x256xf32>
    %110 = vector.extract_strided_slice %89 {offsets = [1, 0], sizes = [1, 256], strides = [1, 1]} : vector<2x256xf32> to vector<1x256xf32>
    %111 = arith.mulf %97, %109 : vector<1x256xf32>
    %112 = arith.subf %110, %111 : vector<1x256xf32>
    %113 = vector.broadcast %109 : vector<1x256xf32> to vector<16x256xf32>
    %114 = arith.mulf %88, %113 : vector<16x256xf32>
    %115 = vector.broadcast %112 : vector<1x256xf32> to vector<16x256xf32>
    %116 = arith.addf %114, %115 : vector<16x256xf32>
    %cst_81 = arith.constant 0.000000e+00 : f32
    %117 = vector.broadcast %cst_81 : f32 to vector<16x256xf32>
    %118 = arith.maximumf %116, %117 : vector<16x256xf32>
    %119 = arith.truncf %118 : vector<16x256xf32> to vector<16x256xbf16>
    %c0_82 = arith.constant 0 : index
    %c0_83 = arith.constant 0 : index
    %c0_84 = arith.constant 0 : index
    %120 = vector.load %arg10[%c0_82, %c0_83, %c0_84] : memref<4x256x256xbf16, #tpu.memory_space<vmem>>, vector<1x256x256xbf16>
    %121 = vector.shape_cast %120 : vector<1x256x256xbf16> to vector<256x256xbf16>
    %cst_85 = arith.constant dense<0.000000e+00> : vector<16x256xf32>
    %122 = tpu.matmul %119, %121, %cst_85 {dimension_numbers = #tpu.dot_dimension_numbers<[1], [0], [0], [1], [0, 0, 1, 1], [], []>} : vector<16x256xbf16>, vector<256x256xbf16>, vector<16x256xf32> -> vector<16x256xf32>
    %c0_86 = arith.constant 0 : index
    %c0_87 = arith.constant 0 : index
    %c0_88 = arith.constant 0 : index
    %123 = vector.load %arg11[%c0_86, %c0_87, %c0_88] : memref<4x32x16xf32, #tpu.memory_space<vmem>>, vector<1x32x16xf32>
    %124 = vector.shape_cast %123 : vector<1x32x16xf32> to vector<32x16xf32>
    %cst_89 = arith.constant dense<0.000000e+00> : vector<32x256xf32>
    %125 = tpu.matmul %124, %122, %cst_89 {dimension_numbers = #tpu.dot_dimension_numbers<[1], [0], [0], [1], [0, 0, 1, 1], [], []>} : vector<32x16xf32>, vector<16x256xf32>, vector<32x256xf32> -> vector<32x256xf32>
    %c1_90 = arith.constant 1 : index
    %c0_91 = arith.constant 0 : index
    %c0_92 = arith.constant 0 : index
    %126 = vector.load %arg10[%c1_90, %c0_91, %c0_92] : memref<4x256x256xbf16, #tpu.memory_space<vmem>>, vector<1x256x256xbf16>
    %127 = vector.shape_cast %126 : vector<1x256x256xbf16> to vector<256x256xbf16>
    %cst_93 = arith.constant dense<0.000000e+00> : vector<16x256xf32>
    %128 = tpu.matmul %119, %127, %cst_93 {dimension_numbers = #tpu.dot_dimension_numbers<[1], [0], [0], [1], [0, 0, 1, 1], [], []>} : vector<16x256xbf16>, vector<256x256xbf16>, vector<16x256xf32> -> vector<16x256xf32>
    %c1_94 = arith.constant 1 : index
    %c0_95 = arith.constant 0 : index
    %c0_96 = arith.constant 0 : index
    %129 = vector.load %arg11[%c1_94, %c0_95, %c0_96] : memref<4x32x16xf32, #tpu.memory_space<vmem>>, vector<1x32x16xf32>
    %130 = vector.shape_cast %129 : vector<1x32x16xf32> to vector<32x16xf32>
    %cst_97 = arith.constant dense<0.000000e+00> : vector<32x256xf32>
    %131 = tpu.matmul %130, %128, %cst_97 {dimension_numbers = #tpu.dot_dimension_numbers<[1], [0], [0], [1], [0, 0, 1, 1], [], []>} : vector<32x16xf32>, vector<16x256xf32>, vector<32x256xf32> -> vector<32x256xf32>
    %132 = arith.addf %125, %131 : vector<32x256xf32>
    %c2_98 = arith.constant 2 : index
    %c0_99 = arith.constant 0 : index
    %c0_100 = arith.constant 0 : index
    %133 = vector.load %arg10[%c2_98, %c0_99, %c0_100] : memref<4x256x256xbf16, #tpu.memory_space<vmem>>, vector<1x256x256xbf16>
    %134 = vector.shape_cast %133 : vector<1x256x256xbf16> to vector<256x256xbf16>
    %cst_101 = arith.constant dense<0.000000e+00> : vector<16x256xf32>
    %135 = tpu.matmul %119, %134, %cst_101 {dimension_numbers = #tpu.dot_dimension_numbers<[1], [0], [0], [1], [0, 0, 1, 1], [], []>} : vector<16x256xbf16>, vector<256x256xbf16>, vector<16x256xf32> -> vector<16x256xf32>
    %c2_102 = arith.constant 2 : index
    %c0_103 = arith.constant 0 : index
    %c0_104 = arith.constant 0 : index
    %136 = vector.load %arg11[%c2_102, %c0_103, %c0_104] : memref<4x32x16xf32, #tpu.memory_space<vmem>>, vector<1x32x16xf32>
    %137 = vector.shape_cast %136 : vector<1x32x16xf32> to vector<32x16xf32>
    %cst_105 = arith.constant dense<0.000000e+00> : vector<32x256xf32>
    %138 = tpu.matmul %137, %135, %cst_105 {dimension_numbers = #tpu.dot_dimension_numbers<[1], [0], [0], [1], [0, 0, 1, 1], [], []>} : vector<32x16xf32>, vector<16x256xf32>, vector<32x256xf32> -> vector<32x256xf32>
    %139 = arith.addf %132, %138 : vector<32x256xf32>
    %c3_106 = arith.constant 3 : index
    %c0_107 = arith.constant 0 : index
    %c0_108 = arith.constant 0 : index
    %140 = vector.load %arg10[%c3_106, %c0_107, %c0_108] : memref<4x256x256xbf16, #tpu.memory_space<vmem>>, vector<1x256x256xbf16>
    %141 = vector.shape_cast %140 : vector<1x256x256xbf16> to vector<256x256xbf16>
    %cst_109 = arith.constant dense<0.000000e+00> : vector<16x256xf32>
    %142 = tpu.matmul %119, %141, %cst_109 {dimension_numbers = #tpu.dot_dimension_numbers<[1], [0], [0], [1], [0, 0, 1, 1], [], []>} : vector<16x256xbf16>, vector<256x256xbf16>, vector<16x256xf32> -> vector<16x256xf32>
    %c3_110 = arith.constant 3 : index
    %c0_111 = arith.constant 0 : index
    %c0_112 = arith.constant 0 : index
    %143 = vector.load %arg11[%c3_110, %c0_111, %c0_112] : memref<4x32x16xf32, #tpu.memory_space<vmem>>, vector<1x32x16xf32>
    %144 = vector.shape_cast %143 : vector<1x32x16xf32> to vector<32x16xf32>
    %cst_113 = arith.constant dense<0.000000e+00> : vector<32x256xf32>
    %145 = tpu.matmul %144, %142, %cst_113 {dimension_numbers = #tpu.dot_dimension_numbers<[1], [0], [0], [1], [0, 0, 1, 1], [], []>} : vector<32x16xf32>, vector<16x256xf32>, vector<32x256xf32> -> vector<32x256xf32>
    %146 = arith.addf %139, %145 : vector<32x256xf32>
    %c0_114 = arith.constant 0 : index
    %c0_115 = arith.constant 0 : index
    %147 = vector.load %arg16[%c0_114, %c0_115] : memref<2x256xf32, #tpu.memory_space<vmem>>, vector<2x256xf32>
    %c0_116 = arith.constant 0 : index
    %c0_117 = arith.constant 0 : index
    %148 = vector.load %arg17[%c0_116, %c0_117] : memref<256x256xf32, #tpu.memory_space<vmem>>, vector<256x256xf32>
    %cst_118 = arith.constant 1.000000e+00 : f32
    %149 = vector.broadcast %cst_118 : f32 to vector<1x32xf32>
    %cst_119 = arith.constant dense<0.000000e+00> : vector<1x256xf32>
    %150 = tpu.matmul %149, %146, %cst_119 {dimension_numbers = #tpu.dot_dimension_numbers<[1], [0], [0], [1], [0, 0, 1, 1], [], []>} : vector<1x32xf32>, vector<32x256xf32>, vector<1x256xf32> -> vector<1x256xf32>
    %151 = arith.mulf %146, %146 : vector<32x256xf32>
    %cst_120 = arith.constant dense<0.000000e+00> : vector<1x256xf32>
    %152 = tpu.matmul %149, %151, %cst_120 {dimension_numbers = #tpu.dot_dimension_numbers<[1], [0], [0], [1], [0, 0, 1, 1], [], []>} : vector<1x32xf32>, vector<32x256xf32>, vector<1x256xf32> -> vector<1x256xf32>
    %cst_121 = arith.constant dense<0.000000e+00> : vector<1x256xf32>
    %153 = tpu.matmul %150, %148, %cst_121 {dimension_numbers = #tpu.dot_dimension_numbers<[1], [0], [0], [1], [0, 0, 1, 1], [], []>} : vector<1x256xf32>, vector<256x256xf32>, vector<1x256xf32> -> vector<1x256xf32>
    %cst_122 = arith.constant 0.001953125 : f32
    %154 = vector.broadcast %cst_122 : f32 to vector<1x256xf32>
    %155 = arith.mulf %153, %154 : vector<1x256xf32>
    %cst_123 = arith.constant dense<0.000000e+00> : vector<1x256xf32>
    %156 = tpu.matmul %152, %148, %cst_123 {dimension_numbers = #tpu.dot_dimension_numbers<[1], [0], [0], [1], [0, 0, 1, 1], [], []>} : vector<1x256xf32>, vector<256x256xf32>, vector<1x256xf32> -> vector<1x256xf32>
    %cst_124 = arith.constant 0.001953125 : f32
    %157 = vector.broadcast %cst_124 : f32 to vector<1x256xf32>
    %158 = arith.mulf %156, %157 : vector<1x256xf32>
    %159 = arith.mulf %155, %155 : vector<1x256xf32>
    %160 = arith.subf %158, %159 : vector<1x256xf32>
    %cst_125 = arith.constant 0.000000e+00 : f32
    %161 = vector.broadcast %cst_125 : f32 to vector<1x256xf32>
    %162 = arith.maximumf %160, %161 : vector<1x256xf32>
    %cst_126 = arith.constant 9.99999974E-6 : f32
    %163 = vector.broadcast %cst_126 : f32 to vector<1x256xf32>
    %164 = arith.addf %162, %163 : vector<1x256xf32>
    %165 = math.rsqrt %164 : vector<1x256xf32>
    %166 = vector.extract_strided_slice %147 {offsets = [0, 0], sizes = [1, 256], strides = [1, 1]} : vector<2x256xf32> to vector<1x256xf32>
    %167 = arith.mulf %165, %166 : vector<1x256xf32>
    %168 = vector.extract_strided_slice %147 {offsets = [1, 0], sizes = [1, 256], strides = [1, 1]} : vector<2x256xf32> to vector<1x256xf32>
    %169 = arith.mulf %155, %167 : vector<1x256xf32>
    %170 = arith.subf %168, %169 : vector<1x256xf32>
    %171 = vector.broadcast %167 : vector<1x256xf32> to vector<32x256xf32>
    %172 = arith.mulf %146, %171 : vector<32x256xf32>
    %173 = vector.broadcast %170 : vector<1x256xf32> to vector<32x256xf32>
    %174 = arith.addf %172, %173 : vector<32x256xf32>
    %cst_127 = arith.constant 0.000000e+00 : f32
    %175 = vector.broadcast %cst_127 : f32 to vector<32x256xf32>
    %176 = arith.maximumf %174, %175 : vector<32x256xf32>
    %177 = arith.truncf %176 : vector<32x256xf32> to vector<32x256xbf16>
    %c0_128 = arith.constant 0 : index
    %c0_129 = arith.constant 0 : index
    %c0_130 = arith.constant 0 : index
    %178 = vector.load %arg14[%c0_128, %c0_129, %c0_130] : memref<4x256x256xbf16, #tpu.memory_space<vmem>>, vector<1x256x256xbf16>
    %179 = vector.shape_cast %178 : vector<1x256x256xbf16> to vector<256x256xbf16>
    %cst_131 = arith.constant dense<0.000000e+00> : vector<32x256xf32>
    %180 = tpu.matmul %177, %179, %cst_131 {dimension_numbers = #tpu.dot_dimension_numbers<[1], [0], [0], [1], [0, 0, 1, 1], [], []>} : vector<32x256xbf16>, vector<256x256xbf16>, vector<32x256xf32> -> vector<32x256xf32>
    %c0_132 = arith.constant 0 : index
    %c0_133 = arith.constant 0 : index
    %c0_134 = arith.constant 0 : index
    %181 = vector.load %arg15[%c0_132, %c0_133, %c0_134] : memref<4x64x32xf32, #tpu.memory_space<vmem>>, vector<1x64x32xf32>
    %182 = vector.shape_cast %181 : vector<1x64x32xf32> to vector<64x32xf32>
    %cst_135 = arith.constant dense<0.000000e+00> : vector<64x256xf32>
    %183 = tpu.matmul %182, %180, %cst_135 {dimension_numbers = #tpu.dot_dimension_numbers<[1], [0], [0], [1], [0, 0, 1, 1], [], []>} : vector<64x32xf32>, vector<32x256xf32>, vector<64x256xf32> -> vector<64x256xf32>
    %c1_136 = arith.constant 1 : index
    %c0_137 = arith.constant 0 : index
    %c0_138 = arith.constant 0 : index
    %184 = vector.load %arg14[%c1_136, %c0_137, %c0_138] : memref<4x256x256xbf16, #tpu.memory_space<vmem>>, vector<1x256x256xbf16>
    %185 = vector.shape_cast %184 : vector<1x256x256xbf16> to vector<256x256xbf16>
    %cst_139 = arith.constant dense<0.000000e+00> : vector<32x256xf32>
    %186 = tpu.matmul %177, %185, %cst_139 {dimension_numbers = #tpu.dot_dimension_numbers<[1], [0], [0], [1], [0, 0, 1, 1], [], []>} : vector<32x256xbf16>, vector<256x256xbf16>, vector<32x256xf32> -> vector<32x256xf32>
    %c1_140 = arith.constant 1 : index
    %c0_141 = arith.constant 0 : index
    %c0_142 = arith.constant 0 : index
    %187 = vector.load %arg15[%c1_140, %c0_141, %c0_142] : memref<4x64x32xf32, #tpu.memory_space<vmem>>, vector<1x64x32xf32>
    %188 = vector.shape_cast %187 : vector<1x64x32xf32> to vector<64x32xf32>
    %cst_143 = arith.constant dense<0.000000e+00> : vector<64x256xf32>
    %189 = tpu.matmul %188, %186, %cst_143 {dimension_numbers = #tpu.dot_dimension_numbers<[1], [0], [0], [1], [0, 0, 1, 1], [], []>} : vector<64x32xf32>, vector<32x256xf32>, vector<64x256xf32> -> vector<64x256xf32>
    %190 = arith.addf %183, %189 : vector<64x256xf32>
    %c2_144 = arith.constant 2 : index
    %c0_145 = arith.constant 0 : index
    %c0_146 = arith.constant 0 : index
    %191 = vector.load %arg14[%c2_144, %c0_145, %c0_146] : memref<4x256x256xbf16, #tpu.memory_space<vmem>>, vector<1x256x256xbf16>
    %192 = vector.shape_cast %191 : vector<1x256x256xbf16> to vector<256x256xbf16>
    %cst_147 = arith.constant dense<0.000000e+00> : vector<32x256xf32>
    %193 = tpu.matmul %177, %192, %cst_147 {dimension_numbers = #tpu.dot_dimension_numbers<[1], [0], [0], [1], [0, 0, 1, 1], [], []>} : vector<32x256xbf16>, vector<256x256xbf16>, vector<32x256xf32> -> vector<32x256xf32>
    %c2_148 = arith.constant 2 : index
    %c0_149 = arith.constant 0 : index
    %c0_150 = arith.constant 0 : index
    %194 = vector.load %arg15[%c2_148, %c0_149, %c0_150] : memref<4x64x32xf32, #tpu.memory_space<vmem>>, vector<1x64x32xf32>
    %195 = vector.shape_cast %194 : vector<1x64x32xf32> to vector<64x32xf32>
    %cst_151 = arith.constant dense<0.000000e+00> : vector<64x256xf32>
    %196 = tpu.matmul %195, %193, %cst_151 {dimension_numbers = #tpu.dot_dimension_numbers<[1], [0], [0], [1], [0, 0, 1, 1], [], []>} : vector<64x32xf32>, vector<32x256xf32>, vector<64x256xf32> -> vector<64x256xf32>
    %197 = arith.addf %190, %196 : vector<64x256xf32>
    %c3_152 = arith.constant 3 : index
    %c0_153 = arith.constant 0 : index
    %c0_154 = arith.constant 0 : index
    %198 = vector.load %arg14[%c3_152, %c0_153, %c0_154] : memref<4x256x256xbf16, #tpu.memory_space<vmem>>, vector<1x256x256xbf16>
    %199 = vector.shape_cast %198 : vector<1x256x256xbf16> to vector<256x256xbf16>
    %cst_155 = arith.constant dense<0.000000e+00> : vector<32x256xf32>
    %200 = tpu.matmul %177, %199, %cst_155 {dimension_numbers = #tpu.dot_dimension_numbers<[1], [0], [0], [1], [0, 0, 1, 1], [], []>} : vector<32x256xbf16>, vector<256x256xbf16>, vector<32x256xf32> -> vector<32x256xf32>
    %c3_156 = arith.constant 3 : index
    %c0_157 = arith.constant 0 : index
    %c0_158 = arith.constant 0 : index
    %201 = vector.load %arg15[%c3_156, %c0_157, %c0_158] : memref<4x64x32xf32, #tpu.memory_space<vmem>>, vector<1x64x32xf32>
    %202 = vector.shape_cast %201 : vector<1x64x32xf32> to vector<64x32xf32>
    %cst_159 = arith.constant dense<0.000000e+00> : vector<64x256xf32>
    %203 = tpu.matmul %202, %200, %cst_159 {dimension_numbers = #tpu.dot_dimension_numbers<[1], [0], [0], [1], [0, 0, 1, 1], [], []>} : vector<64x32xf32>, vector<32x256xf32>, vector<64x256xf32> -> vector<64x256xf32>
    %204 = arith.addf %197, %203 : vector<64x256xf32>
    %c0_160 = arith.constant 0 : index
    %c0_161 = arith.constant 0 : index
    %205 = vector.load %arg20[%c0_160, %c0_161] : memref<2x256xf32, #tpu.memory_space<vmem>>, vector<2x256xf32>
    %c0_162 = arith.constant 0 : index
    %c0_163 = arith.constant 0 : index
    %206 = vector.load %arg21[%c0_162, %c0_163] : memref<256x256xf32, #tpu.memory_space<vmem>>, vector<256x256xf32>
    %cst_164 = arith.constant 1.000000e+00 : f32
    %207 = vector.broadcast %cst_164 : f32 to vector<1x64xf32>
    %cst_165 = arith.constant dense<0.000000e+00> : vector<1x256xf32>
    %208 = tpu.matmul %207, %204, %cst_165 {dimension_numbers = #tpu.dot_dimension_numbers<[1], [0], [0], [1], [0, 0, 1, 1], [], []>} : vector<1x64xf32>, vector<64x256xf32>, vector<1x256xf32> -> vector<1x256xf32>
    %209 = arith.mulf %204, %204 : vector<64x256xf32>
    %cst_166 = arith.constant dense<0.000000e+00> : vector<1x256xf32>
    %210 = tpu.matmul %207, %209, %cst_166 {dimension_numbers = #tpu.dot_dimension_numbers<[1], [0], [0], [1], [0, 0, 1, 1], [], []>} : vector<1x64xf32>, vector<64x256xf32>, vector<1x256xf32> -> vector<1x256xf32>
    %cst_167 = arith.constant dense<0.000000e+00> : vector<1x256xf32>
    %211 = tpu.matmul %208, %206, %cst_167 {dimension_numbers = #tpu.dot_dimension_numbers<[1], [0], [0], [1], [0, 0, 1, 1], [], []>} : vector<1x256xf32>, vector<256x256xf32>, vector<1x256xf32> -> vector<1x256xf32>
    %cst_168 = arith.constant 4.8828125E-4 : f32
    %212 = vector.broadcast %cst_168 : f32 to vector<1x256xf32>
    %213 = arith.mulf %211, %212 : vector<1x256xf32>
    %cst_169 = arith.constant dense<0.000000e+00> : vector<1x256xf32>
    %214 = tpu.matmul %210, %206, %cst_169 {dimension_numbers = #tpu.dot_dimension_numbers<[1], [0], [0], [1], [0, 0, 1, 1], [], []>} : vector<1x256xf32>, vector<256x256xf32>, vector<1x256xf32> -> vector<1x256xf32>
    %cst_170 = arith.constant 4.8828125E-4 : f32
    %215 = vector.broadcast %cst_170 : f32 to vector<1x256xf32>
    %216 = arith.mulf %214, %215 : vector<1x256xf32>
    %217 = arith.mulf %213, %213 : vector<1x256xf32>
    %218 = arith.subf %216, %217 : vector<1x256xf32>
    %cst_171 = arith.constant 0.000000e+00 : f32
    %219 = vector.broadcast %cst_171 : f32 to vector<1x256xf32>
    %220 = arith.maximumf %218, %219 : vector<1x256xf32>
    %cst_172 = arith.constant 9.99999974E-6 : f32
    %221 = vector.broadcast %cst_172 : f32 to vector<1x256xf32>
    %222 = arith.addf %220, %221 : vector<1x256xf32>
    %223 = math.rsqrt %222 : vector<1x256xf32>
    %224 = vector.extract_strided_slice %205 {offsets = [0, 0], sizes = [1, 256], strides = [1, 1]} : vector<2x256xf32> to vector<1x256xf32>
    %225 = arith.mulf %223, %224 : vector<1x256xf32>
    %226 = vector.extract_strided_slice %205 {offsets = [1, 0], sizes = [1, 256], strides = [1, 1]} : vector<2x256xf32> to vector<1x256xf32>
    %227 = arith.mulf %213, %225 : vector<1x256xf32>
    %228 = arith.subf %226, %227 : vector<1x256xf32>
    %229 = vector.broadcast %225 : vector<1x256xf32> to vector<64x256xf32>
    %230 = arith.mulf %204, %229 : vector<64x256xf32>
    %231 = vector.broadcast %228 : vector<1x256xf32> to vector<64x256xf32>
    %232 = arith.addf %230, %231 : vector<64x256xf32>
    %cst_173 = arith.constant 0.000000e+00 : f32
    %233 = vector.broadcast %cst_173 : f32 to vector<64x256xf32>
    %234 = arith.maximumf %232, %233 : vector<64x256xf32>
    %235 = arith.truncf %234 : vector<64x256xf32> to vector<64x256xbf16>
    %c0_174 = arith.constant 0 : index
    %c0_175 = arith.constant 0 : index
    %c0_176 = arith.constant 0 : index
    %236 = vector.load %arg18[%c0_174, %c0_175, %c0_176] : memref<4x256x256xbf16, #tpu.memory_space<vmem>>, vector<1x256x256xbf16>
    %237 = vector.shape_cast %236 : vector<1x256x256xbf16> to vector<256x256xbf16>
    %cst_177 = arith.constant dense<0.000000e+00> : vector<64x256xf32>
    %238 = tpu.matmul %235, %237, %cst_177 {dimension_numbers = #tpu.dot_dimension_numbers<[1], [0], [0], [1], [0, 0, 1, 1], [], []>} : vector<64x256xbf16>, vector<256x256xbf16>, vector<64x256xf32> -> vector<64x256xf32>
    %c0_178 = arith.constant 0 : index
    %c0_179 = arith.constant 0 : index
    %c0_180 = arith.constant 0 : index
    %239 = vector.load %arg19[%c0_178, %c0_179, %c0_180] : memref<4x128x64xf32, #tpu.memory_space<vmem>>, vector<1x128x64xf32>
    %240 = vector.shape_cast %239 : vector<1x128x64xf32> to vector<128x64xf32>
    %cst_181 = arith.constant dense<0.000000e+00> : vector<128x256xf32>
    %241 = tpu.matmul %240, %238, %cst_181 {dimension_numbers = #tpu.dot_dimension_numbers<[1], [0], [0], [1], [0, 0, 1, 1], [], []>} : vector<128x64xf32>, vector<64x256xf32>, vector<128x256xf32> -> vector<128x256xf32>
    %c1_182 = arith.constant 1 : index
    %c0_183 = arith.constant 0 : index
    %c0_184 = arith.constant 0 : index
    %242 = vector.load %arg18[%c1_182, %c0_183, %c0_184] : memref<4x256x256xbf16, #tpu.memory_space<vmem>>, vector<1x256x256xbf16>
    %243 = vector.shape_cast %242 : vector<1x256x256xbf16> to vector<256x256xbf16>
    %cst_185 = arith.constant dense<0.000000e+00> : vector<64x256xf32>
    %244 = tpu.matmul %235, %243, %cst_185 {dimension_numbers = #tpu.dot_dimension_numbers<[1], [0], [0], [1], [0, 0, 1, 1], [], []>} : vector<64x256xbf16>, vector<256x256xbf16>, vector<64x256xf32> -> vector<64x256xf32>
    %c1_186 = arith.constant 1 : index
    %c0_187 = arith.constant 0 : index
    %c0_188 = arith.constant 0 : index
    %245 = vector.load %arg19[%c1_186, %c0_187, %c0_188] : memref<4x128x64xf32, #tpu.memory_space<vmem>>, vector<1x128x64xf32>
    %246 = vector.shape_cast %245 : vector<1x128x64xf32> to vector<128x64xf32>
    %cst_189 = arith.constant dense<0.000000e+00> : vector<128x256xf32>
    %247 = tpu.matmul %246, %244, %cst_189 {dimension_numbers = #tpu.dot_dimension_numbers<[1], [0], [0], [1], [0, 0, 1, 1], [], []>} : vector<128x64xf32>, vector<64x256xf32>, vector<128x256xf32> -> vector<128x256xf32>
    %248 = arith.addf %241, %247 : vector<128x256xf32>
    %c2_190 = arith.constant 2 : index
    %c0_191 = arith.constant 0 : index
    %c0_192 = arith.constant 0 : index
    %249 = vector.load %arg18[%c2_190, %c0_191, %c0_192] : memref<4x256x256xbf16, #tpu.memory_space<vmem>>, vector<1x256x256xbf16>
    %250 = vector.shape_cast %249 : vector<1x256x256xbf16> to vector<256x256xbf16>
    %cst_193 = arith.constant dense<0.000000e+00> : vector<64x256xf32>
    %251 = tpu.matmul %235, %250, %cst_193 {dimension_numbers = #tpu.dot_dimension_numbers<[1], [0], [0], [1], [0, 0, 1, 1], [], []>} : vector<64x256xbf16>, vector<256x256xbf16>, vector<64x256xf32> -> vector<64x256xf32>
    %c2_194 = arith.constant 2 : index
    %c0_195 = arith.constant 0 : index
    %c0_196 = arith.constant 0 : index
    %252 = vector.load %arg19[%c2_194, %c0_195, %c0_196] : memref<4x128x64xf32, #tpu.memory_space<vmem>>, vector<1x128x64xf32>
    %253 = vector.shape_cast %252 : vector<1x128x64xf32> to vector<128x64xf32>
    %cst_197 = arith.constant dense<0.000000e+00> : vector<128x256xf32>
    %254 = tpu.matmul %253, %251, %cst_197 {dimension_numbers = #tpu.dot_dimension_numbers<[1], [0], [0], [1], [0, 0, 1, 1], [], []>} : vector<128x64xf32>, vector<64x256xf32>, vector<128x256xf32> -> vector<128x256xf32>
    %255 = arith.addf %248, %254 : vector<128x256xf32>
    %c3_198 = arith.constant 3 : index
    %c0_199 = arith.constant 0 : index
    %c0_200 = arith.constant 0 : index
    %256 = vector.load %arg18[%c3_198, %c0_199, %c0_200] : memref<4x256x256xbf16, #tpu.memory_space<vmem>>, vector<1x256x256xbf16>
    %257 = vector.shape_cast %256 : vector<1x256x256xbf16> to vector<256x256xbf16>
    %cst_201 = arith.constant dense<0.000000e+00> : vector<64x256xf32>
    %258 = tpu.matmul %235, %257, %cst_201 {dimension_numbers = #tpu.dot_dimension_numbers<[1], [0], [0], [1], [0, 0, 1, 1], [], []>} : vector<64x256xbf16>, vector<256x256xbf16>, vector<64x256xf32> -> vector<64x256xf32>
    %c3_202 = arith.constant 3 : index
    %c0_203 = arith.constant 0 : index
    %c0_204 = arith.constant 0 : index
    %259 = vector.load %arg19[%c3_202, %c0_203, %c0_204] : memref<4x128x64xf32, #tpu.memory_space<vmem>>, vector<1x128x64xf32>
    %260 = vector.shape_cast %259 : vector<1x128x64xf32> to vector<128x64xf32>
    %cst_205 = arith.constant dense<0.000000e+00> : vector<128x256xf32>
    %261 = tpu.matmul %260, %258, %cst_205 {dimension_numbers = #tpu.dot_dimension_numbers<[1], [0], [0], [1], [0, 0, 1, 1], [], []>} : vector<128x64xf32>, vector<64x256xf32>, vector<128x256xf32> -> vector<128x256xf32>
    %262 = arith.addf %255, %261 : vector<128x256xf32>
    %263 = math.tanh %262 : vector<128x256xf32>
    %c0_206 = arith.constant 0 : index
    %c0_207 = arith.constant 0 : index
    %264 = vector.load %arg22[%c0_206, %c0_207] : memref<128x256xf32, #tpu.memory_space<vmem>>, vector<128x256xf32>
    tpu.vector_store %arg22[%c0_206, %c0_207], %263 {strides = array<i32>} : memref<128x256xf32, #tpu.memory_space<vmem>>, vector<128x256xf32>,
    return
  }
  func.func @transform_0(%arg0: i32) -> (i32, i32) {
    %c0_i32 = arith.constant 0 : i32
    %c0_i32_0 = arith.constant 0 : i32
    %c0_i32_1 = arith.constant 0 : i32
    return %c0_i32, %c0_i32_0 : i32, i32
  }
  func.func @transform_1(%arg0: i32) -> (i32, i32) {
    %c0_i32 = arith.constant 0 : i32
    %c0_i32_0 = arith.constant 0 : i32
    %c0_i32_1 = arith.constant 0 : i32
    return %c0_i32, %c0_i32_0 : i32, i32
  }
  func.func @transform_2(%arg0: i32) -> (i32, i32) {
    %c0_i32 = arith.constant 0 : i32
    %c0_i32_0 = arith.constant 0 : i32
    %c0_i32_1 = arith.constant 0 : i32
    return %c0_i32, %c0_i32_0 : i32, i32
  }
  func.func @transform_3(%arg0: i32) -> (i32, i32) {
    %c0_i32 = arith.constant 0 : i32
    %c0_i32_0 = arith.constant 0 : i32
    %c0_i32_1 = arith.constant 0 : i32
    return %c0_i32, %c0_i32_0 : i32, i32
  }
  func.func @transform_4(%arg0: i32) -> (i32, i32, i32) {
    %c0_i32 = arith.constant 0 : i32
    %c0_i32_0 = arith.constant 0 : i32
    %c0_i32_1 = arith.constant 0 : i32
    %c0_i32_2 = arith.constant 0 : i32
    return %c0_i32, %c0_i32_0, %c0_i32_1 : i32, i32, i32
  }
  func.func @transform_5(%arg0: i32) -> (i32, i32, i32) {
    %c0_i32 = arith.constant 0 : i32
    %c0_i32_0 = arith.constant 0 : i32
    %c0_i32_1 = arith.constant 0 : i32
    %c0_i32_2 = arith.constant 0 : i32
    return %c0_i32, %c0_i32_0, %c0_i32_1 : i32, i32, i32
  }
  func.func @transform_6(%arg0: i32) -> (i32, i32, i32) {
    %c0_i32 = arith.constant 0 : i32
    %c0_i32_0 = arith.constant 0 : i32
    %c0_i32_1 = arith.constant 0 : i32
    %c0_i32_2 = arith.constant 0 : i32
    return %c0_i32, %c0_i32_0, %c0_i32_1 : i32, i32, i32
  }
  func.func @transform_7(%arg0: i32) -> (i32, i32) {
    %c0_i32 = arith.constant 0 : i32
    %c0_i32_0 = arith.constant 0 : i32
    %c0_i32_1 = arith.constant 0 : i32
    return %c0_i32, %c0_i32_0 : i32, i32
  }
  func.func @transform_8(%arg0: i32) -> (i32, i32) {
    %c0_i32 = arith.constant 0 : i32
    %c0_i32_0 = arith.constant 0 : i32
    %c0_i32_1 = arith.constant 0 : i32
    return %c0_i32, %c0_i32_0 : i32, i32
  }
  func.func @transform_9(%arg0: i32) -> (i32, i32, i32) {
    %c0_i32 = arith.constant 0 : i32
    %c0_i32_0 = arith.constant 0 : i32
    %c0_i32_1 = arith.constant 0 : i32
    %c0_i32_2 = arith.constant 0 : i32
    return %c0_i32, %c0_i32_0, %c0_i32_1 : i32, i32, i32
  }
  func.func @transform_10(%arg0: i32) -> (i32, i32, i32) {
    %c0_i32 = arith.constant 0 : i32
    %c0_i32_0 = arith.constant 0 : i32
    %c0_i32_1 = arith.constant 0 : i32
    %c0_i32_2 = arith.constant 0 : i32
    return %c0_i32, %c0_i32_0, %c0_i32_1 : i32, i32, i32
  }
  func.func @transform_11(%arg0: i32) -> (i32, i32) {
    %c0_i32 = arith.constant 0 : i32
    %c0_i32_0 = arith.constant 0 : i32
    %c0_i32_1 = arith.constant 0 : i32
    return %c0_i32, %c0_i32_0 : i32, i32
  }
  func.func @transform_12(%arg0: i32) -> (i32, i32) {
    %c0_i32 = arith.constant 0 : i32
    %c0_i32_0 = arith.constant 0 : i32
    %c0_i32_1 = arith.constant 0 : i32
    return %c0_i32, %c0_i32_0 : i32, i32
  }
  func.func @transform_13(%arg0: i32) -> (i32, i32, i32) {
    %c0_i32 = arith.constant 0 : i32
    %c0_i32_0 = arith.constant 0 : i32
    %c0_i32_1 = arith.constant 0 : i32
    %c0_i32_2 = arith.constant 0 : i32
    return %c0_i32, %c0_i32_0, %c0_i32_1 : i32, i32, i32
  }
  func.func @transform_14(%arg0: i32) -> (i32, i32, i32) {
    %c0_i32 = arith.constant 0 : i32
    %c0_i32_0 = arith.constant 0 : i32
    %c0_i32_1 = arith.constant 0 : i32
    %c0_i32_2 = arith.constant 0 : i32
    return %c0_i32, %c0_i32_0, %c0_i32_1 : i32, i32, i32
  }
  func.func @transform_15(%arg0: i32) -> (i32, i32) {
    %c0_i32 = arith.constant 0 : i32
    %c0_i32_0 = arith.constant 0 : i32
    %c0_i32_1 = arith.constant 0 : i32
    return %c0_i32, %c0_i32_0 : i32, i32
  }
  func.func @transform_16(%arg0: i32) -> (i32, i32) {
    %c0_i32 = arith.constant 0 : i32
    %c0_i32_0 = arith.constant 0 : i32
    %c0_i32_1 = arith.constant 0 : i32
    return %c0_i32, %c0_i32_0 : i32, i32
  }
  func.func @transform_17(%arg0: i32) -> (i32, i32, i32) {
    %c0_i32 = arith.constant 0 : i32
    %c0_i32_0 = arith.constant 0 : i32
    %c0_i32_1 = arith.constant 0 : i32
    %c0_i32_2 = arith.constant 0 : i32
    return %c0_i32, %c0_i32_0, %c0_i32_1 : i32, i32, i32
  }
  func.func @transform_18(%arg0: i32) -> (i32, i32, i32) {
    %c0_i32 = arith.constant 0 : i32
    %c0_i32_0 = arith.constant 0 : i32
    %c0_i32_1 = arith.constant 0 : i32
    %c0_i32_2 = arith.constant 0 : i32
    return %c0_i32, %c0_i32_0, %c0_i32_1 : i32, i32, i32
  }
  func.func @transform_19(%arg0: i32) -> (i32, i32) {
    %c0_i32 = arith.constant 0 : i32
    %c0_i32_0 = arith.constant 0 : i32
    %c0_i32_1 = arith.constant 0 : i32
    return %c0_i32, %c0_i32_0 : i32, i32
  }
  func.func @transform_20(%arg0: i32) -> (i32, i32) {
    %c0_i32 = arith.constant 0 : i32
    %c0_i32_0 = arith.constant 0 : i32
    %c0_i32_1 = arith.constant 0 : i32
    return %c0_i32, %c0_i32_0 : i32, i32
  }
  func.func @transform_21(%arg0: i32) -> (i32, i32) {
    %c0_i32 = arith.constant 0 : i32
    %c0_i32_0 = arith.constant 0 : i32
    %c0_i32_1 = arith.constant 0 : i32
    return %c0_i32, %c0_i32_0 : i32, i32
  }
}

</mosaic_0001>

<bundles_post_ra>
// kernel: generator_forward.1
= control target key start
LH: loop header
LB: loop body
LE: loop exit
PB: predicated region body
PF: predicated region fallthrough
CT: control target
= control target key end

     0   :  { %s18072_s0 = inlined_call_operand.vmem [shape: f32[2,124], index: 0, kind: input, shape index: {}]   ;;  %s18073_s1 = inlined_call_operand.vmem [shape: bf16[124,392], index: 1, kind: input, shape index: {}]   ;;  %s18074_s2 = inlined_call_operand.vmem [shape: f32[1,392], index: 2, kind: input, shape index: {}]   ;;  %s18075_s3 = inlined_call_operand.hbm [shape: bf16[392,1024], index: 3, kind: input, shape index: {}]   ;;  %s18076_s4 = inlined_call_operand.vmem [shape: f32[4,8,2], index: 4, kind: input, shape index: {}]   ;;  %s18077_s5 = inlined_call_operand.hbm [shape: bf16[4,256,256], index: 5, kind: input, shape index: {}]   ;;  %s18078_s6 = inlined_call_operand.vmem [shape: f32[4,16,8], index: 6, kind: input, shape index: {}]   ;;  %s18079_s7 = inlined_call_operand.vmem [shape: f32[2,256], index: 7, kind: input, shape index: {}]   ;;  %s18080_s8 = inlined_call_operand.vmem [shape: f32[256,256], index: 8, kind: input, shape index: {}]   ;;  %s18081_s9 = inlined_call_operand.hbm [shape: bf16[4,256,256], index: 9, kind: input, shape index: {}]   ;;  %s18082_s10 = inlined_call_operand.vmem [shape: f32[4,32,16], index: 10, kind: input, shape index: {}]   ;;  %s18083_s11 = inlined_call_operand.vmem [shape: f32[2,256], index: 11, kind: input, shape index: {}]   ;;  %s18084_s12 = inlined_call_operand.hbm [shape: f32[256,256], index: 12, kind: input, shape index: {}]   ;;  %s18085_s13 = inlined_call_operand.hbm [shape: bf16[4,256,256], index: 13, kind: input, shape index: {}]   ;;  %s18086_s14 = inlined_call_operand.vmem [shape: f32[4,64,32], index: 14, kind: input, shape index: {}]   ;;  %s18087_s15 = inlined_call_operand.vmem [shape: f32[2,256], index: 15, kind: input, shape index: {}]   ;;  %s18088_s16 = inlined_call_operand.hbm [shape: f32[256,256], index: 16, kind: input, shape index: {}]   ;;  %s18089_s17 = inlined_call_operand.hbm [shape: bf16[4,256,256], index: 17, kind: input, shape index: {}]   ;;  %s18090_s18 = inlined_call_operand.vmem [shape: f32[4,128,64], index: 18, kind: input, shape index: {}]   ;;  %s18091_s19 = inlined_call_operand.vmem [shape: f32[2,256], index: 19, kind: input, shape index: {}]   ;;  %s18092_s20 = inlined_call_operand.hbm [shape: f32[256,256], index: 20, kind: input, shape index: {}]   ;;  %s18093_s21 = inlined_call_operand.vmem [shape: f32[128,256], index: 21, kind: output, shape index: {}]  }
   0x1   :  { %18107 = sst [smem:[#allocation66_spill]] %s18072_s0 }
   0x2   :  { %18108 = sst [smem:[#allocation67_spill]] %s18073_s1 }
   0x3   :  { %18109 = sst [smem:[#allocation68_spill]] %s18074_s2 }
   0x4   :  { %18110 = sst [smem:[#allocation69_spill]] %s18075_s3 }
   0x5   :  { %18111 = sst [smem:[#allocation70_spill]] %s18076_s4 }
   0x6   :  { %18112 = sst [smem:[#allocation71_spill]] %s18077_s5 }
   0x7   :  { %26 = vsyncpa [#allocation3], 0 }
   0x8   :  { %27 = vsyncpa [#allocation5], 0 }
   0x9   :  { %28 = vsyncpa [#allocation8], 0 }
   0xa   :  { %29 = vsyncpa [#allocation11], 0  ;;  %s18113_s26 = sld [smem:[#allocation71_spill]] }
  0x10   :  { %s56_s27 = sshll.u32 %s18113_s26, 4  ;;  %s57_s27 = int_to_ptr.hbm [resolvable:$true] %s56_s27 }
  0x11   :  { %30 = vsyncpa [#allocation14], 0  ;;  %s14484_s3 = smov [#allocation4]   ;;  %s92_s4 = sshll.u32 %s18084_s12, 4  ;;  %s93_s4 = int_to_ptr.hbm [resolvable:$true] %s92_s4 }
  0x12   :  { %s58_s28 = sshll.u32 %s14484_s3, 4  ;;  %s18096_s30 = smov 128   ;;  %s59_s28 = int_to_ptr.vmem [resolvable:$true] %s58_s28 }
  0x13   :  { %s18098_s5 = smov 8   ;;  %s14487_s22 = smov [#allocation7]  }
  0x14   :  { %64 = dma.hbm_to_vmem [thread:$0]  %s57_s27, 16384, %s59_s28, [#allocation5], %s18096_s30, %s18096_s30, %s18098_s5  }
  0x15   :  { %s94_s23 = sshll.u32 %s14487_s22, 4  ;;  %s18100_s1 = smov 256   ;;  %s95_s23 = int_to_ptr.vmem [resolvable:$true] %s94_s23 }
  0x16   :  { %s14489_s24 = smov 16   ;;  %s122_s12 = sshll.u32 %s18088_s16, 4  ;;  %s123_s12 = int_to_ptr.hbm [resolvable:$true] %s122_s12 }
  0x17   :  { %100 = dma.hbm_to_vmem [thread:$0]  %s93_s4, 8192, %s95_s23, [#allocation8], %s18100_s1, %s18100_s1, %s14489_s24  }
  0x18   :  { %s14490_s26 = smov [#allocation10]   ;;  %s18114_s28 = sld [smem:[#allocation69_spill]] }
  0x19   :  { %s124_s3 = sshll.u32 %s14490_s26, 4  ;;  %s14491_s22 = smov [#allocation2]   ;;  %s125_s3 = int_to_ptr.vmem [resolvable:$true] %s124_s3 }
  0x1a   :  { %130 = dma.hbm_to_vmem [thread:$0]  %s123_s12, 8192, %s125_s3, [#allocation11], %s18100_s1, %s18100_s1, %s14489_s24  }
  0x1b   :  { %s43_s30 = sshll.u32 %s14491_s22, 4  ;;  %s14492_s4 = smov 512   ;;  %s44_s30 = int_to_ptr.vmem [resolvable:$true] %s43_s30 }
  0x1c   :  { %s14493_s23 = smov 32   ;;  %s75_s25 = sshll.u32 %s18081_s9, 4  ;;  %s76_s25 = int_to_ptr.hbm [resolvable:$true] %s75_s25 }
  0x1d   :  { %s14494_s26 = smov [#allocation6]   ;;  %s18115_s12 = smov 8  }
  0x1e   :  { %s41_s0 = sshll.u32 %s18114_s28, 4  ;;  %s77_s5 = sshll.u32 %s14494_s26, 4  ;;  %s42_s0 = int_to_ptr.hbm [resolvable:$true] %s41_s0  ;;  %s78_s5 = int_to_ptr.vmem [resolvable:$true] %s77_s5 }
  0x1f   :  { %49 = dma.hbm_to_vmem [thread:$0]  %s42_s0, 25088, %s44_s30, [#allocation3], %s14492_s4, %s14492_s4, %s14493_s23  }
  0x20   :  { %s105_s28 = sshll.u32 %s18085_s13, 4  ;;  %s18116_s3 = smov 128   ;;  %s106_s28 = int_to_ptr.hbm [resolvable:$true] %s105_s28 }
  0x21   :  { %83 = dma.hbm_to_vmem [thread:$0]  %s76_s25, 16384, %s78_s5, [#allocation5], %s18116_s3, %s18116_s3, %s18115_s12  }
  0x22   :  { %s14495_s22 = smov [#allocation9]   ;;  %s135_s4 = sshll.u32 %s18089_s17, 4  ;;  %s136_s4 = int_to_ptr.hbm [resolvable:$true] %s135_s4 }
  0x23   :  { %s107_s1 = sshll.u32 %s14495_s22, 4  ;;  %s152_s13 = sshll.u32 %s18092_s20, 4  ;;  %s108_s1 = int_to_ptr.vmem [resolvable:$true] %s107_s1  ;;  %s153_s13 = int_to_ptr.hbm [resolvable:$true] %s152_s13 }
  0x24   :  { %113 = dma.hbm_to_vmem [thread:$0]  %s106_s28, 16384, %s108_s1, [#allocation8], %s18116_s3, %s18116_s3, %s18115_s12  }
  0x25   :  { %s14496_s16 = smov [#allocation12]   ;;  %s14497_s5 = smov [#allocation13]  }
  0x26   :  { %s137_s2 = sshll.u32 %s14496_s16, 4  ;;  %s154_s17 = sshll.u32 %s14497_s5, 4  ;;  %s138_s2 = int_to_ptr.vmem [resolvable:$true] %s137_s2  ;;  %s155_s17 = int_to_ptr.vmem [resolvable:$true] %s154_s17 }
  0x27   :  { %143 = dma.hbm_to_vmem [thread:$0]  %s136_s4, 16384, %s138_s2, [#allocation11], %s18116_s3, %s18116_s3, %s18115_s12  }
  0x28   :  { %s18117_s25 = smov 256  }
  0x29   :  { %160 = dma.hbm_to_vmem [thread:$0]  %s153_s13, 8192, %s155_s17, [#allocation14], %s18117_s25, %s18117_s25, %s14489_s24  }
  0x2a   :  { %14474 = dma.done.wait [#allocation3], 25088  }
  0x2b   :  { %14475 = vsyncadd [#allocation3], 4294942208 }
  0x2c   :  { %14476 = dma.done.wait [#allocation5], 32768  }
  0x2d   :  { %14477 = vsyncadd [#allocation5], 4294934528 }
  0x2e   :  { %14478 = dma.done.wait [#allocation8], 24576  }
  0x2f   :  { %14479 = vsyncadd [#allocation8], 4294942720 }
  0x30   :  { %14480 = dma.done.wait [#allocation11], 24576  }
  0x31   :  { %14481 = vsyncadd [#allocation11], 4294942720 }
  0x32   :  { %14482 = dma.done.wait [#allocation14], 8192  }
  0x33   :  { %14483 = vsyncadd [#allocation14], 4294959104  ;;  %vm398_vm0 = vcmask 1045504   ;;  %s18118_s26 = sld [smem:[#allocation67_spill]]  ;;  %vm394_vm1 = vcmask 1014784   ;;  %vm1651_vm2 = vcmask 1043456  }
  0x34   :  { %s18119_s0 = sld [smem:[#allocation66_spill]]  ;;  %vm1647_vm3 = vcmask 64512   ;;  %vm2099_vm4 = vcmask 1041408   ;;  %vm2095_vm5 = vcmask 15360   ;;  %vm3947_vm12 = vcmask 130048  }
  0x35   :  { %s18120_s9 = sld [smem:[#allocation68_spill]] }
  0x36   :  { %s18121_s16 = sld [smem:[#allocation70_spill]] }
  0x39   :  { %v10244_v0 = vld [vmem:[%s18118_s26 + $0xe0] sm:$0xf]  ;;  %v13481_v1 = vld [vmem:[%s18118_s26 + $0xec] sm:$0x30]  ;;  %v13479_v2 = vld [vmem:[%s18118_s26 + $0xe4] sm:$0xf] }
  0x3a   :  { %v10245_v3 = vor.u32 %v13481_v1, %v10244_v0  ;;  %v10246_v4 = vld [vmem:[%s18118_s26 + $0xf0] sm:$0x30]  ;;  %v10252_v5 = vld [vmem:[%s18118_s26 + $0xe8] sm:$0xf]  ;;  %v13482_v6 = vld [vmem:[%s18118_s26 + $0xf4] sm:$0x30] }
  0x3b   :  { %v10249_v7 = vor.u32 %v13479_v2, %v10246_v4  ;;  %v10253_v8 = vor.u32 %v13482_v6, %v10252_v5  ;;  %v13480_v9 = vld [vmem:[%s18118_s26 + $0xec] sm:$0xf]  ;;  %v10254_v10 = vld [vmem:[%s18118_s26 + $0xf8] sm:$0x30]  ;;  %v10228_v11 = vld [vmem:[%s18118_s26 + $0xc0] sm:$0xf] }
  0x3c   :  { %v400_v12 = vsel %vm398_vm0, %v10245_v3, 0  ;;  %v10257_v13 = vor.u32 %v13480_v9, %v10254_v10  ;;  %v13477_v14 = vld [vmem:[%s18118_s26 + $0xcc] sm:$0xf0]  ;;  %v13475_v15 = vld [vmem:[%s18118_s26 + $0xc4] sm:$0xf] }
  0x3d   :  { %411 = vmatpush.bf16.msra.mxu0 %v400_v12  ;;  %v403_v16 = vsel %vm398_vm0, %v10249_v7, 0  ;;  %v406_v17 = vsel %vm398_vm0, %v10253_v8, 0  ;;  %v10229_v18 = vor.u32 %v13477_v14, %v10228_v11  ;;  %v10230_v19 = vld [vmem:[%s18118_s26 + $0xd0] sm:$0xf0]  ;;  %v10236_v20 = vld [vmem:[%s18118_s26 + $0xc8] sm:$0xf] }
  0x3e   :  { %424 = vmatpush.bf16.msra.mxu1 %v403_v16  ;;  %437 = vmatpush.bf16.msra.mxu2 %v406_v17  ;;  %v409_v21 = vsel %vm398_vm0, %v10257_v13, 0  ;;  %v10233_v22 = vor.u32 %v13475_v15, %v10230_v19  ;;  %v13478_v23 = vld [vmem:[%s18118_s26 + $0xd4] sm:$0xf0]  ;;  %v13476_v24 = vld [vmem:[%s18118_s26 + $0xcc] sm:$0xf] }
  0x3f   :  { %450 = vmatpush.bf16.msra.mxu3 %v409_v21  ;;  %v10237_v25 = vor.u32 %v13478_v23, %v10236_v20  ;;  %v10238_v26 = vld [vmem:[%s18118_s26 + $0xd8] sm:$0xf0]  ;;  %v10212_v27 = vld [vmem:[%s18118_s26 + $0xa0] sm:$0xf]  ;;  %v13473_v28 = vld [vmem:[%s18118_s26 + $0xac] sm:$0xf0] }
  0x40   :  { %v10241_v29 = vor.u32 %v13476_v24, %v10238_v26  ;;  %v13471_v30 = vld [vmem:[%s18118_s26 + $0xa4] sm:$0xf]  ;;  %v10214_v31 = vld [vmem:[%s18118_s26 + $0xb0] sm:$0xf0]  ;;  %v10220_v32 = vld [vmem:[%s18118_s26 + $0xa8] sm:$0xf]  ;;  %v10213_v33 = vor.u32 %v13473_v28, %v10212_v27 }
  0x41   :  { %412 = vmatpush.bf16.msra.mxu0 %v10229_v18  ;;  %v13474_v34 = vld [vmem:[%s18118_s26 + $0xb4] sm:$0xf0]  ;;  %v13472_v35 = vld [vmem:[%s18118_s26 + $0xac] sm:$0xf]  ;;  %v10222_v36 = vld [vmem:[%s18118_s26 + $0xb8] sm:$0xf0]  ;;  %v10217_v37 = vor.u32 %v13471_v30, %v10214_v31 }
  0x42   :  { %425 = vmatpush.bf16.msra.mxu1 %v10233_v22  ;;  %438 = vmatpush.bf16.msra.mxu2 %v10237_v25  ;;  %v10221_v38 = vor.u32 %v13474_v34, %v10220_v32  ;;  %v10196_v39 = vld [vmem:[%s18118_s26 + $0x80] sm:$0xf]  ;;  %v13469_v40 = vld [vmem:[%s18118_s26 + $0x8c] sm:$0xf0]  ;;  %v13467_v41 = vld [vmem:[%s18118_s26 + $0x84] sm:$0xf]  ;;  %v10225_v42 = vor.u32 %v13472_v35, %v10222_v36 }
  0x43   :  { %451 = vmatpush.bf16.msra.mxu3 %v10241_v29  ;;  %v10198_v43 = vld [vmem:[%s18118_s26 + $0x90] sm:$0xf0]  ;;  %v10204_v44 = vld [vmem:[%s18118_s26 + $0x88] sm:$0xf]  ;;  %v13470_v45 = vld [vmem:[%s18118_s26 + $0x94] sm:$0xf0]  ;;  %v10197_v48 = vor.u32 %v13469_v40, %v10196_v39 }
  0x44   :  { %v13468_v46 = vld [vmem:[%s18118_s26 + $0x8c] sm:$0xf]  ;;  %v10206_v47 = vld [vmem:[%s18118_s26 + $0x98] sm:$0xf0]  ;;  %v10201_v49 = vor.u32 %v13467_v41, %v10198_v43  ;;  %v10205_v50 = vor.u32 %v13470_v45, %v10204_v44  ;;  %v10180_v51 = vld [vmem:[%s18118_s26 + $0x60] sm:$0xf] }
  0x45   :  { %413 = vmatpush.bf16.msra.mxu0 %v10213_v33  ;;  %v13465_v52 = vld [vmem:[%s18118_s26 + $0x6c] sm:$0xf0]  ;;  %v13463_v53 = vld [vmem:[%s18118_s26 + $0x64] sm:$0xf]  ;;  %v10209_v54 = vor.u32 %v13468_v46, %v10206_v47  ;;  %v10182_v55 = vld [vmem:[%s18118_s26 + $0x70] sm:$0xf0] }
  0x46   :  { %426 = vmatpush.bf16.msra.mxu1 %v10217_v37  ;;  %439 = vmatpush.bf16.msra.mxu2 %v10221_v38  ;;  %v10188_v56 = vld [vmem:[%s18118_s26 + $0x68] sm:$0xf]  ;;  %v13466_v57 = vld [vmem:[%s18118_s26 + $0x74] sm:$0xf0]  ;;  %v13464_v58 = vld [vmem:[%s18118_s26 + $0x6c] sm:$0xf]  ;;  %v10181_v60 = vor.u32 %v13465_v52, %v10180_v51  ;;  %v10185_v61 = vor.u32 %v13463_v53, %v10182_v55 }
  0x47   :  { %452 = vmatpush.bf16.msra.mxu3 %v10225_v42  ;;  %v10190_v59 = vld [vmem:[%s18118_s26 + $0x78] sm:$0xf0]  ;;  %v10189_v62 = vor.u32 %v13466_v57, %v10188_v56  ;;  %v10164_v63 = vld [vmem:[%s18118_s26 + $0x40] sm:$0xf]  ;;  %v13461_v0 = vld [vmem:[%s18118_s26 + $0x4c] sm:$0xf0] }
  0x48   :  { %v13459_v1 = vld [vmem:[%s18118_s26 + $0x44] sm:$0xf]  ;;  %v10193_v2 = vor.u32 %v13464_v58, %v10190_v59  ;;  %v10166_v3 = vld [vmem:[%s18118_s26 + $0x50] sm:$0xf0]  ;;  %v10172_v4 = vld [vmem:[%s18118_s26 + $0x48] sm:$0xf]  ;;  %v10165_v8 = vor.u32 %v13461_v0, %v10164_v63 }
  0x49   :  { %414 = vmatpush.bf16.msra.mxu0 %v10197_v48  ;;  %v13462_v5 = vld [vmem:[%s18118_s26 + $0x54] sm:$0xf0]  ;;  %v13460_v6 = vld [vmem:[%s18118_s26 + $0x4c] sm:$0xf]  ;;  %v10174_v7 = vld [vmem:[%s18118_s26 + $0x58] sm:$0xf0]  ;;  %v10169_v9 = vor.u32 %v13459_v1, %v10166_v3 }
  0x4a   :  { %427 = vmatpush.bf16.msra.mxu1 %v10201_v49  ;;  %440 = vmatpush.bf16.msra.mxu2 %v10205_v50  ;;  %v10173_v10 = vor.u32 %v13462_v5, %v10172_v4  ;;  %v10148_v11 = vld [vmem:[%s18118_s26 + $0x20] sm:$0xf]  ;;  %v13457_v12 = vld [vmem:[%s18118_s26 + $0x2c] sm:$0xf0]  ;;  %v13455_v13 = vld [vmem:[%s18118_s26 + $0x24] sm:$0xf]  ;;  %v10177_v14 = vor.u32 %v13460_v6, %v10174_v7 }
  0x4b   :  { %453 = vmatpush.bf16.msra.mxu3 %v10209_v54  ;;  %v10150_v15 = vld [vmem:[%s18118_s26 + $0x30] sm:$0xf0]  ;;  %v10156_v16 = vld [vmem:[%s18118_s26 + $0x28] sm:$0xf]  ;;  %v13458_v17 = vld [vmem:[%s18118_s26 + $0x34] sm:$0xf0]  ;;  %v10149_v20 = vor.u32 %v13457_v12, %v10148_v11 }
  0x4c   :  { %v13456_v18 = vld [vmem:[%s18118_s26 + $0x2c] sm:$0xf]  ;;  %v10158_v19 = vld [vmem:[%s18118_s26 + $0x38] sm:$0xf0]  ;;  %v10132_v21 = vld [vmem:[%s18118_s26] sm:$0xf]  ;;  %v10153_v22 = vor.u32 %v13455_v13, %v10150_v15  ;;  %v10157_v23 = vor.u32 %v13458_v17, %v10156_v16 }
  0x4d   :  { %415 = vmatpush.bf16.msra.mxu0 %v10181_v60  ;;  %v13453_v24 = vld [vmem:[%s18118_s26 + $0xc] sm:$0xf0]  ;;  %v13451_v25 = vld [vmem:[%s18118_s26 + $0x4] sm:$0xf]  ;;  %v10134_v26 = vld [vmem:[%s18118_s26 + $0x10] sm:$0xf0]  ;;  %v10161_v27 = vor.u32 %v13456_v18, %v10158_v19 }
  0x4e   :  { %428 = vmatpush.bf16.msra.mxu1 %v10185_v61  ;;  %441 = vmatpush.bf16.msra.mxu2 %v10189_v62  ;;  %v10140_v28 = vld [vmem:[%s18118_s26 + $0x8] sm:$0xf]  ;;  %v13454_v29 = vld [vmem:[%s18118_s26 + $0x14] sm:$0xf0]  ;;  %v13452_v30 = vld [vmem:[%s18118_s26 + $0xc] sm:$0xf]  ;;  %v10133_v34 = vor.u32 %v13453_v24, %v10132_v21  ;;  %v10137_v38 = vor.u32 %v13451_v25, %v10134_v26 }
  0x4f   :  { %454 = vmatpush.bf16.msra.mxu3 %v10193_v2  ;;  %v10142_v31 = vld [vmem:[%s18118_s26 + $0x18] sm:$0xf0]  ;;  %v10488_v32 = vld [vmem:[#allocation2 + $0x1c0] sm:$0xf]  ;;  %v10141_v39 = vor.u32 %v13454_v29, %v10140_v28  ;;  %v13539_v57 = vld [vmem:[#allocation2 + $0x1c4] sm:$0xf] }
  0x50   :  { %v13543_v33 = vld [vmem:[#allocation2 + $0x1dc] sm:$0xf0]  ;;  %v10145_v40 = vor.u32 %v13452_v30, %v10142_v31  ;;  %v10490_v58 = vld [vmem:[#allocation2 + $0x1e0] sm:$0xf0] }
  0x51   :  { %416 = vmatpush.bf16.msra.mxu0 %v10165_v8  ;;  %v194_v35 = vld [vmem:[%s18119_s0] sm:$0x3]  ;;  %v10489_v41 = vor.u32 %v13543_v33, %v10488_v32  ;;  %v10493_v5 = vor.u32 %v13539_v57, %v10490_v58  ;;  %v13531_v7 = vld [vmem:[#allocation2 + $0x184] sm:$0xf] }
  0x52   :  { %429 = vmatpush.bf16.msra.mxu1 %v10169_v9  ;;  %442 = vmatpush.bf16.msra.mxu2 %v10173_v10  ;;  %v10744_v36 = vld [vmem:[#allocation2 + $0x3c0] sm:$0xf]  ;;  %v195_v42 = vpack.c.bf16 %v194_v35, %v194_v35  ;;  %v10458_v8 = vld [vmem:[#allocation2 + $0x1a0] sm:$0xf0] }
  0x53   :  { %455 = vmatpush.bf16.msra.mxu3 %v10177_v14  ;;  %v13607_v37 = vld [vmem:[#allocation2 + $0x3dc] sm:$0xf0]  ;;  %v10461_v17 = vor.u32 %v13531_v7, %v10458_v8  ;;  %v13523_v21 = vld [vmem:[#allocation2 + $0x144] sm:$0xf] }
  0x54   :  { %v10456_v43 = vld [vmem:[#allocation2 + $0x180] sm:$0xf]  ;;  %v10745_v45 = vor.u32 %v13607_v37, %v10744_v36  ;;  %v13515_v33 = vld [vmem:[#allocation2 + $0x104] sm:$0xf] }
  0x55   :  { %417 = vmatpush.bf16.msra.mxu0 %v10149_v20  ;;  %v13535_v44 = vld [vmem:[#allocation2 + $0x19c] sm:$0xf0]  ;;  %v13579_v7 = vld [vmem:[#allocation2 + $0x304] sm:$0xf] }
  0x56   :  { %430 = vmatpush.bf16.msra.mxu1 %v10153_v22  ;;  %443 = vmatpush.bf16.msra.mxu2 %v10157_v23  ;;  %v10712_v46 = vld [vmem:[#allocation2 + $0x380] sm:$0xf]  ;;  %v10457_v51 = vor.u32 %v13535_v44, %v10456_v43  ;;  %v10426_v22 = vld [vmem:[#allocation2 + $0x160] sm:$0xf0] }
  0x57   :  { %456 = vmatpush.bf16.msra.mxu3 %v10161_v27  ;;  %v13599_v47 = vld [vmem:[#allocation2 + $0x39c] sm:$0xf0]  ;;  %v10429_v29 = vor.u32 %v13523_v21, %v10426_v22  ;;  %v10650_v8 = vld [vmem:[#allocation2 + $0x320] sm:$0xf0] }
  0x58   :  { %v11000_v48 = vld [vmem:[#allocation2 + $0x5c0] sm:$0xf]  ;;  %v10713_v55 = vor.u32 %v13599_v47, %v10712_v46 }
  0x59   :  { %418 = vmatpush.bf16.msra.mxu0 %v10133_v34  ;;  %v13671_v49 = vld [vmem:[#allocation2 + $0x5dc] sm:$0xf0]  ;;  %v10394_v34 = vld [vmem:[#allocation2 + $0x120] sm:$0xf0] }
  0x5a   :  { %431 = vmatpush.bf16.msra.mxu1 %v10137_v38  ;;  %444 = vmatpush.bf16.msra.mxu2 %v10141_v39  ;;  %v11001_v50 = vor.u32 %v13671_v49, %v11000_v48  ;;  %v10424_v52 = vld [vmem:[#allocation2 + $0x140] sm:$0xf]  ;;  %v10397_v39 = vor.u32 %v13515_v33, %v10394_v34  ;;  %v13603_v48 = vld [vmem:[#allocation2 + $0x3c4] sm:$0xf] }
  0x5b   :  { %457 = vmatpush.bf16.msra.mxu3 %v10145_v40  ;;  %v13527_v53 = vld [vmem:[#allocation2 + $0x15c] sm:$0xf0] }
  0x5c   :  { %v10680_v54 = vld [vmem:[#allocation2 + $0x340] sm:$0xf]  ;;  %10258 = vmatmul.msk.bf16.vlgmr.msra.gmra.mxu0 %vm394_vm1, %v195_v42  ;;  %v10425_v0 = vor.u32 %v13527_v53, %v10424_v52  ;;  %v13667_v53 = vld [vmem:[#allocation2 + $0x5c4] sm:$0xf] }
  0x5d   :  { %1676 = vmatpush.bf16.msrb.mxu0 %v10489_v41  ;;  %v14854_v56 = vld [vmem:[#allocation2 + $0x600] sm:$0xff]  ;;  %10259 = vmatmul.msk.bf16.vlgmr.msra.gmra.mxu1 %vm394_vm1, %v195_v42 }
  0x5e   :  { %1689 = vmatpush.bf16.msrb.mxu1 %v10745_v45  ;;  %10260 = vmatmul.msk.bf16.vlgmr.msra.gmra.mxu2 %vm394_vm1, %v195_v42  ;;  %v13591_v59 = vld [vmem:[#allocation2 + $0x35c] sm:$0xf0]  ;;  %v1247_v60 = vunpack.c.l.b16 %v14854_v56 }
  0x5f   :  { %v10968_v61 = vld [vmem:[#allocation2 + $0x580] sm:$0xf]  ;;  %10261 = vmatmul.msk.bf16.vlgmr.msra.gmra.mxu3 %vm394_vm1, %v195_v42  ;;  %1702 = vmatpush.bf16.msrb.mxu2 %v11001_v50  ;;  %v10681_v6 = vor.u32 %v13591_v59, %v10680_v54  ;;  %v10746_v50 = vld [vmem:[#allocation2 + $0x3e0] sm:$0xf0] }
  0x60   :  { %v13663_v62 = vld [vmem:[#allocation2 + $0x59c] sm:$0xf0]  ;;  %v1447_v4 = vpack.c.b16 %v1247_v60, %v1247_v60  ;;  %v11002_v54 = vld [vmem:[#allocation2 + $0x5e0] sm:$0xf0]  ;;  %v10749_v57 = vor.u32 %v13603_v48, %v10746_v50 }
  0x61   :  { %v10969_v63 = vor.u32 %v13663_v62, %v10968_v61  ;;  %1677 = vmatpush.bf16.msrb.mxu0 %v10457_v51  ;;  %v10392_v1 = vld [vmem:[#allocation2 + $0x100] sm:$0xf]  ;;  %v13595_v59 = vld [vmem:[#allocation2 + $0x384] sm:$0xf]  ;;  %v11005_v61 = vor.u32 %v13667_v53, %v11002_v54 }
  0x62   :  { %v13519_v2 = vld [vmem:[#allocation2 + $0x11c] sm:$0xf0]  ;;  %1690 = vmatpush.bf16.msrb.mxu1 %v10713_v55  ;;  %v1653_v11 = vsel %vm1651_vm2, %v1447_v4, 0  ;;  %v10714_v60 = vld [vmem:[#allocation2 + $0x3a0] sm:$0xf0] }
  0x63   :  { %v10648_v3 = vld [vmem:[#allocation2 + $0x300] sm:$0xf]  ;;  %1722 = vmatpush.bf16.msrb.mxu3 %v1653_v11  ;;  %1703 = vmatpush.bf16.msrb.mxu2 %v10969_v63  ;;  %v10393_v14 = vor.u32 %v13519_v2, %v10392_v1  ;;  %v13659_v62 = vld [vmem:[#allocation2 + $0x584] sm:$0xf] }
  0x64   :  { %v10936_v9 = vld [vmem:[#allocation2 + $0x540] sm:$0xf]  ;;  %v10970_v63 = vld [vmem:[#allocation2 + $0x5a0] sm:$0xf0] }
  0x65   :  { %v13583_v10 = vld [vmem:[#allocation2 + $0x31c] sm:$0xf0]  ;;  %1678 = vmatpush.bf16.msrb.mxu0 %v10425_v0  ;;  %v10717_v0 = vor.u32 %v13595_v59, %v10714_v60  ;;  %v13587_v1 = vld [vmem:[#allocation2 + $0x344] sm:$0xf] }
  0x66   :  { %v13655_v12 = vld [vmem:[#allocation2 + $0x55c] sm:$0xf0]  ;;  %1691 = vmatpush.bf16.msrb.mxu1 %v10681_v6  ;;  %v10649_v18 = vor.u32 %v13583_v10, %v10648_v3  ;;  %v10682_v2 = vld [vmem:[#allocation2 + $0x360] sm:$0xf0]  ;;  %v10973_v3 = vor.u32 %v13659_v62, %v10970_v63  ;;  %v10653_v10 = vor.u32 %v13579_v7, %v10650_v8  ;;  %v14866_v63 = vld [vmem:[#allocation2 + $0x608] sm:$0xff] }
  0x67   :  { %v10937_v13 = vor.u32 %v13655_v12, %v10936_v9  ;;  %v10360_v15 = vld [vmem:[#allocation2 + $0xc0] sm:$0xf]  ;;  %1728 = vmatpush.bf16.msra.mxu3 %v10493_v5  ;;  %v13651_v4 = vld [vmem:[#allocation2 + $0x544] sm:$0xf]  ;;  %v10685_v6 = vor.u32 %v13587_v1, %v10682_v2  ;;  %v1249_v2 = vunpack.c.l.b16 %v14866_v63  ;;  %v13672_v7 = vld [vmem:[#allocation2 + $0x5e4] sm:$0xf0] }
  0x68   :  { %v13511_v16 = vld [vmem:[#allocation2 + $0xdc] sm:$0xf0]  ;;  %v10938_v5 = vld [vmem:[#allocation2 + $0x560] sm:$0xf0] }
  0x69   :  { %v10616_v19 = vld [vmem:[#allocation2 + $0x2c0] sm:$0xf]  ;;  %1704 = vmatpush.bf16.msrb.mxu2 %v10937_v13  ;;  %1679 = vmatpush.bf16.msrb.mxu0 %v10393_v14  ;;  %v10361_v26 = vor.u32 %v13511_v16, %v10360_v15  ;;  %v10941_v9 = vor.u32 %v13651_v4, %v10938_v5  ;;  %v13571_v11 = vld [vmem:[#allocation2 + $0x2c4] sm:$0xf] }
  0x6a   :  { %v13575_v20 = vld [vmem:[#allocation2 + $0x2dc] sm:$0xf0]  ;;  %1692 = vmatpush.bf16.msrb.mxu1 %v10649_v18  ;;  %v10618_v12 = vld [vmem:[#allocation2 + $0x2e0] sm:$0xf0] }
  0x6b   :  { %v10904_v23 = vld [vmem:[#allocation2 + $0x500] sm:$0xf]  ;;  %1729 = vmatpush.bf16.msra.mxu3 %v10461_v17  ;;  %v10617_v30 = vor.u32 %v13575_v20, %v10616_v19  ;;  %v10621_v13 = vor.u32 %v13571_v11, %v10618_v12  ;;  %v13563_v14 = vld [vmem:[#allocation2 + $0x284] sm:$0xf] }
  0x6c   :  { %v13647_v24 = vld [vmem:[#allocation2 + $0x51c] sm:$0xf0]  ;;  %v10586_v15 = vld [vmem:[#allocation2 + $0x2a0] sm:$0xf0] }
  0x6d   :  { %v10905_v25 = vor.u32 %v13647_v24, %v10904_v23  ;;  %v10328_v27 = vld [vmem:[#allocation2 + $0x80] sm:$0xf]  ;;  %1680 = vmatpush.bf16.msrb.mxu0 %v10361_v26  ;;  %v10589_v16 = vor.u32 %v13563_v14, %v10586_v15  ;;  %v13507_v17 = vld [vmem:[#allocation2 + $0xc4] sm:$0xf] }
  0x6e   :  { %v13503_v28 = vld [vmem:[#allocation2 + $0x9c] sm:$0xf0]  ;;  %1693 = vmatpush.bf16.msrb.mxu1 %v10617_v30  ;;  %v10362_v18 = vld [vmem:[#allocation2 + $0xe0] sm:$0xf0] }
  0x6f   :  { %v10584_v31 = vld [vmem:[#allocation2 + $0x280] sm:$0xf]  ;;  %1705 = vmatpush.bf16.msrb.mxu2 %v10905_v25  ;;  %v10329_v38 = vor.u32 %v13503_v28, %v10328_v27  ;;  %1730 = vmatpush.bf16.msra.mxu3 %v10429_v29  ;;  %v10365_v19 = vor.u32 %v13507_v17, %v10362_v18  ;;  %v13555_v23 = vld [vmem:[#allocation2 + $0x244] sm:$0xf]  ;;  %v13664_v17 = vld [vmem:[#allocation2 + $0x5a4] sm:$0xf0] }
  0x70   :  { %v13567_v32 = vld [vmem:[#allocation2 + $0x29c] sm:$0xf0]  ;;  %v10554_v24 = vld [vmem:[#allocation2 + $0x260] sm:$0xf0] }
  0x71   :  { %v10872_v35 = vld [vmem:[#allocation2 + $0x4c0] sm:$0xf]  ;;  %v10585_v42 = vor.u32 %v13567_v32, %v10584_v31  ;;  %1681 = vmatpush.bf16.msrb.mxu0 %v10329_v38  ;;  %v10557_v25 = vor.u32 %v13555_v23, %v10554_v24  ;;  %v13643_v26 = vld [vmem:[#allocation2 + $0x504] sm:$0xf]  ;;  %v10496_v24 = vld [vmem:[#allocation2 + $0x1c8] sm:$0xf] }
  0x72   :  { %v13639_v36 = vld [vmem:[#allocation2 + $0x4dc] sm:$0xf0]  ;;  %v10906_v27 = vld [vmem:[#allocation2 + $0x520] sm:$0xf0] }
  0x73   :  { %v10873_v37 = vor.u32 %v13639_v36, %v10872_v35  ;;  %v10296_v40 = vld [vmem:[#allocation2 + $0x40] sm:$0xf]  ;;  %1731 = vmatpush.bf16.msra.mxu3 %v10397_v39  ;;  %1694 = vmatpush.bf16.msrb.mxu1 %v10585_v42  ;;  %v10909_v28 = vor.u32 %v13643_v26, %v10906_v27  ;;  %v13499_v29 = vld [vmem:[#allocation2 + $0x84] sm:$0xf]  ;;  %v10752_v26 = vld [vmem:[#allocation2 + $0x3c8] sm:$0xf] }
  0x74   :  { %v13495_v41 = vld [vmem:[#allocation2 + $0x5c] sm:$0xf0]  ;;  %v10330_v30 = vld [vmem:[#allocation2 + $0xa0] sm:$0xf0] }
  0x75   :  { %v10552_v43 = vld [vmem:[#allocation2 + $0x240] sm:$0xf]  ;;  %1706 = vmatpush.bf16.msrb.mxu2 %v10873_v37  ;;  %v10297_v45 = vor.u32 %v13495_v41, %v10296_v40  ;;  %v10333_v31 = vor.u32 %v13499_v29, %v10330_v30  ;;  %v13547_v35 = vld [vmem:[#allocation2 + $0x204] sm:$0xf]  ;;  %v1248_v40 = vunpack.c.h.b16 %v14854_v56  ;;  %v13608_v29 = vld [vmem:[#allocation2 + $0x3e4] sm:$0xf0] }
  0x76   :  { %v13559_v44 = vld [vmem:[#allocation2 + $0x25c] sm:$0xf0]  ;;  %v10522_v36 = vld [vmem:[#allocation2 + $0x220] sm:$0xf0]  ;;  %v10944_v30 = vld [vmem:[#allocation2 + $0x548] sm:$0xf] }
  0x77   :  { %v10264_v46 = vld [vmem:[#allocation2] sm:$0xf]  ;;  %v10553_v49 = vor.u32 %v13559_v44, %v10552_v43  ;;  %1682 = vmatpush.bf16.msrb.mxu0 %v10297_v45  ;;  %1732 = vmatpush.bf16.msra.mxu3 %v10365_v19  ;;  %v10525_v37 = vor.u32 %v13547_v35, %v10522_v36  ;;  %v13635_v38 = vld [vmem:[#allocation2 + $0x4c4] sm:$0xf]  ;;  %v1448_v53 = vpack.c.b16 %v1248_v40, %v1248_v40  ;;  %v13536_v40 = vld [vmem:[#allocation2 + $0x1a4] sm:$0xf0] }
  0x78   :  { %v13487_v47 = vld [vmem:[#allocation2 + $0x1c] sm:$0xf0]  ;;  %v10874_v39 = vld [vmem:[#allocation2 + $0x4e0] sm:$0xf0] }
  0x79   :  { %v10520_v51 = vld [vmem:[#allocation2 + $0x200] sm:$0xf]  ;;  %v10265_v55 = vor.u32 %v13487_v47, %v10264_v46  ;;  %1695 = vmatpush.bf16.msrb.mxu1 %v10553_v49  ;;  %v10877_v41 = vor.u32 %v13635_v38, %v10874_v39  ;;  %v13491_v42 = vld [vmem:[#allocation2 + $0x44] sm:$0xf]  ;;  %v1656_v56 = vsel %vm1651_vm2, %v1448_v53, 0 }
  0x7a   :  { %v13551_v52 = vld [vmem:[#allocation2 + $0x21c] sm:$0xf0]  ;;  %v10298_v43 = vld [vmem:[#allocation2 + $0x60] sm:$0xf0]  ;;  %v10464_v39 = vld [vmem:[#allocation2 + $0x188] sm:$0xf] }
  0x7b   :  { %v10521_v58 = vor.u32 %v13551_v52, %v10520_v51  ;;  %1683 = vmatpush.bf16.msrb.mxu0 %v10265_v55  ;;  %v10840_v20 = vld [vmem:[#allocation2 + $0x480] sm:$0xf]  ;;  %1733 = vmatpush.bf16.msra.mxu3 %v10333_v31  ;;  %v10301_v45 = vor.u32 %v13491_v42, %v10298_v43  ;;  %v13627_v48 = vld [vmem:[#allocation2 + $0x484] sm:$0xf]  ;;  %v13656_v31 = vld [vmem:[#allocation2 + $0x564] sm:$0xf0] }
  0x7c   :  { %v13631_v21 = vld [vmem:[#allocation2 + $0x49c] sm:$0xf0]  ;;  %v10842_v49 = vld [vmem:[#allocation2 + $0x4a0] sm:$0xf0]  ;;  %v10945_v38 = vor.u32 %v13656_v31, %v10944_v30  ;;  %v13600_v43 = vld [vmem:[#allocation2 + $0x3a4] sm:$0xf0] }
  0x7d   :  { %1696 = vmatpush.bf16.msrb.mxu1 %v10521_v58  ;;  %v10841_v22 = vor.u32 %v13631_v21, %v10840_v20  ;;  %v10808_v32 = vld [vmem:[#allocation2 + $0x440] sm:$0xf]  ;;  %v10845_v50 = vor.u32 %v13627_v48, %v10842_v49  ;;  %v13483_v51 = vld [vmem:[#allocation2 + $0x4] sm:$0xf]  ;;  %v10688_v53 = vld [vmem:[#allocation2 + $0x348] sm:$0xf] }
  0x7e   :  { %v13623_v33 = vld [vmem:[#allocation2 + $0x45c] sm:$0xf0]  ;;  %v10266_v52 = vld [vmem:[#allocation2 + $0x20] sm:$0xf0]  ;;  %v13568_v30 = vld [vmem:[#allocation2 + $0x2a4] sm:$0xf0] }
  0x7f   :  { %1741 = vmatpush.bf16.msra.mxu0 %v10749_v57  ;;  %1707 = vmatpush.bf16.msrb.mxu2 %v10841_v22  ;;  %v10809_v34 = vor.u32 %v13623_v33, %v10808_v32  ;;  %v10776_v44 = vld [vmem:[#allocation2 + $0x400] sm:$0xf]  ;;  %v10269_v54 = vor.u32 %v13483_v51, %v10266_v52  ;;  %v13619_v55 = vld [vmem:[#allocation2 + $0x444] sm:$0xf]  ;;  %v10432_v51 = vld [vmem:[#allocation2 + $0x148] sm:$0xf] }
  0x80   :  { %v13615_v46 = vld [vmem:[#allocation2 + $0x41c] sm:$0xf0]  ;;  %1734 = vmatpush.bf16.msra.mxu3 %v10301_v45  ;;  %v10810_v57 = vld [vmem:[#allocation2 + $0x460] sm:$0xf0]  ;;  %v13648_v45 = vld [vmem:[#allocation2 + $0x524] sm:$0xf0] }
  0x81   :  { %1754 = vmatpush.bf16.msra.mxu1 %v11005_v61  ;;  %v10777_v47 = vor.u32 %v13615_v46, %v10776_v44  ;;  %v10813_v58 = vor.u32 %v13619_v55, %v10810_v57  ;;  %v13611_v59 = vld [vmem:[#allocation2 + $0x404] sm:$0xf]  ;;  %v228_v62 = vld [vmem:[%s18120_s9] sm:$0xf]  ;;  %v10912_v44 = vld [vmem:[#allocation2 + $0x508] sm:$0xf] }
  0x82   :  { %v10778_v60 = vld [vmem:[#allocation2 + $0x420] sm:$0xf0]  ;;  %v231_v1 = vperm.slane %v228_v62, 1  ;;  %v232_v12 = vperm.slane %v228_v62, 2  ;;  %v233_v15 = vperm.slane %v228_v62, 3 }
  0x83   :  { %1742 = vmatpush.bf16.msra.mxu0 %v10717_v0  ;;  %1708 = vmatpush.bf16.msrb.mxu2 %v10809_v34  ;;  %v10781_v61 = vor.u32 %v13611_v59, %v10778_v60  ;;  %v230_v0 = vperm.slane %v228_v62, 0  ;;  %v13528_v52 = vld [vmem:[#allocation2 + $0x164] sm:$0xf0]  ;;  %v13540_v57 = vld [vmem:[#allocation2 + $0x1cc] sm:$0xf] }
  0x84   :  { %1735 = vmatpush.bf16.msra.mxu3 %v10269_v54  ;;  %v13592_v54 = vld [vmem:[#allocation2 + $0x364] sm:$0xf0]  ;;  %v10433_v59 = vor.u32 %v13528_v52, %v10432_v51 }
  0x85   :  { %1755 = vmatpush.bf16.msra.mxu1 %v10973_v3  ;;  %v13640_v55 = vld [vmem:[#allocation2 + $0x4e4] sm:$0xf0]  ;;  %v10689_v60 = vor.u32 %v13592_v54, %v10688_v53 }
  0x86   :  { %v13520_v62 = vld [vmem:[#allocation2 + $0x124] sm:$0xf0] }
  0x87   :  { %1743 = vmatpush.bf16.msra.mxu0 %v10685_v6  ;;  %1709 = vmatpush.bf16.msrb.mxu2 %v10777_v47  ;;  %v11008_v6 = vld [vmem:[#allocation2 + $0x5c8] sm:$0xf]  ;;  %v10465_v47 = vor.u32 %v13536_v40, %v10464_v39 }
  0x88   :  { %v10784_v31 = vld [vmem:[#allocation2 + $0x408] sm:$0xf] }
  0x89   :  { %1756 = vmatpush.bf16.msra.mxu1 %v10941_v9  ;;  %v1449_v9 = vpack.c.b16 %v1249_v2, %v1249_v2  ;;  %v10656_v2 = vld [vmem:[#allocation2 + $0x308] sm:$0xf] }
  0x8a   :  { %v13496_v39 = vld [vmem:[#allocation2 + $0x64] sm:$0xf0] }
  0x8b   :  { %1744 = vmatpush.bf16.msra.mxu0 %v10653_v10  ;;  %1774 = vmatpush.bf16.msra.mxu2 %v1656_v56  ;;  %v1659_v19 = vsel %vm1651_vm2, %v1449_v9, 0  ;;  %v10880_v56 = vld [vmem:[#allocation2 + $0x4c8] sm:$0xf] }
  0x8c   :  { %v10272_v51 = vld [vmem:[#allocation2 + $0x8] sm:$0xf] }
  0x8d   :  { %1757 = vmatpush.bf16.msra.mxu1 %v10909_v28  ;;  %v13488_v53 = vld [vmem:[#allocation2 + $0x24] sm:$0xf0] }
  0x8e   :  { %v10528_v54 = vld [vmem:[#allocation2 + $0x208] sm:$0xf] }
  0x8f   :  { %1745 = vmatpush.bf16.msra.mxu0 %v10621_v13  ;;  %v11009_v13 = vor.u32 %v13672_v7, %v11008_v6  ;;  %v13532_v6 = vld [vmem:[#allocation2 + $0x18c] sm:$0xf] }
  0x90   :  { %v10466_v7 = vld [vmem:[#allocation2 + $0x1a8] sm:$0xf0] }
  0x91   :  { %1758 = vmatpush.bf16.msra.mxu1 %v10877_v41  ;;  %v10720_v41 = vld [vmem:[#allocation2 + $0x388] sm:$0xf] }
  0x92   :  { %v10721_v49 = vor.u32 %v13600_v43, %v10720_v41  ;;  %v10560_v43 = vld [vmem:[#allocation2 + $0x248] sm:$0xf] }
  0x93   :  { %1746 = vmatpush.bf16.msra.mxu0 %v10589_v16  ;;  %v10976_v16 = vld [vmem:[#allocation2 + $0x588] sm:$0xf] }
  0x94   :  { %v10977_v23 = vor.u32 %v13664_v17, %v10976_v16  ;;  %v13576_v16 = vld [vmem:[#allocation2 + $0x2e4] sm:$0xf0] }
  0x95   :  { %1759 = vmatpush.bf16.msra.mxu1 %v10845_v50  ;;  %v10913_v50 = vor.u32 %v13648_v45, %v10912_v44  ;;  %v10816_v17 = vld [vmem:[#allocation2 + $0x448] sm:$0xf]  ;;  %v13508_v45 = vld [vmem:[#allocation2 + $0xcc] sm:$0xf] }
  0x96   :  { %v13560_v44 = vld [vmem:[#allocation2 + $0x264] sm:$0xf0] }
  0x97   :  { %1747 = vmatpush.bf16.msra.mxu0 %v10557_v25  ;;  %v13544_v25 = vld [vmem:[#allocation2 + $0x1e4] sm:$0xf0]  ;;  %v10561_v52 = vor.u32 %v13560_v44, %v10560_v43  ;;  %v10376_v43 = vld [vmem:[#allocation2 + $0xd0] sm:$0xf] }
  0x98   :  { %v10497_v35 = vor.u32 %v13544_v25, %v10496_v24  ;;  %v10336_v25 = vld [vmem:[#allocation2 + $0x88] sm:$0xf]  ;;  %v13513_v44 = vld [vmem:[#allocation2 + $0xec] sm:$0xf0] }
  0x99   :  { %1760 = vmatpush.bf16.msra.mxu1 %v10813_v58  ;;  %v10498_v58 = vld [vmem:[#allocation2 + $0x1e8] sm:$0xf0] }
  0x9b   :  { %1748 = vmatpush.bf16.msra.mxu0 %v10525_v37  ;;  %v10753_v37 = vor.u32 %v13608_v29, %v10752_v26  ;;  %v13504_v26 = vld [vmem:[#allocation2 + $0xa4] sm:$0xf0] }
  0x9c   :  { %v10592_v29 = vld [vmem:[#allocation2 + $0x288] sm:$0xf] }
  0x9d   :  { %1761 = vmatpush.bf16.msra.mxu1 %v10781_v61  ;;  %v10400_v61 = vld [vmem:[#allocation2 + $0x108] sm:$0xf] }
  0xd9   :  { %v420_v3 = vpop.f32.mrf.mxu0 }
  0xda   :  { %v421_v4 = vadd.f32 %v420_v3, %v230_v0  ;;  %v433_v5 = vpop.f32.mrf.mxu1  ;;  %v10881_v0 = vor.u32 %v13640_v55, %v10880_v56  ;;  %v13584_v3 = vld [vmem:[#allocation2 + $0x324] sm:$0xf0] }
  0xdb   :  { %v434_v8 = vadd.f32 %v433_v5, %v231_v1  ;;  %v10501_v1 = vor.u32 %v13540_v57, %v10498_v58  ;;  %v13632_v5 = vld [vmem:[#allocation2 + $0x4a4] sm:$0xf0]  ;;  %v10657_v9 = vor.u32 %v13584_v3, %v10656_v2  ;;  %v13604_v57 = vld [vmem:[#allocation2 + $0x3cc] sm:$0xf] }
  0xdc   :  { %v463_v10 = vmax.f32 %v421_v4, 0.0  ;;  %v10848_v4 = vld [vmem:[#allocation2 + $0x488] sm:$0xf]  ;;  %v10754_v58 = vld [vmem:[#allocation2 + $0x3e8] sm:$0xf0] }
  0xdd   :  { %v464_v11 = vmax.f32 %v434_v8, 0.0  ;;  %v10401_v8 = vor.u32 %v13520_v62, %v10400_v61  ;;  %v13552_v56 = vld [vmem:[#allocation2 + $0x224] sm:$0xf0]  ;;  %v11010_v61 = vld [vmem:[#allocation2 + $0x5e8] sm:$0xf0] }
  0xde   :  { %v14869_v14 = vpack.c.bf16 %v463_v10, %v463_v10  ;;  %v10368_v10 = vld [vmem:[#allocation2 + $0xc8] sm:$0xf]  ;;  %v10472_v62 = vld [vmem:[#allocation2 + $0x190] sm:$0xf]  ;;  %v13500_v2 = vld [vmem:[#allocation2 + $0x8c] sm:$0xf] }
  0xdf   :  { %v14871_v18 = vpack.c.bf16 %v464_v11, %v464_v11  ;;  %v13512_v11 = vld [vmem:[#allocation2 + $0xe4] sm:$0xf0]  ;;  %v10338_v3 = vld [vmem:[#allocation2 + $0xa8] sm:$0xf0] }
  0xe0   :  { %1684 = vmatmul.bf16.vlgmr.msrb.gmra.mxu0 %v14869_v14 }
  0xe1   :  { %v446_v20 = vpop.f32.mrf.mxu2  ;;  %1697 = vmatmul.bf16.vlgmr.msrb.gmra.mxu1 %v14871_v18  ;;  %1806 = vmatpush.bf16.msrb.mxu0 %v11009_v13  ;;  %v422_v27 = vpop.f32.mrf.mxu0  ;;  %v10469_v13 = vor.u32 %v13532_v6, %v10466_v7 }
  0xe2   :  { %v447_v21 = vadd.f32 %v446_v20, %v232_v12  ;;  %v459_v22 = vpop.f32.mrf.mxu3  ;;  %1826 = vmatpush.bf16.msrb.mxu1 %v1659_v19  ;;  %v435_v32 = vpop.f32.mrf.mxu1  ;;  %v10849_v12 = vor.u32 %v13632_v5, %v10848_v4  ;;  %v13624_v19 = vld [vmem:[#allocation2 + $0x464] sm:$0xf0]  ;;  %v13524_v20 = vld [vmem:[#allocation2 + $0x14c] sm:$0xf]  ;;  %v10529_v4 = vor.u32 %v13552_v56, %v10528_v54  ;;  %v10757_v5 = vor.u32 %v13604_v57, %v10754_v58  ;;  %v10344_v56 = vld [vmem:[#allocation2 + $0x90] sm:$0xf] }
  0xe3   :  { %v460_v28 = vadd.f32 %v459_v22, %v233_v15  ;;  %v10624_v15 = vld [vmem:[#allocation2 + $0x2c8] sm:$0xf]  ;;  %v10369_v22 = vor.u32 %v13512_v11, %v10368_v10  ;;  %v10817_v27 = vor.u32 %v13624_v19, %v10816_v17  ;;  %v13660_v10 = vld [vmem:[#allocation2 + $0x58c] sm:$0xf]  ;;  %v10341_v11 = vor.u32 %v13500_v2, %v10338_v3  ;;  %v10696_v58 = vld [vmem:[#allocation2 + $0x350] sm:$0xf] }
  0xe4   :  { %v465_v33 = vmax.f32 %v447_v21, 0.0  ;;  %v10434_v21 = vld [vmem:[#allocation2 + $0x168] sm:$0xf0]  ;;  %v10625_v24 = vor.u32 %v13576_v16, %v10624_v15  ;;  %v13616_v32 = vld [vmem:[#allocation2 + $0x424] sm:$0xf0] }
  0xe5   :  { %v466_v34 = vmax.f32 %v460_v28, 0.0  ;;  %1807 = vmatpush.bf16.msrb.mxu0 %v10977_v23  ;;  %v1250_v23 = vunpack.c.h.b16 %v14866_v63  ;;  %v10437_v28 = vor.u32 %v13524_v20, %v10434_v21  ;;  %v10337_v63 = vor.u32 %v13504_v26, %v10336_v25  ;;  %v13529_v15 = vld [vmem:[#allocation2 + $0x16c] sm:$0xf0]  ;;  %v13492_v16 = vld [vmem:[#allocation2 + $0x4c] sm:$0xf] }
  0xe6   :  { %v14876_v36 = vpack.c.bf16 %v465_v33, %v465_v33  ;;  %v13516_v33 = vld [vmem:[#allocation2 + $0x10c] sm:$0xf]  ;;  %v10785_v40 = vor.u32 %v13616_v32, %v10784_v31  ;;  %v10760_v32 = vld [vmem:[#allocation2 + $0x3d0] sm:$0xf] }
  0xe7   :  { %v14878_v42 = vpack.c.bf16 %v466_v34, %v466_v34  ;;  %v10402_v34 = vld [vmem:[#allocation2 + $0x128] sm:$0xf0] }
  0xe8   :  { %1710 = vmatmul.bf16.vlgmr.msrb.gmra.mxu2 %v14876_v36  ;;  %v10405_v41 = vor.u32 %v13516_v33, %v10402_v34  ;;  %v10306_v17 = vld [vmem:[#allocation2 + $0x68] sm:$0xf0]  ;;  %v13609_v33 = vld [vmem:[#allocation2 + $0x3ec] sm:$0xf0] }
  0xe9   :  { %11030 = vmatmul.msk.bf16.vlgmr.msrb.gmra.mxu3 %vm1647_vm3, %v14878_v42  ;;  %1780 = vmatpush.bf16.msrb.mxu2 %v10497_v35  ;;  %v448_v46 = vpop.f32.mrf.mxu2  ;;  %v1450_v35 = vpack.c.b16 %v1250_v23, %v1250_v23  ;;  %v10690_v23 = vld [vmem:[#allocation2 + $0x368] sm:$0xf0]  ;;  %v10309_v25 = vor.u32 %v13492_v16, %v10306_v17 }
  0xea   :  { %1793 = vmatpush.bf16.msrb.mxu3 %v10753_v37  ;;  %v461_v48 = vpop.f32.mrf.mxu3  ;;  %1808 = vmatpush.bf16.msrb.mxu0 %v10945_v38  ;;  %v10593_v37 = vor.u32 %v13568_v30, %v10592_v29  ;;  %v10304_v38 = vld [vmem:[#allocation2 + $0x48] sm:$0xf]  ;;  %v10504_v46 = vld [vmem:[#allocation2 + $0x1d0] sm:$0xf]  ;;  %v10946_v26 = vld [vmem:[#allocation2 + $0x568] sm:$0xf0] }
  0xeb   :  { %v10305_v48 = vor.u32 %v13496_v39, %v10304_v38  ;;  %v13484_v29 = vld [vmem:[#allocation2 + $0xc] sm:$0xf] }
  0xec   :  { %v10274_v30 = vld [vmem:[#allocation2 + $0x28] sm:$0xf0] }
  0xed   :  { %1781 = vmatpush.bf16.msrb.mxu2 %v10465_v47  ;;  %v13545_v47 = vld [vmem:[#allocation2 + $0x1ec] sm:$0xf0]  ;;  %v10277_v38 = vor.u32 %v13484_v29, %v10274_v30  ;;  %v13644_v39 = vld [vmem:[#allocation2 + $0x50c] sm:$0xf] }
  0xee   :  { %1794 = vmatpush.bf16.msrb.mxu3 %v10721_v49  ;;  %1809 = vmatpush.bf16.msrb.mxu0 %v10913_v50  ;;  %v1662_v49 = vsel %vm1651_vm2, %v1450_v35, 0  ;;  %v10370_v50 = vld [vmem:[#allocation2 + $0xe8] sm:$0xf0]  ;;  %v10505_v55 = vor.u32 %v13545_v47, %v10504_v46  ;;  %v10728_v46 = vld [vmem:[#allocation2 + $0x390] sm:$0xf] }
  0xef   :  { %v13580_v35 = vld [vmem:[#allocation2 + $0x30c] sm:$0xf]  ;;  %v13601_v47 = vld [vmem:[#allocation2 + $0x3ac] sm:$0xf0] }
  0xf0   :  { %1749 = vmatmul.bf16.vlgmr.msra.gmra.mxu0 %v14871_v18  ;;  %v10729_v54 = vor.u32 %v13601_v47, %v10728_v46  ;;  %v10850_v2 = vld [vmem:[#allocation2 + $0x4a8] sm:$0xf0]  ;;  %v13541_v46 = vld [vmem:[#allocation2 + $0x1d4] sm:$0xf] }
  0xf1   :  { %1782 = vmatpush.bf16.msrb.mxu2 %v10433_v59  ;;  %1762 = vmatmul.bf16.vlgmr.msra.gmra.mxu1 %v14876_v36  ;;  %v13668_v59 = vld [vmem:[#allocation2 + $0x5cc] sm:$0xf]  ;;  %v10506_v47 = vld [vmem:[#allocation2 + $0x1f0] sm:$0xf0] }
  0xf2   :  { %1795 = vmatpush.bf16.msrb.mxu3 %v10689_v60  ;;  %1810 = vmatpush.bf16.msrb.mxu0 %v10881_v0  ;;  %v10373_v60 = vor.u32 %v13508_v45, %v10370_v50  ;;  %v13537_v0 = vld [vmem:[#allocation2 + $0x1ac] sm:$0xf0]  ;;  %v11013_v6 = vor.u32 %v13668_v59, %v11010_v61  ;;  %v10626_v50 = vld [vmem:[#allocation2 + $0x2e8] sm:$0xf0] }
  0xf3   :  { %1832 = vmatpush.bf16.msra.mxu1 %v10501_v1  ;;  %v10273_v1 = vor.u32 %v13488_v53, %v10272_v51  ;;  %v10473_v7 = vor.u32 %v13537_v0, %v10472_v62  ;;  %v10377_v51 = vor.u32 %v13513_v44, %v10376_v43  ;;  %v10882_v53 = vld [vmem:[#allocation2 + $0x4e8] sm:$0xf0]  ;;  %v13593_v59 = vld [vmem:[#allocation2 + $0x36c] sm:$0xf0]  ;;  %v10730_v43 = vld [vmem:[#allocation2 + $0x3b0] sm:$0xf0] }
  0xf4   :  { %v13564_v61 = vld [vmem:[#allocation2 + $0x28c] sm:$0xf]  ;;  %v10697_v3 = vor.u32 %v13593_v59, %v10696_v58  ;;  %v13533_v59 = vld [vmem:[#allocation2 + $0x194] sm:$0xf] }
  0xf5   :  { %1783 = vmatpush.bf16.msrb.mxu2 %v10401_v8  ;;  %v13596_v8 = vld [vmem:[#allocation2 + $0x38c] sm:$0xf] }
  0xf6   :  { %1796 = vmatpush.bf16.msrb.mxu3 %v10657_v9  ;;  %1811 = vmatpush.bf16.msrb.mxu0 %v10849_v12  ;;  %v10722_v9 = vld [vmem:[#allocation2 + $0x3a8] sm:$0xf0] }
  0xf7   :  { %1833 = vmatpush.bf16.msra.mxu1 %v10469_v13  ;;  %v10978_v12 = vld [vmem:[#allocation2 + $0x5a8] sm:$0xf0]  ;;  %v10440_v13 = vld [vmem:[#allocation2 + $0x150] sm:$0xf]  ;;  %v10725_v19 = vor.u32 %v13596_v8, %v10722_v9 }
  0xf8   :  { %11031 = vmatmul.msk.bf16.vlgmr.msra.gmra.mxu2 %vm1647_vm3, %v14878_v42  ;;  %v10981_v20 = vor.u32 %v13660_v10, %v10978_v12  ;;  %v10441_v21 = vor.u32 %v13529_v15, %v10440_v13  ;;  %v10594_v62 = vld [vmem:[#allocation2 + $0x2a8] sm:$0xf0]  ;;  %v13585_v8 = vld [vmem:[#allocation2 + $0x32c] sm:$0xf0] }
  0xf9   :  { %1736 = vmatmul.bf16.vlgmr.msra.gmra.mxu3 %v14869_v14  ;;  %1784 = vmatpush.bf16.msrb.mxu2 %v10369_v22  ;;  %v13588_v22 = vld [vmem:[#allocation2 + $0x34c] sm:$0xf]  ;;  %v14898_v9 = vld [vmem:[#allocation2 + $0x610] sm:$0xff] }
  0xfa   :  { %1797 = vmatpush.bf16.msrb.mxu3 %v10625_v24  ;;  %1812 = vmatpush.bf16.msrb.mxu0 %v10817_v27  ;;  %v13652_v24 = vld [vmem:[#allocation2 + $0x54c] sm:$0xf]  ;;  %v10408_v27 = vld [vmem:[#allocation2 + $0x110] sm:$0xf]  ;;  %v10693_v31 = vor.u32 %v13588_v22, %v10690_v23  ;;  %v1251_v22 = vunpack.c.l.b16 %v14898_v9 }
  0xfb   :  { %1834 = vmatpush.bf16.msra.mxu1 %v10437_v28  ;;  %v13521_v28 = vld [vmem:[#allocation2 + $0x12c] sm:$0xf0]  ;;  %v10949_v34 = vor.u32 %v13652_v24, %v10946_v26  ;;  %v10562_v12 = vld [vmem:[#allocation2 + $0x268] sm:$0xf0]  ;;  %v10762_v26 = vld [vmem:[#allocation2 + $0x3f0] sm:$0xf0] }
  0xfc   :  { %v13620_v15 = vld [vmem:[#allocation2 + $0x44c] sm:$0xf]  ;;  %v13577_v24 = vld [vmem:[#allocation2 + $0x2ec] sm:$0xf0] }
  0xfd   :  { %1785 = vmatpush.bf16.msrb.mxu2 %v10337_v63  ;;  %v10409_v63 = vor.u32 %v13521_v28, %v10408_v27  ;;  %v10818_v16 = vld [vmem:[#allocation2 + $0x468] sm:$0xf0] }
  0xfe   :  { %1798 = vmatpush.bf16.msrb.mxu3 %v10593_v37  ;;  %1813 = vmatpush.bf16.msrb.mxu0 %v10785_v40  ;;  %v10658_v37 = vld [vmem:[#allocation2 + $0x328] sm:$0xf0]  ;;  %v10821_v27 = vor.u32 %v13620_v15, %v10818_v16  ;;  %v10920_v16 = vld [vmem:[#allocation2 + $0x510] sm:$0xf] }
  0xff   :  { %1835 = vmatpush.bf16.msra.mxu1 %v10405_v41  ;;  %v10914_v40 = vld [vmem:[#allocation2 + $0x528] sm:$0xf0]  ;;  %v10761_v41 = vor.u32 %v13609_v33, %v10760_v32  ;;  %v10661_v45 = vor.u32 %v13580_v35, %v10658_v37  ;;  %v13673_v35 = vld [vmem:[#allocation2 + $0x5ec] sm:$0xf0] }
 0x100   :  { %v13548_v28 = vld [vmem:[#allocation2 + $0x20c] sm:$0xf]  ;;  %v10600_v37 = vld [vmem:[#allocation2 + $0x290] sm:$0xf] }
 0x101   :  { %1786 = vmatpush.bf16.msrb.mxu2 %v10305_v48  ;;  %1814 = vmatmul.bf16.vlgmr.msrb.gmra.mxu0 %v14876_v36  ;;  %v10917_v48 = vor.u32 %v13644_v39, %v10914_v40  ;;  %v10530_v29 = vld [vmem:[#allocation2 + $0x228] sm:$0xf0]  ;;  %v13569_v40 = vld [vmem:[#allocation2 + $0x2ac] sm:$0xf0] }
 0x102   :  { %1878 = vmatpush.bf16.msra.mxu0 %v1662_v49  ;;  %1799 = vmatpush.bf16.msrb.mxu3 %v10561_v52  ;;  %v13572_v49 = vld [vmem:[#allocation2 + $0x2cc] sm:$0xf]  ;;  %v10533_v39 = vor.u32 %v13548_v28, %v10530_v29  ;;  %v10888_v29 = vld [vmem:[#allocation2 + $0x4d0] sm:$0xf] }
 0x103   :  { %11032 = vmatmul.msk.bf16.vlgmr.msrb.gmra.mxu1 %vm1647_vm3, %v14878_v42  ;;  %v13636_v52 = vld [vmem:[#allocation2 + $0x4cc] sm:$0xf]  ;;  %v10629_v57 = vor.u32 %v13572_v49, %v10626_v50  ;;  %v10601_v49 = vor.u32 %v13569_v40, %v10600_v37 }
 0x104   :  { %1836 = vmatpush.bf16.msra.mxu1 %v10373_v60  ;;  %v10885_v60 = vor.u32 %v13636_v52, %v10882_v53  ;;  %v10786_v32 = vld [vmem:[#allocation2 + $0x428] sm:$0xf0]  ;;  %v13665_v52 = vld [vmem:[#allocation2 + $0x5ac] sm:$0xf0] }
 0x105   :  { %1787 = vmatpush.bf16.msrb.mxu2 %v10273_v1  ;;  %v13628_v1 = vld [vmem:[#allocation2 + $0x48c] sm:$0xf]  ;;  %v10568_v53 = vld [vmem:[#allocation2 + $0x250] sm:$0xf] }
 0x106   :  { %1884 = vmatpush.bf16.msrb.mxu0 %v10505_v55  ;;  %1800 = vmatpush.bf16.msrb.mxu3 %v10529_v4  ;;  %v13505_v55 = vld [vmem:[#allocation2 + $0xac] sm:$0xf0]  ;;  %v10853_v10 = vor.u32 %v13628_v1, %v10850_v2 }
 0x107   :  { %v10345_v0 = vor.u32 %v13505_v55, %v10344_v56  ;;  %v10312_v4 = vld [vmem:[#allocation2 + $0x50] sm:$0xf]  ;;  %v13589_v56 = vld [vmem:[#allocation2 + $0x354] sm:$0xf] }
 0x108   :  { %1837 = vmatpush.bf16.msra.mxu1 %v10341_v11  ;;  %1788 = vmatmul.bf16.vlgmr.msrb.gmra.mxu2 %v14869_v14  ;;  %v13556_v11 = vld [vmem:[#allocation2 + $0x24c] sm:$0xf]  ;;  %v10698_v55 = vld [vmem:[#allocation2 + $0x370] sm:$0xf0]  ;;  %v13657_v1 = vld [vmem:[#allocation2 + $0x56c] sm:$0xf0] }
 0x109   :  { %1845 = vmatpush.bf16.msra.mxu2 %v10757_v5  ;;  %1801 = vmatmul.bf16.vlgmr.msrb.gmra.mxu3 %v14871_v18  ;;  %v13497_v5 = vld [vmem:[#allocation2 + $0x6c] sm:$0xf0]  ;;  %v10565_v23 = vor.u32 %v13556_v11, %v10562_v12  ;;  %v13525_v11 = vld [vmem:[#allocation2 + $0x154] sm:$0xf] }
 0x10a   :  { %1858 = vmatpush.bf16.msra.mxu3 %v11013_v6  ;;  %1885 = vmatpush.bf16.msrb.mxu0 %v10473_v7  ;;  %v10597_v6 = vor.u32 %v13564_v61, %v10594_v62  ;;  %v10664_v7 = vld [vmem:[#allocation2 + $0x310] sm:$0xf]  ;;  %v10313_v13 = vor.u32 %v13497_v5, %v10312_v4  ;;  %v10701_v62 = vor.u32 %v13589_v56, %v10698_v55  ;;  %v13581_v4 = vld [vmem:[#allocation2 + $0x314] sm:$0xf] }
 0x10b   :  { %v10665_v17 = vor.u32 %v13585_v8, %v10664_v7  ;;  %v10536_v2 = vld [vmem:[#allocation2 + $0x210] sm:$0xf]  ;;  %v10666_v5 = vld [vmem:[#allocation2 + $0x330] sm:$0xf0] }
 0x10c   :  { %1838 = vmatpush.bf16.msra.mxu1 %v10309_v25  ;;  %v13605_v25 = vld [vmem:[#allocation2 + $0x3d4] sm:$0xf]  ;;  %v10669_v15 = vor.u32 %v13581_v4, %v10666_v5  ;;  %v13625_v56 = vld [vmem:[#allocation2 + $0x46c] sm:$0xf0] }
 0x10d   :  { %1846 = vmatpush.bf16.msra.mxu2 %v10725_v19  ;;  %v10280_v19 = vld [vmem:[#allocation2 + $0x10] sm:$0xf]  ;;  %v13669_v7 = vld [vmem:[#allocation2 + $0x5d4] sm:$0xf] }
 0x10e   :  { %1859 = vmatpush.bf16.msra.mxu3 %v10981_v20  ;;  %1886 = vmatpush.bf16.msrb.mxu0 %v10441_v21  ;;  %v13489_v20 = vld [vmem:[#allocation2 + $0x2c] sm:$0xf0]  ;;  %v11018_v8 = vld [vmem:[#allocation2 + $0x5f0] sm:$0xf0] }
 0x10f   :  { %v10632_v21 = vld [vmem:[#allocation2 + $0x2d0] sm:$0xf]  ;;  %v10281_v30 = vor.u32 %v13489_v20, %v10280_v19  ;;  %v10442_v12 = vld [vmem:[#allocation2 + $0x170] sm:$0xf0]  ;;  %v11021_v19 = vor.u32 %v13669_v7, %v11018_v8 }
 0x110   :  { %1839 = vmatpush.bf16.msra.mxu1 %v10277_v38  ;;  %v10633_v33 = vor.u32 %v13577_v24, %v10632_v21  ;;  %v1451_v38 = vpack.c.b16 %v1251_v22, %v1251_v22  ;;  %v13573_v20 = vld [vmem:[#allocation2 + $0x2d4] sm:$0xf]  ;;  %v10445_v22 = vor.u32 %v13525_v11, %v10442_v12  ;;  %v13617_v7 = vld [vmem:[#allocation2 + $0x42c] sm:$0xf0] }
 0x111   :  { %1847 = vmatpush.bf16.msra.mxu2 %v10693_v31  ;;  %11033 = vmatmul.msk.bf16.vlgmr.msra.gmra.mxu0 %vm1647_vm3, %v14878_v42  ;;  %v13612_v31 = vld [vmem:[#allocation2 + $0x40c] sm:$0xf]  ;;  %v10634_v21 = vld [vmem:[#allocation2 + $0x2f0] sm:$0xf0] }
 0x112   :  { %1860 = vmatpush.bf16.msra.mxu3 %v10949_v34  ;;  %1887 = vmatpush.bf16.msrb.mxu0 %v10409_v63  ;;  %v10765_v34 = vor.u32 %v13605_v25, %v10762_v26  ;;  %v11016_v63 = vld [vmem:[#allocation2 + $0x5d0] sm:$0xf]  ;;  %v10789_v44 = vor.u32 %v13612_v31, %v10786_v32  ;;  %v10986_v24 = vld [vmem:[#allocation2 + $0x5b0] sm:$0xf0]  ;;  %v10637_v28 = vor.u32 %v13573_v20, %v10634_v21  ;;  %v10512_v21 = vld [vmem:[#allocation2 + $0x1d8] sm:$0xf] }
 0x113   :  { %1840 = vmatmul.bf16.vlgmr.msra.gmra.mxu1 %v14869_v14  ;;  %v13517_v26 = vld [vmem:[#allocation2 + $0x114] sm:$0xf] }
 0x114   :  { %1897 = vmatpush.bf16.msrb.mxu1 %v10761_v41  ;;  %v13597_v41 = vld [vmem:[#allocation2 + $0x394] sm:$0xf] }
 0x115   :  { %1848 = vmatpush.bf16.msra.mxu2 %v10661_v45  ;;  %v11017_v45 = vor.u32 %v13673_v35, %v11016_v63  ;;  %v10733_v50 = vor.u32 %v13597_v41, %v10730_v43  ;;  %v13565_v32 = vld [vmem:[#allocation2 + $0x294] sm:$0xf]  ;;  %v10856_v41 = vld [vmem:[#allocation2 + $0x490] sm:$0xf] }
 0x116   :  { %1861 = vmatpush.bf16.msra.mxu3 %v10917_v48  ;;  %1888 = vmatpush.bf16.msrb.mxu0 %v10377_v51  ;;  %v10984_v48 = vld [vmem:[#allocation2 + $0x590] sm:$0xf]  ;;  %v1665_v51 = vsel %vm1651_vm2, %v1451_v38, 0  ;;  %v13653_v63 = vld [vmem:[#allocation2 + $0x554] sm:$0xf] }
 0x117   :  { %v10985_v58 = vor.u32 %v13665_v52, %v10984_v48  ;;  %v10954_v35 = vld [vmem:[#allocation2 + $0x570] sm:$0xf0]  ;;  %v13633_v43 = vld [vmem:[#allocation2 + $0x4ac] sm:$0xf0] }
 0x118   :  { %1898 = vmatpush.bf16.msrb.mxu1 %v10729_v54  ;;  %v13561_v54 = vld [vmem:[#allocation2 + $0x26c] sm:$0xf0]  ;;  %v13509_v38 = vld [vmem:[#allocation2 + $0xd4] sm:$0xf] }
 0x119   :  { %1849 = vmatpush.bf16.msra.mxu2 %v10629_v57  ;;  %v10509_v57 = vor.u32 %v13541_v46, %v10506_v47  ;;  %v10569_v61 = vor.u32 %v13561_v54, %v10568_v53  ;;  %v10570_v46 = vld [vmem:[#allocation2 + $0x270] sm:$0xf0]  ;;  %v10824_v54 = vld [vmem:[#allocation2 + $0x450] sm:$0xf] }
 0x11a   :  { %1862 = vmatpush.bf16.msra.mxu3 %v10885_v60  ;;  %1889 = vmatpush.bf16.msrb.mxu0 %v10345_v0  ;;  %v10474_v60 = vld [vmem:[#allocation2 + $0x1b0] sm:$0xf0]  ;;  %v10952_v0 = vld [vmem:[#allocation2 + $0x550] sm:$0xf] }
 0x11b   :  { %v13645_v48 = vld [vmem:[#allocation2 + $0x514] sm:$0xf] }
 0x11c   :  { %1899 = vmatpush.bf16.msrb.mxu1 %v10697_v3  ;;  %v13553_v3 = vld [vmem:[#allocation2 + $0x22c] sm:$0xf0]  ;;  %v10346_v52 = vld [vmem:[#allocation2 + $0xb0] sm:$0xf0] }
 0x11d   :  { %1850 = vmatpush.bf16.msra.mxu2 %v10597_v6  ;;  %v10477_v6 = vor.u32 %v13533_v59, %v10474_v60  ;;  %v13637_v59 = vld [vmem:[#allocation2 + $0x4d4] sm:$0xf]  ;;  %v1252_v60 = vunpack.c.h.b16 %v14898_v9 }
 0x11e   :  { %1863 = vmatpush.bf16.msra.mxu3 %v10853_v10  ;;  %1890 = vmatpush.bf16.msrb.mxu0 %v10313_v13  ;;  %v10953_v10 = vor.u32 %v13657_v1, %v10952_v0  ;;  %v10537_v13 = vor.u32 %v13553_v3, %v10536_v2  ;;  %v11024_v0 = vld [vmem:[#allocation2 + $0x5d8] sm:$0xf]  ;;  %v10825_v2 = vor.u32 %v13625_v56, %v10824_v54  ;;  %v13493_v3 = vld [vmem:[#allocation2 + $0x54] sm:$0xf] }
 0x11f   :  { %v13674_v1 = vld [vmem:[#allocation2 + $0x5f4] sm:$0xf0]  ;;  %v10314_v4 = vld [vmem:[#allocation2 + $0x70] sm:$0xf0] }
 0x120   :  { %1900 = vmatpush.bf16.msrb.mxu1 %v10665_v17  ;;  %v13649_v17 = vld [vmem:[#allocation2 + $0x52c] sm:$0xf0]  ;;  %v13629_v11 = vld [vmem:[#allocation2 + $0x494] sm:$0xf]  ;;  %v10317_v9 = vor.u32 %v13493_v3, %v10314_v4  ;;  %v13594_v54 = vld [vmem:[#allocation2 + $0x374] sm:$0xf0] }
 0x121   :  { %1851 = vmatpush.bf16.msra.mxu2 %v10565_v23  ;;  %v13661_v23 = vld [vmem:[#allocation2 + $0x594] sm:$0xf]  ;;  %v10921_v25 = vor.u32 %v13649_v17, %v10920_v16  ;;  %v13666_v16 = vld [vmem:[#allocation2 + $0x5b4] sm:$0xf0] }
 0x122   :  { %1864 = vmatpush.bf16.msra.mxu3 %v10821_v27  ;;  %1891 = vmatpush.bf16.msrb.mxu0 %v10281_v30  ;;  %v10410_v27 = vld [vmem:[#allocation2 + $0x130] sm:$0xf0]  ;;  %v13641_v30 = vld [vmem:[#allocation2 + $0x4ec] sm:$0xf0]  ;;  %v10989_v31 = vor.u32 %v13661_v23, %v10986_v24  ;;  %v10768_v23 = vld [vmem:[#allocation2 + $0x3d8] sm:$0xf] }
 0x123   :  { %v10889_v37 = vor.u32 %v13641_v30, %v10888_v29  ;;  %v10858_v12 = vld [vmem:[#allocation2 + $0x4b0] sm:$0xf0]  ;;  %v13610_v24 = vld [vmem:[#allocation2 + $0x3f4] sm:$0xf0] }
 0x124   :  { %1901 = vmatpush.bf16.msrb.mxu1 %v10633_v33  ;;  %v10602_v33 = vld [vmem:[#allocation2 + $0x2b0] sm:$0xf0]  ;;  %v10672_v3 = vld [vmem:[#allocation2 + $0x318] sm:$0xf] }
 0x125   :  { %1852 = vmatpush.bf16.msra.mxu2 %v10533_v39  ;;  %1892 = vmatmul.bf16.vlgmr.msrb.gmra.mxu0 %v14869_v14  ;;  %v10378_v39 = vld [vmem:[#allocation2 + $0xf0] sm:$0xf0]  ;;  %v10605_v40 = vor.u32 %v13565_v32, %v10602_v33  ;;  %v10769_v33 = vor.u32 %v13610_v24, %v10768_v23  ;;  %v13586_v4 = vld [vmem:[#allocation2 + $0x334] sm:$0xf0] }
 0x126   :  { %1949 = vmatpush.bf16.msra.mxu0 %v10765_v34  ;;  %1865 = vmatpush.bf16.msra.mxu3 %v10789_v44  ;;  %v10413_v34 = vor.u32 %v13517_v26, %v10410_v27  ;;  %v10957_v44 = vor.u32 %v13653_v63, %v10954_v35  ;;  %v10381_v47 = vor.u32 %v13509_v38, %v10378_v39  ;;  %v13485_v17 = vld [vmem:[#allocation2 + $0x14] sm:$0xf]  ;;  %v13658_v63 = vld [vmem:[#allocation2 + $0x574] sm:$0xf0] }
 0x127   :  { %v10282_v20 = vld [vmem:[#allocation2 + $0x30] sm:$0xf0]  ;;  %v10861_v26 = vor.u32 %v13629_v11, %v10858_v12  ;;  %v10480_v35 = vld [vmem:[#allocation2 + $0x198] sm:$0xf]  ;;  %v10673_v11 = vor.u32 %v13586_v4, %v10672_v3 }
 0x128   :  { %1902 = vmatpush.bf16.msrb.mxu1 %v10601_v49  ;;  %1853 = vmatmul.bf16.vlgmr.msra.gmra.mxu2 %v14871_v18  ;;  %v10922_v49 = vld [vmem:[#allocation2 + $0x530] sm:$0xf0]  ;;  %v10285_v29 = vor.u32 %v13485_v17, %v10282_v20  ;;  %v13538_v38 = vld [vmem:[#allocation2 + $0x1b4] sm:$0xf0] }
 0x129   :  { %1910 = vmatpush.bf16.msrb.mxu2 %v11017_v45  ;;  %1866 = vmatmul.bf16.vlgmr.msra.gmra.mxu3 %v14876_v36  ;;  %v13557_v45 = vld [vmem:[#allocation2 + $0x254] sm:$0xf]  ;;  %v10925_v55 = vor.u32 %v13645_v48, %v10922_v49  ;;  %v10736_v39 = vld [vmem:[#allocation2 + $0x398] sm:$0xf] }
 0x12a   :  { %1930 = vmatpush.bf16.msrb.mxu3 %v1665_v51  ;;  %1950 = vmatpush.bf16.msra.mxu0 %v10733_v50  ;;  %v10857_v50 = vor.u32 %v13633_v43, %v10856_v41  ;;  %v13501_v51 = vld [vmem:[#allocation2 + $0x94] sm:$0xf]  ;;  %v10573_v53 = vor.u32 %v13557_v45, %v10570_v46  ;;  %v10481_v46 = vor.u32 %v13538_v38, %v10480_v35  ;;  %v10928_v48 = vld [vmem:[#allocation2 + $0x518] sm:$0xf]  ;;  %v10418_v35 = vld [vmem:[#allocation2 + $0x138] sm:$0xf0] }
 0x12b   :  { %v13621_v30 = vld [vmem:[#allocation2 + $0x454] sm:$0xf]  ;;  %v13650_v49 = vld [vmem:[#allocation2 + $0x534] sm:$0xf0] }
 0x12c   :  { %1903 = vmatpush.bf16.msrb.mxu1 %v10569_v61  ;;  %v10349_v61 = vor.u32 %v13501_v51, %v10346_v52  ;;  %v10794_v45 = vld [vmem:[#allocation2 + $0x430] sm:$0xf0]  ;;  %v13530_v52 = vld [vmem:[#allocation2 + $0x174] sm:$0xf0] }
 0x12d   :  { %1911 = vmatpush.bf16.msrb.mxu2 %v10985_v58  ;;  %v10538_v58 = vld [vmem:[#allocation2 + $0x230] sm:$0xf0]  ;;  %v10864_v12 = vld [vmem:[#allocation2 + $0x498] sm:$0xf] }
 0x12e   :  { %1936 = vmatpush.bf16.msra.mxu3 %v10509_v57  ;;  %1951 = vmatpush.bf16.msra.mxu0 %v10701_v62  ;;  %v13549_v57 = vld [vmem:[#allocation2 + $0x214] sm:$0xf]  ;;  %v13578_v17 = vld [vmem:[#allocation2 + $0x2f4] sm:$0xf0] }
 0x12f   :  { %v10890_v62 = vld [vmem:[#allocation2 + $0x4f0] sm:$0xf0]  ;;  %v10541_v5 = vor.u32 %v13549_v57, %v10538_v58  ;;  %v10896_v57 = vld [vmem:[#allocation2 + $0x4d8] sm:$0xf]  ;;  %v13542_v58 = vld [vmem:[#allocation2 + $0x1dc] sm:$0xf] }
 0x130   :  { %1904 = vmatpush.bf16.msrb.mxu1 %v10537_v13  ;;  %v10893_v8 = vor.u32 %v13637_v59, %v10890_v62  ;;  %v1452_v13 = vpack.c.b16 %v1252_v60, %v1252_v60  ;;  %v10514_v59 = vld [vmem:[#allocation2 + $0x1f8] sm:$0xf0] }
 0x131   :  { %1912 = vmatpush.bf16.msrb.mxu2 %v10953_v10  ;;  %v11025_v10 = vor.u32 %v13674_v1, %v11024_v0  ;;  %v13642_v0 = vld [vmem:[#allocation2 + $0x4f4] sm:$0xf0] }
 0x132   :  { %1937 = vmatpush.bf16.msra.mxu3 %v10477_v6  ;;  %1952 = vmatpush.bf16.msra.mxu0 %v10669_v15  ;;  %v10792_v6 = vld [vmem:[#allocation2 + $0x410] sm:$0xf]  ;;  %v10992_v15 = vld [vmem:[#allocation2 + $0x598] sm:$0xf] }
 0x133   :  { %1905 = vmatmul.bf16.vlgmr.msrb.gmra.mxu1 %v14871_v18  ;;  %v10993_v27 = vor.u32 %v13666_v16, %v10992_v15  ;;  %v10416_v1 = vld [vmem:[#allocation2 + $0x118] sm:$0xf] }
 0x134   :  { %1962 = vmatpush.bf16.msra.mxu1 %v11021_v19  ;;  %v10793_v19 = vor.u32 %v13617_v7, %v10792_v6  ;;  %v10897_v6 = vor.u32 %v13642_v0, %v10896_v57  ;;  %v13534_v7 = vld [vmem:[#allocation2 + $0x19c] sm:$0xf]  ;;  %v13514_v15 = vld [vmem:[#allocation2 + $0xf4] sm:$0xf0] }
 0x135   :  { %1913 = vmatpush.bf16.msrb.mxu2 %v10921_v25  ;;  %v14909_v25 = vld [vmem:[#allocation2 + $0x618] sm:$0xff] }
 0x136   :  { %1938 = vmatpush.bf16.msra.mxu3 %v10445_v22  ;;  %1953 = vmatpush.bf16.msra.mxu0 %v10637_v28  ;;  %v13546_v22 = vld [vmem:[#allocation2 + $0x1f4] sm:$0xf0]  ;;  %v1668_v28 = vsel %vm1651_vm2, %v1452_v13, 0  ;;  %v10770_v57 = vld [vmem:[#allocation2 + $0x3f8] sm:$0xf0] }
 0x137   :  { %v10513_v32 = vor.u32 %v13546_v22, %v10512_v21  ;;  %v13634_v13 = vld [vmem:[#allocation2 + $0x4b4] sm:$0xf0]  ;;  %v13526_v21 = vld [vmem:[#allocation2 + $0x15c] sm:$0xf] }
 0x138   :  { %1963 = vmatpush.bf16.msra.mxu1 %v10989_v31  ;;  %v10826_v31 = vld [vmem:[#allocation2 + $0x470] sm:$0xf0]  ;;  %v10640_v16 = vld [vmem:[#allocation2 + $0x2d8] sm:$0xf]  ;;  %v10865_v20 = vor.u32 %v13634_v13, %v10864_v12  ;;  %v10450_v22 = vld [vmem:[#allocation2 + $0x178] sm:$0xf0] }
 0x139   :  { %1914 = vmatpush.bf16.msrb.mxu2 %v10889_v37  ;;  %11034 = vmatmul.msk.bf16.vlgmr.msrb.gmra.mxu3 %vm1647_vm3, %v14878_v42  ;;  %v1253_v37 = vunpack.c.l.b16 %v14909_v25  ;;  %v10829_v41 = vor.u32 %v13621_v30, %v10826_v31  ;;  %v10641_v24 = vor.u32 %v13578_v17, %v10640_v16  ;;  %v10608_v30 = vld [vmem:[#allocation2 + $0x298] sm:$0xf]  ;;  %v10354_v0 = vld [vmem:[#allocation2 + $0xb8] sm:$0xf0] }
 0x13a   :  { %1939 = vmatpush.bf16.msra.mxu3 %v10413_v34  ;;  %1954 = vmatpush.bf16.msra.mxu0 %v10605_v40  ;;  %v10960_v34 = vld [vmem:[#allocation2 + $0x558] sm:$0xf]  ;;  %v13494_v13 = vld [vmem:[#allocation2 + $0x5c] sm:$0xf] }
 0x13b   :  { %v13602_v40 = vld [vmem:[#allocation2 + $0x3b4] sm:$0xf0]  ;;  %v10961_v43 = vor.u32 %v13658_v63, %v10960_v34  ;;  %v1453_v51 = vpack.c.b16 %v1253_v37, %v1253_v37  ;;  %v13518_v63 = vld [vmem:[#allocation2 + $0x11c] sm:$0xf] }
 0x13c   :  { %1964 = vmatpush.bf16.msra.mxu1 %v10957_v44  ;;  %v13613_v44 = vld [vmem:[#allocation2 + $0x414] sm:$0xf]  ;;  %v13570_v31 = vld [vmem:[#allocation2 + $0x2b4] sm:$0xf0]  ;;  %v13590_v17 = vld [vmem:[#allocation2 + $0x35c] sm:$0xf] }
 0x13d   :  { %1915 = vmatpush.bf16.msrb.mxu2 %v10857_v50  ;;  %v10448_v50 = vld [vmem:[#allocation2 + $0x158] sm:$0xf]  ;;  %v10797_v56 = vor.u32 %v13613_v44, %v10794_v45  ;;  %v1671_v62 = vsel %vm1651_vm2, %v1453_v51, 0  ;;  %v10609_v38 = vor.u32 %v13570_v31, %v10608_v30  ;;  %v13582_v30 = vld [vmem:[#allocation2 + $0x31c] sm:$0xf] }
 0x13e   :  { %1940 = vmatpush.bf16.msra.mxu3 %v10381_v47  ;;  %1955 = vmatpush.bf16.msra.mxu0 %v10573_v53  ;;  %v10737_v47 = vor.u32 %v13602_v40, %v10736_v39  ;;  %v10704_v53 = vld [vmem:[#allocation2 + $0x358] sm:$0xf]  ;;  %v10449_v60 = vor.u32 %v13530_v52, %v10448_v50  ;;  %v10674_v31 = vld [vmem:[#allocation2 + $0x338] sm:$0xf0] }
 0x13f   :  { %v10800_v39 = vld [vmem:[#allocation2 + $0x418] sm:$0xf] }
 0x140   :  { %1965 = vmatpush.bf16.msra.mxu1 %v10925_v55  ;;  %v10929_v55 = vor.u32 %v13650_v49, %v10928_v48  ;;  %v13618_v40 = vld [vmem:[#allocation2 + $0x434] sm:$0xf0]  ;;  %v13510_v48 = vld [vmem:[#allocation2 + $0xdc] sm:$0xf] }
 0x141   :  { %1916 = vmatpush.bf16.msrb.mxu2 %v10825_v2  ;;  %v13522_v2 = vld [vmem:[#allocation2 + $0x134] sm:$0xf0]  ;;  %v10386_v49 = vld [vmem:[#allocation2 + $0xf8] sm:$0xf0] }
 0x142   :  { %1941 = vmatpush.bf16.msra.mxu3 %v10349_v61  ;;  %1956 = vmatpush.bf16.msra.mxu0 %v10541_v5  ;;  %v10705_v61 = vor.u32 %v13594_v54, %v10704_v53  ;;  %v10517_v5 = vor.u32 %v13542_v58, %v10514_v59  ;;  %v10576_v44 = vld [vmem:[#allocation2 + $0x258] sm:$0xf]  ;;  %v10389_v58 = vor.u32 %v13510_v48, %v10386_v49  ;;  %v13670_v59 = vld [vmem:[#allocation2 + $0x5dc] sm:$0xf] }
 0x143   :  { %v13562_v45 = vld [vmem:[#allocation2 + $0x274] sm:$0xf0]  ;;  %v13630_v49 = vld [vmem:[#allocation2 + $0x49c] sm:$0xf] }
 0x144   :  { %1966 = vmatpush.bf16.msra.mxu1 %v10893_v8  ;;  %v10482_v8 = vld [vmem:[#allocation2 + $0x1b8] sm:$0xf0]  ;;  %v10577_v51 = vor.u32 %v13562_v45, %v10576_v44  ;;  %v10288_v52 = vld [vmem:[#allocation2 + $0x18] sm:$0xf] }
 0x145   :  { %1917 = vmatpush.bf16.msrb.mxu2 %v10793_v19  ;;  %1957 = vmatmul.bf16.vlgmr.msra.gmra.mxu0 %v14871_v18  ;;  %v10485_v19 = vor.u32 %v13534_v7, %v10482_v8  ;;  %v13490_v53 = vld [vmem:[#allocation2 + $0x34] sm:$0xf0]  ;;  %v10738_v8 = vld [vmem:[#allocation2 + $0x3b8] sm:$0xf0] }
 0x146   :  { %2014 = vmatpush.bf16.msrb.mxu0 %v11025_v10  ;;  %1942 = vmatpush.bf16.msra.mxu3 %v10317_v9  ;;  %v10417_v10 = vor.u32 %v13522_v2, %v10416_v1  ;;  %v10384_v9 = vld [vmem:[#allocation2 + $0xd8] sm:$0xf]  ;;  %v10289_v1 = vor.u32 %v13490_v53, %v10288_v52  ;;  %v13558_v53 = vld [vmem:[#allocation2 + $0x25c] sm:$0xf] }
 0x147   :  { %v10385_v23 = vor.u32 %v13514_v15, %v10384_v9  ;;  %v10544_v54 = vld [vmem:[#allocation2 + $0x218] sm:$0xf]  ;;  %v10322_v9 = vld [vmem:[#allocation2 + $0x78] sm:$0xf0] }
 0x148   :  { %1967 = vmatpush.bf16.msra.mxu1 %v10861_v26  ;;  %1918 = vmatmul.bf16.vlgmr.msrb.gmra.mxu2 %v14876_v36  ;;  %v10832_v26 = vld [vmem:[#allocation2 + $0x458] sm:$0xf] }
 0x149   :  { %1982 = vmatpush.bf16.msra.mxu2 %v1668_v28  ;;  %v10352_v28 = vld [vmem:[#allocation2 + $0x98] sm:$0xf] }
 0x14a   :  { %2015 = vmatpush.bf16.msrb.mxu0 %v10993_v27  ;;  %1943 = vmatpush.bf16.msra.mxu3 %v10285_v29  ;;  %v13626_v27 = vld [vmem:[#allocation2 + $0x474] sm:$0xf0] }
 0x14b   :  { %v13506_v29 = vld [vmem:[#allocation2 + $0xb4] sm:$0xf0]  ;;  %v10833_v34 = vor.u32 %v13626_v27, %v10832_v26 }
 0x14c   :  { %1968 = vmatpush.bf16.msra.mxu1 %v10829_v41  ;;  %v10353_v37 = vor.u32 %v13506_v29, %v10352_v28  ;;  %v10320_v41 = vld [vmem:[#allocation2 + $0x58] sm:$0xf] }
 0x14d   :  { %1988 = vmatpush.bf16.msrb.mxu2 %v10513_v32  ;;  %1944 = vmatmul.bf16.vlgmr.msra.gmra.mxu3 %v14869_v14  ;;  %v10453_v32 = vor.u32 %v13526_v21, %v10450_v22  ;;  %v13654_v21 = vld [vmem:[#allocation2 + $0x55c] sm:$0xf] }
 0x14e   :  { %2001 = vmatpush.bf16.msrb.mxu3 %v10769_v33  ;;  %2016 = vmatpush.bf16.msrb.mxu0 %v10961_v43  ;;  %v1254_v33 = vunpack.c.h.b16 %v14909_v25  ;;  %v13498_v43 = vld [vmem:[#allocation2 + $0x74] sm:$0xf0]  ;;  %v10962_v22 = vld [vmem:[#allocation2 + $0x578] sm:$0xf0] }
 0x14f   :  { %v10321_v50 = vor.u32 %v13498_v43, %v10320_v41  ;;  %v10965_v27 = vor.u32 %v13654_v21, %v10962_v22  ;;  %v10898_v41 = vld [vmem:[#allocation2 + $0x4f8] sm:$0xf0] }
 0x150   :  { %1969 = vmatpush.bf16.msra.mxu1 %v10797_v56  ;;  %v1454_v25 = vpack.c.b16 %v1254_v33, %v1254_v33  ;;  %v13554_v56 = vld [vmem:[#allocation2 + $0x234] sm:$0xf0]  ;;  %v13646_v33 = vld [vmem:[#allocation2 + $0x51c] sm:$0xf] }
 0x151   :  { %1989 = vmatpush.bf16.msrb.mxu2 %v10481_v46  ;;  %v10421_v46 = vor.u32 %v13518_v63, %v10418_v35  ;;  %v10545_v2 = vor.u32 %v13554_v56, %v10544_v54  ;;  %v10677_v63 = vor.u32 %v13582_v30, %v10674_v31  ;;  %v10578_v54 = vld [vmem:[#allocation2 + $0x278] sm:$0xf0] }
 0x152   :  { %2002 = vmatpush.bf16.msrb.mxu3 %v10737_v47  ;;  %2017 = vmatpush.bf16.msrb.mxu0 %v10929_v55  ;;  %v10801_v47 = vor.u32 %v13618_v40, %v10800_v39  ;;  %v13606_v55 = vld [vmem:[#allocation2 + $0x3dc] sm:$0xf] }
 0x153   :  { %1970 = vmatmul.bf16.vlgmr.msra.gmra.mxu1 %v14876_v36  ;;  %v10773_v3 = vor.u32 %v13606_v55, %v10770_v57  ;;  %v13638_v40 = vld [vmem:[#allocation2 + $0x4dc] sm:$0xf] }
 0x154   :  { %2034 = vmatpush.bf16.msrb.mxu1 %v1671_v62  ;;  %v13502_v62 = vld [vmem:[#allocation2 + $0x9c] sm:$0xf] }
 0x155   :  { %1990 = vmatpush.bf16.msrb.mxu2 %v10449_v60  ;;  %v11026_v60 = vld [vmem:[#allocation2 + $0x5f8] sm:$0xf0]  ;;  %v10357_v7 = vor.u32 %v13502_v62, %v10354_v0 }
 0x156   :  { %2003 = vmatpush.bf16.msrb.mxu3 %v10705_v61  ;;  %2018 = vmatpush.bf16.msrb.mxu0 %v10897_v6  ;;  %v1674_v61 = vsel %vm1651_vm2, %v1454_v25, 0  ;;  %v11029_v4 = vor.u32 %v13670_v59, %v11026_v60  ;;  %v13566_v25 = vld [vmem:[#allocation2 + $0x29c] sm:$0xf] }
 0x157   :  { %v13622_v56 = vld [vmem:[#allocation2 + $0x45c] sm:$0xf] }
 0x158   :  { %2040 = vmatpush.bf16.msra.mxu1 %v10517_v5  ;;  %11035 = vmatmul.msk.bf16.vlgmr.msra.gmra.mxu2 %vm1647_vm3, %v14878_v42  ;;  %v13598_v5 = vld [vmem:[#allocation2 + $0x39c] sm:$0xf] }
 0x159   :  { %1991 = vmatpush.bf16.msrb.mxu2 %v10417_v10  ;;  %v13662_v10 = vld [vmem:[#allocation2 + $0x59c] sm:$0xf]  ;;  %v10741_v15 = vor.u32 %v13598_v5, %v10738_v8 }
 0x15a   :  { %2004 = vmatpush.bf16.msrb.mxu3 %v10673_v11  ;;  %2019 = vmatpush.bf16.msrb.mxu0 %v10865_v20  ;;  %v10994_v11 = vld [vmem:[#allocation2 + $0x5b8] sm:$0xf0] }
 0x15b   :  { %v10997_v16 = vor.u32 %v13662_v10, %v10994_v11  ;;  %v10706_v20 = vld [vmem:[#allocation2 + $0x378] sm:$0xf0] }
 0x15c   :  { %2041 = vmatpush.bf16.msra.mxu1 %v10485_v19  ;;  %v10325_v19 = vor.u32 %v13494_v13, %v10322_v9  ;;  %v10709_v26 = vor.u32 %v13590_v17, %v10706_v20  ;;  %v10834_v55 = vld [vmem:[#allocation2 + $0x478] sm:$0xf0] }
 0x15d   :  { %1992 = vmatpush.bf16.msrb.mxu2 %v10385_v23  ;;  %v14925_v6 = vpop.f32.mrf.mxu0  ;;  %v13486_v23 = vld [vmem:[#allocation2 + $0x1c] sm:$0xf]  ;;  %v10837_v60 = vor.u32 %v13622_v56, %v10834_v55  ;;  %v11038_v56 = vld [vmem:[%s18121_s16 + $0x8] sm:$0xff] }
 0x15e   :  { %2005 = vmatpush.bf16.msrb.mxu3 %v10641_v24  ;;  %2020 = vmatpush.bf16.msrb.mxu0 %v10833_v34  ;;  %v14927_v12 = vpop.f32.mrf.mxu1  ;;  %v10290_v24 = vld [vmem:[#allocation2 + $0x38] sm:$0xf0] }
 0x15f   :  { %v10293_v29 = vor.u32 %v13486_v23, %v10290_v24  ;;  %v10930_v34 = vld [vmem:[#allocation2 + $0x538] sm:$0xf0]  ;;  %v1699_v57 = vadd.f32 %v14927_v12, %v14925_v6 }
 0x160   :  { %2042 = vmatpush.bf16.msra.mxu1 %v10453_v32  ;;  %v10933_v35 = vor.u32 %v13646_v33, %v10930_v34  ;;  %v10546_v62 = vld [vmem:[#allocation2 + $0x238] sm:$0xf0] }
 0x161   :  { %1993 = vmatpush.bf16.msrb.mxu2 %v10353_v37  ;;  %v13574_v37 = vld [vmem:[#allocation2 + $0x2dc] sm:$0xf] }
 0x162   :  { %2006 = vmatpush.bf16.msrb.mxu3 %v10609_v38  ;;  %2021 = vmatpush.bf16.msrb.mxu0 %v10801_v47  ;;  %v10642_v38 = vld [vmem:[#allocation2 + $0x2f8] sm:$0xf0] }
 0x163   :  { %11036 = vmatmul.msk.bf16.vlgmr.msrb.gmra.mxu1 %vm1647_vm3, %v14878_v42  ;;  %v10645_v44 = vor.u32 %v13574_v37, %v10642_v38  ;;  %v10610_v47 = vld [vmem:[#allocation2 + $0x2b8] sm:$0xf0] }
 0x164   :  { %2043 = vmatpush.bf16.msra.mxu1 %v10421_v46  ;;  %v10901_v46 = vor.u32 %v13638_v40, %v10898_v41 }
 0x165   :  { %1994 = vmatpush.bf16.msrb.mxu2 %v10321_v50  ;;  %2022 = vmatmul.bf16.vlgmr.msrb.gmra.mxu0 %v14876_v36  ;;  %v1687_v28 = vpop.f32.mrf.mxu0  ;;  %v10866_v50 = vld [vmem:[#allocation2 + $0x4b8] sm:$0xf0] }
 0x166   :  { %2007 = vmatpush.bf16.msrb.mxu3 %v10577_v51  ;;  %2086 = vmatpush.bf16.msra.mxu0 %v1674_v61  ;;  %v1700_v32 = vpop.f32.mrf.mxu1  ;;  %v10613_v51 = vor.u32 %v13566_v25, %v10610_v47  ;;  %v10869_v52 = vor.u32 %v13630_v49, %v10866_v50  ;;  %v13550_v61 = vld [vmem:[#allocation2 + $0x21c] sm:$0xf] }
 0x168   :  { %2044 = vmatpush.bf16.msra.mxu1 %v10389_v58  ;;  %v10581_v58 = vor.u32 %v13558_v53, %v10578_v54 }
 0x169   :  { %1995 = vmatpush.bf16.msrb.mxu2 %v10289_v1  ;;  %v13614_v1 = vld [vmem:[#allocation2 + $0x41c] sm:$0xf] }
 0x16a   :  { %2008 = vmatpush.bf16.msrb.mxu3 %v10545_v2  ;;  %v10802_v2 = vld [vmem:[#allocation2 + $0x438] sm:$0xf0] }
 0x16b   :  { %v1711_v39 = vpop.f32.mrf.mxu2  ;;  %v10805_v5 = vor.u32 %v13614_v1, %v10802_v2 }
 0x16c   :  { %2045 = vmatpush.bf16.msra.mxu1 %v10357_v7  ;;  %1996 = vmatmul.bf16.vlgmr.msrb.gmra.mxu2 %v14869_v14  ;;  %v1724_v43 = vpop.f32.mrf.mxu3 }
 0x16d   :  { %2053 = vmatpush.bf16.msra.mxu2 %v10773_v3  ;;  %2009 = vmatmul.bf16.vlgmr.msrb.gmra.mxu3 %v14871_v18  ;;  %v1750_v45 = vpop.f32.mrf.mxu0  ;;  %v1712_v3 = vadd.f32 %v1711_v39, %v1699_v57 }
 0x16e   :  { %2066 = vmatpush.bf16.msra.mxu3 %v11029_v4  ;;  %v1763_v48 = vpop.f32.mrf.mxu1  ;;  %v10549_v4 = vor.u32 %v13550_v61, %v10546_v62 }
 0x16f   :  { %v1725_v8 = vadd.f32 %v1724_v43, %v1712_v3  ;;  %v11047_v3 = vld [vmem:[%s18121_s16 + $0x10] sm:$0xff] }
 0x170   :  { %2046 = vmatpush.bf16.msra.mxu1 %v10325_v19 }
 0x171   :  { %2054 = vmatpush.bf16.msra.mxu2 %v10741_v15 }
 0x172   :  { %2067 = vmatpush.bf16.msra.mxu3 %v10997_v16 }
 0x174   :  { %2047 = vmatpush.bf16.msra.mxu1 %v10293_v29 }
 0x175   :  { %2055 = vmatpush.bf16.msra.mxu2 %v10709_v26  ;;  %11037 = vmatmul.msk.bf16.vlgmr.msra.gmra.mxu0 %vm1647_vm3, %v14878_v42  ;;  %v1726_v42 = vpop.f32.mrf.mxu3  ;;  %v1752_v59 = vpop.f32.mrf.mxu0 }
 0x176   :  { %2068 = vmatpush.bf16.msra.mxu3 %v10965_v27  ;;  %v1765_v0 = vpop.f32.mrf.mxu1 }
 0x177   :  { %2048 = vmatmul.bf16.vlgmr.msra.gmra.mxu1 %v14869_v14  ;;  %v1713_v14 = vpop.f32.mrf.mxu2 }
 0x178   :  { %v2092_v14 = vld [vmem:[%s18121_s16] sm:$0xff] }
 0x179   :  { %2056 = vmatpush.bf16.msra.mxu2 %v10677_v63 }
 0x17a   :  { %2069 = vmatpush.bf16.msra.mxu3 %v10933_v35 }
 0x17d   :  { %2057 = vmatpush.bf16.msra.mxu2 %v10645_v44  ;;  %v1737_v6 = vpop.f32.mrf.mxu3 }
 0x17e   :  { %2070 = vmatpush.bf16.msra.mxu3 %v10901_v46  ;;  %v1751_v10 = vadd.f32 %v1750_v45, %v1737_v6  ;;  %v1815_v12 = vpop.f32.mrf.mxu0  ;;  %v11052_v6 = vld [vmem:[%s18121_s16 + $0x18] sm:$0xff] }
 0x17f   :  { %v1776_v7 = vpop.f32.mrf.mxu2 }
 0x180   :  { %v1764_v11 = vadd.f32 %v1763_v48, %v1751_v10  ;;  %v1828_v13 = vpop.f32.mrf.mxu1 }
 0x181   :  { %2058 = vmatpush.bf16.msra.mxu2 %v10613_v51 }
 0x182   :  { %2071 = vmatpush.bf16.msra.mxu3 %v10869_v52  ;;  %v1777_v9 = vadd.f32 %v1776_v7, %v1764_v11 }
 0x185   :  { %2059 = vmatpush.bf16.msra.mxu2 %v10581_v58  ;;  %v1739_v16 = vpop.f32.mrf.mxu3 }
 0x186   :  { %2072 = vmatpush.bf16.msra.mxu3 %v10837_v60  ;;  %v1817_v17 = vpop.f32.mrf.mxu0 }
 0x187   :  { %v1778_v15 = vpop.f32.mrf.mxu2 }
 0x188   :  { %v1830_v19 = vpop.f32.mrf.mxu1 }
 0x189   :  { %2060 = vmatpush.bf16.msra.mxu2 %v10549_v4 }
 0x18a   :  { %2073 = vmatpush.bf16.msra.mxu3 %v10805_v5 }
 0x18c   :  { %2061 = vmatmul.bf16.vlgmr.msra.gmra.mxu2 %v14871_v18 }
 0x18d   :  { %11043 = vmatpush.msk.msrb.mxu2 %vm2099_vm4, %v1725_v8  ;;  %2074 = vmatmul.bf16.vlgmr.msra.gmra.mxu3 %v14876_v36  ;;  %v1802_v21 = vpop.f32.mrf.mxu3 }
 0x18e   :  { %11045 = vmatpush.msk.msrb.mxu3 %vm2099_vm4, %v1777_v9  ;;  %v1880_v24 = vpop.f32.mrf.mxu0 }
 0x18f   :  { %v1789_v20 = vpop.f32.mrf.mxu2 }
 0x190   :  { %v1803_v22 = vadd.f32 %v1802_v21, %v1789_v20  ;;  %v1841_v26 = vpop.f32.mrf.mxu1 }
 0x192   :  { %v1816_v23 = vadd.f32 %v1815_v12, %v1803_v22 }
 0x194   :  { %v1829_v27 = vadd.f32 %v1828_v13, %v1816_v23 }
 0x195   :  { %v1804_v28 = vpop.f32.mrf.mxu3 }
 0x196   :  { %11039 = vmatpush.msk.msrb.mxu0 %vm2099_vm4, %v1829_v27  ;;  %v1882_v29 = vpop.f32.mrf.mxu0 }
 0x197   :  { %v1791_v18 = vpop.f32.mrf.mxu2  ;;  %11040 = vmatmul.msk.f32.vlgmr.msrb.gmra.mxu0 %vm2095_vm5, %v11038_v56 }
 0x198   :  { %v1843_v30 = vpop.f32.mrf.mxu1 }
 0x199   :  { %v14974_v30 = vld [vmem:[%s18080_s8 + $0xf0] sm:$0xff] }
 0x19c   :  { %11044 = vmatmul.msk.f32.vlgmr.msrb.gmra.mxu2 %vm2095_vm5, %v2092_v14 }
 0x19d   :  { %11046 = vmatmul.msk.f32.vlgmr.msrb.gmra.mxu3 %vm2095_vm5, %v2092_v14  ;;  %v15107_v14 = vld [vmem:[%s18080_s8 + $0x40] sm:$0xff] }
 0x1a2   :  { %v1893_v36 = vpop.f32.mrf.mxu0 }
 0x1aa   :  { %v1895_v31 = vpop.f32.mrf.mxu0 }
 0x1ab   :  { %v1854_v32 = vpop.f32.mrf.mxu2  ;;  %v14981_v31 = vld [vmem:[%s18080_s8 + $0xf8] sm:$0xff] }
 0x1ac   :  { %v1867_v33 = vpop.f32.mrf.mxu3  ;;  %v1855_v34 = vadd.f32 %v1854_v32, %v1841_v26  ;;  %v14986_v32 = vld [vmem:[%s18080_s8 + $0xe0] sm:$0xff] }
 0x1ae   :  { %v1868_v63 = vadd.f32 %v1867_v33, %v1855_v34  ;;  %v14994_v33 = vld [vmem:[%s18080_s8 + $0xe8] sm:$0xff]  ;;  %v14999_v34 = vld [vmem:[%s18080_s8 + $0xd0] sm:$0xff] }
 0x1b0   :  { %v1906_v35 = vpop.f32.mrf.mxu1  ;;  %v1881_v37 = vadd.f32 %v1880_v24, %v1868_v63  ;;  %v15006_v63 = vld [vmem:[%s18080_s8 + $0xd8] sm:$0xff] }
 0x1b1   :  { %v1907_v45 = vadd.f32 %v1906_v35, %v1893_v36  ;;  %v18101_v36 = vmov 1.0   ;;  %v15011_v35 = vld [vmem:[%s18080_s8 + $0xc0] sm:$0xff] }
 0x1b2   :  { %11041 = vmatpush.msk.msrb.mxu1 %vm2099_vm4, %v1881_v37  ;;  %v15018_v37 = vld [vmem:[%s18080_s8 + $0xc8] sm:$0xff] }
 0x1b3   :  { %v1856_v38 = vpop.f32.mrf.mxu2  ;;  %11042 = vmatmul.msk.f32.vlgmr.msrb.gmra.mxu1 %vm2095_vm5, %v11038_v56 }
 0x1b4   :  { %v1869_v39 = vpop.f32.mrf.mxu3  ;;  %v15023_v38 = vld [vmem:[%s18080_s8 + $0xb0] sm:$0xff] }
 0x1b5   :  { %v15030_v39 = vld [vmem:[%s18080_s8 + $0xb8] sm:$0xff] }
 0x1b8   :  { %v1908_v40 = vpop.f32.mrf.mxu1 }
 0x1b9   :  { %v15035_v40 = vld [vmem:[%s18080_s8 + $0xa0] sm:$0xff] }
 0x1bc   :  { %v1932_v41 = vpop.f32.mrf.mxu3 }
 0x1c2   :  { %v1958_v43 = vpop.f32.mrf.mxu0 }
 0x1c4   :  { %v1934_v44 = vpop.f32.mrf.mxu3 }
 0x1ca   :  { %v1960_v46 = vpop.f32.mrf.mxu0 }
 0x1cb   :  { %v1919_v25 = vpop.f32.mrf.mxu2  ;;  %v15059_v46 = vld [vmem:[%s18080_s8 + $0x80] sm:$0xff] }
 0x1cc   :  { %v1920_v47 = vadd.f32 %v1919_v25, %v1907_v45  ;;  %v15054_v45 = vld [vmem:[%s18080_s8 + $0x98] sm:$0xff]  ;;  %v15066_v25 = vld [vmem:[%s18080_s8 + $0x88] sm:$0xff] }
 0x1ce   :  { %v1933_v48 = vadd.f32 %v1932_v41, %v1920_v47  ;;  %v15042_v41 = vld [vmem:[%s18080_s8 + $0xa8] sm:$0xff]  ;;  %v15071_v47 = vld [vmem:[%s18080_s8 + $0x70] sm:$0xff] }
 0x1d0   :  { %v1945_v49 = vpop.f32.mrf.mxu3  ;;  %v1971_v50 = vpop.f32.mrf.mxu1  ;;  %11048 = vmatpush.msk.msra.mxu0 %vm2099_vm4, %v1933_v48  ;;  %v15078_v48 = vld [vmem:[%s18080_s8 + $0x78] sm:$0xff] }
 0x1d1   :  { %v1959_v52 = vadd.f32 %v1958_v43, %v1945_v49  ;;  %11049 = vmatmul.msk.f32.vlgmr.msra.gmra.mxu0 %vm2095_vm5, %v11047_v3  ;;  %v15047_v43 = vld [vmem:[%s18080_s8 + $0x90] sm:$0xff]  ;;  %v15083_v49 = vld [vmem:[%s18080_s8 + $0x60] sm:$0xff] }
 0x1d3   :  { %v1921_v51 = vpop.f32.mrf.mxu2  ;;  %v1972_v55 = vadd.f32 %v1971_v50, %v1959_v52  ;;  %v15095_v52 = vld [vmem:[%s18080_s8 + $0x50] sm:$0xff] }
 0x1d4   :  { %v15090_v51 = vld [vmem:[%s18080_s8 + $0x68] sm:$0xff] }
 0x1d8   :  { %v1947_v53 = vpop.f32.mrf.mxu3  ;;  %v1973_v54 = vpop.f32.mrf.mxu1 }
 0x1d9   :  { %v15102_v54 = vld [vmem:[%s18080_s8 + $0x58] sm:$0xff] }
 0x1db   :  { %v1984_v57 = vpop.f32.mrf.mxu2 }
 0x1dc   :  { %v1985_v42 = vadd.f32 %v1984_v57, %v1972_v55  ;;  %v15114_v55 = vld [vmem:[%s18080_s8 + $0x48] sm:$0xff]  ;;  %v15119_v57 = vld [vmem:[%s18080_s8 + $0x30] sm:$0xff] }
 0x1de   :  { %11050 = vmatpush.msk.msra.mxu1 %vm2099_vm4, %v1985_v42 }
 0x1df   :  { %11051 = vmatmul.msk.f32.vlgmr.msra.gmra.mxu1 %vm2095_vm5, %v11047_v3  ;;  %v15162_v3 = vld [vmem:[%s18080_s8 + $0x1f8] sm:$0xff] }
 0x1e0   :  { %v2036_v58 = vpop.f32.mrf.mxu1 }
 0x1e2   :  { %v2023_v59 = vpop.f32.mrf.mxu0 }
 0x1e3   :  { %v1986_v60 = vpop.f32.mrf.mxu2 }
 0x1e8   :  { %v2038_v61 = vpop.f32.mrf.mxu1 }
 0x1ea   :  { %v2025_v62 = vpop.f32.mrf.mxu0 }
 0x1eb   :  { %v15140_v62 = vld [vmem:[%s18080_s8 + $0x28] sm:$0xff] }
 0x1ef   :  { %v1997_v0 = vpop.f32.mrf.mxu2 }
 0x1f0   :  { %v2010_v1 = vpop.f32.mrf.mxu3 }
 0x1f1   :  { %v2011_v2 = vadd.f32 %v2010_v1, %v1997_v0  ;;  %v15145_v0 = vld [vmem:[%s18080_s8 + $0x1f0] sm:$0xff] }
 0x1f2   :  { %v2088_v8 = vpop.f32.mrf.mxu0 }
 0x1f3   :  { %v2024_v4 = vadd.f32 %v2023_v59, %v2011_v2  ;;  %v15131_v59 = vld [vmem:[%s18080_s8 + $0x20] sm:$0xff]  ;;  %v15155_v2 = vld [vmem:[%s18080_s8 + $0x10] sm:$0xff] }
 0x1f4   :  { %v2049_v5 = vpop.f32.mrf.mxu1 }
 0x1f5   :  { %v2037_v7 = vadd.f32 %v2036_v58, %v2024_v4  ;;  %v15126_v58 = vld [vmem:[%s18080_s8 + $0x38] sm:$0xff]  ;;  %v15167_v4 = vld [vmem:[%s18080_s8 + $0x1e0] sm:$0xff] }
 0x1f7   :  { %11053 = vmatpush.msk.msra.mxu2 %vm2099_vm4, %v2037_v7  ;;  %v1999_v10 = vpop.f32.mrf.mxu2  ;;  %v15179_v7 = vld [vmem:[%s18080_s8] sm:$0xff] }
 0x1f8   :  { %v2012_v11 = vpop.f32.mrf.mxu3  ;;  %11054 = vmatmul.msk.f32.vlgmr.msra.gmra.mxu2 %vm2095_vm5, %v11052_v6  ;;  %v15199_v10 = vld [vmem:[%s18080_s8 + $0x8] sm:$0xff] }
 0x1f9   :  { %v15204_v11 = vld [vmem:[%s18080_s8 + $0x1d8] sm:$0xff] }
 0x1fa   :  { %v2090_v13 = vpop.f32.mrf.mxu0 }
 0x1fb   :  { %v15218_v13 = vld [vmem:[%s18080_s8 + $0x1c8] sm:$0xff] }
 0x1fc   :  { %v2051_v12 = vpop.f32.mrf.mxu1 }
 0x1fd   :  { %v15209_v12 = vld [vmem:[%s18080_s8 + $0x1c0] sm:$0xff] }
 0x20f   :  { %v2062_v9 = vpop.f32.mrf.mxu2 }
 0x210   :  { %v2063_v15 = vadd.f32 %v2062_v9, %v2049_v5  ;;  %v2075_v16 = vpop.f32.mrf.mxu3  ;;  %v15174_v5 = vld [vmem:[%s18080_s8 + $0x18] sm:$0xff]  ;;  %v15223_v9 = vld [vmem:[%s18080_s8 + $0x1b0] sm:$0xff] }
 0x212   :  { %v2076_v17 = vadd.f32 %v2075_v16, %v2063_v15  ;;  %v15232_v15 = vld [vmem:[%s18080_s8 + $0x1b8] sm:$0xff]  ;;  %v15237_v16 = vld [vmem:[%s18080_s8 + $0x1a0] sm:$0xff] }
 0x214   :  { %v2089_v19 = vadd.f32 %v2088_v8, %v2076_v17  ;;  %v2123_v22 = vpop.f32.mrf.mxu0  ;;  %v15186_v8 = vld [vmem:[%s18080_s8 + $0x1e8] sm:$0xff] }
 0x215   :  { %v15246_v17 = vld [vmem:[%s18080_s8 + $0x1a8] sm:$0xff] }
 0x216   :  { %11055 = vmatpush.msk.msra.mxu3 %vm2099_vm4, %v2089_v19  ;;  %v15251_v19 = vld [vmem:[%s18080_s8 + $0x190] sm:$0xff] }
 0x217   :  { %v2064_v20 = vpop.f32.mrf.mxu2  ;;  %11056 = vmatmul.msk.f32.vlgmr.msra.gmra.mxu3 %vm2095_vm5, %v11052_v6  ;;  %v15191_v6 = vld [vmem:[%s18080_s8 + $0x1d0] sm:$0xff] }
 0x218   :  { %v2077_v21 = vpop.f32.mrf.mxu3  ;;  %v15260_v20 = vld [vmem:[%s18080_s8 + $0x198] sm:$0xff] }
 0x219   :  { %v15265_v21 = vld [vmem:[%s18080_s8 + $0x180] sm:$0xff] }
 0x21f   :  { %v2172_v23 = vpop.f32.mrf.mxu2 }
 0x220   :  { %v2173_v24 = vadd.f32 %v2172_v23, %v2123_v22  ;;  %v2192_v50 = vpop.f32.mrf.mxu3  ;;  %v15274_v22 = vld [vmem:[%s18080_s8 + $0x188] sm:$0xff]  ;;  %v15279_v23 = vld [vmem:[%s18080_s8 + $0x170] sm:$0xff] }
 0x230   :  { %v2143_v44 = vpop.f32.mrf.mxu1 }
 0x231   :  { %v2193_v53 = vadd.f32 %v2192_v50, %v2143_v44  ;;  %v11121_v50 = vld [vmem:[#allocation4 + $0x78] sm:$0xf0] }
 0x24e   :  { %v2223_v26 = vpop.f32.mrf.mxu0 }
 0x24f   :  { %v2246_v27 = vadd.f32 %v2223_v26, %v2173_v24  ;;  %v15288_v24 = vld [vmem:[%s18080_s8 + $0x178] sm:$0xff]  ;;  %v15293_v26 = vld [vmem:[%s18080_s8 + $0x160] sm:$0xff] }
 0x25c   :  { %v2243_v56 = vpop.f32.mrf.mxu1 }
 0x25d   :  { %v2247_v42 = vadd.f32 %v2243_v56, %v2193_v53  ;;  %v13705_v53 = vld [vmem:[#allocation4 + $0xf4] sm:$0xf]  ;;  %v11111_v56 = vld [vmem:[#allocation4 + $0x60] sm:$0xf] }
 0x27b   :  { %v2276_v18 = vpop.f32.mrf.mxu2 }
 0x27c   :  { %v14966_v28 = vadd.f32 %v2276_v18, %v2246_v27  ;;  %v15302_v27 = vld [vmem:[%s18080_s8 + $0x168] sm:$0xff]  ;;  %v15307_v18 = vld [vmem:[%s18080_s8 + $0x150] sm:$0xff] }
 0x27e   :  { %v2409_v29 = vmul.f32 %v14966_v28, %v14966_v28  ;;  %2384 = vmatpush.msrb.mxu0 %v14966_v28 }
 0x27f   :  { %11057 = vmatmul.msk.f32.vlgmr.msrb.gmra.mxu0 %vm1647_vm3, %v18101_v36 }
 0x280   :  { %2426 = vmatpush.msrb.mxu2 %v2409_v29  ;;  %2451 = vmatpush.msra.mxu0 %v14974_v30  ;;  %v15316_v29 = vld [vmem:[%s18080_s8 + $0x158] sm:$0xff] }
 0x281   :  { %11059 = vmatmul.msk.f32.vlgmr.msrb.gmra.mxu2 %vm1647_vm3, %v18101_v36 }
 0x282   :  { %2491 = vmatpush.msra.mxu2 %v14981_v31  ;;  %2452 = vmatpush.msra.mxu0 %v14986_v32 }
 0x284   :  { %2492 = vmatpush.msra.mxu2 %v14994_v33  ;;  %2453 = vmatpush.msra.mxu0 %v14999_v34 }
 0x286   :  { %2493 = vmatpush.msra.mxu2 %v15006_v63  ;;  %2454 = vmatpush.msra.mxu0 %v15011_v35 }
 0x288   :  { %2494 = vmatpush.msra.mxu2 %v15018_v37  ;;  %2455 = vmatpush.msra.mxu0 %v15023_v38 }
 0x28a   :  { %2495 = vmatpush.msra.mxu2 %v15030_v39  ;;  %2456 = vmatpush.msra.mxu0 %v15035_v40 }
 0x28c   :  { %2496 = vmatpush.msra.mxu2 %v15042_v41  ;;  %2457 = vmatpush.msra.mxu0 %v15047_v43 }
 0x28e   :  { %2497 = vmatpush.msra.mxu2 %v15054_v45  ;;  %2458 = vmatpush.msra.mxu0 %v15059_v46 }
 0x290   :  { %2498 = vmatpush.msra.mxu2 %v15066_v25  ;;  %2459 = vmatpush.msra.mxu0 %v15071_v47 }
 0x292   :  { %2499 = vmatpush.msra.mxu2 %v15078_v48  ;;  %2460 = vmatpush.msra.mxu0 %v15083_v49 }
 0x294   :  { %2500 = vmatpush.msra.mxu2 %v15090_v51  ;;  %2461 = vmatpush.msra.mxu0 %v15095_v52 }
 0x296   :  { %2501 = vmatpush.msra.mxu2 %v15102_v54  ;;  %2462 = vmatpush.msra.mxu0 %v15107_v14 }
 0x298   :  { %2502 = vmatpush.msra.mxu2 %v15114_v55  ;;  %2463 = vmatpush.msra.mxu0 %v15119_v57 }
 0x29a   :  { %v2296_v60 = vpop.f32.mrf.mxu3  ;;  %2503 = vmatpush.msra.mxu2 %v15126_v58  ;;  %2464 = vmatpush.msra.mxu0 %v15131_v59 }
 0x29b   :  { %v15135_v61 = vadd.f32 %v2296_v60, %v2247_v42  ;;  %v11113_v60 = vld [vmem:[#allocation4 + $0x68] sm:$0xf0] }
 0x29c   :  { %2504 = vmatpush.msra.mxu2 %v15140_v62  ;;  %2465 = vmatpush.msra.mxu0 %v15155_v2 }
 0x29d   :  { %v2410_v1 = vmul.f32 %v15135_v61, %v15135_v61  ;;  %2404 = vmatpush.msrb.mxu1 %v15135_v61 }
 0x29e   :  { %11058 = vmatmul.msk.f32.vlgmr.msrb.gmra.mxu1 %vm1647_vm3, %v18101_v36  ;;  %2505 = vmatpush.msra.mxu2 %v15174_v5 }
 0x29f   :  { %2446 = vmatpush.msrb.mxu3 %v2410_v1  ;;  %2471 = vmatpush.msra.mxu1 %v15145_v0  ;;  %v13703_v1 = vld [vmem:[#allocation4 + $0xe4] sm:$0xf] }
 0x2a0   :  { %11060 = vmatmul.msk.f32.vlgmr.msrb.gmra.mxu3 %vm1647_vm3, %v18101_v36  ;;  %2466 = vmatpush.msra.mxu0 %v15179_v7 }
 0x2a1   :  { %2511 = vmatpush.msra.mxu3 %v15162_v3  ;;  %2472 = vmatpush.msra.mxu1 %v15167_v4 }
 0x2a2   :  { %2506 = vmatpush.msra.mxu2 %v15199_v10  ;;  %2533 = vmatpush.msrb.mxu0 %v14974_v30  ;;  %v15321_v30 = vld [vmem:[%s18080_s8 + $0x140] sm:$0xff] }
 0x2a3   :  { %2512 = vmatpush.msra.mxu3 %v15186_v8  ;;  %2473 = vmatpush.msra.mxu1 %v15191_v6 }
 0x2a4   :  { %2573 = vmatpush.msrb.mxu2 %v14981_v31  ;;  %2534 = vmatpush.msrb.mxu0 %v14986_v32  ;;  %v2343_v31 = vld [vmem:[%s18080_s8 + $0x148] sm:$0xff]  ;;  %v2340_v32 = vld [vmem:[%s18080_s8 + $0x130] sm:$0xff] }
 0x2a5   :  { %2513 = vmatpush.msra.mxu3 %v15204_v11  ;;  %2474 = vmatpush.msra.mxu1 %v15209_v12 }
 0x2a6   :  { %2574 = vmatpush.msrb.mxu2 %v14994_v33  ;;  %2535 = vmatpush.msrb.mxu0 %v14999_v34  ;;  %v2341_v33 = vld [vmem:[%s18080_s8 + $0x138] sm:$0xff]  ;;  %v2338_v34 = vld [vmem:[%s18080_s8 + $0x120] sm:$0xff] }
 0x2a7   :  { %2514 = vmatpush.msra.mxu3 %v15218_v13  ;;  %2475 = vmatpush.msra.mxu1 %v15223_v9 }
 0x2a8   :  { %2575 = vmatpush.msrb.mxu2 %v15006_v63  ;;  %2536 = vmatpush.msrb.mxu0 %v15011_v35  ;;  %v2339_v63 = vld [vmem:[%s18080_s8 + $0x128] sm:$0xff]  ;;  %v2336_v35 = vld [vmem:[%s18080_s8 + $0x110] sm:$0xff] }
 0x2a9   :  { %2515 = vmatpush.msra.mxu3 %v15232_v15  ;;  %2476 = vmatpush.msra.mxu1 %v15237_v16 }
 0x2aa   :  { %2576 = vmatpush.msrb.mxu2 %v15018_v37  ;;  %2537 = vmatpush.msrb.mxu0 %v15023_v38  ;;  %v2337_v37 = vld [vmem:[%s18080_s8 + $0x118] sm:$0xff]  ;;  %v2334_v38 = vld [vmem:[%s18080_s8 + $0x100] sm:$0xff] }
 0x2ab   :  { %2516 = vmatpush.msra.mxu3 %v15246_v17  ;;  %2477 = vmatpush.msra.mxu1 %v15251_v19 }
 0x2ac   :  { %2577 = vmatpush.msrb.mxu2 %v15030_v39  ;;  %2538 = vmatpush.msrb.mxu0 %v15035_v40  ;;  %v2335_v39 = vld [vmem:[%s18080_s8 + $0x108] sm:$0xff] }
 0x2ad   :  { %2517 = vmatpush.msra.mxu3 %v15260_v20  ;;  %2478 = vmatpush.msra.mxu1 %v15265_v21 }
 0x2ae   :  { %2578 = vmatpush.msrb.mxu2 %v15042_v41  ;;  %2539 = vmatpush.msrb.mxu0 %v15047_v43 }
 0x2af   :  { %2518 = vmatpush.msra.mxu3 %v15274_v22  ;;  %2479 = vmatpush.msra.mxu1 %v15279_v23 }
 0x2b0   :  { %2579 = vmatpush.msrb.mxu2 %v15054_v45  ;;  %2540 = vmatpush.msrb.mxu0 %v15059_v46  ;;  %v11119_v45 = vld [vmem:[#allocation4 + $0x70] sm:$0xf]  ;;  %v13690_v46 = vld [vmem:[#allocation4 + $0x74] sm:$0xf0] }
 0x2b1   :  { %2519 = vmatpush.msra.mxu3 %v15288_v24  ;;  %2480 = vmatpush.msra.mxu1 %v15293_v26 }
 0x2b2   :  { %2580 = vmatpush.msrb.mxu2 %v15066_v25  ;;  %2541 = vmatpush.msrb.mxu0 %v15071_v47  ;;  %v11183_v25 = vld [vmem:[#allocation4 + $0xf0] sm:$0xf]  ;;  %v11120_v47 = vor.u32 %v13690_v46, %v11119_v45 }
 0x2b3   :  { %2520 = vmatpush.msra.mxu3 %v15302_v27  ;;  %2481 = vmatpush.msra.mxu1 %v15307_v18 }
 0x2b4   :  { %2581 = vmatpush.msrb.mxu2 %v15078_v48  ;;  %2542 = vmatpush.msrb.mxu0 %v15083_v49  ;;  %v13706_v48 = vld [vmem:[#allocation4 + $0xf4] sm:$0xf0]  ;;  %v13689_v49 = vld [vmem:[#allocation4 + $0x74] sm:$0xf] }
 0x2b5   :  { %2521 = vmatpush.msra.mxu3 %v15316_v29  ;;  %2482 = vmatpush.msra.mxu1 %v15321_v30 }
 0x2b6   :  { %2582 = vmatpush.msrb.mxu2 %v15090_v51  ;;  %2543 = vmatpush.msrb.mxu0 %v15095_v52  ;;  %v11184_v51 = vor.u32 %v13706_v48, %v11183_v25  ;;  %v11124_v52 = vor.u32 %v13689_v49, %v11121_v50  ;;  %v11153_v25 = vld [vmem:[#allocation4 + $0xb8] sm:$0xf0]  ;;  %v11079_v50 = vld [vmem:[#allocation4 + $0x20] sm:$0xf] }
 0x2b7   :  { %2522 = vmatpush.msra.mxu3 %v2343_v31  ;;  %2483 = vmatpush.msra.mxu1 %v2340_v32 }
 0x2b8   :  { %2583 = vmatpush.msrb.mxu2 %v15102_v54  ;;  %2544 = vmatpush.msrb.mxu0 %v15107_v14  ;;  %v11185_v54 = vld [vmem:[#allocation4 + $0xf8] sm:$0xf0] }
 0x2b9   :  { %2523 = vmatpush.msra.mxu3 %v2341_v33  ;;  %2484 = vmatpush.msra.mxu1 %v2338_v34  ;;  %v11188_v14 = vor.u32 %v13705_v53, %v11185_v54 }
 0x2ba   :  { %2584 = vmatpush.msrb.mxu2 %v15114_v55  ;;  %2545 = vmatpush.msrb.mxu0 %v15119_v57  ;;  %v13688_v55 = vld [vmem:[#allocation4 + $0x64] sm:$0xf0]  ;;  %v11175_v57 = vld [vmem:[#allocation4 + $0xe0] sm:$0xf] }
 0x2bb   :  { %2524 = vmatpush.msra.mxu3 %v2339_v63  ;;  %2485 = vmatpush.msra.mxu1 %v2336_v35  ;;  %v11112_v42 = vor.u32 %v13688_v55, %v11111_v56  ;;  %v13679_v56 = vld [vmem:[#allocation4 + $0x24] sm:$0xf]  ;;  %v11081_v55 = vld [vmem:[#allocation4 + $0x28] sm:$0xf0] }
 0x2bc   :  { %2585 = vmatpush.msrb.mxu2 %v15126_v58  ;;  %2546 = vmatpush.msrb.mxu0 %v15131_v59  ;;  %v13704_v58 = vld [vmem:[#allocation4 + $0xe4] sm:$0xf0]  ;;  %v13687_v59 = vld [vmem:[#allocation4 + $0x64] sm:$0xf] }
 0x2bd   :  { %2525 = vmatpush.msra.mxu3 %v2337_v37  ;;  %2486 = vmatpush.msra.mxu1 %v2334_v38 }
 0x2be   :  { %2586 = vmatpush.msrb.mxu2 %v15140_v62  ;;  %2547 = vmatpush.msrb.mxu0 %v15155_v2  ;;  %v11176_v62 = vor.u32 %v13704_v58, %v11175_v57  ;;  %v11177_v2 = vld [vmem:[#allocation4 + $0xe8] sm:$0xf0]  ;;  %v11084_v58 = vor.u32 %v13679_v56, %v11081_v55  ;;  %v11303_v55 = vld [vmem:[#allocation4 + $0x1e0] sm:$0xf] }
 0x2bf   :  { %2553 = vmatpush.msrb.mxu1 %v15145_v0  ;;  %2526 = vmatpush.msra.mxu3 %v2335_v39  ;;  %v11116_v0 = vor.u32 %v13687_v59, %v11113_v60  ;;  %v13695_v59 = vld [vmem:[#allocation4 + $0xa4] sm:$0xf]  ;;  %v11145_v60 = vld [vmem:[#allocation4 + $0xa8] sm:$0xf0] }
 0x2c0   :  { %2587 = vmatpush.msrb.mxu2 %v15174_v5  ;;  %2548 = vmatpush.msrb.mxu0 %v15179_v7  ;;  %v13686_v5 = vld [vmem:[#allocation4 + $0x54] sm:$0xf0]  ;;  %v11167_v7 = vld [vmem:[#allocation4 + $0xd0] sm:$0xf] }
 0x2c1   :  { %2593 = vmatpush.msrb.mxu3 %v15162_v3  ;;  %2554 = vmatpush.msrb.mxu1 %v15167_v4  ;;  %v11180_v3 = vor.u32 %v13703_v1, %v11177_v2  ;;  %v11103_v4 = vld [vmem:[#allocation4 + $0x50] sm:$0xf]  ;;  %v13678_v2 = vld [vmem:[#allocation4 + $0x14] sm:$0xf0] }
 0x2c2   :  { %2588 = vmatpush.msrb.mxu2 %v15199_v10  ;;  %v13685_v10 = vld [vmem:[#allocation4 + $0x54] sm:$0xf]  ;;  %v11071_v1 = vld [vmem:[#allocation4 + $0x10] sm:$0xf] }
 0x2c3   :  { %2594 = vmatpush.msrb.mxu3 %v15186_v8  ;;  %2555 = vmatpush.msrb.mxu1 %v15191_v6  ;;  %v11104_v8 = vor.u32 %v13686_v5, %v11103_v4  ;;  %v13702_v6 = vld [vmem:[#allocation4 + $0xd4] sm:$0xf0] }
 0x2c5   :  { %2595 = vmatpush.msrb.mxu3 %v15204_v11  ;;  %2556 = vmatpush.msrb.mxu1 %v15209_v12  ;;  %v11105_v11 = vld [vmem:[#allocation4 + $0x58] sm:$0xf0] }
 0x2c7   :  { %2596 = vmatpush.msrb.mxu3 %v15218_v13  ;;  %2557 = vmatpush.msrb.mxu1 %v15223_v9  ;;  %v11168_v13 = vor.u32 %v13702_v6, %v11167_v7  ;;  %v11108_v9 = vor.u32 %v13685_v10, %v11105_v11  ;;  %v11072_v7 = vor.u32 %v13678_v2, %v11071_v1  ;;  %v13694_v6 = vld [vmem:[#allocation4 + $0x94] sm:$0xf0]  ;;  %v11305_v1 = vld [vmem:[#allocation4 + $0x1e8] sm:$0xf0]  ;;  %v11231_v2 = vld [vmem:[#allocation4 + $0x150] sm:$0xf] }
 0x2c9   :  { %2597 = vmatpush.msrb.mxu3 %v15232_v15  ;;  %2558 = vmatpush.msrb.mxu1 %v15237_v16  ;;  %v13701_v15 = vld [vmem:[#allocation4 + $0xd4] sm:$0xf]  ;;  %v11169_v16 = vld [vmem:[#allocation4 + $0xd8] sm:$0xf0] }
 0x2cb   :  { %2598 = vmatpush.msrb.mxu3 %v15246_v17  ;;  %2559 = vmatpush.msrb.mxu1 %v15251_v19  ;;  %v11172_v17 = vor.u32 %v13701_v15, %v11169_v16  ;;  %v11095_v19 = vld [vmem:[#allocation4 + $0x40] sm:$0xf] }
 0x2cd   :  { %2599 = vmatpush.msrb.mxu3 %v15260_v20  ;;  %2560 = vmatpush.msrb.mxu1 %v15265_v21  ;;  %v13684_v20 = vld [vmem:[#allocation4 + $0x44] sm:$0xf0]  ;;  %v11159_v21 = vld [vmem:[#allocation4 + $0xc0] sm:$0xf] }
 0x2cf   :  { %2600 = vmatpush.msrb.mxu3 %v15274_v22  ;;  %2561 = vmatpush.msrb.mxu1 %v15279_v23  ;;  %v11096_v22 = vor.u32 %v13684_v20, %v11095_v19  ;;  %v13700_v23 = vld [vmem:[#allocation4 + $0xc4] sm:$0xf0] }
 0x2d1   :  { %2601 = vmatpush.msrb.mxu3 %v15288_v24  ;;  %2562 = vmatpush.msrb.mxu1 %v15293_v26  ;;  %v13683_v24 = vld [vmem:[#allocation4 + $0x44] sm:$0xf]  ;;  %v11097_v26 = vld [vmem:[#allocation4 + $0x48] sm:$0xf0] }
 0x2d3   :  { %2602 = vmatpush.msrb.mxu3 %v15302_v27  ;;  %2563 = vmatpush.msrb.mxu1 %v15307_v18  ;;  %v11160_v18 = vor.u32 %v13700_v23, %v11159_v21  ;;  %v11063_v21 = vld [vmem:[#allocation4] sm:$0xf] }
 0x2d4   :  { %v11127_v23 = vld [vmem:[#allocation4 + $0x80] sm:$0xf] }
 0x2d5   :  { %2603 = vmatpush.msrb.mxu3 %v15316_v29  ;;  %2564 = vmatpush.msrb.mxu1 %v15321_v30  ;;  %v11100_v29 = vor.u32 %v13683_v24, %v11097_v26  ;;  %v13699_v30 = vld [vmem:[#allocation4 + $0xc4] sm:$0xf] }
 0x2d7   :  { %2604 = vmatpush.msrb.mxu3 %v2343_v31  ;;  %2565 = vmatpush.msrb.mxu1 %v2340_v32  ;;  %v11161_v31 = vld [vmem:[#allocation4 + $0xc8] sm:$0xf0] }
 0x2d9   :  { %2605 = vmatpush.msrb.mxu3 %v2341_v33  ;;  %2566 = vmatpush.msrb.mxu1 %v2338_v34  ;;  %v11164_v33 = vor.u32 %v13699_v30, %v11161_v31 }
 0x2db   :  { %2606 = vmatpush.msrb.mxu3 %v2339_v63  ;;  %2567 = vmatpush.msrb.mxu1 %v2336_v35  ;;  %v11087_v63 = vld [vmem:[#allocation4 + $0x30] sm:$0xf]  ;;  %v13682_v35 = vld [vmem:[#allocation4 + $0x34] sm:$0xf0] }
 0x2dd   :  { %2607 = vmatpush.msrb.mxu3 %v2337_v37  ;;  %2568 = vmatpush.msrb.mxu1 %v2334_v38  ;;  %v11151_v37 = vld [vmem:[#allocation4 + $0xb0] sm:$0xf]  ;;  %v11088_v38 = vor.u32 %v13682_v35, %v11087_v63 }
 0x2df   :  { %2608 = vmatpush.msrb.mxu3 %v2335_v39  ;;  %v13698_v39 = vld [vmem:[#allocation4 + $0xb4] sm:$0xf0] }
 0x2fc   :  { %v2386_v40 = vpop.f32.mrf.mxu0 }
 0x2fd   :  { %2467 = vmatmul.f32.vlgmr.msra.gmra.mxu0 %v2386_v40  ;;  %2507 = vmatmul.f32.vlgmr.msra.gmra.mxu2 %v2386_v40  ;;  %v13681_v40 = vld [vmem:[#allocation4 + $0x34] sm:$0xf] }
 0x2fe   :  { %2868 = vmatpush.bf16.msra.mxu0 %v11120_v47  ;;  %2894 = vmatpush.bf16.msra.mxu2 %v11124_v52  ;;  %v11143_v52 = vld [vmem:[#allocation4 + $0xa0] sm:$0xf] }
 0x302   :  { %2869 = vmatpush.bf16.msra.mxu0 %v11112_v42  ;;  %2895 = vmatpush.bf16.msra.mxu2 %v11116_v0  ;;  %v11148_v0 = vor.u32 %v13695_v59, %v11145_v60  ;;  %v11241_v59 = vld [vmem:[#allocation4 + $0x168] sm:$0xf0]  ;;  %v13735_v60 = vld [vmem:[#allocation4 + $0x1e4] sm:$0xf] }
 0x304   :  { %v2428_v41 = vpop.f32.mrf.mxu2 }
 0x305   :  { %2549 = vmatmul.f32.vlgmr.msrb.gmra.mxu0 %v2428_v41  ;;  %2589 = vmatmul.f32.vlgmr.msrb.gmra.mxu2 %v2428_v41  ;;  %v11152_v41 = vor.u32 %v13698_v39, %v11151_v37  ;;  %v11247_v39 = vld [vmem:[#allocation4 + $0x170] sm:$0xf] }
 0x306   :  { %2870 = vmatpush.bf16.msra.mxu0 %v11104_v8  ;;  %2896 = vmatpush.bf16.msra.mxu2 %v11108_v9  ;;  %v11135_v8 = vld [vmem:[#allocation4 + $0x90] sm:$0xf]  ;;  %v13693_v9 = vld [vmem:[#allocation4 + $0x94] sm:$0xf] }
 0x307   :  { %v11136_v11 = vor.u32 %v13694_v6, %v11135_v8  ;;  %v13734_v8 = vld [vmem:[#allocation4 + $0x1d4] sm:$0xf0] }
 0x30a   :  { %2871 = vmatpush.bf16.msra.mxu0 %v11096_v22  ;;  %2897 = vmatpush.bf16.msra.mxu2 %v11100_v29  ;;  %v13676_v22 = vld [vmem:[#allocation4 + $0x4] sm:$0xf0]  ;;  %v13675_v29 = vld [vmem:[#allocation4 + $0x4] sm:$0xf] }
 0x30e   :  { %2872 = vmatpush.bf16.msra.mxu0 %v11088_v38 }
 0x31b   :  { %v2406_v43 = vpop.f32.mrf.mxu1 }
 0x31c   :  { %2487 = vmatmul.f32.vlgmr.msra.gmra.mxu1 %v2406_v43  ;;  %2527 = vmatmul.f32.vlgmr.msra.gmra.mxu3 %v2406_v43  ;;  %v11089_v43 = vld [vmem:[#allocation4 + $0x38] sm:$0xf0] }
 0x31d   :  { %2881 = vmatpush.bf16.msra.mxu1 %v11184_v51  ;;  %2907 = vmatpush.bf16.msra.mxu3 %v11188_v14  ;;  %v11092_v46 = vor.u32 %v13681_v40, %v11089_v43  ;;  %v13680_v51 = vld [vmem:[#allocation4 + $0x24] sm:$0xf0]  ;;  %v13722_v40 = vld [vmem:[#allocation4 + $0x174] sm:$0xf0] }
 0x31e   :  { %v11080_v54 = vor.u32 %v13680_v51, %v11079_v50  ;;  %v13696_v14 = vld [vmem:[#allocation4 + $0xa4] sm:$0xf0]  ;;  %v13738_v43 = vld [vmem:[#allocation4 + $0x1f4] sm:$0xf0]  ;;  %v11313_v51 = vld [vmem:[#allocation4 + $0x1f8] sm:$0xf0] }
 0x31f   :  { %2898 = vmatpush.bf16.msra.mxu2 %v11092_v46  ;;  %v11144_v42 = vor.u32 %v13696_v14, %v11143_v52  ;;  %v11248_v46 = vor.u32 %v13722_v40, %v11247_v39  ;;  %v11239_v52 = vld [vmem:[#allocation4 + $0x160] sm:$0xf]  ;;  %v11279_v39 = vld [vmem:[#allocation4 + $0x1b0] sm:$0xf] }
 0x320   :  { %2873 = vmatpush.bf16.msra.mxu0 %v11080_v54 }
 0x321   :  { %2882 = vmatpush.bf16.msra.mxu1 %v11176_v62  ;;  %2908 = vmatpush.bf16.msra.mxu3 %v11180_v3 }
 0x323   :  { %v2448_v44 = vpop.f32.mrf.mxu3  ;;  %2899 = vmatpush.bf16.msra.mxu2 %v11084_v58  ;;  %v13719_v58 = vld [vmem:[#allocation4 + $0x164] sm:$0xf] }
 0x324   :  { %2569 = vmatmul.f32.vlgmr.msrb.gmra.mxu1 %v2448_v44  ;;  %2609 = vmatmul.f32.vlgmr.msrb.gmra.mxu3 %v2448_v44  ;;  %v13697_v44 = vld [vmem:[#allocation4 + $0xb4] sm:$0xf] }
 0x325   :  { %2883 = vmatpush.bf16.msra.mxu1 %v11168_v13  ;;  %2909 = vmatpush.bf16.msra.mxu3 %v11172_v17  ;;  %v11156_v49 = vor.u32 %v13697_v44, %v11153_v25  ;;  %v11073_v13 = vld [vmem:[#allocation4 + $0x18] sm:$0xf0]  ;;  %v13721_v25 = vld [vmem:[#allocation4 + $0x174] sm:$0xf] }
 0x326   :  { %2874 = vmatpush.bf16.msra.mxu0 %v11072_v7  ;;  %v11137_v17 = vld [vmem:[#allocation4 + $0x98] sm:$0xf0]  ;;  %v11295_v7 = vld [vmem:[#allocation4 + $0x1d0] sm:$0xf] }
 0x327   :  { %v11140_v20 = vor.u32 %v13693_v9, %v11137_v17  ;;  %v11297_v17 = vld [vmem:[#allocation4 + $0x1d8] sm:$0xf0] }
 0x329   :  { %2884 = vmatpush.bf16.msra.mxu1 %v11160_v18  ;;  %2910 = vmatpush.bf16.msra.mxu3 %v11164_v33  ;;  %v13692_v18 = vld [vmem:[#allocation4 + $0x84] sm:$0xf0]  ;;  %v13691_v33 = vld [vmem:[#allocation4 + $0x84] sm:$0xf] }
 0x32a   :  { %v11128_v31 = vor.u32 %v13692_v18, %v11127_v23  ;;  %v11287_v23 = vld [vmem:[#allocation4 + $0x1c0] sm:$0xf]  ;;  %v11225_v18 = vld [vmem:[#allocation4 + $0x148] sm:$0xf0] }
 0x32d   :  { %2885 = vmatpush.bf16.msra.mxu1 %v11152_v41  ;;  %2911 = vmatpush.bf16.msra.mxu3 %v11156_v49  ;;  %v11311_v41 = vld [vmem:[#allocation4 + $0x1f0] sm:$0xf] }
 0x32e   :  { %v11312_v49 = vor.u32 %v13738_v43, %v11311_v41  ;;  %v13730_v43 = vld [vmem:[#allocation4 + $0x1b4] sm:$0xf0] }
 0x331   :  { %2886 = vmatpush.bf16.msra.mxu1 %v11144_v42  ;;  %2912 = vmatpush.bf16.msra.mxu3 %v11148_v0  ;;  %v11244_v0 = vor.u32 %v13719_v58, %v11241_v59  ;;  %v11209_v59 = vld [vmem:[#allocation4 + $0x128] sm:$0xf0] }
 0x335   :  { %2887 = vmatpush.bf16.msra.mxu1 %v11136_v11  ;;  %2913 = vmatpush.bf16.msra.mxu3 %v11140_v20  ;;  %v13717_v11 = vld [vmem:[#allocation4 + $0x154] sm:$0xf]  ;;  %v11223_v20 = vld [vmem:[#allocation4 + $0x140] sm:$0xf] }
 0x339   :  { %2888 = vmatpush.bf16.msra.mxu1 %v11128_v31 }
 0x33d   :  { %3128 = vmatpush.bf16.msrb.mxu1 %v11312_v49 }
 0x37a   :  { %v2468_v12 = vpop.f32.mrf.mxu0 }
 0x380   :  { %v2508_v34 = vpop.f32.mrf.mxu2 }
 0x382   :  { %v2550_v48 = vpop.f32.mrf.mxu0 }
 0x388   :  { %v2590_v10 = vpop.f32.mrf.mxu2 }
 0x399   :  { %v2488_v27 = vpop.f32.mrf.mxu1 }
 0x39a   :  { %v2489_v32 = vadd.f32 %v2488_v27, %v2468_v12  ;;  %v13677_v12 = vld [vmem:[#allocation4 + $0x14] sm:$0xf]  ;;  %v11064_v27 = vor.u32 %v13676_v22, %v11063_v21  ;;  %v13716_v21 = vld [vmem:[#allocation4 + $0x144] sm:$0xf0] }
 0x39b   :  { %v11076_v16 = vor.u32 %v13677_v12, %v11073_v13  ;;  %v11233_v12 = vld [vmem:[#allocation4 + $0x158] sm:$0xf0]  ;;  %v13733_v13 = vld [vmem:[#allocation4 + $0x1d4] sm:$0xf] }
 0x39c   :  { %v15396_v45 = vmul.f32 0.03125, %v2489_v32  ;;  %v11065_v32 = vld [vmem:[#allocation4 + $0x8] sm:$0xf0]  ;;  %2875 = vmatpush.bf16.msra.mxu0 %v11064_v27  ;;  %v11224_v27 = vor.u32 %v13716_v21, %v11223_v20  ;;  %v13725_v20 = vld [vmem:[#allocation4 + $0x194] sm:$0xf] }
 0x39d   :  { %2900 = vmatpush.bf16.msra.mxu2 %v11076_v16  ;;  %v11068_v37 = vor.u32 %v13675_v29, %v11065_v32  ;;  %v11236_v16 = vor.u32 %v13717_v11, %v11233_v12  ;;  %v13731_v29 = vld [vmem:[#allocation4 + $0x1c4] sm:$0xf]  ;;  %v13710_v11 = vld [vmem:[#allocation4 + $0x114] sm:$0xf0]  ;;  %v11263_v12 = vld [vmem:[#allocation4 + $0x190] sm:$0xf] }
 0x39e   :  { %v2615_v3 = vmul.f32 %v15396_v45, %v15396_v45  ;;  %v11265_v21 = vld [vmem:[#allocation4 + $0x198] sm:$0xf0] }
 0x39f   :  { %v2528_v47 = vpop.f32.mrf.mxu3 }
 0x3a0   :  { %v2529_v53 = vadd.f32 %v2528_v47, %v2508_v34  ;;  %v11129_v34 = vld [vmem:[#allocation4 + $0x88] sm:$0xf0]  ;;  %v11249_v47 = vld [vmem:[#allocation4 + $0x178] sm:$0xf0]  ;;  %3115 = vmatpush.bf16.msrb.mxu0 %v11248_v46  ;;  %v15422_v46 = vld [vmem:[%s18079_s7] sm:$0xf] }
 0x3a1   :  { %v2570_v57 = vpop.f32.mrf.mxu1  ;;  %v11132_v38 = vor.u32 %v13691_v33, %v11129_v34  ;;  %2901 = vmatpush.bf16.msra.mxu2 %v11068_v37  ;;  %v11252_v50 = vor.u32 %v13721_v25, %v11249_v47  ;;  %v11215_v37 = vld [vmem:[#allocation4 + $0x130] sm:$0xf]  ;;  %v11217_v47 = vld [vmem:[#allocation4 + $0x138] sm:$0xf0] }
 0x3a2   :  { %v2571_v62 = vadd.f32 %v2570_v57, %v2550_v48  ;;  %v15400_v4 = vmul.f32 0.03125, %v2529_v53  ;;  %v13737_v48 = vld [vmem:[#allocation4 + $0x1f4] sm:$0xf]  ;;  %v13720_v53 = vld [vmem:[#allocation4 + $0x164] sm:$0xf0] }
 0x3a3   :  { %2914 = vmatpush.bf16.msra.mxu3 %v11132_v38  ;;  %v11316_v14 = vor.u32 %v13737_v48, %v11313_v51  ;;  %v11240_v56 = vor.u32 %v13720_v53, %v11239_v52  ;;  %v13736_v57 = vld [vmem:[#allocation4 + $0x1e4] sm:$0xf0]  ;;  %v13714_v38 = vld [vmem:[#allocation4 + $0x134] sm:$0xf0]  ;;  %v13729_v48 = vld [vmem:[#allocation4 + $0x1b4] sm:$0xf] }
 0x3a4   :  { %v2613_v5 = vmul.f32 0.03125, %v2571_v62  ;;  %v2616_v30 = vmul.f32 %v15400_v4, %v15400_v4  ;;  %v11304_v42 = vor.u32 %v13736_v57, %v11303_v55  ;;  %v11216_v25 = vor.u32 %v13714_v38, %v11215_v37  ;;  %v11281_v52 = vld [vmem:[#allocation4 + $0x1b8] sm:$0xf0]  ;;  %v11207_v53 = vld [vmem:[#allocation4 + $0x120] sm:$0xf] }
 0x3a5   :  { %3141 = vmatpush.bf16.msrb.mxu2 %v11252_v50  ;;  %3116 = vmatpush.bf16.msrb.mxu0 %v11240_v56  ;;  %v11280_v50 = vor.u32 %v13730_v43, %v11279_v39  ;;  %v11271_v56 = vld [vmem:[#allocation4 + $0x1a0] sm:$0xf]  ;;  %v13728_v55 = vld [vmem:[#allocation4 + $0x1a4] sm:$0xf0]  ;;  %v13711_v57 = vld [vmem:[#allocation4 + $0x124] sm:$0xf] }
 0x3a6   :  { %v2617_v15 = vsub.f32 %v2613_v5, %v2615_v3  ;;  %v11308_v3 = vor.u32 %v13735_v60, %v11305_v1  ;;  %v13718_v5 = vld [vmem:[#allocation4 + $0x154] sm:$0xf0]  ;;  %3129 = vmatpush.bf16.msrb.mxu1 %v11304_v42  ;;  %v13727_v60 = vld [vmem:[#allocation4 + $0x1a4] sm:$0xf]  ;;  %v2645_v1 = vperm.slane %v15422_v46, 2 }
 0x3a7   :  { %v2610_v19 = vpop.f32.mrf.mxu3  ;;  %3154 = vmatpush.bf16.msrb.mxu3 %v11316_v14  ;;  %v11284_v14 = vor.u32 %v13729_v48, %v11281_v52  ;;  %v11257_v37 = vld [vmem:[#allocation4 + $0x188] sm:$0xf0] }
 0x3a8   :  { %v2619_v24 = vmax.f32 %v2617_v15, 0.0  ;;  %v2611_v26 = vadd.f32 %v2610_v19, %v2590_v10  ;;  %v11232_v10 = vor.u32 %v13718_v5, %v11231_v2  ;;  %v11296_v15 = vor.u32 %v13734_v8, %v11295_v7  ;;  %v11199_v5 = vld [vmem:[#allocation4 + $0x110] sm:$0xf]  ;;  %v13769_v7 = vld [vmem:[#allocation4 + $0x2f4] sm:$0xf] }
 0x3a9   :  { %3142 = vmatpush.bf16.msrb.mxu2 %v11244_v0  ;;  %v11300_v19 = vor.u32 %v13733_v13, %v11297_v17  ;;  %v2644_v0 = vperm.slane %v15422_v46, 0 }
 0x3aa   :  { %v15404_v63 = vadd.f32 1e-05, %v2619_v24  ;;  %v2614_v35 = vmul.f32 0.03125, %v2611_v26  ;;  %v13732_v24 = vld [vmem:[#allocation4 + $0x1c4] sm:$0xf0]  ;;  %3117 = vmatpush.bf16.msrb.mxu0 %v11232_v10  ;;  %3130 = vmatpush.bf16.msrb.mxu1 %v11296_v15  ;;  %v11212_v10 = vor.u32 %v13711_v57, %v11209_v59 }
 0x3ab   :  { %3155 = vmatpush.bf16.msrb.mxu3 %v11308_v3  ;;  %v13715_v26 = vld [vmem:[#allocation4 + $0x144] sm:$0xf]  ;;  %v11288_v32 = vor.u32 %v13732_v24, %v11287_v23  ;;  %v11273_v3 = vld [vmem:[#allocation4 + $0x1a8] sm:$0xf0]  ;;  %v13709_v15 = vld [vmem:[#allocation4 + $0x114] sm:$0xf] }
 0x3ac   :  { %14202 = vrsqrt.f32 %v15404_v63  ;;  %v2618_v44 = vsub.f32 %v2614_v35, %v2616_v30  ;;  %v11289_v30 = vld [vmem:[#allocation4 + $0x1c8] sm:$0xf0]  ;;  %v11228_v33 = vor.u32 %v13715_v26, %v11225_v18  ;;  %vm2629_vm7 = vweird.f32 %v15404_v63  ;;  %v13708_v18 = vld [vmem:[#allocation4 + $0x104] sm:$0xf0] }
 0x3ad   :  { %3143 = vmatpush.bf16.msrb.mxu2 %v11236_v16  ;;  %v11292_v35 = vor.u32 %v13731_v29, %v11289_v30  ;;  %v11276_v13 = vor.u32 %v13727_v60, %v11273_v3  ;;  %v11201_v16 = vld [vmem:[#allocation4 + $0x118] sm:$0xf0]  ;;  %v2920_v3 = vld [vmem:[%s18078_s6] sm:$0xff] }
 0x3ae   :  { %v2620_v54 = vmax.f32 %v2618_v44, 0.0  ;;  %v13713_v44 = vld [vmem:[#allocation4 + $0x134] sm:$0xf]  ;;  %3118 = vmatpush.bf16.msrb.mxu0 %v11224_v27  ;;  %3131 = vmatpush.bf16.msrb.mxu1 %v11288_v32  ;;  %v11204_v26 = vor.u32 %v13709_v15, %v11201_v16  ;;  %v11191_v27 = vld [vmem:[#allocation4 + $0x100] sm:$0xf] }
 0x3af   :  { %3156 = vmatpush.bf16.msrb.mxu3 %v11300_v19  ;;  %v11220_v51 = vor.u32 %v13713_v44, %v11217_v47  ;;  %v13707_v32 = vld [vmem:[#allocation4 + $0x104] sm:$0xf] }
 0x3b0   :  { %v15407_v62 = vadd.f32 1e-05, %v2620_v54  ;;  %v13712_v54 = vld [vmem:[#allocation4 + $0x124] sm:$0xf0] }
 0x3b1   :  { %3144 = vmatpush.bf16.msrb.mxu2 %v11228_v33  ;;  %v11208_v2 = vor.u32 %v13712_v54, %v11207_v53  ;;  %v11193_v33 = vld [vmem:[#allocation4 + $0x108] sm:$0xf0] }
 0x3b2   :  { %v15409_v6 = vpop.eup %14202  ;;  %14204 = vrsqrt.f32 %v15407_v62  ;;  %3119 = vmatpush.bf16.msrb.mxu0 %v11216_v25  ;;  %3132 = vmatpush.bf16.msrb.mxu1 %v11280_v50  ;;  %vm2639_vm10 = vweird.f32 %v15407_v62 }
 0x3b3   :  { %v2624_v9 = vmul.f32 %v15409_v6, %v15404_v63  ;;  %vm2630_vm6 = vweird.f32 %v15409_v6  ;;  %3157 = vmatpush.bf16.msrb.mxu3 %v11292_v35  ;;  %v11272_v63 = vor.u32 %v13728_v55, %v11271_v56  ;;  %v13723_v35 = vld [vmem:[#allocation4 + $0x184] sm:$0xf] }
 0x3b4   :  { %vm15432_vm8 = vmor %vm2629_vm7, %vm2630_vm6  ;;  %v11260_v44 = vor.u32 %v13723_v35, %v11257_v37 }
 0x3b5   :  { %v2625_v22 = vmul.f32 %v15409_v6, %v2624_v9  ;;  %3145 = vmatpush.bf16.msrb.mxu2 %v11220_v51  ;;  %v13726_v9 = vld [vmem:[#allocation4 + $0x194] sm:$0xf0] }
 0x3b6   :  { %3120 = vmatpush.bf16.msrb.mxu0 %v11208_v2  ;;  %3133 = vmatpush.bf16.msrb.mxu1 %v11272_v63  ;;  %v11264_v24 = vor.u32 %v13726_v9, %v11263_v12  ;;  %v11379_v2 = vld [vmem:[#allocation4 + $0x268] sm:$0xf0]  ;;  %v13749_v63 = vld [vmem:[#allocation4 + $0x254] sm:$0xf] }
 0x3b7   :  { %v2626_v31 = vmul.f32 0.5, %v2625_v22  ;;  %3158 = vmatpush.bf16.msrb.mxu3 %v11284_v14  ;;  %v11200_v22 = vor.u32 %v13710_v11, %v11199_v5 }
 0x3b8   :  { %v15415_v34 = vpop.eup %14204 }
 0x3b9   :  { %v2627_v40 = vsub.f32 1.5, %v2626_v31  ;;  %v2634_v41 = vmul.f32 %v15415_v34, %v15407_v62  ;;  %vm2640_vm9 = vweird.f32 %v15415_v34  ;;  %3146 = vmatpush.bf16.msrb.mxu2 %v11212_v10  ;;  %v11268_v62 = vor.u32 %v13725_v20, %v11265_v21  ;;  %v13724_v31 = vld [vmem:[#allocation4 + $0x184] sm:$0xf0]  ;;  %v11371_v10 = vld [vmem:[#allocation4 + $0x258] sm:$0xf0] }
 0x3ba   :  { %vm2641_vm11 = vmor %vm2639_vm10, %vm2640_vm9  ;;  %3121 = vmatpush.bf16.msrb.mxu0 %v11200_v22  ;;  %3134 = vmatpush.bf16.msrb.mxu1 %v11264_v24  ;;  %v11443_v20 = vld [vmem:[#allocation4 + $0x2e8] sm:$0xf0]  ;;  %v13747_v21 = vld [vmem:[#allocation4 + $0x244] sm:$0xf] }
 0x3bb   :  { %v2635_v49 = vmul.f32 %v15415_v34, %v2634_v41  ;;  %v2628_v42 = vmul.f32 %v15409_v6, %v2627_v40  ;;  %3159 = vmatpush.bf16.msrb.mxu3 %v11276_v13  ;;  %v11196_v40 = vor.u32 %v13707_v32, %v11193_v33  ;;  %v11363_v22 = vld [vmem:[#allocation4 + $0x248] sm:$0xf0] }
 0x3bd   :  { %v2636_v58 = vmul.f32 0.5, %v2635_v49  ;;  %v2632_v17 = vsel %vm15432_vm8, %v15409_v6, %v2628_v42  ;;  %v11255_v6 = vld [vmem:[#allocation4 + $0x180] sm:$0xf]  ;;  %3147 = vmatpush.bf16.msrb.mxu2 %v11204_v26  ;;  %v11366_v26 = vor.u32 %v13747_v21, %v11363_v22  ;;  %v13766_v22 = vld [vmem:[#allocation4 + $0x2d4] sm:$0xf0] }
 0x3be   :  { %v2648_v29 = vmul.f32 %v2644_v0, %v2632_v17  ;;  %v11256_v39 = vor.u32 %v13724_v31, %v11255_v6  ;;  %v11374_v17 = vor.u32 %v13749_v63, %v11371_v10  ;;  %v11385_v6 = vld [vmem:[#allocation4 + $0x270] sm:$0xf]  ;;  %v11361_v63 = vld [vmem:[#allocation4 + $0x240] sm:$0xf]  ;;  %v13748_v10 = vld [vmem:[#allocation4 + $0x244] sm:$0xf0] }
 0x3bf   :  { %v2637_v8 = vsub.f32 1.5, %v2636_v58  ;;  %3160 = vmatpush.bf16.msrb.mxu3 %v11268_v62  ;;  %v11355_v62 = vld [vmem:[#allocation4 + $0x238] sm:$0xf0] }
 0x3c0   :  { %v2650_v41 = vmul.f32 %v2648_v29, %v15396_v45  ;;  %3135 = vmatpush.bf16.msrb.mxu1 %v11256_v39  ;;  %v2659_v48 = vperm.slane %v2648_v29, 0  ;;  %v13754_v29 = vld [vmem:[#allocation4 + $0x274] sm:$0xf0]  ;;  %v13763_v39 = vld [vmem:[#allocation4 + $0x2c4] sm:$0xf] }
 0x3c1   :  { %v2638_v19 = vmul.f32 %v15415_v34, %v2637_v8  ;;  %3148 = vmatpush.bf16.msrb.mxu2 %v11196_v40  ;;  %v11451_v8 = vld [vmem:[#allocation4 + $0x2f8] sm:$0xf0]  ;;  %v11427_v40 = vld [vmem:[#allocation4 + $0x2c8] sm:$0xf0] }
 0x3c2   :  { %v2661_v52 = vmul.f32 %v2659_v48, %v14966_v28  ;;  %v13753_v28 = vld [vmem:[#allocation4 + $0x274] sm:$0xf]  ;;  %v11454_v13 = vor.u32 %v13769_v7, %v11451_v8  ;;  %v13759_v7 = vld [vmem:[#allocation4 + $0x2a4] sm:$0xf]  ;;  %v11411_v8 = vld [vmem:[#allocation4 + $0x2a8] sm:$0xf0] }
 0x3c3   :  { %v2642_v23 = vsel %vm2641_vm11, %v15415_v34, %v2638_v19  ;;  %v11192_v34 = vor.u32 %v13708_v18, %v11191_v27  ;;  %3161 = vmatpush.bf16.msrb.mxu3 %v11260_v44  ;;  %v13767_v19 = vld [vmem:[#allocation4 + $0x2e4] sm:$0xf]  ;;  %v13765_v27 = vld [vmem:[#allocation4 + $0x2d4] sm:$0xf]  ;;  %v11435_v18 = vld [vmem:[#allocation4 + $0x2d8] sm:$0xf0] }
 0x3c4   :  { %v2649_v30 = vmul.f32 %v2645_v1, %v2642_v23  ;;  %v13751_v1 = vld [vmem:[#allocation4 + $0x264] sm:$0xf]  ;;  %v2921_v23 = vld [vmem:[%s18078_s6 + $0x8] sm:$0xff]  ;;  %v11446_v24 = vor.u32 %v13767_v19, %v11443_v20  ;;  %v11438_v33 = vor.u32 %v13765_v27, %v11435_v18  ;;  %v11317_v48 = vld [vmem:[%s18078_s6 + $0x10] sm:$0xff]  ;;  %v11362_v20 = vor.u32 %v13748_v10, %v11361_v63 }
 0x3c5   :  { %3122 = vmatpush.bf16.msrb.mxu0 %v11192_v34  ;;  %v11382_v5 = vor.u32 %v13751_v1, %v11379_v2  ;;  %v13752_v44 = vld [vmem:[#allocation4 + $0x264] sm:$0xf0]  ;;  %v11433_v19 = vld [vmem:[#allocation4 + $0x2d0] sm:$0xf]  ;;  %v13746_v18 = vld [vmem:[#allocation4 + $0x234] sm:$0xf0] }
 0x3c6   :  { %v2651_v38 = vmul.f32 %v2649_v30, %v15400_v4  ;;  %v2660_v49 = vperm.slane %v2649_v30, 0  ;;  %v13745_v30 = vld [vmem:[#allocation4 + $0x234] sm:$0xf]  ;;  %v11353_v27 = vld [vmem:[#allocation4 + $0x230] sm:$0xf]  ;;  %vm7607_vm11 = vcmask 523264  }
 0x3c7   :  { %v11358_v34 = vor.u32 %v13745_v30, %v11355_v62 }
 0x3c8   :  { %v2654_v43 = vrot.slane %v2651_v38, 6  ;;  %v2662_v45 = vmul.f32 %v2660_v49, %v15135_v61  ;;  %v11387_v61 = vld [vmem:[#allocation4 + $0x278] sm:$0xf0]  ;;  %v11386_v38 = vor.u32 %v13754_v29, %v11385_v6  ;;  %v11449_v49 = vld [vmem:[#allocation4 + $0x2f0] sm:$0xf] }
 0x3c9   :  { %v11390_v60 = vor.u32 %v13753_v28, %v11387_v61  ;;  %v11511_v6 = vld [vmem:[#allocation4 + $0x360] sm:$0xf]  ;;  %v13784_v29 = vld [vmem:[#allocation4 + $0x364] sm:$0xf0] }
 0x3ca   :  { %v2655_v25 = vsel %vm2099_vm4, %v2650_v41, %v2654_v43  ;;  %v11377_v41 = vld [vmem:[#allocation4 + $0x260] sm:$0xf] }
 0x3cb   :  { %v2656_v47 = vrot.slane %v2655_v25, 7  ;;  %v13743_v25 = vld [vmem:[#allocation4 + $0x224] sm:$0xf] }
 0x3cd   :  { %v2658_v4 = vsub.f32 %v15422_v46, %v2656_v47  ;;  %v11347_v47 = vld [vmem:[#allocation4 + $0x228] sm:$0xf0] }
 0x3cf   :  { %v2664_v50 = vperm.slane %v2658_v4, 1  ;;  %v2665_v51 = vperm.slane %v2658_v4, 3  ;;  %v11430_v4 = vor.u32 %v13763_v39, %v11427_v40  ;;  %v11583_v39 = vld [vmem:[#allocation4 + $0x3f0] sm:$0xf]  ;;  %v11512_v40 = vor.u32 %v13784_v29, %v11511_v6  ;;  %v13774_v6 = vld [vmem:[#allocation4 + $0x314] sm:$0xf0] }
 0x3d1   :  { %v2668_v53 = vperm.slane %v2664_v50, 1  ;;  %v2669_v54 = vperm.slane %v2665_v51, 1  ;;  %v13770_v50 = vld [vmem:[#allocation4 + $0x2f4] sm:$0xf0]  ;;  %v11378_v51 = vor.u32 %v13752_v44, %v11377_v41  ;;  %v13744_v44 = vld [vmem:[#allocation4 + $0x224] sm:$0xf0] }
 0x3d2   :  { %v11450_v61 = vor.u32 %v13770_v50, %v11449_v49  ;;  %v13802_v41 = vld [vmem:[#allocation4 + $0x3f4] sm:$0xf0] }
 0x3d3   :  { %v2670_v14 = vadd.f32 %v2668_v53, %v2661_v52  ;;  %v2671_v56 = vadd.f32 %v2669_v54, %v2662_v45  ;;  %v11350_v52 = vor.u32 %v13743_v25, %v11347_v47  ;;  %v13761_v45 = vld [vmem:[#allocation4 + $0x2b4] sm:$0xf]  ;;  %v11419_v53 = vld [vmem:[#allocation4 + $0x2b8] sm:$0xf0]  ;;  %v11369_v54 = vld [vmem:[#allocation4 + $0x250] sm:$0xf]  ;;  %v11584_v49 = vor.u32 %v13802_v41, %v11583_v39 }
 0x3d4   :  { %v11503_v25 = vld [vmem:[#allocation4 + $0x350] sm:$0xf]  ;;  %v13782_v47 = vld [vmem:[#allocation4 + $0x354] sm:$0xf0]  ;;  %v11527_v41 = vld [vmem:[#allocation4 + $0x380] sm:$0xf] }
 0x3d5   :  { %v2672_v55 = vmax.f32 %v2670_v14, 0.0  ;;  %v2673_v57 = vmax.f32 %v2671_v56, 0.0  ;;  %v13750_v14 = vld [vmem:[#allocation4 + $0x254] sm:$0xf0]  ;;  %v13741_v56 = vld [vmem:[#allocation4 + $0x214] sm:$0xf] }
 0x3d6   :  { %v13790_v39 = vld [vmem:[#allocation4 + $0x394] sm:$0xf0] }
 0x3d7   :  { %v15451_v42 = vpack.c.bf16 %v2672_v55, %v2672_v55  ;;  %v15453_v58 = vpack.c.bf16 %v2673_v57, %v2673_v57  ;;  %v11339_v55 = vld [vmem:[#allocation4 + $0x218] sm:$0xf0] }
 0x3d9   :  { %2876 = vmatmul.bf16.vlgmr.msra.gmra.mxu0 %v15451_v42  ;;  %2889 = vmatmul.bf16.vlgmr.msra.gmra.mxu1 %v15453_v58 }
 0x3da   :  { %2902 = vmatmul.bf16.vlgmr.msra.gmra.mxu2 %v15451_v42  ;;  %2915 = vmatmul.bf16.vlgmr.msra.gmra.mxu3 %v15453_v58 }
 0x3e9   :  { %3123 = vmatmul.bf16.vlgmr.msrb.gmra.mxu0 %v15451_v42  ;;  %3136 = vmatmul.bf16.vlgmr.msrb.gmra.mxu1 %v15453_v58 }
 0x3ea   :  { %3149 = vmatmul.bf16.vlgmr.msrb.gmra.mxu2 %v15451_v42  ;;  %3162 = vmatmul.bf16.vlgmr.msrb.gmra.mxu3 %v15453_v58 }
 0x456   :  { %v2877_v46 = vpop.f32.mrf.mxu0  ;;  %v2890_v59 = vpop.f32.mrf.mxu1 }
 0x457   :  { %v2891_v0 = vadd.f32 %v2890_v59, %v2877_v46  ;;  %v11422_v46 = vor.u32 %v13761_v45, %v11419_v53  ;;  %v11441_v59 = vld [vmem:[#allocation4 + $0x2e0] sm:$0xf]  ;;  %v11504_v53 = vor.u32 %v13782_v47, %v11503_v25 }
 0x458   :  { %v11575_v45 = vld [vmem:[#allocation4 + $0x3e0] sm:$0xf] }
 0x459   :  { %3243 = vmatpush.msra.mxu2 %v2891_v0 }
 0x45a   :  { %11323 = vmatmul.msk.f32.vlgmr.msra.gmra.mxu2 %vm1647_vm3, %v2920_v3 }
 0x45b   :  { %3493 = vmatpush.bf16.msrb.mxu2 %v11390_v60  ;;  %v13768_v60 = vld [vmem:[#allocation4 + $0x2e4] sm:$0xf0] }
 0x45d   :  { %v2903_v11 = vpop.f32.mrf.mxu2  ;;  %v2916_v12 = vpop.f32.mrf.mxu3 }
 0x45e   :  { %v2917_v9 = vadd.f32 %v2916_v12, %v2903_v11  ;;  %v2879_v15 = vpop.f32.mrf.mxu0  ;;  %v2892_v16 = vpop.f32.mrf.mxu1  ;;  %v13739_v11 = vld [vmem:[#allocation4 + $0x204] sm:$0xf]  ;;  %v11331_v12 = vld [vmem:[#allocation4 + $0x208] sm:$0xf0] }
 0x45f   :  { %3494 = vmatpush.bf16.msrb.mxu2 %v11382_v5  ;;  %v11342_v5 = vor.u32 %v13741_v56, %v11339_v55  ;;  %v11318_v15 = vld [vmem:[%s18078_s6 + $0x18] sm:$0xff]  ;;  %v11442_v16 = vor.u32 %v13768_v60, %v11441_v59  ;;  %v11334_v21 = vor.u32 %v13739_v11, %v11331_v12  ;;  %v11495_v55 = vld [vmem:[#allocation4 + $0x340] sm:$0xf]  ;;  %v13760_v60 = vld [vmem:[#allocation4 + $0x2a4] sm:$0xf0] }
 0x460   :  { %3266 = vmatpush.msra.mxu3 %v2917_v9  ;;  %v13786_v9 = vld [vmem:[#allocation4 + $0x374] sm:$0xf0]  ;;  %v11409_v59 = vld [vmem:[#allocation4 + $0x2a0] sm:$0xf]  ;;  %v11401_v12 = vld [vmem:[#allocation4 + $0x290] sm:$0xf] }
 0x461   :  { %11325 = vmatmul.msk.f32.vlgmr.msra.gmra.mxu3 %vm1647_vm3, %v2920_v3  ;;  %v11370_v3 = vor.u32 %v13750_v14, %v11369_v54  ;;  %v13800_v54 = vld [vmem:[#allocation4 + $0x3e4] sm:$0xf0]  ;;  %v11337_v14 = vld [vmem:[#allocation4 + $0x210] sm:$0xf]  ;;  %v13742_v56 = vld [vmem:[#allocation4 + $0x214] sm:$0xf0]  ;;  %v11410_v63 = vor.u32 %v13760_v60, %v11409_v59 }
 0x462   :  { %3506 = vmatpush.bf16.msrb.mxu3 %v11454_v13  ;;  %11324 = vmatmul.msk.f32.gmra.mxu2 %vm1647_vm3, %v2921_v23  ;;  %v11519_v13 = vld [vmem:[#allocation4 + $0x370] sm:$0xf] }
 0x463   :  { %3495 = vmatpush.bf16.msrb.mxu2 %v11374_v17  ;;  %v11414_v17 = vor.u32 %v13759_v7, %v11411_v8  ;;  %v11487_v7 = vld [vmem:[#allocation4 + $0x330] sm:$0xf]  ;;  %v13778_v8 = vld [vmem:[#allocation4 + $0x334] sm:$0xf0] }
 0x465   :  { %v2905_v31 = vpop.f32.mrf.mxu2  ;;  %v2918_v32 = vpop.f32.mrf.mxu3 }
 0x466   :  { %3507 = vmatpush.bf16.msrb.mxu3 %v11446_v24  ;;  %v3124_v35 = vpop.f32.mrf.mxu0  ;;  %v3137_v37 = vpop.f32.mrf.mxu1  ;;  %v11403_v24 = vld [vmem:[#allocation4 + $0x298] sm:$0xf0]  ;;  %v11434_v31 = vor.u32 %v13766_v22, %v11433_v19  ;;  %v13776_v19 = vld [vmem:[#allocation4 + $0x324] sm:$0xf0]  ;;  %v11393_v22 = vld [vmem:[#allocation4 + $0x280] sm:$0xf] }
 0x467   :  { %3496 = vmatpush.bf16.msrb.mxu2 %v11366_v26  ;;  %v3138_v43 = vadd.f32 %v3137_v37, %v3124_v35  ;;  %v11520_v26 = vor.u32 %v13786_v9, %v11519_v13  ;;  %v13764_v35 = vld [vmem:[#allocation4 + $0x2c4] sm:$0xf0]  ;;  %v11354_v37 = vor.u32 %v13746_v18, %v11353_v27  ;;  %v13758_v13 = vld [vmem:[#allocation4 + $0x294] sm:$0xf0]  ;;  %v11488_v9 = vor.u32 %v13778_v8, %v11487_v7  ;;  %v11471_v18 = vld [vmem:[#allocation4 + $0x310] sm:$0xf] }
 0x468   :  { %v13794_v27 = vld [vmem:[#allocation4 + $0x3b4] sm:$0xf0]  ;;  %v11456_v7 = vld [vmem:[%s18078_s6 + $0x28] sm:$0xff] }
 0x469   :  { %3191 = vmatpush.msra.mxu0 %v3138_v43  ;;  %11326 = vmatmul.msk.f32.gmra.mxu3 %vm1647_vm3, %v2921_v23  ;;  %v13757_v23 = vld [vmem:[#allocation4 + $0x294] sm:$0xf]  ;;  %v11345_v43 = vld [vmem:[#allocation4 + $0x220] sm:$0xf] }
 0x46a   :  { %3508 = vmatpush.bf16.msrb.mxu3 %v11438_v33  ;;  %11319 = vmatmul.msk.f32.vlgmr.msra.gmra.mxu0 %vm1647_vm3, %v11317_v48  ;;  %v11406_v32 = vor.u32 %v13757_v23, %v11403_v24  ;;  %v11425_v33 = vld [vmem:[#allocation4 + $0x2c0] sm:$0xf]  ;;  %v11346_v50 = vor.u32 %v13744_v44, %v11345_v43  ;;  %v13756_v23 = vld [vmem:[#allocation4 + $0x284] sm:$0xf0] }
 0x46b   :  { %3467 = vmatpush.bf16.msrb.mxu0 %v11386_v38  ;;  %3497 = vmatpush.bf16.msrb.mxu2 %v11358_v34  ;;  %v13755_v38 = vld [vmem:[#allocation4 + $0x284] sm:$0xf]  ;;  %v11395_v34 = vld [vmem:[#allocation4 + $0x288] sm:$0xf0]  ;;  %v11394_v29 = vor.u32 %v13756_v23, %v11393_v22  ;;  %v13788_v43 = vld [vmem:[#allocation4 + $0x384] sm:$0xf0] }
 0x46c   :  { %v11528_v44 = vor.u32 %v13788_v43, %v11527_v41  ;;  %v13781_v22 = vld [vmem:[#allocation4 + $0x354] sm:$0xf]  ;;  %v11505_v23 = vld [vmem:[#allocation4 + $0x358] sm:$0xf0]  ;;  %v13775_v43 = vld [vmem:[#allocation4 + $0x324] sm:$0xf] }
 0x46d   :  { %v3150_v57 = vpop.f32.mrf.mxu2  ;;  %v3163_v28 = vpop.f32.mrf.mxu3 }
 0x46e   :  { %3509 = vmatpush.bf16.msrb.mxu3 %v11430_v4  ;;  %v3164_v0 = vadd.f32 %v3163_v28, %v3150_v57  ;;  %v3126_v1 = vpop.f32.mrf.mxu0  ;;  %v3139_v2 = vpop.f32.mrf.mxu1  ;;  %v11398_v4 = vor.u32 %v13755_v38, %v11395_v34  ;;  %v13780_v57 = vld [vmem:[#allocation4 + $0x344] sm:$0xf0]  ;;  %v11535_v34 = vld [vmem:[#allocation4 + $0x390] sm:$0xf] }
 0x46f   :  { %3468 = vmatpush.bf16.msrb.mxu0 %v11378_v51  ;;  %3498 = vmatpush.bf16.msrb.mxu2 %v11350_v52  ;;  %v11417_v51 = vld [vmem:[#allocation4 + $0x2b0] sm:$0xf]  ;;  %v13762_v52 = vld [vmem:[#allocation4 + $0x2b4] sm:$0xf0]  ;;  %v11496_v1 = vor.u32 %v13780_v57, %v11495_v55  ;;  %v11455_v55 = vld [vmem:[%s18078_s6 + $0x20] sm:$0xff] }
 0x470   :  { %3214 = vmatpush.msra.mxu1 %v3164_v0  ;;  %v11418_v28 = vor.u32 %v13762_v52, %v11417_v51  ;;  %v11567_v0 = vld [vmem:[#allocation4 + $0x3d0] sm:$0xf]  ;;  %v13798_v2 = vld [vmem:[#allocation4 + $0x3d4] sm:$0xf0] }
 0x471   :  { %11321 = vmatmul.msk.f32.vlgmr.msra.gmra.mxu1 %vm1647_vm3, %v11317_v48  ;;  %v11426_v48 = vor.u32 %v13764_v35, %v11425_v33  ;;  %v11568_v10 = vor.u32 %v13798_v2, %v11567_v0  ;;  %v11463_v33 = vld [vmem:[#allocation4 + $0x300] sm:$0xf]  ;;  %v13772_v35 = vld [vmem:[#allocation4 + $0x304] sm:$0xf0]  ;;  %v13797_v0 = vld [vmem:[#allocation4 + $0x3d4] sm:$0xf] }
 0x472   :  { %3480 = vmatpush.bf16.msrb.mxu1 %v11450_v61  ;;  %3510 = vmatpush.bf16.msrb.mxu3 %v11422_v46  ;;  %v11576_v61 = vor.u32 %v13800_v54, %v11575_v45  ;;  %v11338_v46 = vor.u32 %v13742_v56, %v11337_v14  ;;  %v11464_v38 = vor.u32 %v13772_v35, %v11463_v33  ;;  %v13801_v45 = vld [vmem:[#allocation4 + $0x3f4] sm:$0xf]  ;;  %v11537_v33 = vld [vmem:[#allocation4 + $0x398] sm:$0xf0] }
 0x473   :  { %3469 = vmatpush.bf16.msrb.mxu0 %v11370_v3  ;;  %3499 = vmatpush.bf16.msrb.mxu2 %v11342_v5  ;;  %v11329_v3 = vld [vmem:[#allocation4 + $0x200] sm:$0xf]  ;;  %v13740_v5 = vld [vmem:[#allocation4 + $0x204] sm:$0xf0] }
 0x474   :  { %11320 = vmatmul.msk.f32.gmra.mxu0 %vm1647_vm3, %v11318_v15  ;;  %v11330_v11 = vor.u32 %v13740_v5, %v11329_v3  ;;  %v13785_v3 = vld [vmem:[#allocation4 + $0x374] sm:$0xf]  ;;  %v11521_v5 = vld [vmem:[#allocation4 + $0x378] sm:$0xf0] }
 0x475   :  { %v3152_v30 = vpop.f32.mrf.mxu2  ;;  %v3165_v62 = vpop.f32.mrf.mxu3 }
 0x476   :  { %3481 = vmatpush.bf16.msrb.mxu1 %v11442_v16  ;;  %3511 = vmatpush.bf16.msrb.mxu3 %v11414_v17  ;;  %v13796_v16 = vld [vmem:[#allocation4 + $0x3c4] sm:$0xf0]  ;;  %v11479_v17 = vld [vmem:[#allocation4 + $0x320] sm:$0xf]  ;;  %v11472_v62 = vor.u32 %v13774_v6, %v11471_v18  ;;  %v11545_v18 = vld [vmem:[#allocation4 + $0x3a8] sm:$0xf0]  ;;  %v11508_v6 = vor.u32 %v13781_v22, %v11505_v23 }
 0x477   :  { %3470 = vmatpush.bf16.msrb.mxu0 %v11362_v20  ;;  %3500 = vmatpush.bf16.msrb.mxu2 %v11334_v21  ;;  %v11402_v20 = vor.u32 %v13758_v13, %v11401_v12  ;;  %v11480_v24 = vor.u32 %v13776_v19, %v11479_v17  ;;  %v13793_v19 = vld [vmem:[#allocation4 + $0x3b4] sm:$0xf]  ;;  %v15563_v23 = vld [vmem:[#allocation7 + $0xd8] sm:$0xff] }
 0x478   :  { %v15561_v22 = vld [vmem:[#allocation7 + $0xd0] sm:$0xff] }
 0x479   :  { %11322 = vmatmul.msk.f32.gmra.mxu1 %vm1647_vm3, %v11318_v15  ;;  %v11559_v15 = vld [vmem:[#allocation4 + $0x3c0] sm:$0xf] }
 0x47a   :  { %3482 = vmatpush.bf16.msrb.mxu1 %v11434_v31  ;;  %3512 = vmatpush.bf16.msrb.mxu3 %v11406_v32  ;;  %v11560_v21 = vor.u32 %v13796_v16, %v11559_v15  ;;  %v11543_v31 = vld [vmem:[#allocation4 + $0x3a0] sm:$0xf]  ;;  %v13792_v32 = vld [vmem:[#allocation4 + $0x3a4] sm:$0xf0]  ;;  %v13783_v15 = vld [vmem:[#allocation4 + $0x364] sm:$0xf] }
 0x47b   :  { %3771 = vmatpush.bf16.msra.mxu2 %v11520_v26  ;;  %3471 = vmatpush.bf16.msrb.mxu0 %v11354_v37  ;;  %v11551_v26 = vld [vmem:[#allocation4 + $0x3b0] sm:$0xf]  ;;  %v11544_v37 = vor.u32 %v13792_v32, %v11543_v31  ;;  %v11513_v16 = vld [vmem:[#allocation4 + $0x368] sm:$0xf0]  ;;  %v13789_v32 = vld [vmem:[#allocation4 + $0x394] sm:$0xf] }
 0x47c   :  { %3501 = vmatmul.bf16.vlgmr.msrb.gmra.mxu2 %v15451_v42  ;;  %v11552_v30 = vor.u32 %v13794_v27, %v11551_v26  ;;  %v13791_v27 = vld [vmem:[#allocation4 + $0x3a4] sm:$0xf] }
 0x47e   :  { %3483 = vmatpush.bf16.msrb.mxu1 %v11426_v48  ;;  %3513 = vmatpush.bf16.msrb.mxu3 %v11398_v4 }
 0x47f   :  { %3772 = vmatpush.bf16.msra.mxu2 %v11512_v40  ;;  %3472 = vmatpush.bf16.msrb.mxu0 %v11346_v50  ;;  %v11536_v40 = vor.u32 %v13790_v39, %v11535_v34  ;;  %v11540_v34 = vor.u32 %v13789_v32, %v11537_v33  ;;  %v13787_v39 = vld [vmem:[#allocation4 + $0x384] sm:$0xf]  ;;  %v15593_v32 = vld [vmem:[#allocation7 + $0x88] sm:$0xff]  ;;  %v15597_v33 = vld [vmem:[#allocation7 + $0x70] sm:$0xff] }
 0x481   :  { %3514 = vmatmul.bf16.vlgmr.msrb.gmra.mxu3 %v15453_v58 }
 0x482   :  { %3784 = vmatpush.bf16.msra.mxu3 %v11584_v49  ;;  %3484 = vmatpush.bf16.msrb.mxu1 %v11418_v28 }
 0x483   :  { %3773 = vmatpush.bf16.msra.mxu2 %v11504_v53  ;;  %3473 = vmatpush.bf16.msrb.mxu0 %v11338_v46  ;;  %v11585_v53 = vld [vmem:[#allocation4 + $0x3f8] sm:$0xf0]  ;;  %v11577_v46 = vld [vmem:[#allocation4 + $0x3e8] sm:$0xf0] }
 0x484   :  { %v11588_v57 = vor.u32 %v13801_v45, %v11585_v53 }
 0x486   :  { %3785 = vmatpush.bf16.msra.mxu3 %v11576_v61  ;;  %3485 = vmatpush.bf16.msrb.mxu1 %v11410_v63  ;;  %v13799_v61 = vld [vmem:[#allocation4 + $0x3e4] sm:$0xf] }
 0x487   :  { %3774 = vmatpush.bf16.msra.mxu2 %v11496_v1  ;;  %3474 = vmatpush.bf16.msrb.mxu0 %v11330_v11  ;;  %v11580_v60 = vor.u32 %v13799_v61, %v11577_v46  ;;  %v11569_v1 = vld [vmem:[#allocation4 + $0x3d8] sm:$0xf0]  ;;  %v11561_v11 = vld [vmem:[#allocation4 + $0x3c8] sm:$0xf0]  ;;  %v13771_v46 = vld [vmem:[#allocation4 + $0x304] sm:$0xf] }
 0x488   :  { %v11572_v8 = vor.u32 %v13797_v0, %v11569_v1  ;;  %v11590_v0 = vld [vmem:[%s18078_s6 + $0x38] sm:$0xff] }
 0x48a   :  { %3786 = vmatpush.bf16.msra.mxu3 %v11568_v10  ;;  %3486 = vmatpush.bf16.msrb.mxu1 %v11402_v20  ;;  %v13795_v10 = vld [vmem:[#allocation4 + $0x3c4] sm:$0xf]  ;;  %v11553_v20 = vld [vmem:[#allocation4 + $0x3b8] sm:$0xf0] }
 0x48b   :  { %3775 = vmatpush.bf16.msra.mxu2 %v11488_v9  ;;  %3475 = vmatmul.bf16.vlgmr.msrb.gmra.mxu0 %v15451_v42  ;;  %v11524_v9 = vor.u32 %v13785_v3, %v11521_v5  ;;  %v11564_v17 = vor.u32 %v13795_v10, %v11561_v11 }
 0x48e   :  { %3787 = vmatpush.bf16.msra.mxu3 %v11560_v21  ;;  %3487 = vmatpush.bf16.msrb.mxu1 %v11394_v29  ;;  %v11516_v21 = vor.u32 %v13783_v15, %v11513_v16  ;;  %v13779_v29 = vld [vmem:[#allocation4 + $0x344] sm:$0xf] }
 0x48f   :  { %3776 = vmatpush.bf16.msra.mxu2 %v11480_v24  ;;  %v11556_v24 = vor.u32 %v13793_v19, %v11553_v20  ;;  %v15555_v20 = vld [vmem:[#allocation7 + $0xe0] sm:$0xff] }
 0x491   :  { %3488 = vmatmul.bf16.vlgmr.msrb.gmra.mxu1 %v15453_v58 }
 0x492   :  { %3788 = vmatpush.bf16.msra.mxu3 %v11552_v30  ;;  %v11497_v30 = vld [vmem:[#allocation4 + $0x348] sm:$0xf0] }
 0x493   :  { %3777 = vmatpush.bf16.msra.mxu2 %v11472_v62  ;;  %v11548_v62 = vor.u32 %v13791_v27, %v11545_v18  ;;  %v11500_v35 = vor.u32 %v13779_v29, %v11497_v30  ;;  %v15573_v27 = vld [vmem:[#allocation7 + $0xb0] sm:$0xff]  ;;  %v15575_v18 = vld [vmem:[#allocation7 + $0xb8] sm:$0xff]  ;;  %v15581_v29 = vld [vmem:[#allocation7 + $0xa8] sm:$0xff] }
 0x494   :  { %v15585_v30 = vld [vmem:[#allocation7 + $0x90] sm:$0xff] }
 0x496   :  { %3789 = vmatpush.bf16.msra.mxu3 %v11544_v37  ;;  %v13777_v37 = vld [vmem:[#allocation4 + $0x334] sm:$0xf] }
 0x497   :  { %3778 = vmatpush.bf16.msra.mxu2 %v11464_v38  ;;  %v11489_v38 = vld [vmem:[#allocation4 + $0x338] sm:$0xf0] }
 0x498   :  { %v11492_v41 = vor.u32 %v13777_v37, %v11489_v38  ;;  %v15603_v38 = vld [vmem:[#allocation7 + $0x60] sm:$0xff] }
 0x49a   :  { %3790 = vmatpush.bf16.msra.mxu3 %v11536_v40  ;;  %3779 = vmatmul.bf16.vlgmr.msra.gmra.mxu2 %v15451_v42  ;;  %v11529_v40 = vld [vmem:[#allocation4 + $0x388] sm:$0xf0] }
 0x49b   :  { %v11532_v45 = vor.u32 %v13787_v39, %v11529_v40  ;;  %v15609_v39 = vld [vmem:[#allocation7 + $0x50] sm:$0xff]  ;;  %v15611_v40 = vld [vmem:[#allocation7 + $0x58] sm:$0xff] }
 0x49e   :  { %3791 = vmatpush.bf16.msra.mxu3 %v11528_v44  ;;  %v11481_v44 = vld [vmem:[#allocation4 + $0x328] sm:$0xf0] }
 0x4a1   :  { %3792 = vmatmul.bf16.vlgmr.msra.gmra.mxu3 %v15453_v58 }
 0x4dd   :  { %v15489_v25 = vpop.f32.mrf.mxu2 }
 0x4e4   :  { %v15491_v47 = vpop.f32.mrf.mxu3 }
 0x4e5   :  { %v15495_v4 = vpop.f32.mrf.mxu2 }
 0x4e7   :  { %v15493_v48 = vpop.f32.mrf.mxu0 }
 0x4ec   :  { %v15497_v49 = vpop.f32.mrf.mxu3 }
 0x4ee   :  { %v15499_v50 = vpop.f32.mrf.mxu1 }
 0x4f1   :  { %v15501_v51 = vpop.f32.mrf.mxu0 }
 0x4f2   :  { %v3249_v10 = vadd.f32 %v15495_v4, %v15501_v51  ;;  %v15549_v4 = vld [vmem:[#allocation7 + $0xf0] sm:$0xff]  ;;  %v15551_v51 = vld [vmem:[#allocation7 + $0xf8] sm:$0xff] }
 0x4f6   :  { %v15503_v14 = vpop.f32.mrf.mxu1 }
 0x4ff   :  { %v3502_v52 = vpop.f32.mrf.mxu2 }
 0x504   :  { %v3515_v54 = vpop.f32.mrf.mxu3 }
 0x505   :  { %v3516_v56 = vadd.f32 %v3515_v54, %v3502_v52 }
 0x507   :  { %v3504_v28 = vpop.f32.mrf.mxu2  ;;  %3566 = vmatpush.msra.mxu1 %v3516_v56  ;;  %v11589_v56 = vld [vmem:[%s18078_s6 + $0x30] sm:$0xff] }
 0x508   :  { %v3476_v59 = vpop.f32.mrf.mxu0  ;;  %11459 = vmatmul.msk.f32.vlgmr.msra.gmra.mxu1 %vm1647_vm3, %v11455_v55  ;;  %v11473_v28 = vld [vmem:[#allocation4 + $0x318] sm:$0xf0] }
 0x509   :  { %3810 = vmatpush.bf16.msrb.mxu1 %v11588_v57  ;;  %v13773_v57 = vld [vmem:[#allocation4 + $0x314] sm:$0xf] }
 0x50a   :  { %v11476_v61 = vor.u32 %v13773_v57, %v11473_v28  ;;  %v15645_v28 = vld [vmem:[#allocation7 + $0x10] sm:$0xff] }
 0x50c   :  { %v3517_v2 = vpop.f32.mrf.mxu3 }
 0x50d   :  { %3811 = vmatpush.bf16.msrb.mxu1 %v11580_v60 }
 0x50e   :  { %v3489_v63 = vpop.f32.mrf.mxu1 }
 0x50f   :  { %v3490_v12 = vadd.f32 %v3489_v63, %v3476_v59  ;;  %v11465_v59 = vld [vmem:[#allocation4 + $0x308] sm:$0xf0]  ;;  %v3246_v63 = vadd.f32 %v15489_v25, %v15493_v48 }
 0x510   :  { %v3478_v13 = vpop.f32.mrf.mxu0  ;;  %11460 = vmatmul.msk.f32.gmra.mxu1 %vm1647_vm3, %v11456_v7  ;;  %v11468_v1 = vor.u32 %v13771_v46, %v11465_v59  ;;  %v15653_v59 = vld [vmem:[#allocation7 + $0x18] sm:$0xff] }
 0x511   :  { %3812 = vmatpush.bf16.msrb.mxu1 %v11572_v8  ;;  %3543 = vmatpush.msra.mxu0 %v3490_v12 }
 0x512   :  { %11457 = vmatmul.msk.f32.vlgmr.msra.gmra.mxu0 %vm1647_vm3, %v11455_v55  ;;  %v11484_v55 = vor.u32 %v13775_v43, %v11481_v44  ;;  %v3272_v43 = vadd.f32 %v15497_v49, %v15503_v14  ;;  %v15619_v44 = vld [vmem:[#allocation7 + $0x40] sm:$0xff] }
 0x513   :  { %3797 = vmatpush.bf16.msrb.mxu0 %v11524_v9 }
 0x515   :  { %3813 = vmatpush.bf16.msrb.mxu1 %v11564_v17 }
 0x516   :  { %v3491_v26 = vpop.f32.mrf.mxu1 }
 0x517   :  { %3798 = vmatpush.bf16.msrb.mxu0 %v11516_v21  ;;  %v15557_v21 = vld [vmem:[#allocation7 + $0xe8] sm:$0xff] }
 0x518   :  { %v15569_v26 = vld [vmem:[#allocation7 + $0xc8] sm:$0xff] }
 0x519   :  { %3814 = vmatpush.bf16.msrb.mxu1 %v11556_v24  ;;  %v15567_v24 = vld [vmem:[#allocation7 + $0xc0] sm:$0xff] }
 0x51a   :  { %11458 = vmatmul.msk.f32.gmra.mxu0 %vm1647_vm3, %v11456_v7 }
 0x51b   :  { %3799 = vmatpush.bf16.msrb.mxu0 %v11508_v6  ;;  %v15579_v6 = vld [vmem:[#allocation7 + $0xa0] sm:$0xff] }
 0x51d   :  { %v3780_v31 = vpop.f32.mrf.mxu2  ;;  %3815 = vmatpush.bf16.msrb.mxu1 %v11548_v62  ;;  %v15587_v62 = vld [vmem:[#allocation7 + $0x98] sm:$0xff] }
 0x51f   :  { %3800 = vmatpush.bf16.msrb.mxu0 %v11500_v35  ;;  %v15599_v35 = vld [vmem:[#allocation7 + $0x78] sm:$0xff] }
 0x521   :  { %3816 = vmatpush.bf16.msrb.mxu1 %v11540_v34  ;;  %v15605_v34 = vld [vmem:[#allocation7 + $0x68] sm:$0xff] }
 0x523   :  { %3801 = vmatpush.bf16.msrb.mxu0 %v11492_v41  ;;  %v3269_v41 = vadd.f32 %v15491_v47, %v15499_v50  ;;  %v15627_v47 = vld [vmem:[#allocation7 + $0x30] sm:$0xff]  ;;  %v15629_v50 = vld [vmem:[#allocation7 + $0x38] sm:$0xff] }
 0x524   :  { %v3793_v52 = vpop.f32.mrf.mxu3 }
 0x525   :  { %v3794_v53 = vadd.f32 %v3793_v52, %v3780_v31  ;;  %v3782_v54 = vpop.f32.mrf.mxu2  ;;  %3817 = vmatpush.bf16.msrb.mxu1 %v11532_v45  ;;  %v15591_v31 = vld [vmem:[#allocation7 + $0x80] sm:$0xff]  ;;  %v15621_v52 = vld [vmem:[#allocation7 + $0x48] sm:$0xff] }
 0x527   :  { %3847 = vmatpush.msrb.mxu2 %v3794_v53  ;;  %3802 = vmatpush.bf16.msrb.mxu0 %v11484_v55  ;;  %v15639_v55 = vld [vmem:[#allocation7 + $0x28] sm:$0xff] }
 0x528   :  { %11591 = vmatmul.msk.f32.vlgmr.msrb.gmra.mxu2 %vm1647_vm3, %v11589_v56  ;;  %3818 = vmatmul.bf16.vlgmr.msrb.gmra.mxu1 %v15453_v58 }
 0x52b   :  { %3803 = vmatpush.bf16.msrb.mxu0 %v11476_v61  ;;  %v15647_v61 = vld [vmem:[#allocation7 + $0x1f0] sm:$0xff] }
 0x52c   :  { %v3795_v60 = vpop.f32.mrf.mxu3 }
 0x52d   :  { %v15657_v60 = vld [vmem:[#allocation7 + $0x1f8] sm:$0xff] }
 0x52f   :  { %3804 = vmatpush.bf16.msrb.mxu0 %v11468_v1  ;;  %v15663_v1 = vld [vmem:[#allocation7] sm:$0xff] }
 0x530   :  { %11592 = vmatmul.msk.f32.gmra.mxu2 %vm1647_vm3, %v11590_v0 }
 0x532   :  { %3805 = vmatmul.bf16.vlgmr.msrb.gmra.mxu0 %v15451_v42 }
 0x585   :  { %v15525_v2 = vpop.f32.mrf.mxu1 }
 0x586   :  { %v3575_v45 = vadd.f32 %v15525_v2, %v3269_v41  ;;  %v15665_v2 = vld [vmem:[#allocation7 + $0x8] sm:$0xff]  ;;  %v11659_v41 = vld [vmem:[#allocation6 + $0x78] sm:$0xf0] }
 0x58d   :  { %v15527_v3 = vpop.f32.mrf.mxu1 }
 0x58e   :  { %v3577_v53 = vadd.f32 %v15527_v3, %v3272_v43  ;;  %v15669_v3 = vld [vmem:[#allocation7 + $0x1e8] sm:$0xff] }
 0x58f   :  { %v3545_v5 = vpop.f32.mrf.mxu0 }
 0x590   :  { %v3574_v12 = vadd.f32 %v3545_v5, %v3246_v63  ;;  %v15671_v5 = vld [vmem:[#allocation7 + $0x1d0] sm:$0xff] }
 0x591   :  { %v15686_v63 = vld [vmem:[#allocation7 + $0x1b0] sm:$0xff] }
 0x597   :  { %v3548_v7 = vpop.f32.mrf.mxu0 }
 0x598   :  { %v3576_v13 = vadd.f32 %v3548_v7, %v3249_v10  ;;  %v15678_v7 = vld [vmem:[#allocation7 + $0x1c0] sm:$0xff]  ;;  %v15692_v10 = vld [vmem:[#allocation7 + $0x1b8] sm:$0xff] }
 0x5a5   :  { %v3819_v58 = vpop.f32.mrf.mxu1 }
 0x5ab   :  { %v3849_v8 = vpop.f32.mrf.mxu2 }
 0x5ac   :  { %v15533_v16 = vadd.f32 %v3849_v8, %v3574_v12  ;;  %v15684_v8 = vld [vmem:[#allocation7 + $0x1c8] sm:$0xff] }
 0x5ad   :  { %v3821_v11 = vpop.f32.mrf.mxu1  ;;  %v15700_v12 = vld [vmem:[#allocation7 + $0x1a8] sm:$0xff] }
 0x5ae   :  { %v3990_v25 = vmul.f32 %v15533_v16, %v15533_v16  ;;  %v15694_v11 = vld [vmem:[#allocation7 + $0x1a0] sm:$0xff] }
 0x5af   :  { %v3806_v9 = vpop.f32.mrf.mxu0 }
 0x5b0   :  { %v3820_v15 = vadd.f32 %v3819_v58, %v3806_v9  ;;  %v15676_v58 = vld [vmem:[#allocation7 + $0x1d8] sm:$0xff] }
 0x5b1   :  { %v15708_v9 = vld [vmem:[#allocation7 + $0x198] sm:$0xff] }
 0x5b2   :  { %3870 = vmatpush.msrb.mxu3 %v3820_v15  ;;  %v15710_v15 = vld [vmem:[#allocation7 + $0x180] sm:$0xff] }
 0x5b3   :  { %v3852_v42 = vpop.f32.mrf.mxu2  ;;  %11593 = vmatmul.msk.f32.vlgmr.msrb.gmra.mxu3 %vm1647_vm3, %v11589_v56  ;;  %v15637_v56 = vld [vmem:[#allocation7 + $0x20] sm:$0xff] }
 0x5b4   :  { %v15535_v17 = vadd.f32 %v3852_v42, %v3576_v13  ;;  %v15702_v13 = vld [vmem:[#allocation7 + $0x190] sm:$0xff]  ;;  %v15716_v42 = vld [vmem:[#allocation7 + $0x188] sm:$0xff] }
 0x5b6   :  { %v3992_v19 = vmul.f32 %v15535_v17, %v15535_v17  ;;  %3964 = vmatpush.msra.mxu0 %v15535_v17 }
 0x5b7   :  { %v3808_v48 = vpop.f32.mrf.mxu0 }
 0x5b8   :  { %3965 = vmatpush.msra.mxu0 %v15533_v16  ;;  %4008 = vmatpush.msra.mxu2 %v3992_v19  ;;  %v15718_v19 = vld [vmem:[#allocation7 + $0x170] sm:$0xff]  ;;  %v15726_v48 = vld [vmem:[#allocation7 + $0x160] sm:$0xff] }
 0x5b9   :  { %11595 = vmatmul.msk.f32.vlgmr.msra.gmra.mxu0 %vm3947_vm12, %v18101_v36 }
 0x5ba   :  { %4009 = vmatpush.msra.mxu2 %v3990_v25  ;;  %4034 = vmatpush.msrb.mxu0 %v15549_v4  ;;  %v15724_v25 = vld [vmem:[#allocation7 + $0x178] sm:$0xff] }
 0x5bb   :  { %11594 = vmatmul.msk.f32.gmra.mxu3 %vm1647_vm3, %v11590_v0  ;;  %11597 = vmatmul.msk.f32.vlgmr.msra.gmra.mxu2 %vm3947_vm12, %v18101_v36  ;;  %v15659_v0 = vld [vmem:[#allocation7 + $0x1e0] sm:$0xff]  ;;  %vm5640_vm3 = vcmask 261120  }
 0x5bc   :  { %4074 = vmatpush.msrb.mxu2 %v15551_v51  ;;  %4035 = vmatpush.msrb.mxu0 %v15555_v20 }
 0x5be   :  { %4075 = vmatpush.msrb.mxu2 %v15557_v21  ;;  %4036 = vmatpush.msrb.mxu0 %v15561_v22 }
 0x5c0   :  { %4076 = vmatpush.msrb.mxu2 %v15563_v23  ;;  %4037 = vmatpush.msrb.mxu0 %v15567_v24 }
 0x5c2   :  { %4077 = vmatpush.msrb.mxu2 %v15569_v26  ;;  %4038 = vmatpush.msrb.mxu0 %v15573_v27 }
 0x5c4   :  { %4078 = vmatpush.msrb.mxu2 %v15575_v18  ;;  %4039 = vmatpush.msrb.mxu0 %v15579_v6 }
 0x5c6   :  { %4079 = vmatpush.msrb.mxu2 %v15581_v29  ;;  %4040 = vmatpush.msrb.mxu0 %v15585_v30 }
 0x5c8   :  { %4080 = vmatpush.msrb.mxu2 %v15587_v62  ;;  %4041 = vmatpush.msrb.mxu0 %v15591_v31 }
 0x5ca   :  { %4081 = vmatpush.msrb.mxu2 %v15593_v32  ;;  %4042 = vmatpush.msrb.mxu0 %v15597_v33 }
 0x5cc   :  { %4082 = vmatpush.msrb.mxu2 %v15599_v35  ;;  %4043 = vmatpush.msrb.mxu0 %v15603_v38 }
 0x5ce   :  { %4083 = vmatpush.msrb.mxu2 %v15605_v34  ;;  %4044 = vmatpush.msrb.mxu0 %v15609_v39 }
 0x5d0   :  { %4084 = vmatpush.msrb.mxu2 %v15611_v40  ;;  %4045 = vmatpush.msrb.mxu0 %v15619_v44 }
 0x5d2   :  { %4085 = vmatpush.msrb.mxu2 %v15621_v52  ;;  %4046 = vmatpush.msrb.mxu0 %v15627_v47 }
 0x5d4   :  { %4086 = vmatpush.msrb.mxu2 %v15629_v50  ;;  %4047 = vmatpush.msrb.mxu0 %v15637_v56 }
 0x5d6   :  { %4087 = vmatpush.msrb.mxu2 %v15639_v55  ;;  %4048 = vmatpush.msrb.mxu0 %v15645_v28 }
 0x5d8   :  { %4088 = vmatpush.msrb.mxu2 %v15653_v59  ;;  %4049 = vmatpush.msrb.mxu0 %v15663_v1 }
 0x5da   :  { %4089 = vmatpush.msrb.mxu2 %v15665_v2  ;;  %4116 = vmatpush.msra.mxu0 %v15549_v4  ;;  %v15732_v4 = vld [vmem:[#allocation7 + $0x168] sm:$0xff] }
 0x5dc   :  { %4156 = vmatpush.msra.mxu2 %v15551_v51  ;;  %4117 = vmatpush.msra.mxu0 %v15555_v20  ;;  %v15734_v51 = vld [vmem:[#allocation7 + $0x150] sm:$0xff]  ;;  %v3926_v20 = vld [vmem:[#allocation7 + $0x158] sm:$0xff] }
 0x5de   :  { %4157 = vmatpush.msra.mxu2 %v15557_v21  ;;  %4118 = vmatpush.msra.mxu0 %v15561_v22  ;;  %v3923_v21 = vld [vmem:[#allocation7 + $0x140] sm:$0xff]  ;;  %v3924_v22 = vld [vmem:[#allocation7 + $0x148] sm:$0xff] }
 0x5e0   :  { %4158 = vmatpush.msra.mxu2 %v15563_v23  ;;  %4119 = vmatpush.msra.mxu0 %v15567_v24  ;;  %v3921_v23 = vld [vmem:[#allocation7 + $0x130] sm:$0xff]  ;;  %v3922_v24 = vld [vmem:[#allocation7 + $0x138] sm:$0xff] }
 0x5e2   :  { %4159 = vmatpush.msra.mxu2 %v15569_v26  ;;  %4120 = vmatpush.msra.mxu0 %v15573_v27  ;;  %v3919_v26 = vld [vmem:[#allocation7 + $0x120] sm:$0xff]  ;;  %v3920_v27 = vld [vmem:[#allocation7 + $0x128] sm:$0xff] }
 0x5e4   :  { %4160 = vmatpush.msra.mxu2 %v15575_v18  ;;  %4121 = vmatpush.msra.mxu0 %v15579_v6  ;;  %v3917_v18 = vld [vmem:[#allocation7 + $0x110] sm:$0xff]  ;;  %v3918_v6 = vld [vmem:[#allocation7 + $0x118] sm:$0xff] }
 0x5e6   :  { %4161 = vmatpush.msra.mxu2 %v15581_v29  ;;  %4122 = vmatpush.msra.mxu0 %v15585_v30  ;;  %v3915_v29 = vld [vmem:[#allocation7 + $0x100] sm:$0xff]  ;;  %v3916_v30 = vld [vmem:[#allocation7 + $0x108] sm:$0xff] }
 0x5e8   :  { %4162 = vmatpush.msra.mxu2 %v15587_v62  ;;  %4123 = vmatpush.msra.mxu0 %v15591_v31 }
 0x5ea   :  { %4163 = vmatpush.msra.mxu2 %v15593_v32  ;;  %4124 = vmatpush.msra.mxu0 %v15597_v33 }
 0x5ec   :  { %4164 = vmatpush.msra.mxu2 %v15599_v35  ;;  %4125 = vmatpush.msra.mxu0 %v15603_v38  ;;  %v11657_v35 = vld [vmem:[#allocation6 + $0x70] sm:$0xf] }
 0x5ed   :  { %v11721_v38 = vld [vmem:[#allocation6 + $0xf0] sm:$0xf] }
 0x5ee   :  { %4165 = vmatpush.msra.mxu2 %v15605_v34  ;;  %4126 = vmatpush.msra.mxu0 %v15609_v39  ;;  %v13834_v39 = vld [vmem:[#allocation6 + $0xf4] sm:$0xf0] }
 0x5ef   :  { %v11722_v43 = vor.u32 %v13834_v39, %v11721_v38  ;;  %v13825_v38 = vld [vmem:[#allocation6 + $0xb4] sm:$0xf] }
 0x5f0   :  { %4166 = vmatpush.msra.mxu2 %v15611_v40  ;;  %4127 = vmatpush.msra.mxu0 %v15619_v44  ;;  %v13817_v40 = vld [vmem:[#allocation6 + $0x74] sm:$0xf] }
 0x5f1   :  { %v11662_v44 = vor.u32 %v13817_v40, %v11659_v41  ;;  %v11617_v40 = vld [vmem:[#allocation6 + $0x20] sm:$0xf]  ;;  %v13808_v41 = vld [vmem:[#allocation6 + $0x24] sm:$0xf0] }
 0x5f2   :  { %4167 = vmatpush.msra.mxu2 %v15621_v52  ;;  %4128 = vmatpush.msra.mxu0 %v15627_v47  ;;  %v13833_v52 = vld [vmem:[#allocation6 + $0xf4] sm:$0xf]  ;;  %v11649_v47 = vld [vmem:[#allocation6 + $0x60] sm:$0xf] }
 0x5f4   :  { %4168 = vmatpush.msra.mxu2 %v15629_v50  ;;  %4129 = vmatpush.msra.mxu0 %v15637_v56  ;;  %v13816_v50 = vld [vmem:[#allocation6 + $0x64] sm:$0xf0] }
 0x5f5   :  { %v11650_v56 = vor.u32 %v13816_v50, %v11649_v47  ;;  %v13807_v47 = vld [vmem:[#allocation6 + $0x24] sm:$0xf]  ;;  %v11619_v50 = vld [vmem:[#allocation6 + $0x28] sm:$0xf0] }
 0x5f6   :  { %4169 = vmatpush.msra.mxu2 %v15639_v55  ;;  %4130 = vmatpush.msra.mxu0 %v15645_v28  ;;  %v13832_v55 = vld [vmem:[#allocation6 + $0xe4] sm:$0xf0]  ;;  %v11651_v28 = vld [vmem:[#allocation6 + $0x68] sm:$0xf0] }
 0x5f8   :  { %4170 = vmatpush.msra.mxu2 %v15653_v59  ;;  %4131 = vmatpush.msra.mxu0 %v15663_v1  ;;  %v13831_v59 = vld [vmem:[#allocation6 + $0xe4] sm:$0xf]  ;;  %v11641_v1 = vld [vmem:[#allocation6 + $0x50] sm:$0xf] }
 0x5fa   :  { %4171 = vmatpush.msra.mxu2 %v15665_v2  ;;  %v13814_v2 = vld [vmem:[#allocation6 + $0x54] sm:$0xf0] }
 0x636   :  { %v3872_v37 = vpop.f32.mrf.mxu3  ;;  %v3967_v62 = vpop.f32.mrf.mxu0 }
 0x637   :  { %v15631_v14 = vadd.f32 %v3872_v37, %v3575_v45  ;;  %4050 = vmatmul.f32.vlgmr.msrb.gmra.mxu0 %v3967_v62  ;;  %4090 = vmatmul.f32.vlgmr.msrb.gmra.mxu2 %v3967_v62  ;;  %v13818_v37 = vld [vmem:[#allocation6 + $0x74] sm:$0xf0]  ;;  %v11723_v45 = vld [vmem:[#allocation6 + $0xf8] sm:$0xf0] }
 0x638   :  { %v11658_v34 = vor.u32 %v13818_v37, %v11657_v35  ;;  %4485 = vmatpush.bf16.msrb.mxu2 %v11662_v44  ;;  %v13826_v62 = vld [vmem:[#allocation6 + $0xb4] sm:$0xf0] }
 0x639   :  { %v3991_v46 = vmul.f32 %v15631_v14, %v15631_v14 }
 0x63a   :  { %4457 = vmatpush.bf16.msrb.mxu0 %v11658_v34  ;;  %v11691_v34 = vld [vmem:[#allocation6 + $0xb8] sm:$0xf0] }
 0x63b   :  { %v11694_v39 = vor.u32 %v13825_v38, %v11691_v34  ;;  %v13866_v34 = vld [vmem:[#allocation6 + $0x1f4] sm:$0xf0] }
 0x63e   :  { %v3875_v49 = vpop.f32.mrf.mxu3  ;;  %v4011_v31 = vpop.f32.mrf.mxu2  ;;  %4458 = vmatpush.bf16.msrb.mxu0 %v11650_v56 }
 0x63f   :  { %v15633_v54 = vadd.f32 %v3875_v49, %v3577_v53  ;;  %4132 = vmatmul.f32.vlgmr.msra.gmra.mxu0 %v4011_v31  ;;  %4172 = vmatmul.f32.vlgmr.msra.gmra.mxu2 %v4011_v31  ;;  %v11726_v53 = vor.u32 %v13833_v52, %v11723_v45  ;;  %v11713_v49 = vld [vmem:[#allocation6 + $0xe0] sm:$0xf]  ;;  %v13809_v31 = vld [vmem:[#allocation6 + $0x34] sm:$0xf]  ;;  %v11618_v45 = vor.u32 %v13808_v41, %v11617_v40  ;;  %v11787_v41 = vld [vmem:[#allocation6 + $0x178] sm:$0xf0] }
 0x640   :  { %v13849_v40 = vld [vmem:[#allocation6 + $0x174] sm:$0xf] }
 0x641   :  { %v3993_v57 = vmul.f32 %v15633_v54, %v15633_v54  ;;  %3984 = vmatpush.msra.mxu1 %v15633_v54 }
 0x643   :  { %3985 = vmatpush.msra.mxu1 %v15631_v14  ;;  %4028 = vmatpush.msra.mxu3 %v3993_v57  ;;  %v13815_v57 = vld [vmem:[#allocation6 + $0x64] sm:$0xf] }
 0x644   :  { %11596 = vmatmul.msk.f32.vlgmr.msra.gmra.mxu1 %vm3947_vm12, %v18101_v36 }
 0x645   :  { %4029 = vmatpush.msra.mxu3 %v3991_v46  ;;  %4054 = vmatpush.msrb.mxu1 %v15647_v61  ;;  %v11654_v46 = vor.u32 %v13815_v57, %v11651_v28  ;;  %v13823_v57 = vld [vmem:[#allocation6 + $0xa4] sm:$0xf]  ;;  %v11683_v28 = vld [vmem:[#allocation6 + $0xa8] sm:$0xf0] }
 0x646   :  { %11598 = vmatmul.msk.f32.vlgmr.msra.gmra.mxu3 %vm3947_vm12, %v18101_v36 }
 0x647   :  { %4094 = vmatpush.msrb.mxu3 %v15657_v60  ;;  %4055 = vmatpush.msrb.mxu1 %v15659_v0 }
 0x648   :  { %4486 = vmatpush.bf16.msrb.mxu2 %v11654_v46 }
 0x649   :  { %4095 = vmatpush.msrb.mxu3 %v15669_v3  ;;  %4056 = vmatpush.msrb.mxu1 %v15671_v5 }
 0x64b   :  { %4096 = vmatpush.msrb.mxu3 %v15676_v58  ;;  %4057 = vmatpush.msrb.mxu1 %v15678_v7 }
 0x64d   :  { %4097 = vmatpush.msrb.mxu3 %v15684_v8  ;;  %4058 = vmatpush.msrb.mxu1 %v15686_v63 }
 0x64f   :  { %4098 = vmatpush.msrb.mxu3 %v15692_v10  ;;  %4059 = vmatpush.msrb.mxu1 %v15694_v11 }
 0x651   :  { %4099 = vmatpush.msrb.mxu3 %v15700_v12  ;;  %4060 = vmatpush.msrb.mxu1 %v15702_v13 }
 0x653   :  { %4100 = vmatpush.msrb.mxu3 %v15708_v9  ;;  %4061 = vmatpush.msrb.mxu1 %v15710_v15 }
 0x655   :  { %4101 = vmatpush.msrb.mxu3 %v15716_v42  ;;  %4062 = vmatpush.msrb.mxu1 %v15718_v19 }
 0x657   :  { %4102 = vmatpush.msrb.mxu3 %v15724_v25  ;;  %4063 = vmatpush.msrb.mxu1 %v15726_v48 }
 0x659   :  { %4103 = vmatpush.msrb.mxu3 %v15732_v4  ;;  %4064 = vmatpush.msrb.mxu1 %v15734_v51 }
 0x65b   :  { %4104 = vmatpush.msrb.mxu3 %v3926_v20  ;;  %4065 = vmatpush.msrb.mxu1 %v3923_v21 }
 0x65d   :  { %4105 = vmatpush.msrb.mxu3 %v3924_v22  ;;  %4066 = vmatpush.msrb.mxu1 %v3921_v23 }
 0x65f   :  { %4106 = vmatpush.msrb.mxu3 %v3922_v24  ;;  %4067 = vmatpush.msrb.mxu1 %v3919_v26 }
 0x661   :  { %4107 = vmatpush.msrb.mxu3 %v3920_v27  ;;  %4068 = vmatpush.msrb.mxu1 %v3917_v18 }
 0x663   :  { %4108 = vmatpush.msrb.mxu3 %v3918_v6  ;;  %4069 = vmatpush.msrb.mxu1 %v3915_v29 }
 0x665   :  { %4136 = vmatpush.msra.mxu1 %v15647_v61  ;;  %4109 = vmatpush.msrb.mxu3 %v3916_v30  ;;  %v11714_v61 = vor.u32 %v13832_v55, %v11713_v49  ;;  %v11622_v55 = vor.u32 %v13807_v47, %v11619_v50  ;;  %v13848_v47 = vld [vmem:[#allocation6 + $0x164] sm:$0xf0] }
 0x667   :  { %4176 = vmatpush.msra.mxu3 %v15657_v60  ;;  %4137 = vmatpush.msra.mxu1 %v15659_v0  ;;  %v11715_v60 = vld [vmem:[#allocation6 + $0xe8] sm:$0xf0] }
 0x668   :  { %v11718_v0 = vor.u32 %v13831_v59, %v11715_v60  ;;  %v11686_v59 = vor.u32 %v13823_v57, %v11683_v28  ;;  %v13864_v57 = vld [vmem:[#allocation6 + $0x1e4] sm:$0xf0]  ;;  %v13847_v28 = vld [vmem:[#allocation6 + $0x164] sm:$0xf] }
 0x669   :  { %4177 = vmatpush.msra.mxu3 %v15669_v3  ;;  %4138 = vmatpush.msra.mxu1 %v15671_v5  ;;  %v11705_v3 = vld [vmem:[#allocation6 + $0xd0] sm:$0xf]  ;;  %v11642_v5 = vor.u32 %v13814_v2, %v11641_v1  ;;  %v13806_v1 = vld [vmem:[#allocation6 + $0x14] sm:$0xf0] }
 0x66b   :  { %4178 = vmatpush.msra.mxu3 %v15676_v58  ;;  %4139 = vmatpush.msra.mxu1 %v15678_v7  ;;  %v13830_v58 = vld [vmem:[#allocation6 + $0xd4] sm:$0xf0]  ;;  %v13813_v7 = vld [vmem:[#allocation6 + $0x54] sm:$0xf] }
 0x66c   :  { %4459 = vmatpush.bf16.msrb.mxu0 %v11642_v5  ;;  %v13822_v5 = vld [vmem:[#allocation6 + $0x94] sm:$0xf0] }
 0x66d   :  { %4179 = vmatpush.msra.mxu3 %v15684_v8  ;;  %4140 = vmatpush.msra.mxu1 %v15686_v63  ;;  %v11643_v8 = vld [vmem:[#allocation6 + $0x58] sm:$0xf0]  ;;  %v11706_v63 = vor.u32 %v13830_v58, %v11705_v3  ;;  %v11673_v3 = vld [vmem:[#allocation6 + $0x90] sm:$0xf]  ;;  %v13805_v58 = vld [vmem:[#allocation6 + $0x14] sm:$0xf] }
 0x66f   :  { %4180 = vmatpush.msra.mxu3 %v15692_v10  ;;  %4141 = vmatpush.msra.mxu1 %v15694_v11  ;;  %v11646_v10 = vor.u32 %v13813_v7, %v11643_v8  ;;  %v13829_v11 = vld [vmem:[#allocation6 + $0xd4] sm:$0xf] }
 0x671   :  { %4181 = vmatpush.msra.mxu3 %v15700_v12  ;;  %4142 = vmatpush.msra.mxu1 %v15702_v13  ;;  %v11707_v12 = vld [vmem:[#allocation6 + $0xd8] sm:$0xf0] }
 0x672   :  { %4487 = vmatpush.bf16.msrb.mxu2 %v11646_v10  ;;  %v11611_v10 = vld [vmem:[#allocation6 + $0x18] sm:$0xf0] }
 0x673   :  { %4182 = vmatpush.msra.mxu3 %v15708_v9  ;;  %4143 = vmatpush.msra.mxu1 %v15710_v15  ;;  %v11710_v9 = vor.u32 %v13829_v11, %v11707_v12  ;;  %v11633_v15 = vld [vmem:[#allocation6 + $0x40] sm:$0xf]  ;;  %v13821_v11 = vld [vmem:[#allocation6 + $0x94] sm:$0xf] }
 0x675   :  { %4183 = vmatpush.msra.mxu3 %v15716_v42  ;;  %4144 = vmatpush.msra.mxu1 %v15718_v19  ;;  %v13812_v42 = vld [vmem:[#allocation6 + $0x44] sm:$0xf0]  ;;  %v11697_v19 = vld [vmem:[#allocation6 + $0xc0] sm:$0xf] }
 0x677   :  { %4184 = vmatpush.msra.mxu3 %v15724_v25  ;;  %4145 = vmatpush.msra.mxu1 %v15726_v48  ;;  %v11634_v25 = vor.u32 %v13812_v42, %v11633_v15  ;;  %v13828_v48 = vld [vmem:[#allocation6 + $0xc4] sm:$0xf0]  ;;  %v11675_v15 = vld [vmem:[#allocation6 + $0x98] sm:$0xf0] }
 0x679   :  { %4185 = vmatpush.msra.mxu3 %v15732_v4  ;;  %4146 = vmatpush.msra.mxu1 %v15734_v51  ;;  %v13811_v4 = vld [vmem:[#allocation6 + $0x44] sm:$0xf]  ;;  %v11635_v51 = vld [vmem:[#allocation6 + $0x48] sm:$0xf0] }
 0x67a   :  { %4460 = vmatpush.bf16.msrb.mxu0 %v11634_v25  ;;  %v11601_v25 = vld [vmem:[#allocation6] sm:$0xf] }
 0x67b   :  { %4186 = vmatpush.msra.mxu3 %v3926_v20  ;;  %4147 = vmatpush.msra.mxu1 %v3923_v21  ;;  %v11698_v20 = vor.u32 %v13828_v48, %v11697_v19  ;;  %v11638_v21 = vor.u32 %v13811_v4, %v11635_v51  ;;  %v11678_v19 = vor.u32 %v13821_v11, %v11675_v15  ;;  %v13804_v48 = vld [vmem:[#allocation6 + $0x4] sm:$0xf0]  ;;  %v11665_v4 = vld [vmem:[#allocation6 + $0x80] sm:$0xf]  ;;  %v13845_v11 = vld [vmem:[#allocation6 + $0x154] sm:$0xf] }
 0x67d   :  { %4187 = vmatpush.msra.mxu3 %v3924_v22  ;;  %4148 = vmatpush.msra.mxu1 %v3921_v23  ;;  %v13827_v22 = vld [vmem:[#allocation6 + $0xc4] sm:$0xf]  ;;  %v11699_v23 = vld [vmem:[#allocation6 + $0xc8] sm:$0xf0] }
 0x67e   :  { %4488 = vmatpush.bf16.msrb.mxu2 %v11638_v21  ;;  %v13820_v21 = vld [vmem:[#allocation6 + $0x84] sm:$0xf0] }
 0x67f   :  { %4188 = vmatpush.msra.mxu3 %v3922_v24  ;;  %4149 = vmatpush.msra.mxu1 %v3919_v26  ;;  %v11702_v26 = vor.u32 %v13827_v22, %v11699_v23  ;;  %v13803_v22 = vld [vmem:[#allocation6 + $0x4] sm:$0xf]  ;;  %v11603_v23 = vld [vmem:[#allocation6 + $0x8] sm:$0xf0] }
 0x681   :  { %4189 = vmatpush.msra.mxu3 %v3920_v27  ;;  %4150 = vmatpush.msra.mxu1 %v3917_v18  ;;  %v11625_v27 = vld [vmem:[#allocation6 + $0x30] sm:$0xf]  ;;  %v13810_v18 = vld [vmem:[#allocation6 + $0x34] sm:$0xf0] }
 0x683   :  { %4190 = vmatpush.msra.mxu3 %v3918_v6  ;;  %4151 = vmatpush.msra.mxu1 %v3915_v29  ;;  %v11689_v6 = vld [vmem:[#allocation6 + $0xb0] sm:$0xf] }
 0x684   :  { %v11690_v35 = vor.u32 %v13826_v62, %v11689_v6  ;;  %v13819_v6 = vld [vmem:[#allocation6 + $0x84] sm:$0xf]  ;;  %v11785_v62 = vld [vmem:[#allocation6 + $0x170] sm:$0xf] }
 0x685   :  { %4191 = vmatpush.msra.mxu3 %v3916_v30  ;;  %v11626_v30 = vor.u32 %v13810_v18, %v11625_v27  ;;  %v11666_v27 = vor.u32 %v13820_v21, %v11665_v4  ;;  %v11606_v18 = vor.u32 %v13803_v22, %v11603_v23  ;;  %v11761_v4 = vld [vmem:[#allocation6 + $0x140] sm:$0xf]  ;;  %v13860_v22 = vld [vmem:[#allocation6 + $0x1c4] sm:$0xf0]  ;;  %v13843_v23 = vld [vmem:[#allocation6 + $0x144] sm:$0xf] }
 0x687   :  { %4461 = vmatpush.bf16.msrb.mxu0 %v11626_v30 }
 0x68b   :  { %4462 = vmatpush.bf16.msrb.mxu0 %v11618_v45  ;;  %v11851_v45 = vld [vmem:[#allocation6 + $0x1f8] sm:$0xf0] }
 0x6b4   :  { %v4051_v13 = vpop.f32.mrf.mxu0 }
 0x6ba   :  { %v4091_v29 = vpop.f32.mrf.mxu2 }
 0x6bc   :  { %v4133_v52 = vpop.f32.mrf.mxu0 }
 0x6c1   :  { %v3987_v32 = vpop.f32.mrf.mxu1 }
 0x6c2   :  { %4070 = vmatmul.f32.vlgmr.msrb.gmra.mxu1 %v3987_v32  ;;  %4110 = vmatmul.f32.vlgmr.msrb.gmra.mxu3 %v3987_v32  ;;  %v11627_v32 = vld [vmem:[#allocation6 + $0x38] sm:$0xf0] }
 0x6c3   :  { %4471 = vmatpush.bf16.msrb.mxu1 %v11722_v43  ;;  %4499 = vmatpush.bf16.msrb.mxu3 %v11726_v53  ;;  %v11630_v37 = vor.u32 %v13809_v31, %v11627_v32  ;;  %v11681_v43 = vld [vmem:[#allocation6 + $0xa0] sm:$0xf]  ;;  %v13824_v53 = vld [vmem:[#allocation6 + $0xa4] sm:$0xf0]  ;;  %v13850_v31 = vld [vmem:[#allocation6 + $0x174] sm:$0xf0] }
 0x6c4   :  { %v11682_v56 = vor.u32 %v13824_v53, %v11681_v43  ;;  %v11849_v32 = vld [vmem:[#allocation6 + $0x1f0] sm:$0xf]  ;;  %v11786_v38 = vor.u32 %v13850_v31, %v11785_v62  ;;  %v13865_v43 = vld [vmem:[#allocation6 + $0x1f4] sm:$0xf]  ;;  %v11777_v53 = vld [vmem:[#allocation6 + $0x160] sm:$0xf] }
 0x6c5   :  { %4489 = vmatpush.bf16.msrb.mxu2 %v11630_v37  ;;  %v11854_v50 = vor.u32 %v13865_v43, %v11851_v45  ;;  %v15807_v45 = vld [vmem:[%s18083_s11] sm:$0xf] }
 0x6c7   :  { %4472 = vmatpush.bf16.msrb.mxu1 %v11714_v61  ;;  %4500 = vmatpush.bf16.msrb.mxu3 %v11718_v0  ;;  %v11609_v0 = vld [vmem:[#allocation6 + $0x10] sm:$0xf] }
 0x6c8   :  { %v11610_v2 = vor.u32 %v13806_v1, %v11609_v0  ;;  %v11843_v1 = vld [vmem:[#allocation6 + $0x1e8] sm:$0xf0] }
 0x6c9   :  { %v4031_v33 = vpop.f32.mrf.mxu3  ;;  %4490 = vmatpush.bf16.msrb.mxu2 %v11622_v55  ;;  %v11841_v55 = vld [vmem:[#allocation6 + $0x1e0] sm:$0xf] }
 0x6ca   :  { %4152 = vmatmul.f32.vlgmr.msra.gmra.mxu1 %v4031_v33  ;;  %4192 = vmatmul.f32.vlgmr.msra.gmra.mxu3 %v4031_v33 }
 0x6cb   :  { %4473 = vmatpush.bf16.msrb.mxu1 %v11706_v63  ;;  %4501 = vmatpush.bf16.msrb.mxu3 %v11710_v9  ;;  %v11674_v63 = vor.u32 %v13822_v5, %v11673_v3  ;;  %v11614_v9 = vor.u32 %v13805_v58, %v11611_v10  ;;  %v13846_v3 = vld [vmem:[#allocation6 + $0x154] sm:$0xf0] }
 0x6cc   :  { %4463 = vmatpush.bf16.msrb.mxu0 %v11610_v2  ;;  %v11769_v2 = vld [vmem:[#allocation6 + $0x150] sm:$0xf] }
 0x6cd   :  { %4491 = vmatpush.bf16.msrb.mxu2 %v11614_v9  ;;  %v13861_v9 = vld [vmem:[#allocation6 + $0x1d4] sm:$0xf] }
 0x6cf   :  { %4474 = vmatpush.bf16.msrb.mxu1 %v11698_v20  ;;  %4502 = vmatpush.bf16.msrb.mxu3 %v11702_v26  ;;  %v11602_v20 = vor.u32 %v13804_v48, %v11601_v25 }
 0x6d1   :  { %4464 = vmatpush.bf16.msrb.mxu0 %v11602_v20  ;;  %4492 = vmatpush.bf16.msrb.mxu2 %v11606_v18  ;;  %v11825_v20 = vld [vmem:[#allocation6 + $0x1c0] sm:$0xf]  ;;  %v13859_v18 = vld [vmem:[#allocation6 + $0x1c4] sm:$0xf] }
 0x6d3   :  { %4475 = vmatpush.bf16.msrb.mxu1 %v11690_v35  ;;  %4503 = vmatpush.bf16.msrb.mxu3 %v11694_v39  ;;  %v11850_v39 = vor.u32 %v13866_v34, %v11849_v32  ;;  %v11753_v32 = vld [vmem:[#allocation6 + $0x130] sm:$0xf] }
 0x6d5   :  { %4710 = vmatpush.bf16.msra.mxu0 %v11786_v38 }
 0x6d7   :  { %4476 = vmatpush.bf16.msrb.mxu1 %v11682_v56  ;;  %4504 = vmatpush.bf16.msrb.mxu3 %v11686_v59  ;;  %v11778_v56 = vor.u32 %v13848_v47, %v11777_v53  ;;  %v11779_v59 = vld [vmem:[#allocation6 + $0x168] sm:$0xf0] }
 0x6d8   :  { %v11782_v0 = vor.u32 %v13847_v28, %v11779_v59  ;;  %v13839_v59 = vld [vmem:[#allocation6 + $0x124] sm:$0xf] }
 0x6d9   :  { %4711 = vmatpush.bf16.msra.mxu0 %v11778_v56  ;;  %v11745_v56 = vld [vmem:[#allocation6 + $0x120] sm:$0xf] }
 0x6db   :  { %4477 = vmatpush.bf16.msrb.mxu1 %v11674_v63  ;;  %4505 = vmatpush.bf16.msrb.mxu3 %v11678_v19  ;;  %v13862_v63 = vld [vmem:[#allocation6 + $0x1d4] sm:$0xf0]  ;;  %v11835_v19 = vld [vmem:[#allocation6 + $0x1d8] sm:$0xf0] }
 0x6dc   :  { %v11838_v48 = vor.u32 %v13861_v9, %v11835_v19  ;;  %v11801_v9 = vld [vmem:[#allocation6 + $0x190] sm:$0xf]  ;;  %v4513_v19 = vld [vmem:[%s18082_s10] sm:$0xff] }
 0x6df   :  { %4478 = vmatpush.bf16.msrb.mxu1 %v11666_v27  ;;  %v11763_v27 = vld [vmem:[#allocation6 + $0x148] sm:$0xf0] }
 0x6e3   :  { %4724 = vmatpush.bf16.msra.mxu1 %v11850_v39 }
 0x73f   :  { %v4071_v24 = vpop.f32.mrf.mxu1 }
 0x740   :  { %v4072_v33 = vadd.f32 %v4071_v24, %v4051_v13  ;;  %v4173_v13 = vpop.f32.mrf.mxu2 }
 0x742   :  { %v15781_v49 = vmul.f32 0.0078125, %v4072_v33 }
 0x744   :  { %v4198_v7 = vmul.f32 %v15781_v49, %v15781_v49 }
 0x745   :  { %v4111_v44 = vpop.f32.mrf.mxu3 }
 0x746   :  { %v4112_v61 = vadd.f32 %v4111_v44, %v4091_v29  ;;  %v11667_v29 = vld [vmem:[#allocation6 + $0x88] sm:$0xf0] }
 0x747   :  { %v4153_v46 = vpop.f32.mrf.mxu1  ;;  %v11670_v30 = vor.u32 %v13819_v6, %v11667_v29  ;;  %v11827_v6 = vld [vmem:[#allocation6 + $0x1c8] sm:$0xf0]  ;;  %v11766_v29 = vor.u32 %v13843_v23, %v11763_v27  ;;  %v11803_v23 = vld [vmem:[#allocation6 + $0x198] sm:$0xf0]  ;;  %v13836_v27 = vld [vmem:[#allocation6 + $0x104] sm:$0xf0] }
 0x748   :  { %v4154_v60 = vadd.f32 %v4153_v46, %v4133_v52  ;;  %v15785_v12 = vmul.f32 0.0078125, %v4112_v61  ;;  %v11790_v52 = vor.u32 %v13849_v40, %v11787_v41  ;;  %v11842_v46 = vor.u32 %v13864_v57, %v11841_v55  ;;  %v13858_v40 = vld [vmem:[#allocation6 + $0x1b4] sm:$0xf0]  ;;  %v13841_v41 = vld [vmem:[#allocation6 + $0x134] sm:$0xf] }
 0x749   :  { %4506 = vmatpush.bf16.msrb.mxu3 %v11670_v30  ;;  %v11830_v62 = vor.u32 %v13859_v18, %v11827_v6  ;;  %v13840_v55 = vld [vmem:[#allocation6 + $0x124] sm:$0xf0]  ;;  %v11793_v18 = vld [vmem:[#allocation6 + $0x180] sm:$0xf] }
 0x74a   :  { %v4196_v8 = vmul.f32 0.0078125, %v4154_v60  ;;  %v4199_v33 = vmul.f32 %v15785_v12, %v15785_v12  ;;  %4738 = vmatpush.bf16.msra.mxu2 %v11790_v52  ;;  %v13863_v60 = vld [vmem:[#allocation6 + $0x1e4] sm:$0xf]  ;;  %4725 = vmatpush.bf16.msra.mxu1 %v11842_v46  ;;  %v13857_v52 = vld [vmem:[#allocation6 + $0x1b4] sm:$0xf]  ;;  %v11746_v28 = vor.u32 %v13840_v55, %v11745_v56 }
 0x74b   :  { %v11846_v58 = vor.u32 %v13863_v60, %v11843_v1  ;;  %v13856_v46 = vld [vmem:[#allocation6 + $0x1a4] sm:$0xf0] }
 0x74c   :  { %v4200_v42 = vsub.f32 %v4196_v8, %v4198_v7  ;;  %v11770_v7 = vor.u32 %v13846_v3, %v11769_v2  ;;  %v11833_v8 = vld [vmem:[#allocation6 + $0x1d0] sm:$0xf]  ;;  %v11747_v2 = vld [vmem:[#allocation6 + $0x128] sm:$0xf0]  ;;  %v13855_v3 = vld [vmem:[#allocation6 + $0x1a4] sm:$0xf] }
 0x74d   :  { %v4193_v51 = vpop.f32.mrf.mxu3  ;;  %4752 = vmatpush.bf16.msra.mxu3 %v11854_v50  ;;  %v11834_v10 = vor.u32 %v13862_v63, %v11833_v8  ;;  %v11819_v50 = vld [vmem:[#allocation6 + $0x1b8] sm:$0xf0]  ;;  %v11737_v8 = vld [vmem:[#allocation6 + $0x110] sm:$0xf]  ;;  %v13838_v63 = vld [vmem:[#allocation6 + $0x114] sm:$0xf0] }
 0x74e   :  { %v4202_v24 = vmax.f32 %v4200_v42, 0.0  ;;  %v4194_v26 = vadd.f32 %v4193_v51, %v4173_v13  ;;  %v11771_v13 = vld [vmem:[#allocation6 + $0x158] sm:$0xf0]  ;;  %4739 = vmatpush.bf16.msra.mxu2 %v11782_v0  ;;  %v13844_v51 = vld [vmem:[#allocation6 + $0x144] sm:$0xf0]  ;;  %4712 = vmatpush.bf16.msra.mxu0 %v11770_v7  ;;  %v11822_v57 = vor.u32 %v13857_v52, %v11819_v50 }
 0x74f   :  { %v11774_v42 = vor.u32 %v13845_v11, %v11771_v13  ;;  %v11762_v21 = vor.u32 %v13844_v51, %v11761_v4  ;;  %4726 = vmatpush.bf16.msra.mxu1 %v11834_v10  ;;  %v11811_v7 = vld [vmem:[#allocation6 + $0x1a8] sm:$0xf0]  ;;  %v13837_v4 = vld [vmem:[#allocation6 + $0x114] sm:$0xf]  ;;  %v11739_v51 = vld [vmem:[#allocation6 + $0x118] sm:$0xf0] }
 0x750   :  { %v15789_v35 = vadd.f32 1e-05, %v4202_v24  ;;  %v4197_v37 = vmul.f32 0.0078125, %v4194_v26  ;;  %v11826_v26 = vor.u32 %v13860_v22, %v11825_v20  ;;  %v11814_v13 = vor.u32 %v13855_v3, %v11811_v7  ;;  %v13853_v22 = vld [vmem:[#allocation6 + $0x194] sm:$0xf] }
 0x751   :  { %4753 = vmatpush.bf16.msra.mxu3 %v11846_v58  ;;  %v11750_v58 = vor.u32 %v13839_v59, %v11747_v2  ;;  %v13852_v6 = vld [vmem:[#allocation6 + $0x184] sm:$0xf0] }
 0x752   :  { %14206 = vrsqrt.f32 %v15789_v35  ;;  %v4201_v44 = vsub.f32 %v4197_v37, %v4199_v33  ;;  %4740 = vmatpush.bf16.msra.mxu2 %v11774_v42  ;;  %4713 = vmatpush.bf16.msra.mxu0 %v11762_v21  ;;  %v13842_v33 = vld [vmem:[#allocation6 + $0x134] sm:$0xf0]  ;;  %v11817_v37 = vld [vmem:[#allocation6 + $0x1b0] sm:$0xf]  ;;  %vm4212_vm15 = vweird.f32 %v15789_v35 }
 0x753   :  { %4727 = vmatpush.bf16.msra.mxu1 %v11826_v26  ;;  %v11754_v39 = vor.u32 %v13842_v33, %v11753_v32  ;;  %v11818_v43 = vor.u32 %v13858_v40, %v11817_v37  ;;  %v13854_v42 = vld [vmem:[#allocation6 + $0x194] sm:$0xf0]  ;;  %v11742_v26 = vor.u32 %v13837_v4, %v11739_v51  ;;  %v11927_v4 = vld [vmem:[#allocation6 + $0x268] sm:$0xf0] }
 0x754   :  { %v4203_v61 = vmax.f32 %v4201_v44, 0.0  ;;  %v11755_v44 = vld [vmem:[#allocation6 + $0x138] sm:$0xf0]  ;;  %v11802_v21 = vor.u32 %v13854_v42, %v11801_v9 }
 0x755   :  { %4754 = vmatpush.bf16.msra.mxu3 %v11838_v48  ;;  %v11758_v47 = vor.u32 %v13841_v41, %v11755_v44  ;;  %v11738_v48 = vor.u32 %v13838_v63, %v11737_v8  ;;  %v11935_v9 = vld [vmem:[#allocation6 + $0x278] sm:$0xf0] }
 0x756   :  { %v15792_v5 = vadd.f32 1e-05, %v4203_v61  ;;  %4741 = vmatpush.bf16.msra.mxu2 %v11766_v29  ;;  %4714 = vmatpush.bf16.msra.mxu0 %v11754_v39  ;;  %v11809_v61 = vld [vmem:[#allocation6 + $0x1a0] sm:$0xf]  ;;  %v11794_v39 = vor.u32 %v13852_v6, %v11793_v18  ;;  %v11919_v18 = vld [vmem:[#allocation6 + $0x258] sm:$0xf0] }
 0x757   :  { %4728 = vmatpush.bf16.msra.mxu1 %v11818_v43  ;;  %v11810_v1 = vor.u32 %v13856_v46, %v11809_v61 }
 0x758   :  { %v15794_v15 = vpop.eup %14206  ;;  %14208 = vrsqrt.f32 %v15792_v5  ;;  %vm4222_vm1 = vweird.f32 %v15792_v5 }
 0x759   :  { %v4207_v25 = vmul.f32 %v15794_v15, %v15789_v35  ;;  %4755 = vmatpush.bf16.msra.mxu3 %v11830_v62  ;;  %vm4213_vm13 = vweird.f32 %v15794_v15  ;;  %v4227_v35 = vperm.slane %v15807_v45, 0  ;;  %v13835_v62 = vld [vmem:[#allocation6 + $0x104] sm:$0xf] }
 0x75a   :  { %4742 = vmatpush.bf16.msra.mxu2 %v11758_v47  ;;  %vm15816_vm0 = vmor %vm4212_vm15, %vm4213_vm13  ;;  %4715 = vmatpush.bf16.msra.mxu0 %v11746_v28 }
 0x75b   :  { %v4208_v24 = vmul.f32 %v15794_v15, %v4207_v25  ;;  %v4228_v25 = vperm.slane %v15807_v45, 2  ;;  %4729 = vmatpush.bf16.msra.mxu1 %v11810_v1 }
 0x75d   :  { %v4209_v30 = vmul.f32 0.5, %v4208_v24  ;;  %4756 = vmatpush.bf16.msra.mxu3 %v11822_v57  ;;  %v11729_v24 = vld [vmem:[#allocation6 + $0x100] sm:$0xf] }
 0x75e   :  { %v15800_v31 = vpop.eup %14208  ;;  %4743 = vmatpush.bf16.msra.mxu2 %v11750_v58  ;;  %4716 = vmatpush.bf16.msra.mxu0 %v11738_v48  ;;  %v11730_v37 = vor.u32 %v13836_v27, %v11729_v24  ;;  %v13879_v48 = vld [vmem:[#allocation6 + $0x264] sm:$0xf]  ;;  %v13877_v27 = vld [vmem:[#allocation6 + $0x254] sm:$0xf] }
 0x75f   :  { %v4210_v38 = vsub.f32 1.5, %v4209_v30  ;;  %v4217_v34 = vmul.f32 %v15800_v31, %v15792_v5  ;;  %vm4223_vm14 = vweird.f32 %v15800_v31  ;;  %v11806_v30 = vor.u32 %v13853_v22, %v11803_v23  ;;  %4730 = vmatpush.bf16.msra.mxu1 %v11802_v21  ;;  %v13897_v21 = vld [vmem:[#allocation6 + $0x2f4] sm:$0xf]  ;;  %v11999_v22 = vld [vmem:[#allocation6 + $0x2f8] sm:$0xf0] }
 0x760   :  { %vm15824_vm2 = vmor %vm4222_vm1, %vm4223_vm14 }
 0x761   :  { %v4218_v53 = vmul.f32 %v15800_v31, %v4217_v34  ;;  %v4211_v60 = vmul.f32 %v15794_v15, %v4210_v38  ;;  %4757 = vmatpush.bf16.msra.mxu3 %v11814_v13  ;;  %v13851_v38 = vld [vmem:[#allocation6 + $0x184] sm:$0xf]  ;;  %v11795_v34 = vld [vmem:[#allocation6 + $0x188] sm:$0xf0]  ;;  %v13881_v13 = vld [vmem:[#allocation6 + $0x274] sm:$0xf] }
 0x762   :  { %4744 = vmatpush.bf16.msra.mxu2 %v11742_v26  ;;  %v11798_v43 = vor.u32 %v13851_v38, %v11795_v34  ;;  %4717 = vmatpush.bf16.msra.mxu0 %v11730_v37  ;;  %v11911_v37 = vld [vmem:[#allocation6 + $0x248] sm:$0xf0] }
 0x763   :  { %v4219_v0 = vmul.f32 0.5, %v4218_v53  ;;  %v4215_v5 = vsel %vm15816_vm0, %v15794_v15, %v4211_v60  ;;  %v11731_v15 = vld [vmem:[#allocation6 + $0x108] sm:$0xf0]  ;;  %4731 = vmatpush.bf16.msra.mxu1 %v11794_v39 }
 0x764   :  { %v4231_v32 = vmul.f32 %v4227_v35, %v4215_v5  ;;  %v11734_v41 = vor.u32 %v13835_v62, %v11731_v15  ;;  %v11922_v62 = vor.u32 %v13877_v27, %v11919_v18  ;;  %v13895_v15 = vld [vmem:[#allocation6 + $0x2e4] sm:$0xf]  ;;  %v11879_v27 = vld [vmem:[#allocation6 + $0x208] sm:$0xf0]  ;;  %v11909_v18 = vld [vmem:[#allocation6 + $0x240] sm:$0xf] }
 0x765   :  { %v4220_v11 = vsub.f32 1.5, %v4219_v0  ;;  %4758 = vmatpush.bf16.msra.mxu3 %v11806_v30  ;;  %v4514_v30 = vld [vmem:[%s18082_s10 + $0x8] sm:$0xff] }
 0x766   :  { %4745 = vmatpush.bf16.msra.mxu2 %v11734_v41  ;;  %v4242_v47 = vperm.slane %v4231_v32, 0  ;;  %v13893_v41 = vld [vmem:[#allocation6 + $0x2d4] sm:$0xf] }
 0x767   :  { %v4221_v20 = vmul.f32 %v15800_v31, %v4220_v11 }
 0x768   :  { %v4244_v57 = vmul.f32 %v4242_v47, %v15533_v16  ;;  %v4246_v28 = vmul.f32 %v4242_v47, %v15535_v17 }
 0x769   :  { %v4225_v29 = vsel %vm15824_vm2, %v15800_v31, %v4221_v20  ;;  %v4233_v31 = vmul.f32 %v4231_v32, %v15781_v49  ;;  %4759 = vmatpush.bf16.msra.mxu3 %v11798_v43  ;;  %v11930_v20 = vor.u32 %v13879_v48, %v11927_v4  ;;  %v11991_v32 = vld [vmem:[#allocation6 + $0x2e8] sm:$0xf0]  ;;  %v11983_v43 = vld [vmem:[#allocation6 + $0x2d8] sm:$0xf0]  ;;  %v13887_v4 = vld [vmem:[#allocation6 + $0x2a4] sm:$0xf] }
 0x76a   :  { %v4232_v33 = vmul.f32 %v4228_v25, %v4225_v29  ;;  %v11938_v25 = vor.u32 %v13881_v13, %v11935_v9  ;;  %v12002_v29 = vor.u32 %v13897_v21, %v11999_v22  ;;  %v11994_v38 = vor.u32 %v13895_v15, %v11991_v32  ;;  %v13869_v13 = vld [vmem:[#allocation6 + $0x214] sm:$0xf]  ;;  %v11887_v9 = vld [vmem:[#allocation6 + $0x218] sm:$0xf0]  ;;  %v11856_v21 = vld [vmem:[%s18082_s10 + $0x28] sm:$0xff] }
 0x76b   :  { %v4516_v22 = vld [vmem:[%s18082_s10 + $0x18] sm:$0xff]  ;;  %v11981_v32 = vld [vmem:[#allocation6 + $0x2d0] sm:$0xf] }
 0x76c   :  { %v4234_v40 = vmul.f32 %v4232_v33, %v15785_v12  ;;  %v4243_v56 = vperm.slane %v4232_v33, 0  ;;  %v13875_v33 = vld [vmem:[#allocation6 + $0x244] sm:$0xf]  ;;  %v13914_v15 = vld [vmem:[#allocation6 + $0x374] sm:$0xf0] }
 0x76e   :  { %v4237_v44 = vrot.slane %v4234_v40, 6  ;;  %v4245_v49 = vmul.f32 %v4243_v56, %v15631_v14  ;;  %v4247_v61 = vmul.f32 %v4243_v56, %v15633_v54  ;;  %v11914_v40 = vor.u32 %v13875_v33, %v11911_v37  ;;  %v11903_v56 = vld [vmem:[#allocation6 + $0x238] sm:$0xf0]  ;;  %v13894_v33 = vld [vmem:[#allocation6 + $0x2d4] sm:$0xf0] }
 0x770   :  { %v4238_v52 = vsel %vm2099_vm4, %v4233_v31, %v4237_v44 }
 0x771   :  { %v4239_v53 = vrot.slane %v4238_v52, 7  ;;  %v11933_v52 = vld [vmem:[#allocation6 + $0x270] sm:$0xf] }
 0x773   :  { %v4241_v50 = vsub.f32 %v15807_v45, %v4239_v53  ;;  %v13882_v53 = vld [vmem:[#allocation6 + $0x274] sm:$0xf0] }
 0x775   :  { %v4249_v55 = vperm.slane %v4241_v50, 1  ;;  %v4250_v12 = vperm.slane %v4241_v50, 3  ;;  %v13873_v50 = vld [vmem:[#allocation6 + $0x234] sm:$0xf] }
 0x777   :  { %v4253_v46 = vperm.slane %v4249_v55, 1  ;;  %v4254_v59 = vperm.slane %v4250_v12, 1  ;;  %v11986_v55 = vor.u32 %v13893_v41, %v11983_v43  ;;  %v11901_v41 = vld [vmem:[#allocation6 + $0x230] sm:$0xf]  ;;  %v13874_v43 = vld [vmem:[#allocation6 + $0x234] sm:$0xf0] }
 0x779   :  { %v4255_v60 = vadd.f32 %v4253_v46, %v4244_v57  ;;  %v4256_v0 = vadd.f32 %v4254_v59, %v4245_v49  ;;  %v4257_v1 = vadd.f32 %v4253_v46, %v4246_v28  ;;  %v4258_v2 = vadd.f32 %v4254_v59, %v4247_v61  ;;  %v11855_v57 = vld [vmem:[%s18082_s10 + $0x20] sm:$0xff]  ;;  %v11975_v61 = vld [vmem:[#allocation6 + $0x2c8] sm:$0xf0]  ;;  %v4515_v46 = vld [vmem:[%s18082_s10 + $0x10] sm:$0xff] }
 0x77a   :  { %v11934_v28 = vor.u32 %v13882_v53, %v11933_v52  ;;  %v13891_v49 = vld [vmem:[#allocation6 + $0x2c4] sm:$0xf]  ;;  %v11906_v59 = vor.u32 %v13873_v50, %v11903_v56  ;;  %v13912_v52 = vld [vmem:[#allocation6 + $0x364] sm:$0xf0]  ;;  %v11973_v50 = vld [vmem:[#allocation6 + $0x2c0] sm:$0xf] }
 0x77b   :  { %v4259_v3 = vmax.f32 %v4255_v60, 0.0  ;;  %v4260_v58 = vmax.f32 %v4256_v0, 0.0  ;;  %v4261_v45 = vmax.f32 %v4257_v1, 0.0  ;;  %v4262_v7 = vmax.f32 %v4258_v2, 0.0  ;;  %v11925_v60 = vld [vmem:[#allocation6 + $0x260] sm:$0xf] }
 0x77c   :  { %v13880_v0 = vld [vmem:[#allocation6 + $0x264] sm:$0xf0]  ;;  %v13871_v1 = vld [vmem:[#allocation6 + $0x224] sm:$0xf]  ;;  %v11895_v2 = vld [vmem:[#allocation6 + $0x228] sm:$0xf0] }
 0x77d   :  { %v15844_v8 = vpack.c.bf16 %v4261_v45, %v4259_v3  ;;  %v15846_v63 = vpack.c.bf16 %v4262_v7, %v4260_v58  ;;  %v11978_v3 = vor.u32 %v13891_v49, %v11975_v61  ;;  %v13889_v58 = vld [vmem:[#allocation6 + $0x2b4] sm:$0xf]  ;;  %v13892_v56 = vld [vmem:[#allocation6 + $0x2c4] sm:$0xf0]  ;;  %v13930_v61 = vld [vmem:[#allocation6 + $0x3f4] sm:$0xf0] }
 0x77f   :  { %4465 = vmatmul.bf16.vlgmr.msrb.gmra.mxu0 %v15844_v8  ;;  %4479 = vmatmul.bf16.vlgmr.msrb.gmra.mxu1 %v15846_v63 }
 0x780   :  { %4493 = vmatmul.bf16.vlgmr.msrb.gmra.mxu2 %v15844_v8  ;;  %4507 = vmatmul.bf16.vlgmr.msrb.gmra.mxu3 %v15846_v63 }
 0x78f   :  { %4718 = vmatmul.bf16.vlgmr.msra.gmra.mxu0 %v15844_v8  ;;  %4732 = vmatmul.bf16.vlgmr.msra.gmra.mxu1 %v15846_v63 }
 0x790   :  { %4746 = vmatmul.bf16.vlgmr.msra.gmra.mxu2 %v15844_v8  ;;  %4760 = vmatmul.bf16.vlgmr.msra.gmra.mxu3 %v15846_v63 }
 0x7fc   :  { %v4466_v16 = vpop.f32.mrf.mxu0  ;;  %v4480_v17 = vpop.f32.mrf.mxu1 }
 0x7fd   :  { %v4481_v35 = vadd.f32 %v4480_v17, %v4466_v16  ;;  %v11926_v16 = vor.u32 %v13880_v0, %v11925_v60  ;;  %v11967_v17 = vld [vmem:[#allocation6 + $0x2b8] sm:$0xf0]  ;;  %v11974_v60 = vor.u32 %v13892_v56, %v11973_v50  ;;  %v12057_v0 = vld [vmem:[#allocation6 + $0x350] sm:$0xf]  ;;  %v13920_v50 = vld [vmem:[#allocation6 + $0x3a4] sm:$0xf0] }
 0x7fe   :  { %v12017_v56 = vld [vmem:[#allocation6 + $0x300] sm:$0xf] }
 0x803   :  { %v4494_v14 = vpop.f32.mrf.mxu2  ;;  %v4508_v54 = vpop.f32.mrf.mxu3 }
 0x804   :  { %v4468_v10 = vpop.f32.mrf.mxu0  ;;  %v4482_v11 = vpop.f32.mrf.mxu1  ;;  %v4509_v6 = vadd.f32 %v4508_v54, %v4494_v14  ;;  %v11997_v14 = vld [vmem:[#allocation6 + $0x2f0] sm:$0xf]  ;;  %v13898_v54 = vld [vmem:[#allocation6 + $0x2f4] sm:$0xf0] }
 0x805   :  { %v4483_v42 = vadd.f32 %v4482_v11, %v4468_v10  ;;  %v11898_v11 = vor.u32 %v13871_v1, %v11895_v2  ;;  %v11998_v48 = vor.u32 %v13898_v54, %v11997_v14  ;;  %v13910_v1 = vld [vmem:[#allocation6 + $0x354] sm:$0xf0]  ;;  %v13928_v14 = vld [vmem:[#allocation6 + $0x3e4] sm:$0xf0]  ;;  %v11885_v54 = vld [vmem:[#allocation6 + $0x210] sm:$0xf] }
 0x807   :  { %4867 = vmatpush.msrb.mxu2 %v4483_v42  ;;  %v11917_v42 = vld [vmem:[#allocation6 + $0x250] sm:$0xf] }
 0x809   :  { %4868 = vmatpush.msrb.mxu2 %v4481_v35  ;;  %v13878_v35 = vld [vmem:[#allocation6 + $0x254] sm:$0xf0] }
 0x80a   :  { %11867 = vmatmul.msk.f32.vlgmr.msrb.gmra.mxu2 %vm3947_vm12, %v4513_v19 }
 0x80b   :  { %v4496_v51 = vpop.f32.mrf.mxu2  ;;  %v4510_v5 = vpop.f32.mrf.mxu3  ;;  %5132 = vmatpush.bf16.msra.mxu2 %v11938_v25  ;;  %v11970_v25 = vor.u32 %v13889_v58, %v11967_v17  ;;  %v13890_v58 = vld [vmem:[#allocation6 + $0x2b4] sm:$0xf0]  ;;  %v12058_v17 = vor.u32 %v13910_v1, %v12057_v0 }
 0x80c   :  { %v4511_v23 = vadd.f32 %v4510_v5, %v4496_v51  ;;  %v4719_v24 = vpop.f32.mrf.mxu0  ;;  %v4733_v26 = vpop.f32.mrf.mxu1  ;;  %v11959_v51 = vld [vmem:[#allocation6 + $0x2a8] sm:$0xf0]  ;;  %v11989_v5 = vld [vmem:[#allocation6 + $0x2e0] sm:$0xf] }
 0x80d   :  { %v4734_v12 = vadd.f32 %v4733_v26, %v4719_v24  ;;  %v11918_v24 = vor.u32 %v13878_v35, %v11917_v42  ;;  %v13867_v26 = vld [vmem:[#allocation6 + $0x204] sm:$0xf]  ;;  %v11957_v42 = vld [vmem:[#allocation6 + $0x2a0] sm:$0xf]  ;;  %v13888_v35 = vld [vmem:[#allocation6 + $0x2a4] sm:$0xf0] }
 0x80e   :  { %4896 = vmatpush.msrb.mxu3 %v4511_v23  ;;  %v11890_v23 = vor.u32 %v13869_v13, %v11887_v9  ;;  %v11882_v37 = vor.u32 %v13867_v26, %v11879_v27  ;;  %v12049_v13 = vld [vmem:[#allocation6 + $0x340] sm:$0xf]  ;;  %v13908_v9 = vld [vmem:[#allocation6 + $0x344] sm:$0xf0]  ;;  %v11949_v26 = vld [vmem:[#allocation6 + $0x290] sm:$0xf] }
 0x80f   :  { %5133 = vmatpush.bf16.msra.mxu2 %v11930_v20  ;;  %v13896_v20 = vld [vmem:[#allocation6 + $0x2e4] sm:$0xf0]  ;;  %v13886_v27 = vld [vmem:[#allocation6 + $0x294] sm:$0xf0] }
 0x810   :  { %4897 = vmatpush.msrb.mxu3 %v4509_v6  ;;  %v13876_v6 = vld [vmem:[#allocation6 + $0x244] sm:$0xf0] }
 0x811   :  { %11871 = vmatmul.msk.f32.vlgmr.msrb.gmra.mxu3 %vm3947_vm12, %v4513_v19 }
 0x812   :  { %5146 = vmatpush.bf16.msra.mxu3 %v12002_v29  ;;  %11868 = vmatmul.msk.f32.gmra.mxu2 %vm3947_vm12, %v4514_v30  ;;  %v11962_v29 = vor.u32 %v13887_v4, %v11959_v51  ;;  %v12121_v4 = vld [vmem:[#allocation6 + $0x3d0] sm:$0xf]  ;;  %v12050_v51 = vor.u32 %v13908_v9, %v12049_v13 }
 0x813   :  { %v4747_v34 = vpop.f32.mrf.mxu2  ;;  %v4761_v39 = vpop.f32.mrf.mxu3  ;;  %5134 = vmatpush.bf16.msra.mxu2 %v11922_v62  ;;  %v12073_v62 = vld [vmem:[#allocation6 + $0x370] sm:$0xf] }
 0x814   :  { %v4721_v31 = vpop.f32.mrf.mxu0  ;;  %v4735_v44 = vpop.f32.mrf.mxu1  ;;  %v4762_v19 = vadd.f32 %v4761_v39, %v4747_v34  ;;  %v13885_v34 = vld [vmem:[#allocation6 + $0x294] sm:$0xf]  ;;  %v11951_v39 = vld [vmem:[#allocation6 + $0x298] sm:$0xf0] }
 0x815   :  { %v4736_v47 = vadd.f32 %v4735_v44, %v4721_v31  ;;  %v11982_v31 = vor.u32 %v13894_v33, %v11981_v32  ;;  %v12065_v44 = vld [vmem:[#allocation6 + $0x360] sm:$0xf]  ;;  %v11954_v53 = vor.u32 %v13885_v34, %v11951_v39  ;;  %v13904_v33 = vld [vmem:[#allocation6 + $0x324] sm:$0xf0] }
 0x816   :  { %5147 = vmatpush.bf16.msra.mxu3 %v11994_v38  ;;  %v11910_v38 = vor.u32 %v13876_v6, %v11909_v18  ;;  %v12066_v49 = vor.u32 %v13912_v52, %v12065_v44  ;;  %v12033_v32 = vld [vmem:[#allocation6 + $0x320] sm:$0xf]  ;;  %v13902_v44 = vld [vmem:[#allocation6 + $0x314] sm:$0xf0] }
 0x817   :  { %5135 = vmatpush.bf16.msra.mxu2 %v11914_v40  ;;  %4797 = vmatpush.msrb.mxu0 %v4736_v47  ;;  %v12074_v40 = vor.u32 %v13914_v15, %v12073_v62  ;;  %v11857_v47 = vld [vmem:[%s18082_s10 + $0x30] sm:$0xff]  ;;  %v13924_v62 = vld [vmem:[#allocation6 + $0x3c4] sm:$0xf0]  ;;  %v11950_v15 = vor.u32 %v13886_v27, %v11949_v26  ;;  %v12034_v39 = vor.u32 %v13904_v33, %v12033_v32  ;;  %v13927_v26 = vld [vmem:[#allocation6 + $0x3e4] sm:$0xf] }
 0x818   :  { %v12131_v27 = vld [vmem:[#allocation6 + $0x3e8] sm:$0xf0]  ;;  %v12075_v32 = vld [vmem:[#allocation6 + $0x378] sm:$0xf0] }
 0x819   :  { %11872 = vmatmul.msk.f32.gmra.mxu3 %vm3947_vm12, %v4514_v30  ;;  %4798 = vmatpush.msrb.mxu0 %v4734_v12  ;;  %v11990_v30 = vor.u32 %v13896_v20, %v11989_v5  ;;  %v13883_v12 = vld [vmem:[#allocation6 + $0x284] sm:$0xf]  ;;  %v13926_v5 = vld [vmem:[#allocation6 + $0x3d4] sm:$0xf0]  ;;  %v11877_v20 = vld [vmem:[#allocation6 + $0x200] sm:$0xf] }
 0x81a   :  { %5148 = vmatpush.bf16.msra.mxu3 %v11986_v55  ;;  %11859 = vmatmul.msk.f32.vlgmr.msrb.gmra.mxu0 %vm3947_vm12, %v11855_v57  ;;  %v11902_v55 = vor.u32 %v13874_v43, %v11901_v41  ;;  %v12122_v18 = vor.u32 %v13926_v5, %v12121_v4  ;;  %v13922_v41 = vld [vmem:[#allocation6 + $0x3b4] sm:$0xf0]  ;;  %v12139_v5 = vld [vmem:[#allocation6 + $0x3f8] sm:$0xf0] }
 0x81b   :  { %v4749_v45 = vpop.f32.mrf.mxu2  ;;  %v4763_v7 = vpop.f32.mrf.mxu3  ;;  %11869 = vmatmul.msk.f32.gmra.mxu2 %vm3947_vm12, %v4515_v46  ;;  %5104 = vmatpush.bf16.msra.mxu0 %v11934_v28  ;;  %v12137_v28 = vld [vmem:[#allocation6 + $0x3f0] sm:$0xf] }
 0x81c   :  { %v4764_v10 = vadd.f32 %v4763_v7, %v4749_v45  ;;  %5136 = vmatpush.bf16.msra.mxu2 %v11906_v59  ;;  %v13872_v59 = vld [vmem:[#allocation6 + $0x224] sm:$0xf0]  ;;  %v12138_v45 = vor.u32 %v13930_v61, %v12137_v28  ;;  %v12089_v28 = vld [vmem:[#allocation6 + $0x390] sm:$0xf] }
 0x81e   :  { %5149 = vmatpush.bf16.msra.mxu3 %v11978_v3  ;;  %4826 = vmatpush.msrb.mxu1 %v4764_v10  ;;  %v11965_v3 = vld [vmem:[#allocation6 + $0x2b0] sm:$0xf]  ;;  %v13870_v10 = vld [vmem:[#allocation6 + $0x214] sm:$0xf0] }
 0x81f   :  { %5105 = vmatpush.bf16.msra.mxu0 %v11926_v16  ;;  %v12129_v16 = vld [vmem:[#allocation6 + $0x3e0] sm:$0xf] }
 0x820   :  { %5137 = vmatpush.bf16.msra.mxu2 %v11898_v11  ;;  %4827 = vmatpush.msrb.mxu1 %v4762_v19  ;;  %v11966_v11 = vor.u32 %v13890_v58, %v11965_v3  ;;  %v12130_v19 = vor.u32 %v13928_v14, %v12129_v16 }
 0x821   :  { %11863 = vmatmul.msk.f32.vlgmr.msrb.gmra.mxu1 %vm3947_vm12, %v11855_v57  ;;  %11873 = vmatmul.msk.f32.gmra.mxu3 %vm3947_vm12, %v4515_v46  ;;  %v11943_v57 = vld [vmem:[#allocation6 + $0x288] sm:$0xf0]  ;;  %v11893_v46 = vld [vmem:[#allocation6 + $0x220] sm:$0xf] }
 0x822   :  { %5150 = vmatpush.bf16.msra.mxu3 %v11970_v25  ;;  %5118 = vmatpush.bf16.msra.mxu1 %v11998_v48  ;;  %v11946_v2 = vor.u32 %v13883_v12, %v11943_v57  ;;  %v11894_v7 = vor.u32 %v13872_v59, %v11893_v46  ;;  %v11858_v25 = vld [vmem:[%s18082_s10 + $0x38] sm:$0xff]  ;;  %v11886_v48 = vor.u32 %v13870_v10, %v11885_v54  ;;  %v12081_v46 = vld [vmem:[#allocation6 + $0x380] sm:$0xf]  ;;  %v13916_v59 = vld [vmem:[#allocation6 + $0x384] sm:$0xf0] }
 0x823   :  { %11860 = vmatmul.msk.f32.gmra.mxu0 %vm3947_vm12, %v11856_v21  ;;  %11870 = vmatmul.msk.f32.gmra.mxu2 %vm3947_vm12, %v4516_v22 }
 0x824   :  { %5138 = vmatpush.bf16.msra.mxu2 %v11890_v23  ;;  %5106 = vmatpush.bf16.msra.mxu0 %v11918_v24  ;;  %v12041_v23 = vld [vmem:[#allocation6 + $0x330] sm:$0xf]  ;;  %v13906_v24 = vld [vmem:[#allocation6 + $0x334] sm:$0xf0] }
 0x826   :  { %5151 = vmatpush.bf16.msra.mxu3 %v11962_v29  ;;  %5119 = vmatpush.bf16.msra.mxu1 %v11990_v30  ;;  %v12042_v29 = vor.u32 %v13906_v24, %v12041_v23  ;;  %v12113_v30 = vld [vmem:[#allocation6 + $0x3c0] sm:$0xf] }
 0x827   :  { %v12114_v34 = vor.u32 %v13924_v62, %v12113_v30  ;;  %v12003_v23 = vld [vmem:[%s18082_s10 + $0x40] sm:$0xff] }
 0x828   :  { %5139 = vmatpush.bf16.msra.mxu2 %v11882_v37  ;;  %5107 = vmatpush.bf16.msra.mxu0 %v11910_v38  ;;  %v11941_v37 = vld [vmem:[#allocation6 + $0x280] sm:$0xf]  ;;  %v13884_v38 = vld [vmem:[#allocation6 + $0x284] sm:$0xf0] }
 0x829   :  { %11864 = vmatmul.msk.f32.gmra.mxu1 %vm3947_vm12, %v11856_v21  ;;  %11874 = vmatmul.msk.f32.gmra.mxu3 %vm3947_vm12, %v4516_v22  ;;  %v13868_v21 = vld [vmem:[#allocation6 + $0x204] sm:$0xf0]  ;;  %v11958_v22 = vor.u32 %v13888_v35, %v11957_v42  ;;  %v11942_v43 = vor.u32 %v13884_v38, %v11941_v37 }
 0x82a   :  { %5120 = vmatpush.bf16.msra.mxu1 %v11982_v31  ;;  %5152 = vmatpush.bf16.msra.mxu3 %v11954_v53  ;;  %v11878_v6 = vor.u32 %v13868_v21, %v11877_v20  ;;  %v12025_v31 = vld [vmem:[#allocation6 + $0x310] sm:$0xf]  ;;  %v12004_v37 = vld [vmem:[%s18082_s10 + $0x48] sm:$0xff] }
 0x82b   :  { %11861 = vmatmul.msk.f32.gmra.mxu0 %vm3947_vm12, %v11857_v47  ;;  %5140 = vmatmul.bf16.vlgmr.msra.gmra.mxu2 %v15844_v8  ;;  %v12026_v53 = vor.u32 %v13902_v44, %v12025_v31  ;;  %v12067_v31 = vld [vmem:[#allocation6 + $0x368] sm:$0xf0] }
 0x82c   :  { %5436 = vmatpush.bf16.msrb.mxu2 %v12074_v40  ;;  %5108 = vmatpush.bf16.msra.mxu0 %v11902_v55  ;;  %v12105_v40 = vld [vmem:[#allocation6 + $0x3b0] sm:$0xf]  ;;  %v13900_v55 = vld [vmem:[#allocation6 + $0x304] sm:$0xf0] }
 0x82d   :  { %v12106_v52 = vor.u32 %v13922_v41, %v12105_v40  ;;  %v12018_v57 = vor.u32 %v13900_v55, %v12017_v56  ;;  %v13923_v40 = vld [vmem:[#allocation6 + $0x3c4] sm:$0xf]  ;;  %v12115_v41 = vld [vmem:[#allocation6 + $0x3c8] sm:$0xf0]  ;;  %v12059_v56 = vld [vmem:[#allocation6 + $0x358] sm:$0xf0] }
 0x82e   :  { %5121 = vmatpush.bf16.msra.mxu1 %v11974_v60  ;;  %5153 = vmatpush.bf16.msra.mxu3 %v11946_v2  ;;  %v12082_v60 = vor.u32 %v13916_v59, %v12081_v46  ;;  %v12118_v44 = vor.u32 %v13923_v40, %v12115_v41  ;;  %v13907_v59 = vld [vmem:[#allocation6 + $0x344] sm:$0xf]  ;;  %v12145_v41 = vld [vmem:[%s18082_s10 + $0x70] sm:$0xff] }
 0x830   :  { %5437 = vmatpush.bf16.msrb.mxu2 %v12066_v49  ;;  %5109 = vmatpush.bf16.msra.mxu0 %v11894_v7  ;;  %v13918_v49 = vld [vmem:[#allocation6 + $0x394] sm:$0xf0] }
 0x831   :  { %11865 = vmatmul.msk.f32.gmra.mxu1 %vm3947_vm12, %v11857_v47  ;;  %5154 = vmatmul.bf16.vlgmr.msra.gmra.mxu3 %v15846_v63  ;;  %v12097_v47 = vld [vmem:[#allocation6 + $0x3a0] sm:$0xf]  ;;  %v12090_v61 = vor.u32 %v13918_v49, %v12089_v28  ;;  %v13919_v49 = vld [vmem:[#allocation6 + $0x3a4] sm:$0xf] }
 0x832   :  { %5450 = vmatpush.bf16.msrb.mxu3 %v12138_v45  ;;  %5122 = vmatpush.bf16.msra.mxu1 %v11966_v11  ;;  %v12098_v12 = vor.u32 %v13920_v50, %v12097_v47  ;;  %v12107_v47 = vld [vmem:[#allocation6 + $0x3b8] sm:$0xf0]  ;;  %v13909_v50 = vld [vmem:[#allocation6 + $0x354] sm:$0xf] }
 0x833   :  { %11862 = vmatmul.msk.f32.gmra.mxu0 %vm3947_vm12, %v11858_v25  ;;  %v12062_v28 = vor.u32 %v13909_v50, %v12059_v56 }
 0x834   :  { %5438 = vmatpush.bf16.msrb.mxu2 %v12058_v17  ;;  %5110 = vmatpush.bf16.msra.mxu0 %v11886_v48 }
 0x836   :  { %5451 = vmatpush.bf16.msrb.mxu3 %v12130_v19  ;;  %5123 = vmatpush.bf16.msra.mxu1 %v11958_v22 }
 0x838   :  { %5439 = vmatpush.bf16.msrb.mxu2 %v12050_v51  ;;  %5111 = vmatpush.bf16.msra.mxu0 %v11878_v6  ;;  %v13929_v51 = vld [vmem:[#allocation6 + $0x3f4] sm:$0xf] }
 0x839   :  { %11866 = vmatmul.msk.f32.gmra.mxu1 %vm3947_vm12, %v11858_v25  ;;  %v12142_v24 = vor.u32 %v13929_v51, %v12139_v5  ;;  %v13925_v6 = vld [vmem:[#allocation6 + $0x3d4] sm:$0xf]  ;;  %v12043_v51 = vld [vmem:[#allocation6 + $0x338] sm:$0xf0] }
 0x83a   :  { %5452 = vmatpush.bf16.msrb.mxu3 %v12122_v18  ;;  %5124 = vmatpush.bf16.msra.mxu1 %v11950_v15  ;;  %v12134_v18 = vor.u32 %v13927_v26, %v12131_v27  ;;  %v13913_v15 = vld [vmem:[#allocation6 + $0x374] sm:$0xf]  ;;  %v12006_v5 = vld [vmem:[%s18082_s10 + $0x58] sm:$0xff]  ;;  %v13903_v27 = vld [vmem:[#allocation6 + $0x324] sm:$0xf] }
 0x83b   :  { %5112 = vmatmul.bf16.vlgmr.msra.gmra.mxu0 %v15844_v8 }
 0x83c   :  { %5440 = vmatpush.bf16.msrb.mxu2 %v12042_v29  ;;  %v12123_v29 = vld [vmem:[#allocation6 + $0x3d8] sm:$0xf0] }
 0x83d   :  { %v12126_v38 = vor.u32 %v13925_v6, %v12123_v29 }
 0x83e   :  { %5453 = vmatpush.bf16.msrb.mxu3 %v12114_v34  ;;  %5125 = vmatpush.bf16.msra.mxu1 %v11942_v43  ;;  %v13911_v43 = vld [vmem:[#allocation6 + $0x364] sm:$0xf] }
 0x840   :  { %5441 = vmatpush.bf16.msrb.mxu2 %v12034_v39  ;;  %v12078_v39 = vor.u32 %v13913_v15, %v12075_v32  ;;  %v13901_v32 = vld [vmem:[#allocation6 + $0x314] sm:$0xf] }
 0x841   :  { %5126 = vmatmul.bf16.vlgmr.msra.gmra.mxu1 %v15846_v63 }
 0x842   :  { %5454 = vmatpush.bf16.msrb.mxu3 %v12106_v52  ;;  %v12070_v52 = vor.u32 %v13911_v43, %v12067_v31 }
 0x844   :  { %5442 = vmatpush.bf16.msrb.mxu2 %v12026_v53  ;;  %v13921_v53 = vld [vmem:[#allocation6 + $0x3b4] sm:$0xf] }
 0x846   :  { %5455 = vmatpush.bf16.msrb.mxu3 %v12098_v12  ;;  %v12005_v12 = vld [vmem:[%s18082_s10 + $0x50] sm:$0xff] }
 0x848   :  { %5443 = vmatpush.bf16.msrb.mxu2 %v12018_v57  ;;  %v12110_v57 = vor.u32 %v13921_v53, %v12107_v47 }
 0x84a   :  { %5456 = vmatpush.bf16.msrb.mxu3 %v12090_v61  ;;  %v12099_v61 = vld [vmem:[#allocation6 + $0x3a8] sm:$0xf0] }
 0x84b   :  { %5444 = vmatmul.bf16.vlgmr.msrb.gmra.mxu2 %v15844_v8 }
 0x84e   :  { %5457 = vmatpush.bf16.msrb.mxu3 %v12082_v60  ;;  %v12051_v60 = vld [vmem:[#allocation6 + $0x348] sm:$0xf0] }
 0x851   :  { %5458 = vmatmul.bf16.vlgmr.msrb.gmra.mxu3 %v15846_v63 }
 0x88d   :  { %v15902_v0 = vpop.f32.mrf.mxu2 }
 0x894   :  { %v15904_v1 = vpop.f32.mrf.mxu3 }
 0x895   :  { %v15906_v2 = vpop.f32.mrf.mxu2 }
 0x897   :  { %v15908_v3 = vpop.f32.mrf.mxu0 }
 0x89c   :  { %v15910_v58 = vpop.f32.mrf.mxu3 }
 0x89e   :  { %v15912_v45 = vpop.f32.mrf.mxu1  ;;  %v15914_v7 = vpop.f32.mrf.mxu2 }
 0x8a0   :  { %v15916_v16 = vpop.f32.mrf.mxu0 }
 0x8a4   :  { %v15918_v17 = vpop.f32.mrf.mxu3 }
 0x8a6   :  { %v15920_v14 = vpop.f32.mrf.mxu1  ;;  %v15924_v10 = vpop.f32.mrf.mxu2 }
 0x8a8   :  { %v15922_v54 = vpop.f32.mrf.mxu0 }
 0x8ac   :  { %v15926_v11 = vpop.f32.mrf.mxu3 }
 0x8ae   :  { %v15928_v13 = vpop.f32.mrf.mxu1  ;;  %v5141_v42 = vpop.f32.mrf.mxu2 }
 0x8b0   :  { %v15930_v9 = vpop.f32.mrf.mxu0 }
 0x8b4   :  { %v5155_v35 = vpop.f32.mrf.mxu3 }
 0x8b5   :  { %v5156_v22 = vadd.f32 %v5155_v35, %v5141_v42  ;;  %v12102_v42 = vor.u32 %v13919_v49, %v12099_v61  ;;  %v12054_v35 = vor.u32 %v13907_v59, %v12051_v60  ;;  %v4880_v60 = vadd.f32 %v15924_v10, %v15930_v9 }
 0x8b6   :  { %v15932_v19 = vpop.f32.mrf.mxu1  ;;  %v5143_v48 = vpop.f32.mrf.mxu2 }
 0x8b8   :  { %v5113_v25 = vpop.f32.mrf.mxu0 }
 0x8bc   :  { %v5157_v4 = vpop.f32.mrf.mxu3 }
 0x8bd   :  { %v5158_v20 = vadd.f32 %v5157_v4, %v5143_v48  ;;  %v12091_v48 = vld [vmem:[#allocation6 + $0x398] sm:$0xf0]  ;;  %v13905_v4 = vld [vmem:[#allocation6 + $0x334] sm:$0xf] }
 0x8be   :  { %v5127_v21 = vpop.f32.mrf.mxu1 }
 0x8bf   :  { %5220 = vmatpush.msrb.mxu1 %v5158_v20  ;;  %v5128_v34 = vadd.f32 %v5127_v21, %v5113_v25  ;;  %v13917_v25 = vld [vmem:[#allocation6 + $0x394] sm:$0xf]  ;;  %v12046_v21 = vor.u32 %v13905_v4, %v12043_v51 }
 0x8c0   :  { %v5115_v30 = vpop.f32.mrf.mxu0  ;;  %v12094_v20 = vor.u32 %v13917_v25, %v12091_v48  ;;  %v4874_v48 = vadd.f32 %v15906_v2, %v15916_v16 }
 0x8c1   :  { %5221 = vmatpush.msrb.mxu1 %v5156_v22  ;;  %v13915_v22 = vld [vmem:[#allocation6 + $0x384] sm:$0xf] }
 0x8c2   :  { %12011 = vmatmul.msk.f32.vlgmr.msrb.gmra.mxu1 %vm3947_vm12, %v12003_v23 }
 0x8c3   :  { %5478 = vmatpush.bf16.msra.mxu1 %v12142_v24 }
 0x8c6   :  { %v5129_v62 = vpop.f32.mrf.mxu1 }
 0x8c7   :  { %v5130_v33 = vadd.f32 %v5129_v62, %v5115_v30  ;;  %5479 = vmatpush.bf16.msra.mxu1 %v12134_v18  ;;  %v12035_v18 = vld [vmem:[#allocation6 + $0x328] sm:$0xf0]  ;;  %v12143_v62 = vld [vmem:[%s18082_s10 + $0x60] sm:$0xff] }
 0x8c8   :  { %v12038_v15 = vor.u32 %v13903_v27, %v12035_v18  ;;  %v16028_v27 = vld [vmem:[#allocation10 + $0xe0] sm:$0xff] }
 0x8c9   :  { %5191 = vmatpush.msrb.mxu0 %v5130_v33  ;;  %v12027_v33 = vld [vmem:[#allocation6 + $0x318] sm:$0xf0]  ;;  %v16030_v18 = vld [vmem:[#allocation10 + $0x1e0] sm:$0xff] }
 0x8ca   :  { %12012 = vmatmul.msk.f32.gmra.mxu1 %vm3947_vm12, %v12004_v37 }
 0x8cb   :  { %5192 = vmatpush.msrb.mxu0 %v5128_v34  ;;  %5480 = vmatpush.bf16.msra.mxu1 %v12126_v38  ;;  %v13899_v38 = vld [vmem:[#allocation6 + $0x304] sm:$0xf]  ;;  %v12019_v34 = vld [vmem:[#allocation6 + $0x308] sm:$0xf0] }
 0x8cc   :  { %12007 = vmatmul.msk.f32.vlgmr.msrb.gmra.mxu0 %vm3947_vm12, %v12003_v23  ;;  %v12083_v23 = vld [vmem:[#allocation6 + $0x388] sm:$0xf0]  ;;  %v12022_v40 = vor.u32 %v13899_v38, %v12019_v34  ;;  %v16055_v38 = vld [vmem:[#allocation10 + $0xb0] sm:$0xff] }
 0x8cd   :  { %5464 = vmatpush.bf16.msra.mxu0 %v12078_v39  ;;  %v12086_v29 = vor.u32 %v13915_v22, %v12083_v23  ;;  %v12144_v39 = vld [vmem:[%s18082_s10 + $0x68] sm:$0xff]  ;;  %v16020_v23 = vld [vmem:[#allocation10 + $0xf0] sm:$0xff] }
 0x8ce   :  { %v5445_v55 = vpop.f32.mrf.mxu2  ;;  %v16057_v34 = vld [vmem:[#allocation10 + $0x1b0] sm:$0xff] }
 0x8cf   :  { %5481 = vmatpush.bf16.msra.mxu1 %v12118_v44 }
 0x8d1   :  { %5465 = vmatpush.bf16.msra.mxu0 %v12070_v52 }
 0x8d2   :  { %12013 = vmatmul.msk.f32.gmra.mxu1 %vm3947_vm12, %v12005_v12 }
 0x8d3   :  { %5482 = vmatpush.bf16.msra.mxu1 %v12110_v57 }
 0x8d4   :  { %v5459_v46 = vpop.f32.mrf.mxu3  ;;  %12008 = vmatmul.msk.f32.gmra.mxu0 %vm3947_vm12, %v12004_v37  ;;  %v12030_v37 = vor.u32 %v13901_v32, %v12027_v33  ;;  %v16048_v32 = vld [vmem:[#allocation10 + $0x1c0] sm:$0xff]  ;;  %v16050_v33 = vld [vmem:[#allocation10 + $0xc8] sm:$0xff] }
 0x8d5   :  { %5466 = vmatpush.bf16.msra.mxu0 %v12062_v28  ;;  %v5460_v30 = vadd.f32 %v5459_v46, %v5445_v55 }
 0x8d6   :  { %v5447_v24 = vpop.f32.mrf.mxu2 }
 0x8d7   :  { %5483 = vmatpush.bf16.msra.mxu1 %v12102_v42  ;;  %v4877_v42 = vadd.f32 %v15914_v7, %v15922_v54 }
 0x8d9   :  { %5467 = vmatpush.bf16.msra.mxu0 %v12054_v35 }
 0x8da   :  { %12014 = vmatmul.msk.f32.gmra.mxu1 %vm3947_vm12, %v12006_v5 }
 0x8db   :  { %5484 = vmatpush.bf16.msra.mxu1 %v12094_v20 }
 0x8dc   :  { %v5461_v26 = vpop.f32.mrf.mxu3  ;;  %12009 = vmatmul.msk.f32.gmra.mxu0 %vm3947_vm12, %v12005_v12 }
 0x8dd   :  { %v5462_v6 = vadd.f32 %v5461_v26, %v5447_v24  ;;  %5468 = vmatpush.bf16.msra.mxu0 %v12046_v21  ;;  %v16022_v24 = vld [vmem:[#allocation10 + $0x1f0] sm:$0xff]  ;;  %v16024_v26 = vld [vmem:[#allocation10 + $0xf8] sm:$0xff] }
 0x8df   :  { %5523 = vmatpush.msra.mxu2 %v5462_v6  ;;  %5485 = vmatpush.bf16.msra.mxu1 %v12086_v29  ;;  %v16033_v6 = vld [vmem:[#allocation10 + $0xe8] sm:$0xff]  ;;  %v16037_v29 = vld [vmem:[#allocation10 + $0xd0] sm:$0xff] }
 0x8e1   :  { %5524 = vmatpush.msra.mxu2 %v5460_v30  ;;  %5469 = vmatpush.bf16.msra.mxu0 %v12038_v15  ;;  %v16039_v30 = vld [vmem:[#allocation10 + $0x1d0] sm:$0xff]  ;;  %v16046_v15 = vld [vmem:[#allocation10 + $0xc0] sm:$0xff] }
 0x8e2   :  { %12147 = vmatmul.msk.f32.vlgmr.msra.gmra.mxu2 %vm3947_vm12, %v12143_v62  ;;  %5486 = vmatmul.bf16.vlgmr.msra.gmra.mxu1 %v15846_v63  ;;  %v12146_v63 = vld [vmem:[%s18082_s10 + $0x78] sm:$0xff] }
 0x8e3   :  { %5731 = vmatpush.msrb.mxu2 %v16020_v23 }
 0x8e4   :  { %12010 = vmatmul.msk.f32.gmra.mxu0 %vm3947_vm12, %v12006_v5  ;;  %v4871_v5 = vadd.f32 %v15902_v0, %v15908_v3 }
 0x8e5   :  { %5470 = vmatpush.bf16.msra.mxu0 %v12030_v37  ;;  %5732 = vmatpush.msrb.mxu2 %v16028_v27 }
 0x8e7   :  { %5733 = vmatpush.msrb.mxu2 %v16037_v29 }
 0x8e9   :  { %5471 = vmatpush.bf16.msra.mxu0 %v12022_v40  ;;  %5734 = vmatpush.msrb.mxu2 %v16046_v15  ;;  %v16064_v40 = vld [vmem:[#allocation10 + $0xa0] sm:$0xff] }
 0x8ea   :  { %12148 = vmatmul.msk.f32.gmra.mxu2 %vm3947_vm12, %v12144_v39 }
 0x8eb   :  { %5735 = vmatpush.msrb.mxu2 %v16055_v38 }
 0x8ec   :  { %5472 = vmatmul.bf16.vlgmr.msra.gmra.mxu0 %v15844_v8 }
 0x8ed   :  { %5736 = vmatpush.msrb.mxu2 %v16064_v40 }
 0x8f2   :  { %12149 = vmatmul.msk.f32.gmra.mxu2 %vm3947_vm12, %v12145_v41 }
 0x8fa   :  { %12150 = vmatmul.msk.f32.gmra.mxu2 %vm3947_vm12, %v12146_v63 }
 0x93f   :  { %v15972_v43 = vpop.f32.mrf.mxu1 }
 0x947   :  { %v15974_v31 = vpop.f32.mrf.mxu1 }
 0x949   :  { %v5194_v44 = vpop.f32.mrf.mxu0 }
 0x94a   :  { %v5235_v10 = vadd.f32 %v5194_v44, %v4871_v5  ;;  %v4909_v44 = vadd.f32 %v15926_v11, %v15932_v19  ;;  %v16087_v11 = vld [vmem:[#allocation10 + $0x80] sm:$0xff] }
 0x94b   :  { %v16089_v19 = vld [vmem:[#allocation10 + $0x180] sm:$0xff] }
 0x94f   :  { %v15976_v53 = vpop.f32.mrf.mxu1 }
 0x951   :  { %v5197_v52 = vpop.f32.mrf.mxu0 }
 0x952   :  { %v5237_v20 = vadd.f32 %v5197_v52, %v4874_v48  ;;  %v16075_v52 = vld [vmem:[#allocation10 + $0x90] sm:$0xff]  ;;  %v16144_v48 = vld [vmem:[#allocation10 + $0x140] sm:$0xff] }
 0x953   :  { %5737 = vmatpush.msrb.mxu2 %v16075_v52 }
 0x955   :  { %5738 = vmatpush.msrb.mxu2 %v16087_v11 }
 0x957   :  { %v15978_v47 = vpop.f32.mrf.mxu1 }
 0x959   :  { %v5200_v8 = vpop.f32.mrf.mxu0 }
 0x95a   :  { %v5239_v4 = vadd.f32 %v5200_v8, %v4877_v42  ;;  %v16077_v8 = vld [vmem:[#allocation10 + $0x190] sm:$0xff] }
 0x95b   :  { %v16131_v42 = vld [vmem:[#allocation10 + $0x150] sm:$0xff] }
 0x95f   :  { %v5487_v55 = vpop.f32.mrf.mxu1 }
 0x961   :  { %v5203_v50 = vpop.f32.mrf.mxu0 }
 0x962   :  { %v5241_v35 = vadd.f32 %v5203_v50, %v4880_v60  ;;  %v16079_v50 = vld [vmem:[#allocation10 + $0x98] sm:$0xff]  ;;  %v16119_v60 = vld [vmem:[#allocation10 + $0x68] sm:$0xff] }
 0x965   :  { %v5526_v56 = vpop.f32.mrf.mxu2 }
 0x966   :  { %v15998_v54 = vadd.f32 %v5526_v56, %v5235_v10  ;;  %v4906_v56 = vadd.f32 %v15918_v17, %v15928_v13  ;;  %v16156_v10 = vld [vmem:[#allocation10 + $0x130] sm:$0xff] }
 0x967   :  { %v5489_v28 = vpop.f32.mrf.mxu1 }
 0x968   :  { %v5683_v16 = vmul.f32 %v15998_v54, %v15998_v54  ;;  %v5240_v17 = vadd.f32 %v15976_v53, %v4906_v56  ;;  %v16115_v53 = vld [vmem:[#allocation10 + $0x60] sm:$0xff]  ;;  %v16183_v56 = vld [vmem:[#allocation10 + $0x18] sm:$0xff] }
 0x969   :  { %v5473_v12 = vpop.f32.mrf.mxu0 }
 0x96a   :  { %v5488_v59 = vadd.f32 %v5487_v55, %v5473_v12  ;;  %v5242_v55 = vadd.f32 %v15978_v47, %v4909_v44  ;;  %v16091_v12 = vld [vmem:[#allocation10 + $0x88] sm:$0xff]  ;;  %v16101_v47 = vld [vmem:[#allocation10 + $0x70] sm:$0xff] }
 0x96b   :  { %5739 = vmatpush.msrb.mxu2 %v16101_v47  ;;  %v16179_v44 = vld [vmem:[#allocation10 + $0x110] sm:$0xff] }
 0x96d   :  { %v5529_v57 = vpop.f32.mrf.mxu2  ;;  %5740 = vmatpush.msrb.mxu2 %v16115_v53 }
 0x96e   :  { %v15995_v7 = vadd.f32 %v5529_v57, %v5237_v20  ;;  %v16154_v20 = vld [vmem:[#allocation10 + $0x30] sm:$0xff] }
 0x970   :  { %v5685_v3 = vmul.f32 %v15995_v7, %v15995_v7 }
 0x971   :  { %v5475_v49 = vpop.f32.mrf.mxu0 }
 0x972   :  { %v5490_v61 = vadd.f32 %v5489_v28, %v5475_v49  ;;  %v4903_v28 = vadd.f32 %v15910_v58, %v15920_v14  ;;  %v16103_v49 = vld [vmem:[#allocation10 + $0x170] sm:$0xff] }
 0x974   :  { %5552 = vmatpush.msra.mxu3 %v5490_v61  ;;  %v16105_v61 = vld [vmem:[#allocation10 + $0x78] sm:$0xff]  ;;  %v5238_v58 = vadd.f32 %v15974_v31, %v4903_v28  ;;  %v16129_v31 = vld [vmem:[#allocation10 + $0x50] sm:$0xff] }
 0x975   :  { %v5532_v46 = vpop.f32.mrf.mxu2  ;;  %5741 = vmatpush.msrb.mxu2 %v16129_v31  ;;  %v16190_v28 = vld [vmem:[#allocation10 + $0x1f8] sm:$0xff] }
 0x976   :  { %5553 = vmatpush.msra.mxu3 %v5488_v59  ;;  %v15991_v21 = vadd.f32 %v5532_v46, %v5239_v4  ;;  %v4900_v46 = vadd.f32 %v15904_v1, %v15912_v45  ;;  %v16117_v59 = vld [vmem:[#allocation10 + $0x160] sm:$0xff]  ;;  %v16148_v4 = vld [vmem:[#allocation10 + $0x48] sm:$0xff] }
 0x977   :  { %12151 = vmatmul.msk.f32.vlgmr.msra.gmra.mxu3 %vm3947_vm12, %v12143_v62  ;;  %v16041_v62 = vld [vmem:[#allocation10 + $0xd8] sm:$0xff] }
 0x978   :  { %v5687_v0 = vmul.f32 %v15991_v21, %v15991_v21  ;;  %5751 = vmatpush.msrb.mxu3 %v16022_v24  ;;  %v5236_v1 = vadd.f32 %v15972_v43, %v4900_v46  ;;  %v16142_v43 = vld [vmem:[#allocation10 + $0x40] sm:$0xff]  ;;  %v16197_v46 = vld [vmem:[#allocation10 + $0x8] sm:$0xff] }
 0x979   :  { %5742 = vmatpush.msrb.mxu2 %v16142_v43 }
 0x97a   :  { %5752 = vmatpush.msrb.mxu3 %v16030_v18 }
 0x97b   :  { %5743 = vmatpush.msrb.mxu2 %v16154_v20 }
 0x97c   :  { %5753 = vmatpush.msrb.mxu3 %v16039_v30 }
 0x97d   :  { %v5535_v25 = vpop.f32.mrf.mxu2 }
 0x97e   :  { %v15987_v51 = vadd.f32 %v5535_v25, %v5241_v35  ;;  %5754 = vmatpush.msrb.mxu3 %v16048_v32  ;;  %v16133_v35 = vld [vmem:[#allocation10 + $0x58] sm:$0xff] }
 0x97f   :  { %12152 = vmatmul.msk.f32.gmra.mxu3 %vm3947_vm12, %v12144_v39  ;;  %v16059_v39 = vld [vmem:[#allocation10 + $0xb8] sm:$0xff] }
 0x980   :  { %5655 = vmatpush.msrb.mxu0 %v15987_v51  ;;  %v5689_v2 = vmul.f32 %v15987_v51, %v15987_v51  ;;  %5755 = vmatpush.msrb.mxu3 %v16057_v34 }
 0x982   :  { %5656 = vmatpush.msrb.mxu0 %v15991_v21 }
 0x984   :  { %5657 = vmatpush.msrb.mxu0 %v15995_v7 }
 0x986   :  { %5658 = vmatpush.msrb.mxu0 %v15998_v54 }
 0x987   :  { %12153 = vmatmul.msk.f32.gmra.mxu3 %vm3947_vm12, %v12145_v41  ;;  %12155 = vmatmul.msk.f32.vlgmr.msrb.gmra.mxu0 %vm5640_vm3, %v18101_v36  ;;  %v16066_v41 = vld [vmem:[#allocation10 + $0x1a0] sm:$0xff] }
 0x988   :  { %5703 = vmatpush.msra.mxu0 %v5689_v2  ;;  %5756 = vmatpush.msrb.mxu3 %v16066_v41  ;;  %v16161_v2 = vld [vmem:[#allocation10 + $0x38] sm:$0xff] }
 0x98a   :  { %5704 = vmatpush.msra.mxu0 %v5687_v0  ;;  %5757 = vmatpush.msrb.mxu3 %v16077_v8 }
 0x98c   :  { %5705 = vmatpush.msra.mxu0 %v5685_v3  ;;  %5758 = vmatpush.msrb.mxu3 %v16089_v19  ;;  %v16166_v3 = vld [vmem:[#allocation10 + $0x20] sm:$0xff] }
 0x98d   :  { %5744 = vmatpush.msrb.mxu2 %v16166_v3 }
 0x98e   :  { %5706 = vmatpush.msra.mxu0 %v5683_v16  ;;  %5759 = vmatpush.msrb.mxu3 %v16103_v49  ;;  %v16168_v16 = vld [vmem:[#allocation10 + $0x120] sm:$0xff] }
 0x98f   :  { %12154 = vmatmul.msk.f32.gmra.mxu3 %vm3947_vm12, %v12146_v63  ;;  %12157 = vmatmul.msk.f32.vlgmr.msra.gmra.mxu0 %vm5640_vm3, %v18101_v36  ;;  %v16068_v63 = vld [vmem:[#allocation10 + $0xa8] sm:$0xff] }
 0x990   :  { %5771 = vmatpush.msrb.mxu0 %v16024_v26  ;;  %5760 = vmatpush.msrb.mxu3 %v16117_v59 }
 0x992   :  { %5772 = vmatpush.msrb.mxu0 %v16033_v6  ;;  %5761 = vmatpush.msrb.mxu3 %v16131_v42 }
 0x994   :  { %5773 = vmatpush.msrb.mxu0 %v16041_v62  ;;  %5762 = vmatpush.msrb.mxu3 %v16144_v48 }
 0x996   :  { %5774 = vmatpush.msrb.mxu0 %v16050_v33  ;;  %5763 = vmatpush.msrb.mxu3 %v16156_v10 }
 0x998   :  { %5775 = vmatpush.msrb.mxu0 %v16059_v39  ;;  %5764 = vmatpush.msrb.mxu3 %v16168_v16 }
 0x99a   :  { %5776 = vmatpush.msrb.mxu0 %v16068_v63  ;;  %5765 = vmatpush.msrb.mxu3 %v16179_v44 }
 0x99c   :  { %5777 = vmatpush.msrb.mxu0 %v16079_v50 }
 0x99e   :  { %5778 = vmatpush.msrb.mxu0 %v16091_v12 }
 0x9a0   :  { %5779 = vmatpush.msrb.mxu0 %v16105_v61 }
 0x9a2   :  { %5780 = vmatpush.msrb.mxu0 %v16119_v60 }
 0x9a4   :  { %5781 = vmatpush.msrb.mxu0 %v16133_v35 }
 0x9a6   :  { %5782 = vmatpush.msrb.mxu0 %v16148_v4 }
 0x9a8   :  { %5783 = vmatpush.msrb.mxu0 %v16161_v2 }
 0x9fa   :  { %v16012_v9 = vpop.f32.mrf.mxu3 }
 0x9fb   :  { %v16138_v25 = vadd.f32 %v16012_v9, %v5236_v1  ;;  %v16172_v9 = vld [vmem:[#allocation10 + $0x28] sm:$0xff]  ;;  %v16206_v1 = vld [vmem:[#allocation10 + $0x1d8] sm:$0xff] }
 0x9fc   :  { %5784 = vmatpush.msrb.mxu0 %v16172_v9 }
 0x9fe   :  { %5785 = vmatpush.msrb.mxu0 %v16183_v56 }
 0xa00   :  { %5786 = vmatpush.msrb.mxu0 %v16197_v46 }
 0xa02   :  { %v16016_v22 = vpop.f32.mrf.mxu3  ;;  %5853 = vmatpush.msra.mxu0 %v16024_v26  ;;  %v5625_v26 = vld [vmem:[#allocation10 + $0x188] sm:$0xff] }
 0xa03   :  { %v16125_v45 = vadd.f32 %v16016_v22, %v5238_v58  ;;  %v16201_v58 = vld [vmem:[#allocation10 + $0x1e8] sm:$0xff] }
 0xa04   :  { %5854 = vmatpush.msra.mxu0 %v16033_v6  ;;  %v5619_v6 = vld [vmem:[#allocation10 + $0x158] sm:$0xff] }
 0xa05   :  { %v5686_v22 = vmul.f32 %v16125_v45, %v16125_v45 }
 0xa06   :  { %5855 = vmatpush.msra.mxu0 %v16041_v62  ;;  %v5613_v62 = vld [vmem:[#allocation10 + $0x128] sm:$0xff] }
 0xa08   :  { %5856 = vmatpush.msra.mxu0 %v16050_v33  ;;  %v5660_v33 = vpop.f32.mrf.mxu0 }
 0xa09   :  { %5787 = vmatmul.f32.vlgmr.msrb.gmra.mxu0 %v5660_v33 }
 0xa0a   :  { %v5561_v37 = vpop.f32.mrf.mxu3  ;;  %5857 = vmatpush.msra.mxu0 %v16059_v39 }
 0xa0b   :  { %v16111_v14 = vadd.f32 %v5561_v37, %v5240_v17  ;;  %v16177_v37 = vld [vmem:[#allocation10 + $0x10] sm:$0xff]  ;;  %v16194_v17 = vld [vmem:[#allocation10 + $0x100] sm:$0xff] }
 0xa0c   :  { %5745 = vmatpush.msrb.mxu2 %v16177_v37  ;;  %5766 = vmatpush.msrb.mxu3 %v16194_v17 }
 0xa0d   :  { %v5688_v0 = vmul.f32 %v16111_v14, %v16111_v14  ;;  %5858 = vmatpush.msra.mxu0 %v16068_v63  ;;  %v13946_v63 = vld [vmem:[#allocation9 + $0x74] sm:$0xf0] }
 0xa0e   :  { %5833 = vmatpush.msra.mxu3 %v16022_v24  ;;  %v16230_v24 = vld [vmem:[#allocation10 + $0x198] sm:$0xff] }
 0xa0f   :  { %5859 = vmatpush.msra.mxu0 %v16079_v50  ;;  %v13962_v50 = vld [vmem:[#allocation9 + $0xf4] sm:$0xf0] }
 0xa10   :  { %5834 = vmatpush.msra.mxu3 %v16030_v18  ;;  %v5621_v18 = vld [vmem:[#allocation10 + $0x168] sm:$0xff] }
 0xa11   :  { %5860 = vmatpush.msra.mxu0 %v16091_v12 }
 0xa12   :  { %v5564_v57 = vpop.f32.mrf.mxu3  ;;  %5835 = vmatpush.msra.mxu3 %v16039_v30  ;;  %v5615_v30 = vld [vmem:[#allocation10 + $0x138] sm:$0xff] }
 0xa13   :  { %v16097_v13 = vadd.f32 %v5564_v57, %v5242_v55  ;;  %v5684_v55 = vmul.f32 %v16138_v25, %v16138_v25  ;;  %v16188_v57 = vld [vmem:[#allocation10] sm:$0xff]  ;;  %5861 = vmatpush.msra.mxu0 %v16105_v61  ;;  %v13961_v61 = vld [vmem:[#allocation9 + $0xf4] sm:$0xf] }
 0xa14   :  { %5746 = vmatpush.msrb.mxu2 %v16188_v57  ;;  %5836 = vmatpush.msra.mxu3 %v16048_v32  ;;  %v5609_v32 = vld [vmem:[#allocation10 + $0x108] sm:$0xff] }
 0xa15   :  { %5675 = vmatpush.msrb.mxu1 %v16097_v13  ;;  %v5690_v5 = vmul.f32 %v16097_v13, %v16097_v13  ;;  %5862 = vmatpush.msra.mxu0 %v16119_v60 }
 0xa16   :  { %5813 = vmatpush.msra.mxu2 %v16020_v23  ;;  %v16224_v23 = vld [vmem:[#allocation10 + $0x1a8] sm:$0xff]  ;;  %5837 = vmatpush.msra.mxu3 %v16057_v34 }
 0xa17   :  { %5676 = vmatpush.msrb.mxu1 %v16111_v14  ;;  %5863 = vmatpush.msra.mxu0 %v16133_v35  ;;  %v13944_v35 = vld [vmem:[#allocation9 + $0x64] sm:$0xf0] }
 0xa18   :  { %5814 = vmatpush.msra.mxu2 %v16028_v27  ;;  %5838 = vmatpush.msra.mxu3 %v16066_v41  ;;  %v5623_v27 = vld [vmem:[#allocation10 + $0x178] sm:$0xff]  ;;  %v12217_v41 = vld [vmem:[#allocation9 + $0x70] sm:$0xf] }
 0xa19   :  { %5677 = vmatpush.msrb.mxu1 %v16125_v45  ;;  %5864 = vmatpush.msra.mxu0 %v16148_v4  ;;  %v13960_v4 = vld [vmem:[#allocation9 + $0xe4] sm:$0xf0] }
 0xa1a   :  { %5815 = vmatpush.msra.mxu2 %v16037_v29  ;;  %5839 = vmatpush.msra.mxu3 %v16077_v8  ;;  %v5617_v29 = vld [vmem:[#allocation10 + $0x148] sm:$0xff]  ;;  %v12218_v8 = vor.u32 %v13946_v63, %v12217_v41  ;;  %v13939_v41 = vld [vmem:[#allocation9 + $0x44] sm:$0xf] }
 0xa1b   :  { %5678 = vmatpush.msrb.mxu1 %v16138_v25  ;;  %5865 = vmatpush.msra.mxu0 %v16161_v2  ;;  %v12211_v2 = vld [vmem:[#allocation9 + $0x68] sm:$0xf0] }
 0xa1c   :  { %12156 = vmatmul.msk.f32.vlgmr.msrb.gmra.mxu1 %vm5640_vm3, %v18101_v36  ;;  %5816 = vmatpush.msra.mxu2 %v16046_v15  ;;  %v5611_v15 = vld [vmem:[#allocation10 + $0x118] sm:$0xff]  ;;  %v12195_v63 = vld [vmem:[#allocation9 + $0x48] sm:$0xf0] }
 0xa1d   :  { %5723 = vmatpush.msra.mxu1 %v5690_v5  ;;  %v16212_v5 = vld [vmem:[#allocation10 + $0x1c8] sm:$0xff]  ;;  %5840 = vmatpush.msra.mxu3 %v16089_v19  ;;  %v12219_v19 = vld [vmem:[#allocation9 + $0x78] sm:$0xf0] }
 0xa1e   :  { %5817 = vmatpush.msra.mxu2 %v16055_v38  ;;  %5866 = vmatpush.msra.mxu0 %v16172_v9  ;;  %v5708_v38 = vpop.f32.mrf.mxu0 }
 0xa1f   :  { %5724 = vmatpush.msra.mxu1 %v5688_v0  ;;  %v16218_v0 = vld [vmem:[#allocation10 + $0x1b8] sm:$0xff]  ;;  %5841 = vmatpush.msra.mxu3 %v16103_v49 }
 0xa20   :  { %5818 = vmatpush.msra.mxu2 %v16064_v40  ;;  %5867 = vmatpush.msra.mxu0 %v16183_v56 }
 0xa21   :  { %5725 = vmatpush.msra.mxu1 %v5686_v22  ;;  %5842 = vmatpush.msra.mxu3 %v16117_v59  ;;  %v12275_v22 = vld [vmem:[#allocation9 + $0xe8] sm:$0xf0] }
 0xa22   :  { %5819 = vmatpush.msra.mxu2 %v16075_v52  ;;  %5868 = vmatpush.msra.mxu0 %v16197_v46  ;;  %v12281_v52 = vld [vmem:[#allocation9 + $0xf0] sm:$0xf] }
 0xa23   :  { %5726 = vmatpush.msra.mxu1 %v5684_v55  ;;  %5843 = vmatpush.msra.mxu3 %v16131_v42  ;;  %v12209_v42 = vld [vmem:[#allocation9 + $0x60] sm:$0xf]  ;;  %v12201_v55 = vld [vmem:[#allocation9 + $0x50] sm:$0xf] }
 0xa24   :  { %12158 = vmatmul.msk.f32.vlgmr.msra.gmra.mxu1 %vm5640_vm3, %v18101_v36  ;;  %5820 = vmatpush.msra.mxu2 %v16087_v11  ;;  %v13945_v11 = vld [vmem:[#allocation9 + $0x74] sm:$0xf] }
 0xa25   :  { %5791 = vmatpush.msrb.mxu1 %v16190_v28  ;;  %5844 = vmatpush.msra.mxu3 %v16144_v48  ;;  %v12222_v49 = vor.u32 %v13945_v11, %v12219_v19  ;;  %v12210_v48 = vor.u32 %v13944_v35, %v12209_v42  ;;  %v12259_v11 = vld [vmem:[#allocation9 + $0xc8] sm:$0xf0]  ;;  %v13937_v42 = vld [vmem:[#allocation9 + $0x34] sm:$0xf] }
 0xa26   :  { %5821 = vmatpush.msra.mxu2 %v16101_v47  ;;  %5869 = vmatmul.f32.vlgmr.msra.gmra.mxu0 %v5708_v38  ;;  %v12282_v47 = vor.u32 %v13962_v50, %v12281_v52  ;;  %v13955_v52 = vld [vmem:[#allocation9 + $0xc4] sm:$0xf]  ;;  %v12198_v50 = vor.u32 %v13939_v41, %v12195_v63  ;;  %v12161_v63 = vld [vmem:[#allocation9] sm:$0xf] }
 0xa27   :  { %5792 = vmatpush.msrb.mxu1 %v16201_v58  ;;  %5845 = vmatpush.msra.mxu3 %v16156_v10 }
 0xa28   :  { %5822 = vmatpush.msra.mxu2 %v16115_v53  ;;  %v12283_v53 = vld [vmem:[#allocation9 + $0xf8] sm:$0xf0]  ;;  %6206 = vmatpush.bf16.msrb.mxu0 %v12222_v49  ;;  %v13938_v49 = vld [vmem:[#allocation9 + $0x34] sm:$0xf0] }
 0xa29   :  { %5793 = vmatpush.msrb.mxu1 %v16206_v1  ;;  %5846 = vmatpush.msra.mxu3 %v16168_v16  ;;  %v12286_v60 = vor.u32 %v13961_v61, %v12283_v53  ;;  %v12249_v61 = vld [vmem:[#allocation9 + $0xb0] sm:$0xf] }
 0xa2a   :  { %5823 = vmatpush.msra.mxu2 %v16129_v31 }
 0xa2b   :  { %5794 = vmatpush.msrb.mxu1 %v16212_v5  ;;  %5847 = vmatpush.msra.mxu3 %v16179_v44 }
 0xa2c   :  { %5824 = vmatpush.msra.mxu2 %v16142_v43  ;;  %v12273_v43 = vld [vmem:[#allocation9 + $0xe0] sm:$0xf] }
 0xa2d   :  { %5795 = vmatpush.msrb.mxu1 %v16218_v0  ;;  %5848 = vmatpush.msra.mxu3 %v16194_v17  ;;  %v12274_v10 = vor.u32 %v13960_v4, %v12273_v43  ;;  %v13953_v4 = vld [vmem:[#allocation9 + $0xb4] sm:$0xf] }
 0xa2e   :  { %5825 = vmatpush.msra.mxu2 %v16154_v20  ;;  %v13943_v20 = vld [vmem:[#allocation9 + $0x64] sm:$0xf] }
 0xa2f   :  { %5796 = vmatpush.msrb.mxu1 %v16224_v23  ;;  %5747 = vmatmul.f32.vlgmr.msrb.gmra.mxu2 %v5660_v33  ;;  %v12214_v9 = vor.u32 %v13943_v20, %v12211_v2  ;;  %v12251_v20 = vld [vmem:[#allocation9 + $0xb8] sm:$0xf0] }
 0xa30   :  { %5826 = vmatpush.msra.mxu2 %v16166_v3  ;;  %v13959_v3 = vld [vmem:[#allocation9 + $0xe4] sm:$0xf] }
 0xa31   :  { %5797 = vmatpush.msrb.mxu1 %v16230_v24  ;;  %v12278_v56 = vor.u32 %v13959_v3, %v12275_v22  ;;  %6207 = vmatpush.bf16.msrb.mxu0 %v12214_v9  ;;  %v12254_v9 = vor.u32 %v13953_v4, %v12251_v20  ;;  %v12177_v22 = vld [vmem:[#allocation9 + $0x20] sm:$0xf]  ;;  %v12409_v20 = vld [vmem:[#allocation9 + $0x1f0] sm:$0xf] }
 0xa32   :  { %5827 = vmatpush.msra.mxu2 %v16177_v37 }
 0xa33   :  { %5798 = vmatpush.msrb.mxu1 %v5625_v26 }
 0xa34   :  { %5828 = vmatpush.msra.mxu2 %v16188_v57  ;;  %v13942_v57 = vld [vmem:[#allocation9 + $0x54] sm:$0xf0] }
 0xa35   :  { %5799 = vmatpush.msrb.mxu1 %v5623_v27  ;;  %v12202_v46 = vor.u32 %v13942_v57, %v12201_v55  ;;  %v13952_v57 = vld [vmem:[#allocation9 + $0xa4] sm:$0xf0] }
 0xa36   :  { %6168 = vmatpush.bf16.msrb.mxu2 %v12218_v8 }
 0xa37   :  { %5800 = vmatpush.msrb.mxu1 %v5621_v18  ;;  %5829 = vmatmul.f32.vlgmr.msra.gmra.mxu2 %v5708_v38  ;;  %v12257_v38 = vld [vmem:[#allocation9 + $0xc0] sm:$0xf] }
 0xa39   :  { %5801 = vmatpush.msrb.mxu1 %v5619_v6 }
 0xa3a   :  { %6169 = vmatpush.bf16.msrb.mxu2 %v12210_v48  ;;  %v12187_v48 = vld [vmem:[#allocation9 + $0x38] sm:$0xf0] }
 0xa3b   :  { %5802 = vmatpush.msrb.mxu1 %v5617_v29  ;;  %v12190_v3 = vor.u32 %v13937_v42, %v12187_v48 }
 0xa3d   :  { %5803 = vmatpush.msrb.mxu1 %v5615_v30 }
 0xa3e   :  { %6170 = vmatpush.bf16.msrb.mxu2 %v12202_v46 }
 0xa3f   :  { %5804 = vmatpush.msrb.mxu1 %v5613_v62 }
 0xa41   :  { %5805 = vmatpush.msrb.mxu1 %v5611_v15 }
 0xa43   :  { %5806 = vmatpush.msrb.mxu1 %v5609_v32 }
 0xa45   :  { %5873 = vmatpush.msra.mxu1 %v16190_v28  ;;  %v12265_v28 = vld [vmem:[#allocation9 + $0xd0] sm:$0xf] }
 0xa47   :  { %5874 = vmatpush.msra.mxu1 %v16201_v58  ;;  %v13958_v58 = vld [vmem:[#allocation9 + $0xd4] sm:$0xf0] }
 0xa49   :  { %5875 = vmatpush.msra.mxu1 %v16206_v1  ;;  %v13941_v1 = vld [vmem:[#allocation9 + $0x54] sm:$0xf] }
 0xa4b   :  { %5876 = vmatpush.msra.mxu1 %v16212_v5  ;;  %v12203_v5 = vld [vmem:[#allocation9 + $0x58] sm:$0xf0] }
 0xa4d   :  { %5877 = vmatpush.msra.mxu1 %v16218_v0 }
 0xa4f   :  { %5878 = vmatpush.msra.mxu1 %v16224_v23  ;;  %v12266_v23 = vor.u32 %v13958_v58, %v12265_v28  ;;  %v13935_v28 = vld [vmem:[#allocation9 + $0x24] sm:$0xf] }
 0xa51   :  { %5879 = vmatpush.msra.mxu1 %v16230_v24  ;;  %v12206_v24 = vor.u32 %v13941_v1, %v12203_v5  ;;  %v13951_v1 = vld [vmem:[#allocation9 + $0xa4] sm:$0xf]  ;;  %v12243_v5 = vld [vmem:[#allocation9 + $0xa8] sm:$0xf0] }
 0xa53   :  { %5880 = vmatpush.msra.mxu1 %v5625_v26  ;;  %v13957_v26 = vld [vmem:[#allocation9 + $0xd4] sm:$0xf]  ;;  %6208 = vmatpush.bf16.msrb.mxu0 %v12206_v24  ;;  %v12169_v24 = vld [vmem:[#allocation9 + $0x10] sm:$0xf] }
 0xa55   :  { %5881 = vmatpush.msra.mxu1 %v5623_v27  ;;  %v12267_v27 = vld [vmem:[#allocation9 + $0xd8] sm:$0xf0] }
 0xa57   :  { %5882 = vmatpush.msra.mxu1 %v5621_v18  ;;  %6209 = vmatpush.bf16.msrb.mxu0 %v12198_v50 }
 0xa59   :  { %5883 = vmatpush.msra.mxu1 %v5619_v6  ;;  %v12270_v6 = vor.u32 %v13957_v26, %v12267_v27  ;;  %v13934_v26 = vld [vmem:[#allocation9 + $0x14] sm:$0xf0]  ;;  %v12233_v27 = vld [vmem:[#allocation9 + $0x90] sm:$0xf] }
 0xa5b   :  { %5884 = vmatpush.msra.mxu1 %v5617_v29  ;;  %v12193_v29 = vld [vmem:[#allocation9 + $0x40] sm:$0xf]  ;;  %6210 = vmatpush.bf16.msrb.mxu0 %v12190_v3  ;;  %v13977_v3 = vld [vmem:[#allocation9 + $0x174] sm:$0xf] }
 0xa5d   :  { %5885 = vmatpush.msra.mxu1 %v5615_v30  ;;  %v13940_v30 = vld [vmem:[#allocation9 + $0x44] sm:$0xf0] }
 0xa5e   :  { %v12194_v33 = vor.u32 %v13940_v30, %v12193_v29  ;;  %v13950_v29 = vld [vmem:[#allocation9 + $0x94] sm:$0xf0]  ;;  %v13933_v30 = vld [vmem:[#allocation9 + $0x14] sm:$0xf] }
 0xa5f   :  { %5886 = vmatpush.msra.mxu1 %v5613_v62 }
 0xa60   :  { %6171 = vmatpush.bf16.msrb.mxu2 %v12194_v33  ;;  %v13949_v33 = vld [vmem:[#allocation9 + $0x94] sm:$0xf] }
 0xa61   :  { %5887 = vmatpush.msra.mxu1 %v5611_v15 }
 0xa63   :  { %5888 = vmatpush.msra.mxu1 %v5609_v32 }
 0xa86   :  { %v5788_v40 = vpop.f32.mrf.mxu0 }
 0xa99   :  { %v5680_v34 = vpop.f32.mrf.mxu1 }
 0xa9a   :  { %5767 = vmatmul.f32.vlgmr.msrb.gmra.mxu3 %v5680_v34  ;;  %5807 = vmatmul.f32.vlgmr.msrb.gmra.mxu1 %v5680_v34  ;;  %v13956_v34 = vld [vmem:[#allocation9 + $0xc4] sm:$0xf0] }
 0xa9b   :  { %6187 = vmatpush.bf16.msrb.mxu3 %v12282_v47  ;;  %6225 = vmatpush.bf16.msrb.mxu1 %v12286_v60  ;;  %v12185_v47 = vld [vmem:[#allocation9 + $0x30] sm:$0xf] }
 0xa9c   :  { %v12186_v60 = vor.u32 %v13938_v49, %v12185_v47  ;;  %v12163_v49 = vld [vmem:[#allocation9 + $0x8] sm:$0xf0] }
 0xa9e   :  { %6172 = vmatpush.bf16.msrb.mxu2 %v12186_v60 }
 0xa9f   :  { %6188 = vmatpush.bf16.msrb.mxu3 %v12274_v10  ;;  %6226 = vmatpush.bf16.msrb.mxu1 %v12278_v56 }
 0xaa1   :  { %v5728_v39 = vpop.f32.mrf.mxu1 }
 0xaa2   :  { %5849 = vmatmul.f32.vlgmr.msra.gmra.mxu3 %v5728_v39  ;;  %5889 = vmatmul.f32.vlgmr.msra.gmra.mxu1 %v5728_v39 }
 0xaa3   :  { %v5870_v44 = vpop.f32.mrf.mxu0  ;;  %6189 = vmatpush.bf16.msrb.mxu3 %v12266_v23  ;;  %6227 = vmatpush.bf16.msrb.mxu1 %v12270_v6  ;;  %v12246_v23 = vor.u32 %v13951_v1, %v12243_v5  ;;  %v12170_v6 = vor.u32 %v13934_v26, %v12169_v24  ;;  %v13976_v5 = vld [vmem:[#allocation9 + $0x164] sm:$0xf0] }
 0xab2   :  { %v5748_v31 = vpop.f32.mrf.mxu2 }
 0xaba   :  { %v5830_v39 = vpop.f32.mrf.mxu2 }
 0xb17   :  { %v5808_v12 = vpop.f32.mrf.mxu1 }
 0xb18   :  { %v5809_v59 = vadd.f32 %v5808_v12, %v5788_v40  ;;  %v12258_v40 = vor.u32 %v13956_v34, %v12257_v38  ;;  %v12262_v12 = vor.u32 %v13955_v52, %v12259_v11  ;;  %v12235_v38 = vld [vmem:[#allocation9 + $0x98] sm:$0xf0]  ;;  %v13932_v52 = vld [vmem:[#allocation9 + $0x4] sm:$0xf0] }
 0xb19   :  { %v12162_v50 = vor.u32 %v13932_v52, %v12161_v63  ;;  %v13948_v11 = vld [vmem:[#allocation9 + $0x84] sm:$0xf0]  ;;  %v12393_v63 = vld [vmem:[#allocation9 + $0x1d0] sm:$0xf]  ;;  %v13990_v52 = vld [vmem:[#allocation9 + $0x1d4] sm:$0xf0] }
 0xb1a   :  { %v16278_v16 = vmul.f32 0.001953125, %v5809_v59  ;;  %6190 = vmatpush.bf16.msrb.mxu3 %v12258_v40  ;;  %6228 = vmatpush.bf16.msrb.mxu1 %v12262_v12  ;;  %v12238_v40 = vor.u32 %v13949_v33, %v12235_v38  ;;  %v12403_v33 = vld [vmem:[#allocation9 + $0x1e8] sm:$0xf0]  ;;  %v12329_v38 = vld [vmem:[#allocation9 + $0x150] sm:$0xf] }
 0xb1c   :  { %v5896_v62 = vmul.f32 %v16278_v16, %v16278_v16 }
 0xb1d   :  { %v5768_v37 = vpop.f32.mrf.mxu3 }
 0xb1e   :  { %v5769_v17 = vadd.f32 %v5768_v37, %v5748_v31  ;;  %v13954_v31 = vld [vmem:[#allocation9 + $0xb4] sm:$0xf0]  ;;  %v13936_v37 = vld [vmem:[#allocation9 + $0x24] sm:$0xf0]  ;;  %6229 = vmatpush.bf16.msrb.mxu1 %v12254_v9 }
 0xb1f   :  { %v5890_v0 = vpop.f32.mrf.mxu1  ;;  %v12250_v43 = vor.u32 %v13954_v31, %v12249_v61  ;;  %v12178_v55 = vor.u32 %v13936_v37, %v12177_v22  ;;  %v13947_v61 = vld [vmem:[#allocation9 + $0x84] sm:$0xf] }
 0xb20   :  { %v5891_v18 = vadd.f32 %v5890_v0, %v5870_v44  ;;  %v16282_v15 = vmul.f32 0.001953125, %v5769_v17  ;;  %v12241_v44 = vld [vmem:[#allocation9 + $0xa0] sm:$0xf]  ;;  %v12179_v17 = vld [vmem:[#allocation9 + $0x28] sm:$0xf0] }
 0xb21   :  { %6191 = vmatpush.bf16.msrb.mxu3 %v12250_v43  ;;  %v12242_v46 = vor.u32 %v13952_v57, %v12241_v44  ;;  %v12182_v58 = vor.u32 %v13935_v28, %v12179_v17  ;;  %6173 = vmatpush.bf16.msrb.mxu2 %v12178_v55  ;;  %v13978_v43 = vld [vmem:[#allocation9 + $0x174] sm:$0xf0]  ;;  %v12347_v44 = vld [vmem:[#allocation9 + $0x178] sm:$0xf0] }
 0xb22   :  { %v5894_v32 = vmul.f32 0.001953125, %v5891_v18  ;;  %v5895_v35 = vmul.f32 %v16282_v15, %v16282_v15  ;;  %6230 = vmatpush.bf16.msrb.mxu1 %v12246_v23  ;;  %v12350_v28 = vor.u32 %v13977_v3, %v12347_v44  ;;  %v12411_v17 = vld [vmem:[#allocation9 + $0x1f8] sm:$0xf0]  ;;  %v13992_v23 = vld [vmem:[#allocation9 + $0x1e4] sm:$0xf0] }
 0xb23   :  { %6211 = vmatpush.bf16.msrb.mxu0 %v12182_v58 }
 0xb24   :  { %v5898_v8 = vsub.f32 %v5894_v32, %v5896_v62  ;;  %v12234_v62 = vor.u32 %v13950_v29, %v12233_v27  ;;  %v12171_v32 = vld [vmem:[#allocation9 + $0x18] sm:$0xf0]  ;;  %v13975_v27 = vld [vmem:[#allocation9 + $0x164] sm:$0xf] }
 0xb25   :  { %v5850_v19 = vpop.f32.mrf.mxu3  ;;  %6192 = vmatpush.bf16.msrb.mxu3 %v12242_v46  ;;  %6174 = vmatpush.bf16.msrb.mxu2 %v12170_v6  ;;  %v12337_v46 = vld [vmem:[#allocation9 + $0x160] sm:$0xf]  ;;  %v12339_v6 = vld [vmem:[#allocation9 + $0x168] sm:$0xf0]  ;;  %v13991_v29 = vld [vmem:[#allocation9 + $0x1e4] sm:$0xf] }
 0xb26   :  { %v5900_v53 = vmax.f32 %v5898_v8, 0.0  ;;  %v5851_v59 = vadd.f32 %v5850_v19, %v5830_v39  ;;  %v12174_v39 = vor.u32 %v13933_v30, %v12171_v32  ;;  %v12225_v8 = vld [vmem:[#allocation9 + $0x80] sm:$0xf]  ;;  %v13931_v19 = vld [vmem:[#allocation9 + $0x4] sm:$0xf]  ;;  %6231 = vmatpush.bf16.msrb.mxu1 %v12238_v40  ;;  %v12338_v24 = vor.u32 %v13976_v5, %v12337_v46 }
 0xb27   :  { %v12226_v47 = vor.u32 %v13948_v11, %v12225_v8  ;;  %v12166_v60 = vor.u32 %v13931_v19, %v12163_v49  ;;  %v12342_v32 = vor.u32 %v13975_v27, %v12339_v6  ;;  %v12406_v40 = vor.u32 %v13991_v29, %v12403_v33  ;;  %v13973_v19 = vld [vmem:[#allocation9 + $0x154] sm:$0xf]  ;;  %v12377_v46 = vld [vmem:[#allocation9 + $0x1b0] sm:$0xf]  ;;  %v12315_v5 = vld [vmem:[#allocation9 + $0x138] sm:$0xf0] }
 0xb28   :  { %v16286_v10 = vadd.f32 1e-05, %v5900_v53  ;;  %v5893_v2 = vmul.f32 0.001953125, %v5851_v59  ;;  %6212 = vmatpush.bf16.msrb.mxu0 %v12174_v39  ;;  %v12227_v53 = vld [vmem:[#allocation9 + $0x88] sm:$0xf0]  ;;  %v12394_v11 = vor.u32 %v13990_v52, %v12393_v63 }
 0xb29   :  { %6193 = vmatpush.bf16.msrb.mxu3 %v12234_v62  ;;  %v16300_v59 = vld [vmem:[%s18087_s15] sm:$0xf]  ;;  %6175 = vmatpush.bf16.msrb.mxu2 %v12162_v50  ;;  %v12230_v31 = vor.u32 %v13947_v61, %v12227_v53  ;;  %v13989_v49 = vld [vmem:[#allocation9 + $0x1d4] sm:$0xf]  ;;  %v12395_v61 = vld [vmem:[#allocation9 + $0x1d8] sm:$0xf0] }
 0xb2a   :  { %14210 = vrsqrt.f32 %v16286_v10  ;;  %v5897_v56 = vsub.f32 %v5893_v2, %v5895_v35  ;;  %v12345_v35 = vld [vmem:[#allocation9 + $0x170] sm:$0xf]  ;;  %v13994_v2 = vld [vmem:[#allocation9 + $0x1f4] sm:$0xf0]  ;;  %vm5919_vm6 = vweird.f32 %v16286_v10  ;;  %v5925_v57 = vperm.slane %v16300_v59, 2 }
 0xb2b   :  { %v12346_v4 = vor.u32 %v13978_v43, %v12345_v35  ;;  %6232 = vmatpush.bf16.msrb.mxu1 %v12230_v31  ;;  %v12410_v37 = vor.u32 %v13994_v2, %v12409_v20  ;;  %v12321_v31 = vld [vmem:[#allocation9 + $0x140] sm:$0xf]  ;;  %v13971_v20 = vld [vmem:[#allocation9 + $0x144] sm:$0xf]  ;;  %v13985_v27 = vld [vmem:[#allocation9 + $0x1b4] sm:$0xf] }
 0xb2c   :  { %v5899_v0 = vmax.f32 %v5897_v56, 0.0  ;;  %6213 = vmatpush.bf16.msrb.mxu0 %v12166_v60  ;;  %v13993_v56 = vld [vmem:[#allocation9 + $0x1f4] sm:$0xf]  ;;  %v12398_v60 = vor.u32 %v13989_v49, %v12395_v61  ;;  %v12385_v35 = vld [vmem:[#allocation9 + $0x1c0] sm:$0xf] }
 0xb2d   :  { %6194 = vmatpush.bf16.msrb.mxu3 %v12226_v47  ;;  %6445 = vmatpush.bf16.msra.mxu2 %v12346_v4  ;;  %v12414_v1 = vor.u32 %v13993_v56, %v12411_v17  ;;  %v13988_v4 = vld [vmem:[#allocation9 + $0x1c4] sm:$0xf0]  ;;  %v12313_v17 = vld [vmem:[#allocation9 + $0x130] sm:$0xf]  ;;  %v12379_v6 = vld [vmem:[#allocation9 + $0x1b8] sm:$0xf0] }
 0xb2e   :  { %v16289_v18 = vadd.f32 1e-05, %v5899_v0  ;;  %v12401_v0 = vld [vmem:[#allocation9 + $0x1e0] sm:$0xf]  ;;  %v12382_v29 = vor.u32 %v13985_v27, %v12379_v6  ;;  %v12361_v49 = vld [vmem:[#allocation9 + $0x190] sm:$0xf] }
 0xb2f   :  { %v12402_v26 = vor.u32 %v13992_v23, %v12401_v0  ;;  %6502 = vmatpush.bf16.msra.mxu1 %v12414_v1  ;;  %v13969_v1 = vld [vmem:[#allocation9 + $0x134] sm:$0xf] }
 0xb30   :  { %v16291_v34 = vpop.eup %14210  ;;  %14212 = vrsqrt.f32 %v16289_v18  ;;  %6483 = vmatpush.bf16.msra.mxu0 %v12350_v28  ;;  %vm5909_vm9 = vweird.f32 %v16289_v18 }
 0xb31   :  { %v5914_v41 = vmul.f32 %v16291_v34, %v16286_v10  ;;  %vm5920_vm5 = vweird.f32 %v16291_v34  ;;  %6464 = vmatpush.bf16.msra.mxu3 %v12410_v37  ;;  %6446 = vmatpush.bf16.msra.mxu2 %v12338_v24  ;;  %v12387_v37 = vld [vmem:[#allocation9 + $0x1c8] sm:$0xf0] }
 0xb32   :  { %vm16310_vm7 = vmor %vm5919_vm6, %vm5920_vm5 }
 0xb33   :  { %v5915_v12 = vmul.f32 %v16291_v34, %v5914_v41  ;;  %v13974_v41 = vld [vmem:[#allocation9 + $0x154] sm:$0xf0]  ;;  %6503 = vmatpush.bf16.msra.mxu1 %v12406_v40  ;;  %v13967_v40 = vld [vmem:[#allocation9 + $0x124] sm:$0xf] }
 0xb34   :  { %v12330_v50 = vor.u32 %v13974_v41, %v12329_v38  ;;  %6484 = vmatpush.bf16.msra.mxu0 %v12342_v32  ;;  %v12369_v32 = vld [vmem:[#allocation9 + $0x1a0] sm:$0xf]  ;;  %v12307_v41 = vld [vmem:[#allocation9 + $0x128] sm:$0xf0] }
 0xb35   :  { %v5916_v42 = vmul.f32 0.5, %v5915_v12  ;;  %6465 = vmatpush.bf16.msra.mxu3 %v12402_v26  ;;  %v12331_v12 = vld [vmem:[#allocation9 + $0x158] sm:$0xf0]  ;;  %v12310_v52 = vor.u32 %v13967_v40, %v12307_v41  ;;  %v12569_v40 = vld [vmem:[#allocation9 + $0x2e0] sm:$0xf] }
 0xb36   :  { %v16303_v48 = vpop.eup %14212  ;;  %v12334_v47 = vor.u32 %v13973_v19, %v12331_v12  ;;  %6447 = vmatpush.bf16.msra.mxu2 %v12330_v50  ;;  %v12371_v50 = vld [vmem:[#allocation9 + $0x1a8] sm:$0xf0]  ;;  %v14024_v41 = vld [vmem:[#allocation9 + $0x2e4] sm:$0xf0] }
 0xb37   :  { %v5917_v9 = vsub.f32 1.5, %v5916_v42  ;;  %v5904_v22 = vmul.f32 %v16303_v48, %v16289_v18  ;;  %vm5910_vm8 = vweird.f32 %v16303_v48  ;;  %v13972_v42 = vld [vmem:[#allocation9 + $0x144] sm:$0xf0]  ;;  %v13987_v18 = vld [vmem:[#allocation9 + $0x1c4] sm:$0xf]  ;;  %6504 = vmatpush.bf16.msra.mxu1 %v12398_v60 }
 0xb38   :  { %vm5911_vm10 = vmor %vm5909_vm9, %vm5910_vm8  ;;  %v12322_v3 = vor.u32 %v13972_v42, %v12321_v31  ;;  %6485 = vmatpush.bf16.msra.mxu0 %v12334_v47  ;;  %v12390_v55 = vor.u32 %v13987_v18, %v12387_v37  ;;  %v13966_v47 = vld [vmem:[#allocation9 + $0x114] sm:$0xf0]  ;;  %v13965_v42 = vld [vmem:[#allocation9 + $0x114] sm:$0xf] }
 0xb39   :  { %v5918_v10 = vmul.f32 %v16291_v34, %v5917_v9  ;;  %v5905_v58 = vmul.f32 %v16303_v48, %v5904_v22  ;;  %6466 = vmatpush.bf16.msra.mxu3 %v12394_v11  ;;  %v12386_v9 = vor.u32 %v13988_v4, %v12385_v35  ;;  %v12323_v22 = vld [vmem:[#allocation9 + $0x148] sm:$0xf0]  ;;  %v12297_v11 = vld [vmem:[#allocation9 + $0x110] sm:$0xf]  ;;  %v13982_v31 = vld [vmem:[#allocation9 + $0x194] sm:$0xf0] }
 0xb3a   :  { %v12326_v56 = vor.u32 %v13971_v20, %v12323_v22  ;;  %6448 = vmatpush.bf16.msra.mxu2 %v12322_v3  ;;  %v12299_v35 = vld [vmem:[#allocation9 + $0x118] sm:$0xf0]  ;;  %v12298_v20 = vor.u32 %v13966_v47, %v12297_v11  ;;  %v12561_v47 = vld [vmem:[#allocation9 + $0x2d0] sm:$0xf] }
 0xb3b   :  { %v5922_v30 = vsel %vm16310_vm7, %v16291_v34, %v5918_v10  ;;  %v5906_v62 = vmul.f32 0.5, %v5905_v58  ;;  %v5924_v34 = vperm.slane %v16300_v59, 0  ;;  %v13986_v58 = vld [vmem:[#allocation9 + $0x1b4] sm:$0xf0]  ;;  %6505 = vmatpush.bf16.msra.mxu1 %v12390_v55  ;;  %v12363_v3 = vld [vmem:[#allocation9 + $0x198] sm:$0xf0] }
 0xb3c   :  { %v5929_v39 = vmul.f32 %v5925_v57, %v5922_v30  ;;  %6486 = vmatpush.bf16.msra.mxu0 %v12326_v56  ;;  %v12378_v26 = vor.u32 %v13986_v58, %v12377_v46  ;;  %v12305_v30 = vld [vmem:[#allocation9 + $0x120] sm:$0xf]  ;;  %v13980_v55 = vld [vmem:[#allocation9 + $0x184] sm:$0xf0] }
 0xb3d   :  { %v5907_v8 = vsub.f32 1.5, %v5906_v62  ;;  %6467 = vmatpush.bf16.msra.mxu3 %v12386_v9  ;;  %v13968_v62 = vld [vmem:[#allocation9 + $0x124] sm:$0xf0]  ;;  %v12353_v56 = vld [vmem:[#allocation9 + $0x180] sm:$0xf] }
 0xb3e   :  { %v5931_v43 = vmul.f32 %v5929_v39, %v16278_v16  ;;  %v16328_v57 = vperm.slane %v5929_v39, 0  ;;  %v12306_v38 = vor.u32 %v13968_v62, %v12305_v30  ;;  %v13984_v39 = vld [vmem:[#allocation9 + $0x1a4] sm:$0xf0]  ;;  %v12577_v30 = vld [vmem:[#allocation9 + $0x2f0] sm:$0xf] }
 0xb3f   :  { %v5908_v53 = vmul.f32 %v16303_v48, %v5907_v8  ;;  %v12370_v63 = vor.u32 %v13984_v39, %v12369_v32  ;;  %v13983_v8 = vld [vmem:[#allocation9 + $0x1a4] sm:$0xf]  ;;  %6506 = vmatpush.bf16.msra.mxu1 %v12382_v29  ;;  %v14010_v29 = vld [vmem:[#allocation9 + $0x274] sm:$0xf0] }
 0xb40   :  { %v5934_v16 = vrot.slane %v5931_v43, 6  ;;  %v5944_v61 = vmul.f32 %v16328_v57, %v16125_v45  ;;  %v12302_v45 = vor.u32 %v13965_v42, %v12299_v35  ;;  %v14026_v32 = vld [vmem:[#allocation9 + $0x2f4] sm:$0xf0]  ;;  %v14004_v42 = vld [vmem:[#allocation9 + $0x244] sm:$0xf0] }
 0xb41   :  { %v5912_v2 = vsel %vm5911_vm10, %v16303_v48, %v5908_v53  ;;  %v13970_v48 = vld [vmem:[#allocation9 + $0x134] sm:$0xf0]  ;;  %6468 = vmatpush.bf16.msra.mxu3 %v12378_v26  ;;  %v12354_v26 = vor.u32 %v13980_v55, %v12353_v56  ;;  %v12578_v39 = vor.u32 %v14026_v32, %v12577_v30  ;;  %v12553_v35 = vld [vmem:[#allocation9 + $0x2c0] sm:$0xf]  ;;  %v14016_v56 = vld [vmem:[#allocation9 + $0x2a4] sm:$0xf0] }
 0xb42   :  { %v5928_v44 = vmul.f32 %v5924_v34, %v5912_v2  ;;  %v12314_v24 = vor.u32 %v13970_v48, %v12313_v17  ;;  %v12374_v34 = vor.u32 %v13983_v8, %v12371_v50  ;;  %v13981_v2 = vld [vmem:[#allocation9 + $0x194] sm:$0xf]  ;;  %v13979_v17 = vld [vmem:[#allocation9 + $0x184] sm:$0xf] }
 0xb43   :  { %v12366_v9 = vor.u32 %v13981_v2, %v12363_v3  ;;  %v12481_v3 = vld [vmem:[#allocation9 + $0x230] sm:$0xf] }
 0xb44   :  { %v5930_v28 = vmul.f32 %v5928_v44, %v16282_v15  ;;  %v16332_v23 = vperm.slane %v5928_v44, 0  ;;  %v12318_v15 = vor.u32 %v13969_v1, %v12315_v5  ;;  %6449 = vmatpush.bf16.msra.mxu2 %v12314_v24  ;;  %6507 = vmatpush.bf16.msra.mxu1 %v12374_v34  ;;  %v13964_v44 = vld [vmem:[#allocation9 + $0x104] sm:$0xf0]  ;;  %v12355_v1 = vld [vmem:[#allocation9 + $0x188] sm:$0xf0] }
 0xb45   :  { %6469 = vmatpush.bf16.msra.mxu3 %v12370_v63  ;;  %v12358_v6 = vor.u32 %v13979_v17, %v12355_v1  ;;  %v5946_v63 = vmul.f32 %v16328_v57, %v16111_v14  ;;  %v14006_v34 = vld [vmem:[#allocation9 + $0x254] sm:$0xf0]  ;;  %v12457_v1 = vld [vmem:[#allocation9 + $0x200] sm:$0xf] }
 0xb46   :  { %v5935_v10 = vsel %vm2099_vm4, %v5930_v28, %v5934_v16  ;;  %6487 = vmatpush.bf16.msra.mxu0 %v12318_v15  ;;  %v5941_v53 = vmul.f32 %v16332_v23, %v15998_v54  ;;  %v5943_v60 = vmul.f32 %v16332_v23, %v15995_v7  ;;  %v12289_v54 = vld [vmem:[#allocation9 + $0x100] sm:$0xf]  ;;  %v13963_v16 = vld [vmem:[#allocation9 + $0x104] sm:$0xf]  ;;  %v12291_v28 = vld [vmem:[#allocation9 + $0x108] sm:$0xf0]  ;;  %v5945_v8 = vmul.f32 %v16332_v23, %v15991_v21 }
 0xb47   :  { %v5936_v0 = vrot.slane %v5935_v10, 7  ;;  %v12290_v24 = vor.u32 %v13964_v44, %v12289_v54  ;;  %v12294_v27 = vor.u32 %v13963_v16, %v12291_v28  ;;  %v12513_v15 = vld [vmem:[#allocation9 + $0x270] sm:$0xf]  ;;  %v5947_v50 = vmul.f32 %v16332_v23, %v15987_v51  ;;  %v14018_v54 = vld [vmem:[#allocation9 + $0x2b4] sm:$0xf0] }
 0xb48   :  { %6450 = vmatpush.bf16.msra.mxu2 %v12306_v38  ;;  %6508 = vmatpush.bf16.msra.mxu1 %v12366_v9  ;;  %v12514_v62 = vor.u32 %v14010_v29, %v12513_v15  ;;  %v14008_v38 = vld [vmem:[#allocation9 + $0x264] sm:$0xf0]  ;;  %v12545_v9 = vld [vmem:[#allocation9 + $0x2b0] sm:$0xf]  ;;  %v12537_v44 = vld [vmem:[#allocation9 + $0x2a0] sm:$0xf] }
 0xb49   :  { %v5938_v33 = vsub.f32 %v16300_v59, %v5936_v0  ;;  %v5942_v59 = vmul.f32 %v16328_v57, %v16138_v25  ;;  %v12362_v25 = vor.u32 %v13982_v31, %v12361_v49  ;;  %v14022_v49 = vld [vmem:[#allocation9 + $0x2d4] sm:$0xf0]  ;;  %v12489_v31 = vld [vmem:[#allocation9 + $0x240] sm:$0xf]  ;;  %v12538_v16 = vor.u32 %v14016_v56, %v12537_v44  ;;  %v12465_v28 = vld [vmem:[#allocation9 + $0x210] sm:$0xf] }
 0xb4a   :  { %6488 = vmatpush.bf16.msra.mxu0 %v12310_v52  ;;  %v5948_v52 = vmul.f32 %v16328_v57, %v16097_v13  ;;  %v12562_v51 = vor.u32 %v14022_v49, %v12561_v47  ;;  %v13998_v17 = vld [vmem:[#allocation9 + $0x214] sm:$0xf0] }
 0xb4b   :  { %v5950_v19 = vperm.slane %v5938_v33, 1  ;;  %v5951_v12 = vperm.slane %v5938_v33, 3  ;;  %6470 = vmatpush.bf16.msra.mxu3 %v12362_v25  ;;  %v12505_v33 = vld [vmem:[#allocation9 + $0x260] sm:$0xf] }
 0xb4c   :  { %6451 = vmatpush.bf16.msra.mxu2 %v12298_v20  ;;  %6509 = vmatpush.bf16.msra.mxu1 %v12358_v6  ;;  %v12506_v11 = vor.u32 %v14008_v38, %v12505_v33  ;;  %v14020_v20 = vld [vmem:[#allocation9 + $0x2c4] sm:$0xf0] }
 0xb4d   :  { %v16343_v43 = vperm.slane %v5950_v19, 1  ;;  %v16345_v4 = vperm.slane %v5951_v12, 1  ;;  %v12570_v19 = vor.u32 %v14024_v41, %v12569_v40  ;;  %v12497_v12 = vld [vmem:[#allocation9 + $0x250] sm:$0xf] }
 0xb4e   :  { %6489 = vmatpush.bf16.msra.mxu0 %v12302_v45  ;;  %v14002_v45 = vld [vmem:[#allocation9 + $0x234] sm:$0xf0] }
 0xb4f   :  { %v5956_v22 = vadd.f32 %v16343_v43, %v5941_v53  ;;  %v5957_v7 = vadd.f32 %v16345_v4, %v5942_v59  ;;  %v5958_v18 = vadd.f32 %v16343_v43, %v5943_v60  ;;  %v5959_v37 = vadd.f32 %v16345_v4, %v5944_v61  ;;  %6471 = vmatpush.bf16.msra.mxu3 %v12354_v26  ;;  %v12521_v26 = vld [vmem:[#allocation9 + $0x280] sm:$0xf] }
 0xb50   :  { %6452 = vmatpush.bf16.msra.mxu2 %v12290_v24  ;;  %v5960_v14 = vadd.f32 %v16343_v43, %v5945_v8  ;;  %v5961_v13 = vadd.f32 %v16345_v4, %v5946_v63  ;;  %v5962_v57 = vadd.f32 %v16343_v43, %v5947_v50  ;;  %v5963_v21 = vadd.f32 %v16345_v4, %v5948_v52  ;;  %v13996_v24 = vld [vmem:[#allocation9 + $0x204] sm:$0xf0] }
 0xb51   :  { %v5964_v48 = vmax.f32 %v5956_v22, 0.0  ;;  %v5966_v46 = vmax.f32 %v5958_v18, 0.0  ;;  %v5965_v10 = vmax.f32 %v5957_v7, 0.0  ;;  %v5967_v58 = vmax.f32 %v5959_v37, 0.0  ;;  %v12473_v18 = vld [vmem:[#allocation9 + $0x220] sm:$0xf] }
 0xb52   :  { %6490 = vmatpush.bf16.msra.mxu0 %v12294_v27  ;;  %v12498_v59 = vor.u32 %v14006_v34, %v12497_v12  ;;  %v5968_v23 = vmax.f32 %v5960_v14, 0.0  ;;  %v5970_v61 = vmax.f32 %v5962_v57, 0.0  ;;  %v5969_v53 = vmax.f32 %v5961_v13, 0.0  ;;  %v14000_v37 = vld [vmem:[#allocation9 + $0x224] sm:$0xf0] }
 0xb53   :  { %v16351_v5 = vpack.c.bf16 %v5966_v46, %v5964_v48  ;;  %v16353_v0 = vpack.c.bf16 %v5967_v58, %v5965_v10  ;;  %v5971_v60 = vmax.f32 %v5963_v21, 0.0  ;;  %v12490_v43 = vor.u32 %v14004_v42, %v12489_v31  ;;  %v12529_v48 = vld [vmem:[#allocation9 + $0x290] sm:$0xf]  ;;  %v14014_v46 = vld [vmem:[#allocation9 + $0x294] sm:$0xf0] }
 0xb54   :  { %v16371_v25 = vpack.c.bf16 %v5970_v61, %v5968_v23  ;;  %v12554_v4 = vor.u32 %v14020_v20, %v12553_v35  ;;  %v12482_v22 = vor.u32 %v14002_v45, %v12481_v3  ;;  %v12546_v7 = vor.u32 %v14018_v54, %v12545_v9  ;;  %v14012_v27 = vld [vmem:[#allocation9 + $0x284] sm:$0xf0]  ;;  %v12415_v54 = vld [vmem:[%s18086_s14 + $0x40] sm:$0xff] }
 0xb55   :  { %6176 = vmatmul.bf16.vlgmr.msrb.gmra.mxu2 %v16351_v5  ;;  %6195 = vmatmul.bf16.vlgmr.msrb.gmra.mxu3 %v16353_v0  ;;  %v16373_v2 = vpack.c.bf16 %v5971_v60, %v5969_v53  ;;  %v12474_v55 = vor.u32 %v14000_v37, %v12473_v18  ;;  %v12466_v10 = vor.u32 %v13998_v17, %v12465_v28  ;;  %v12416_v17 = vld [vmem:[%s18086_s14 + $0x48] sm:$0xff] }
 0xb56   :  { %6214 = vmatmul.bf16.vlgmr.msrb.gmra.mxu0 %v16351_v5  ;;  %6233 = vmatmul.bf16.vlgmr.msrb.gmra.mxu1 %v16353_v0  ;;  %v12530_v58 = vor.u32 %v14014_v46, %v12529_v48  ;;  %v12458_v6 = vor.u32 %v13996_v24, %v12457_v1  ;;  %v12522_v15 = vor.u32 %v14012_v27, %v12521_v26  ;;  %v12417_v24 = vld [vmem:[%s18086_s14 + $0x50] sm:$0xff] }
 0xb57   :  { %6935 = vmatpush.bf16.msrb.mxu2 %v12514_v62  ;;  %6954 = vmatpush.bf16.msrb.mxu3 %v12578_v39 }
 0xb5b   :  { %6936 = vmatpush.bf16.msrb.mxu2 %v12506_v11  ;;  %6955 = vmatpush.bf16.msrb.mxu3 %v12570_v19 }
 0xb5f   :  { %6937 = vmatpush.bf16.msrb.mxu2 %v12498_v59  ;;  %6956 = vmatpush.bf16.msrb.mxu3 %v12562_v51 }
 0xb63   :  { %6938 = vmatpush.bf16.msrb.mxu2 %v12490_v43  ;;  %6957 = vmatpush.bf16.msrb.mxu3 %v12554_v4 }
 0xb65   :  { %6181 = vmatmul.bf16.gmra.mxu2 %v16371_v25  ;;  %6200 = vmatmul.bf16.gmra.mxu3 %v16373_v2 }
 0xb66   :  { %6219 = vmatmul.bf16.gmra.mxu0 %v16371_v25  ;;  %6238 = vmatmul.bf16.gmra.mxu1 %v16373_v2 }
 0xb67   :  { %6939 = vmatpush.bf16.msrb.mxu2 %v12482_v22  ;;  %6958 = vmatpush.bf16.msrb.mxu3 %v12546_v7 }
 0xb6b   :  { %6940 = vmatpush.bf16.msrb.mxu2 %v12474_v55  ;;  %6959 = vmatpush.bf16.msrb.mxu3 %v12538_v16 }
 0xb6f   :  { %6941 = vmatpush.bf16.msrb.mxu2 %v12466_v10  ;;  %6960 = vmatpush.bf16.msrb.mxu3 %v12530_v58 }
 0xb73   :  { %6942 = vmatpush.bf16.msrb.mxu2 %v12458_v6  ;;  %6961 = vmatpush.bf16.msrb.mxu3 %v12522_v15  ;;  %v12418_v6 = vld [vmem:[%s18086_s14 + $0x58] sm:$0xff] }
 0xb75   :  { %6453 = vmatmul.bf16.vlgmr.msra.gmra.mxu2 %v16351_v5  ;;  %6472 = vmatmul.bf16.vlgmr.msra.gmra.mxu3 %v16353_v0 }
 0xb76   :  { %6491 = vmatmul.bf16.vlgmr.msra.gmra.mxu0 %v16351_v5  ;;  %6510 = vmatmul.bf16.vlgmr.msra.gmra.mxu1 %v16353_v0 }
 0xb85   :  { %6458 = vmatmul.bf16.gmra.mxu2 %v16371_v25  ;;  %6477 = vmatmul.bf16.gmra.mxu3 %v16373_v2 }
 0xb86   :  { %6496 = vmatmul.bf16.gmra.mxu0 %v16371_v25  ;;  %6515 = vmatmul.bf16.gmra.mxu1 %v16373_v2 }
 0xb95   :  { %6943 = vmatmul.bf16.vlgmr.msrb.gmra.mxu2 %v16351_v5  ;;  %6962 = vmatmul.bf16.vlgmr.msrb.gmra.mxu3 %v16353_v0 }
 0xba5   :  { %6948 = vmatmul.bf16.gmra.mxu2 %v16371_v25  ;;  %6967 = vmatmul.bf16.gmra.mxu3 %v16373_v2 }
 0xbd3   :  { %v6215_v29 = vpop.f32.mrf.mxu0  ;;  %v6234_v30 = vpop.f32.mrf.mxu1 }
 0xbd4   :  { %v6235_v62 = vadd.f32 %v6234_v30, %v6215_v29 }
 0xbd8   :  { %v16391_v32 = vpop.f32.mrf.mxu2  ;;  %v16393_v33 = vpop.f32.mrf.mxu3 }
 0xbd9   :  { %v6197_v10 = vadd.f32 %v16393_v33, %v16391_v32 }
 0xbdb   :  { %v6217_v38 = vpop.f32.mrf.mxu0  ;;  %v6236_v39 = vpop.f32.mrf.mxu1 }
 0xbdc   :  { %v6237_v56 = vadd.f32 %v6236_v39, %v6217_v38  ;;  %v16424_v39 = vld [vmem:[%s18086_s14 + $0x80] sm:$0xff] }
 0xbe0   :  { %v6179_v40 = vpop.f32.mrf.mxu2  ;;  %v6198_v41 = vpop.f32.mrf.mxu3 }
 0xbe1   :  { %v6199_v46 = vadd.f32 %v6198_v41, %v6179_v40  ;;  %v12420_v40 = vld [vmem:[%s18086_s14 + $0x68] sm:$0xff] }
 0xbe2   :  { %v16436_v41 = vld [vmem:[%s18086_s14 + $0x88] sm:$0xff] }
 0xbe3   :  { %v6220_v63 = vpop.f32.mrf.mxu0  ;;  %v6239_v52 = vpop.f32.mrf.mxu1 }
 0xbe4   :  { %v6240_v37 = vadd.f32 %v6239_v52, %v6220_v63  ;;  %v12421_v63 = vld [vmem:[%s18086_s14 + $0x70] sm:$0xff] }
 0xbe5   :  { %v16448_v52 = vld [vmem:[%s18086_s14 + $0x90] sm:$0xff] }
 0xbe8   :  { %v6182_v8 = vpop.f32.mrf.mxu2  ;;  %v6201_v50 = vpop.f32.mrf.mxu3 }
 0xbe9   :  { %v6202_v48 = vadd.f32 %v6201_v50, %v6182_v8  ;;  %v12422_v8 = vld [vmem:[%s18086_s14 + $0x78] sm:$0xff] }
 0xbea   :  { %v16460_v50 = vld [vmem:[%s18086_s14 + $0x98] sm:$0xff] }
 0xbeb   :  { %v6222_v11 = vpop.f32.mrf.mxu0  ;;  %v6241_v19 = vpop.f32.mrf.mxu1 }
 0xbec   :  { %v6242_v7 = vadd.f32 %v6241_v19, %v6222_v11  ;;  %v6244_v11 = vld [vmem:[%s18086_s14] sm:$0xff]  ;;  %v14025_v19 = vld [vmem:[#allocation9 + $0x2f4] sm:$0xf] }
 0xbf0   :  { %v6184_v12 = vpop.f32.mrf.mxu2  ;;  %v6203_v34 = vpop.f32.mrf.mxu3 }
 0xbf1   :  { %v6204_v28 = vadd.f32 %v6203_v34, %v6184_v12  ;;  %v12579_v12 = vld [vmem:[#allocation9 + $0x2f8] sm:$0xf0] }
 0xbf2   :  { %v12582_v34 = vor.u32 %v14025_v19, %v12579_v12  ;;  %v13995_v12 = vld [vmem:[#allocation9 + $0x204] sm:$0xf] }
 0xbf3   :  { %v6492_v47 = vpop.f32.mrf.mxu0  ;;  %v6511_v49 = vpop.f32.mrf.mxu1 }
 0xbf4   :  { %v6512_v9 = vadd.f32 %v6511_v49, %v6492_v47  ;;  %v14023_v47 = vld [vmem:[#allocation9 + $0x2e4] sm:$0xf]  ;;  %v12571_v49 = vld [vmem:[#allocation9 + $0x2e8] sm:$0xf0] }
 0xbf8   :  { %v6454_v14 = vpop.f32.mrf.mxu2  ;;  %v6473_v13 = vpop.f32.mrf.mxu3 }
 0xbf9   :  { %v6474_v44 = vadd.f32 %v6473_v13, %v6454_v14  ;;  %v16472_v14 = vld [vmem:[%s18086_s14 + $0xa0] sm:$0xff]  ;;  %v12574_v13 = vor.u32 %v14023_v47, %v12571_v49 }
 0xbfa   :  { %v12721_v49 = vld [vmem:[#allocation9 + $0x3e0] sm:$0xf] }
 0xbfb   :  { %v6494_v57 = vpop.f32.mrf.mxu0  ;;  %v6513_v21 = vpop.f32.mrf.mxu1 }
 0xbfc   :  { %v6514_v43 = vadd.f32 %v6513_v21, %v6494_v57  ;;  %v6245_v57 = vld [vmem:[%s18086_s14 + $0x8] sm:$0xff]  ;;  %v14009_v21 = vld [vmem:[#allocation9 + $0x274] sm:$0xf] }
 0xc00   :  { %v6456_v59 = vpop.f32.mrf.mxu2  ;;  %v6475_v51 = vpop.f32.mrf.mxu3 }
 0xc01   :  { %v6476_v18 = vadd.f32 %v6475_v51, %v6456_v59  ;;  %v12515_v59 = vld [vmem:[#allocation9 + $0x278] sm:$0xf0] }
 0xc02   :  { %v12518_v51 = vor.u32 %v14009_v21, %v12515_v59  ;;  %v12665_v59 = vld [vmem:[#allocation9 + $0x370] sm:$0xf] }
 0xc03   :  { %v6497_v23 = vpop.f32.mrf.mxu0  ;;  %v6516_v61 = vpop.f32.mrf.mxu1 }
 0xc04   :  { %v6517_v20 = vadd.f32 %v6516_v61, %v6497_v23  ;;  %v14021_v23 = vld [vmem:[#allocation9 + $0x2d4] sm:$0xf]  ;;  %v12563_v61 = vld [vmem:[#allocation9 + $0x2d8] sm:$0xf0] }
 0xc08   :  { %v6459_v53 = vpop.f32.mrf.mxu2  ;;  %v6478_v60 = vpop.f32.mrf.mxu3 }
 0xc09   :  { %v6479_v22 = vadd.f32 %v6478_v60, %v6459_v53  ;;  %v12566_v53 = vor.u32 %v14021_v23, %v12563_v61  ;;  %v14007_v60 = vld [vmem:[#allocation9 + $0x264] sm:$0xf]  ;;  %v12713_v23 = vld [vmem:[#allocation9 + $0x3d0] sm:$0xf] }
 0xc0b   :  { %v6499_v31 = vpop.f32.mrf.mxu0  ;;  %v6518_v42 = vpop.f32.mrf.mxu1 }
 0xc0c   :  { %v6519_v35 = vadd.f32 %v6518_v42, %v6499_v31  ;;  %v12507_v31 = vld [vmem:[#allocation9 + $0x268] sm:$0xf0] }
 0xc0d   :  { %v12510_v42 = vor.u32 %v14007_v60, %v12507_v31  ;;  %v12657_v31 = vld [vmem:[#allocation9 + $0x360] sm:$0xf] }
 0xc0e   :  { %6607 = vmatpush.msrb.mxu1 %v6519_v35  ;;  %v14019_v35 = vld [vmem:[#allocation9 + $0x2c4] sm:$0xf] }
 0xc10   :  { %6608 = vmatpush.msrb.mxu1 %v6517_v20  ;;  %v6461_v4 = vpop.f32.mrf.mxu2  ;;  %v6480_v3 = vpop.f32.mrf.mxu3  ;;  %v12555_v20 = vld [vmem:[#allocation9 + $0x2c8] sm:$0xf0] }
 0xc11   :  { %v6481_v45 = vadd.f32 %v6480_v3, %v6461_v4  ;;  %v12558_v4 = vor.u32 %v14019_v35, %v12555_v20  ;;  %v6246_v3 = vld [vmem:[%s18086_s14 + $0x10] sm:$0xff]  ;;  %v12705_v20 = vld [vmem:[#allocation9 + $0x3c0] sm:$0xf] }
 0xc12   :  { %6609 = vmatpush.msrb.mxu1 %v6514_v43  ;;  %v16484_v43 = vld [vmem:[%s18086_s14 + $0xa8] sm:$0xff] }
 0xc13   :  { %6566 = vmatpush.msrb.mxu0 %v6481_v45  ;;  %v14005_v45 = vld [vmem:[#allocation9 + $0x254] sm:$0xf] }
 0xc14   :  { %6610 = vmatpush.msrb.mxu1 %v6512_v9  ;;  %v12499_v9 = vld [vmem:[#allocation9 + $0x258] sm:$0xf0] }
 0xc15   :  { %12431 = vmatmul.msk.f32.vlgmr.msrb.gmra.mxu1 %vm5640_vm3, %v12415_v54  ;;  %6567 = vmatpush.msrb.mxu0 %v6479_v22  ;;  %v14017_v22 = vld [vmem:[#allocation9 + $0x2b4] sm:$0xf] }
 0xc16   :  { %6713 = vmatpush.msra.mxu1 %v6242_v7  ;;  %v12547_v7 = vld [vmem:[#allocation9 + $0x2b8] sm:$0xf0] }
 0xc17   :  { %6568 = vmatpush.msrb.mxu0 %v6476_v18  ;;  %v12550_v18 = vor.u32 %v14017_v22, %v12547_v7  ;;  %v12697_v7 = vld [vmem:[#allocation9 + $0x3b0] sm:$0xf] }
 0xc18   :  { %6714 = vmatpush.msra.mxu1 %v6240_v37  ;;  %v6944_v55 = vpop.f32.mrf.mxu2  ;;  %v6963_v16 = vpop.f32.mrf.mxu3  ;;  %v14003_v37 = vld [vmem:[#allocation9 + $0x244] sm:$0xf] }
 0xc19   :  { %6569 = vmatpush.msrb.mxu0 %v6474_v44  ;;  %v6964_v38 = vadd.f32 %v6963_v16, %v6944_v55  ;;  %v12491_v44 = vld [vmem:[#allocation9 + $0x248] sm:$0xf0]  ;;  %v14015_v55 = vld [vmem:[#allocation9 + $0x2a4] sm:$0xf] }
 0xc1a   :  { %6715 = vmatpush.msra.mxu1 %v6237_v56  ;;  %12423 = vmatmul.msk.f32.vlgmr.msrb.gmra.mxu0 %vm5640_vm3, %v12415_v54  ;;  %v12502_v54 = vor.u32 %v14005_v45, %v12499_v9  ;;  %v12494_v56 = vor.u32 %v14003_v37, %v12491_v44  ;;  %v12539_v16 = vld [vmem:[#allocation9 + $0x2a8] sm:$0xf0]  ;;  %v6250_v45 = vld [vmem:[%s18086_s14 + $0x30] sm:$0xff]  ;;  %v12641_v44 = vld [vmem:[#allocation9 + $0x340] sm:$0xf] }
 0xc1b   :  { %6672 = vmatpush.msra.mxu0 %v6204_v28  ;;  %v16496_v28 = vld [vmem:[%s18086_s14 + $0xb0] sm:$0xff] }
 0xc1c   :  { %6716 = vmatpush.msra.mxu1 %v6235_v62  ;;  %v12419_v62 = vld [vmem:[%s18086_s14 + $0x60] sm:$0xff]  ;;  %v12649_v9 = vld [vmem:[#allocation9 + $0x350] sm:$0xf] }
 0xc1d   :  { %12432 = vmatmul.msk.f32.gmra.mxu1 %vm5640_vm3, %v12416_v17  ;;  %6673 = vmatpush.msra.mxu0 %v6202_v48  ;;  %v6247_v48 = vld [vmem:[%s18086_s14 + $0x18] sm:$0xff] }
 0xc1e   :  { %6992 = vmatpush.bf16.msrb.mxu1 %v12582_v34  ;;  %v12459_v34 = vld [vmem:[#allocation9 + $0x208] sm:$0xf0] }
 0xc1f   :  { %6674 = vmatpush.msra.mxu0 %v6199_v46  ;;  %v14001_v46 = vld [vmem:[#allocation9 + $0x234] sm:$0xf]  ;;  %v12462_v47 = vor.u32 %v13995_v12, %v12459_v34  ;;  %v12609_v34 = vld [vmem:[#allocation9 + $0x300] sm:$0xf] }
 0xc20   :  { %v6946_v58 = vpop.f32.mrf.mxu2  ;;  %v6965_v1 = vpop.f32.mrf.mxu3 }
 0xc21   :  { %6675 = vmatpush.msra.mxu0 %v6197_v10  ;;  %v6966_v33 = vadd.f32 %v6965_v1, %v6946_v58  ;;  %v12483_v10 = vld [vmem:[#allocation9 + $0x238] sm:$0xf0]  ;;  %v14013_v1 = vld [vmem:[#allocation9 + $0x294] sm:$0xf] }
 0xc22   :  { %12424 = vmatmul.msk.f32.gmra.mxu0 %vm5640_vm3, %v12416_v17  ;;  %6993 = vmatpush.bf16.msrb.mxu1 %v12574_v13  ;;  %v12542_v17 = vor.u32 %v14015_v55, %v12539_v16  ;;  %v12486_v58 = vor.u32 %v14001_v46, %v12483_v10  ;;  %v14056_v13 = vld [vmem:[#allocation9 + $0x3e4] sm:$0xf0]  ;;  %v12689_v16 = vld [vmem:[#allocation9 + $0x3a0] sm:$0xf]  ;;  %v12633_v10 = vld [vmem:[#allocation9 + $0x330] sm:$0xf] }
 0xc23   :  { %6973 = vmatpush.bf16.msrb.mxu0 %v12518_v51  ;;  %v12722_v21 = vor.u32 %v14056_v13, %v12721_v49  ;;  %v14042_v51 = vld [vmem:[#allocation9 + $0x374] sm:$0xf0] }
 0xc24   :  { %v12666_v61 = vor.u32 %v14042_v51, %v12665_v59 }
 0xc25   :  { %12433 = vmatmul.msk.f32.gmra.mxu1 %vm5640_vm3, %v12417_v24 }
 0xc26   :  { %6994 = vmatpush.bf16.msrb.mxu1 %v12566_v53  ;;  %v14054_v53 = vld [vmem:[#allocation9 + $0x3d4] sm:$0xf0] }
 0xc27   :  { %6974 = vmatpush.bf16.msrb.mxu0 %v12510_v42  ;;  %v12714_v60 = vor.u32 %v14054_v53, %v12713_v23  ;;  %v14040_v42 = vld [vmem:[#allocation9 + $0x364] sm:$0xf0]  ;;  %v14041_v23 = vld [vmem:[#allocation9 + $0x374] sm:$0xf] }
 0xc28   :  { %v6949_v26 = vpop.f32.mrf.mxu2  ;;  %v6968_v27 = vpop.f32.mrf.mxu3  ;;  %v12658_v35 = vor.u32 %v14040_v42, %v12657_v31  ;;  %v14053_v53 = vld [vmem:[#allocation9 + $0x3d4] sm:$0xf]  ;;  %v12715_v31 = vld [vmem:[#allocation9 + $0x3d8] sm:$0xf0] }
 0xc29   :  { %v6969_v32 = vadd.f32 %v6968_v27, %v6949_v26  ;;  %v13999_v27 = vld [vmem:[#allocation9 + $0x224] sm:$0xf]  ;;  %v12718_v42 = vor.u32 %v14053_v53, %v12715_v31 }
 0xc2a   :  { %12425 = vmatmul.msk.f32.gmra.mxu0 %vm5640_vm3, %v12417_v24  ;;  %6995 = vmatpush.bf16.msrb.mxu1 %v12558_v4  ;;  %v12531_v24 = vld [vmem:[#allocation9 + $0x298] sm:$0xf0]  ;;  %v14052_v4 = vld [vmem:[#allocation9 + $0x3c4] sm:$0xf0] }
 0xc2b   :  { %6975 = vmatpush.bf16.msrb.mxu0 %v12502_v54  ;;  %v12534_v26 = vor.u32 %v14013_v1, %v12531_v24  ;;  %v14038_v54 = vld [vmem:[#allocation9 + $0x354] sm:$0xf0]  ;;  %v12681_v1 = vld [vmem:[#allocation9 + $0x390] sm:$0xf] }
 0xc2c   :  { %v12650_v22 = vor.u32 %v14038_v54, %v12649_v9  ;;  %v12707_v9 = vld [vmem:[#allocation9 + $0x3c8] sm:$0xf0] }
 0xc2d   :  { %12434 = vmatmul.msk.f32.gmra.mxu1 %vm5640_vm3, %v12418_v6 }
 0xc2e   :  { %6996 = vmatpush.bf16.msrb.mxu1 %v12550_v18  ;;  %v14050_v18 = vld [vmem:[#allocation9 + $0x3b4] sm:$0xf0] }
 0xc2f   :  { %6976 = vmatpush.bf16.msrb.mxu0 %v12494_v56  ;;  %v12698_v37 = vor.u32 %v14050_v18, %v12697_v7  ;;  %v14036_v56 = vld [vmem:[#allocation9 + $0x344] sm:$0xf0]  ;;  %v14037_v7 = vld [vmem:[#allocation9 + $0x354] sm:$0xf]  ;;  %v12651_v18 = vld [vmem:[#allocation9 + $0x358] sm:$0xf0] }
 0xc30   :  { %v6951_v15 = vpop.f32.mrf.mxu2  ;;  %v6970_v29 = vpop.f32.mrf.mxu3  ;;  %v12642_v55 = vor.u32 %v14036_v56, %v12641_v44  ;;  %v14049_v44 = vld [vmem:[#allocation9 + $0x3b4] sm:$0xf]  ;;  %v12699_v56 = vld [vmem:[#allocation9 + $0x3b8] sm:$0xf0] }
 0xc31   :  { %v6971_v30 = vadd.f32 %v6970_v29, %v6951_v15  ;;  %v16508_v29 = vld [vmem:[%s18086_s14 + $0xb8] sm:$0xff] }
 0xc32   :  { %12426 = vmatmul.msk.f32.gmra.mxu0 %vm5640_vm3, %v12418_v6  ;;  %6997 = vmatpush.bf16.msrb.mxu1 %v12542_v17  ;;  %v12475_v6 = vld [vmem:[#allocation9 + $0x228] sm:$0xf0]  ;;  %v14048_v17 = vld [vmem:[#allocation9 + $0x3a4] sm:$0xf0] }
 0xc33   :  { %7056 = vmatpush.msra.mxu2 %v6971_v30  ;;  %6977 = vmatpush.bf16.msrb.mxu0 %v12486_v58  ;;  %v12478_v15 = vor.u32 %v13999_v27, %v12475_v6  ;;  %v14011_v30 = vld [vmem:[#allocation9 + $0x284] sm:$0xf]  ;;  %v12690_v46 = vor.u32 %v14048_v17, %v12689_v16  ;;  %v14034_v58 = vld [vmem:[#allocation9 + $0x334] sm:$0xf0]  ;;  %v12625_v6 = vld [vmem:[#allocation9 + $0x320] sm:$0xf] }
 0xc34   :  { %v12634_v24 = vor.u32 %v14034_v58, %v12633_v10  ;;  %v14035_v16 = vld [vmem:[#allocation9 + $0x344] sm:$0xf]  ;;  %v12643_v17 = vld [vmem:[#allocation9 + $0x348] sm:$0xf0] }
 0xc35   :  { %12435 = vmatmul.msk.f32.gmra.mxu1 %vm5640_vm3, %v12419_v62  ;;  %7057 = vmatpush.msra.mxu2 %v6969_v32  ;;  %v14047_v10 = vld [vmem:[#allocation9 + $0x3a4] sm:$0xf]  ;;  %v12691_v58 = vld [vmem:[#allocation9 + $0x3a8] sm:$0xf0] }
 0xc36   :  { %6998 = vmatpush.bf16.msrb.mxu1 %v12534_v26  ;;  %v14046_v26 = vld [vmem:[#allocation9 + $0x394] sm:$0xf0] }
 0xc37   :  { %7058 = vmatpush.msra.mxu2 %v6966_v33  ;;  %6978 = vmatpush.bf16.msrb.mxu0 %v12478_v15  ;;  %v6248_v33 = vld [vmem:[%s18086_s14 + $0x20] sm:$0xff]  ;;  %v12682_v27 = vor.u32 %v14046_v26, %v12681_v1  ;;  %v14032_v15 = vld [vmem:[#allocation9 + $0x324] sm:$0xf0]  ;;  %v12694_v1 = vor.u32 %v14047_v10, %v12691_v58  ;;  %v14033_v26 = vld [vmem:[#allocation9 + $0x334] sm:$0xf] }
 0xc39   :  { %7059 = vmatpush.msra.mxu2 %v6964_v38  ;;  %v13997_v38 = vld [vmem:[#allocation9 + $0x214] sm:$0xf] }
 0xc3a   :  { %12427 = vmatmul.msk.f32.gmra.mxu0 %vm5640_vm3, %v12419_v62  ;;  %12591 = vmatmul.msk.f32.vlgmr.msra.gmra.mxu2 %vm5640_vm3, %v16424_v39  ;;  %v12523_v62 = vld [vmem:[#allocation9 + $0x288] sm:$0xf0] }
 0xc3b   :  { %v12526_v32 = vor.u32 %v14011_v30, %v12523_v62  ;;  %v12626_v30 = vor.u32 %v14032_v15, %v12625_v6  ;;  %v12673_v62 = vld [vmem:[#allocation9 + $0x380] sm:$0xf]  ;;  %v14045_v6 = vld [vmem:[#allocation9 + $0x394] sm:$0xf] }
 0xc3d   :  { %12436 = vmatmul.msk.f32.gmra.mxu1 %vm5640_vm3, %v12420_v40 }
 0xc3e   :  { %6999 = vmatpush.bf16.msrb.mxu1 %v12526_v32  ;;  %v14044_v32 = vld [vmem:[#allocation9 + $0x384] sm:$0xf0] }
 0xc42   :  { %12428 = vmatmul.msk.f32.gmra.mxu0 %vm5640_vm3, %v12420_v40  ;;  %12592 = vmatmul.msk.f32.gmra.mxu2 %vm5640_vm3, %v16436_v41  ;;  %v12467_v40 = vld [vmem:[#allocation9 + $0x218] sm:$0xf0] }
 0xc45   :  { %12437 = vmatmul.msk.f32.gmra.mxu1 %vm5640_vm3, %v12421_v63 }
 0xc4a   :  { %12429 = vmatmul.msk.f32.gmra.mxu0 %vm5640_vm3, %v12421_v63  ;;  %12593 = vmatmul.msk.f32.gmra.mxu2 %vm5640_vm3, %v16448_v52  ;;  %v12470_v63 = vor.u32 %v13997_v38, %v12467_v40  ;;  %v12617_v40 = vld [vmem:[#allocation9 + $0x310] sm:$0xf] }
 0xc4c   :  { %6979 = vmatpush.bf16.msrb.mxu0 %v12470_v63  ;;  %v14030_v63 = vld [vmem:[#allocation9 + $0x314] sm:$0xf0] }
 0xc4d   :  { %12438 = vmatmul.msk.f32.gmra.mxu1 %vm5640_vm3, %v12422_v8 }
 0xc50   :  { %6980 = vmatpush.bf16.msrb.mxu0 %v12462_v47  ;;  %v14028_v47 = vld [vmem:[#allocation9 + $0x304] sm:$0xf0] }
 0xc51   :  { %v12610_v13 = vor.u32 %v14028_v47, %v12609_v34  ;;  %v14029_v34 = vld [vmem:[#allocation9 + $0x314] sm:$0xf]  ;;  %v12619_v47 = vld [vmem:[#allocation9 + $0x318] sm:$0xf0] }
 0xc52   :  { %12430 = vmatmul.msk.f32.gmra.mxu0 %vm5640_vm3, %v12422_v8  ;;  %12594 = vmatmul.msk.f32.gmra.mxu2 %vm5640_vm3, %v16460_v50  ;;  %v12729_v8 = vld [vmem:[#allocation9 + $0x3f0] sm:$0xf] }
 0xc55   :  { %12447 = vmatmul.msk.f32.vlgmr.msra.gmra.mxu1 %vm5640_vm3, %v6244_v11 }
 0xc5a   :  { %12439 = vmatmul.msk.f32.vlgmr.msra.gmra.mxu0 %vm5640_vm3, %v6244_v11  ;;  %12595 = vmatmul.msk.f32.gmra.mxu2 %vm5640_vm3, %v16472_v14  ;;  %v14058_v11 = vld [vmem:[#allocation9 + $0x3f4] sm:$0xf0] }
 0xc5b   :  { %v12730_v19 = vor.u32 %v14058_v11, %v12729_v8  ;;  %7335 = vmatpush.bf16.msra.mxu0 %v12666_v61  ;;  %v12618_v8 = vor.u32 %v14030_v63, %v12617_v40  ;;  %v14057_v11 = vld [vmem:[#allocation9 + $0x3f4] sm:$0xf]  ;;  %v12667_v61 = vld [vmem:[#allocation9 + $0x378] sm:$0xf0] }
 0xc5d   :  { %12448 = vmatmul.msk.f32.gmra.mxu1 %vm5640_vm3, %v6245_v57 }
 0xc5e   :  { %7354 = vmatpush.bf16.msra.mxu1 %v12730_v19  ;;  %v12731_v19 = vld [vmem:[#allocation9 + $0x3f8] sm:$0xf0] }
 0xc5f   :  { %7336 = vmatpush.bf16.msra.mxu0 %v12658_v35  ;;  %v12734_v12 = vor.u32 %v14057_v11, %v12731_v19  ;;  %v14039_v35 = vld [vmem:[#allocation9 + $0x364] sm:$0xf]  ;;  %v12675_v11 = vld [vmem:[#allocation9 + $0x388] sm:$0xf0] }
 0xc62   :  { %12440 = vmatmul.msk.f32.gmra.mxu0 %vm5640_vm3, %v6245_v57  ;;  %12596 = vmatmul.msk.f32.gmra.mxu2 %vm5640_vm3, %v16484_v43  ;;  %v6249_v57 = vld [vmem:[%s18086_s14 + $0x28] sm:$0xff] }
 0xc63   :  { %7355 = vmatpush.bf16.msra.mxu1 %v12722_v21  ;;  %7337 = vmatpush.bf16.msra.mxu0 %v12650_v22  ;;  %v12723_v21 = vld [vmem:[#allocation9 + $0x3e8] sm:$0xf0] }
 0xc65   :  { %12449 = vmatmul.msk.f32.gmra.mxu1 %vm5640_vm3, %v6246_v3 }
 0xc67   :  { %7356 = vmatpush.bf16.msra.mxu1 %v12714_v60  ;;  %7338 = vmatpush.bf16.msra.mxu0 %v12642_v55  ;;  %v12670_v60 = vor.u32 %v14041_v23, %v12667_v61  ;;  %v12702_v55 = vor.u32 %v14049_v44, %v12699_v56 }
 0xc6a   :  { %12441 = vmatmul.msk.f32.gmra.mxu0 %vm5640_vm3, %v6246_v3  ;;  %12597 = vmatmul.msk.f32.gmra.mxu2 %vm5640_vm3, %v16496_v28  ;;  %v12706_v3 = vor.u32 %v14052_v4, %v12705_v20  ;;  %v12659_v20 = vld [vmem:[#allocation9 + $0x368] sm:$0xf0] }
 0xc6b   :  { %7339 = vmatpush.bf16.msra.mxu0 %v12634_v24 }
 0xc6c   :  { %7357 = vmatpush.bf16.msra.mxu1 %v12706_v3  ;;  %v12662_v3 = vor.u32 %v14039_v35, %v12659_v20 }
 0xc6d   :  { %12450 = vmatmul.msk.f32.gmra.mxu1 %vm5640_vm3, %v6247_v48 }
 0xc6f   :  { %7340 = vmatpush.bf16.msra.mxu0 %v12626_v30  ;;  %v12683_v30 = vld [vmem:[#allocation9 + $0x398] sm:$0xf0] }
 0xc70   :  { %7358 = vmatpush.bf16.msra.mxu1 %v12698_v37  ;;  %v12654_v37 = vor.u32 %v14037_v7, %v12651_v18 }
 0xc72   :  { %12442 = vmatmul.msk.f32.gmra.mxu0 %vm5640_vm3, %v6247_v48  ;;  %12598 = vmatmul.msk.f32.gmra.mxu2 %vm5640_vm3, %v16508_v29  ;;  %v6251_v48 = vld [vmem:[%s18086_s14 + $0x38] sm:$0xff] }
 0xc73   :  { %7341 = vmatpush.bf16.msra.mxu0 %v12618_v8  ;;  %v14043_v8 = vld [vmem:[#allocation9 + $0x384] sm:$0xf] }
 0xc74   :  { %7359 = vmatpush.bf16.msra.mxu1 %v12690_v46  ;;  %v12646_v46 = vor.u32 %v14035_v16, %v12643_v17  ;;  %v12678_v19 = vor.u32 %v14043_v8, %v12675_v11 }
 0xc75   :  { %12451 = vmatmul.msk.f32.gmra.mxu1 %vm5640_vm3, %v6248_v33 }
 0xc77   :  { %7342 = vmatpush.bf16.msra.mxu0 %v12610_v13  ;;  %v12622_v13 = vor.u32 %v14029_v34, %v12619_v47 }
 0xc78   :  { %7360 = vmatpush.bf16.msra.mxu1 %v12682_v27  ;;  %v12635_v27 = vld [vmem:[#allocation9 + $0x338] sm:$0xf0] }
 0xc79   :  { %v12638_v15 = vor.u32 %v14033_v26, %v12635_v27 }
 0xc7a   :  { %12443 = vmatmul.msk.f32.gmra.mxu0 %vm5640_vm3, %v6248_v33  ;;  %v12674_v33 = vor.u32 %v14044_v32, %v12673_v62  ;;  %v12686_v62 = vor.u32 %v14045_v6, %v12683_v30  ;;  %v14031_v32 = vld [vmem:[#allocation9 + $0x324] sm:$0xf] }
 0xc7c   :  { %7361 = vmatpush.bf16.msra.mxu1 %v12674_v33  ;;  %v12627_v33 = vld [vmem:[#allocation9 + $0x328] sm:$0xf0] }
 0xc7d   :  { %12452 = vmatmul.msk.f32.gmra.mxu1 %vm5640_vm3, %v6249_v57  ;;  %v12630_v63 = vor.u32 %v14031_v32, %v12627_v33 }
 0xc82   :  { %12444 = vmatmul.msk.f32.gmra.mxu0 %vm5640_vm3, %v6249_v57  ;;  %v14055_v57 = vld [vmem:[#allocation9 + $0x3e4] sm:$0xf] }
 0xc83   :  { %v12726_v59 = vor.u32 %v14055_v57, %v12723_v21  ;;  %v14027_v57 = vld [vmem:[#allocation9 + $0x304] sm:$0xf]  ;;  %v12611_v21 = vld [vmem:[#allocation9 + $0x308] sm:$0xf0] }
 0xc84   :  { %v12614_v23 = vor.u32 %v14027_v57, %v12611_v21 }
 0xc85   :  { %12453 = vmatmul.msk.f32.gmra.mxu1 %vm5640_vm3, %v6250_v45 }
 0xc8a   :  { %12445 = vmatmul.msk.f32.gmra.mxu0 %vm5640_vm3, %v6250_v45  ;;  %v14051_v45 = vld [vmem:[#allocation9 + $0x3c4] sm:$0xf] }
 0xc8b   :  { %v12710_v54 = vor.u32 %v14051_v45, %v12707_v9 }
 0xc8d   :  { %12454 = vmatmul.msk.f32.gmra.mxu1 %vm5640_vm3, %v6251_v48 }
 0xc92   :  { %v16532_v38 = vpop.f32.mrf.mxu1  ;;  %12446 = vmatmul.msk.f32.gmra.mxu0 %vm5640_vm3, %v6251_v48 }
 0xc95   :  { %7000 = vmatmul.bf16.vlgmr.msrb.gmra.mxu1 %v16353_v0 }
 0xc96   :  { %7392 = vmatpush.bf16.msrb.mxu1 %v12734_v12 }
 0xc97   :  { %v16536_v49 = vpop.f32.mrf.mxu0 }
 0xc9a   :  { %v16538_v51 = vpop.f32.mrf.mxu1  ;;  %6981 = vmatmul.bf16.vlgmr.msrb.gmra.mxu0 %v16351_v5  ;;  %7393 = vmatpush.bf16.msrb.mxu1 %v12726_v59 }
 0xc9b   :  { %7373 = vmatpush.bf16.msrb.mxu0 %v12670_v60 }
 0xc9e   :  { %7394 = vmatpush.bf16.msrb.mxu1 %v12718_v42 }
 0xc9f   :  { %v16541_v4 = vpop.f32.mrf.mxu0  ;;  %7374 = vmatpush.bf16.msrb.mxu0 %v12662_v3 }
 0xca2   :  { %v16543_v22 = vpop.f32.mrf.mxu1  ;;  %7395 = vmatpush.bf16.msrb.mxu1 %v12710_v54 }
 0xca3   :  { %7375 = vmatpush.bf16.msrb.mxu0 %v12654_v37 }
 0xca5   :  { %7005 = vmatmul.bf16.gmra.mxu1 %v16373_v2 }
 0xca6   :  { %7396 = vmatpush.bf16.msrb.mxu1 %v12702_v55 }
 0xca7   :  { %v16546_v48 = vpop.f32.mrf.mxu0  ;;  %7376 = vmatpush.bf16.msrb.mxu0 %v12646_v46 }
 0xcaa   :  { %v16548_v24 = vpop.f32.mrf.mxu1  ;;  %6986 = vmatmul.bf16.gmra.mxu0 %v16371_v25  ;;  %7397 = vmatpush.bf16.msrb.mxu1 %v12694_v1 }
 0xcab   :  { %7377 = vmatpush.bf16.msrb.mxu0 %v12638_v15 }
 0xcae   :  { %7398 = vmatpush.bf16.msrb.mxu1 %v12686_v62 }
 0xcaf   :  { %v16551_v40 = vpop.f32.mrf.mxu0  ;;  %7378 = vmatpush.bf16.msrb.mxu0 %v12630_v63 }
 0xcb2   :  { %v16553_v12 = vpop.f32.mrf.mxu1  ;;  %7399 = vmatpush.bf16.msrb.mxu1 %v12678_v19 }
 0xcb3   :  { %7379 = vmatpush.bf16.msrb.mxu0 %v12622_v13 }
 0xcb5   :  { %7362 = vmatmul.bf16.vlgmr.msra.gmra.mxu1 %v16353_v0 }
 0xcb7   :  { %v6583_v59 = vpop.f32.mrf.mxu0  ;;  %7380 = vmatpush.bf16.msrb.mxu0 %v12614_v23 }
 0xcba   :  { %v16556_v61 = vpop.f32.mrf.mxu1  ;;  %7343 = vmatmul.bf16.vlgmr.msra.gmra.mxu0 %v16351_v5 }
 0xcbd   :  { %v7061_v35 = vpop.f32.mrf.mxu2 }
 0xcbf   :  { %v16559_v53 = vpop.f32.mrf.mxu0 }
 0xcc2   :  { %v16561_v60 = vpop.f32.mrf.mxu1 }
 0xcc5   :  { %7367 = vmatmul.bf16.gmra.mxu1 %v16373_v2  ;;  %v16573_v9 = vpop.f32.mrf.mxu2 }
 0xcc7   :  { %v6589_v31 = vpop.f32.mrf.mxu0 }
 0xcca   :  { %v16564_v42 = vpop.f32.mrf.mxu1  ;;  %7348 = vmatmul.bf16.gmra.mxu0 %v16371_v25 }
 0xccd   :  { %v7067_v56 = vpop.f32.mrf.mxu2 }
 0xccf   :  { %v16567_v20 = vpop.f32.mrf.mxu0 }
 0xcd2   :  { %v6718_v3 = vpop.f32.mrf.mxu1 }
 0xcd3   :  { %v16570_v45 = vadd.f32 %v6718_v3, %v16532_v38 }
 0xcd5   :  { %7400 = vmatmul.bf16.vlgmr.msrb.gmra.mxu1 %v16353_v0  ;;  %v16588_v17 = vpop.f32.mrf.mxu2 }
 0xcd7   :  { %v6677_v54 = vpop.f32.mrf.mxu0 }
 0xcd8   :  { %v6678_v7 = vadd.f32 %v6677_v54, %v16536_v49 }
 0xcda   :  { %v16576_v18 = vpop.f32.mrf.mxu1  ;;  %v16578_v37 = vadd.f32 %v7061_v35, %v6678_v7  ;;  %7381 = vmatmul.bf16.vlgmr.msrb.gmra.mxu0 %v16351_v5 }
 0xcdd   :  { %v7073_v58 = vpop.f32.mrf.mxu2 }
 0xcdf   :  { %v16581_v44 = vpop.f32.mrf.mxu0 }
 0xce2   :  { %v6724_v55 = vpop.f32.mrf.mxu1 }
 0xce3   :  { %v16584_v38 = vadd.f32 %v6724_v55, %v16543_v22 }
 0xce5   :  { %7405 = vmatmul.bf16.gmra.mxu1 %v16373_v2 }
 0xce7   :  { %v6683_v0 = vpop.f32.mrf.mxu0 }
 0xce8   :  { %v6684_v16 = vadd.f32 %v6683_v0, %v16546_v48  ;;  %v16603_v48 = vpop.f32.mrf.mxu2 }
 0xcea   :  { %v16590_v49 = vpop.f32.mrf.mxu1  ;;  %v16592_v46 = vadd.f32 %v7067_v56, %v6684_v16  ;;  %7386 = vmatmul.bf16.gmra.mxu0 %v16371_v25 }
 0xcef   :  { %v16595_v5 = vpop.f32.mrf.mxu0 }
 0xcf0   :  { %v7079_v30 = vpop.f32.mrf.mxu2 }
 0xcf2   :  { %v16597_v10 = vpop.f32.mrf.mxu1 }
 0xcf7   :  { %v6689_v22 = vpop.f32.mrf.mxu0 }
 0xcf8   :  { %v6690_v1 = vadd.f32 %v6689_v22, %v6583_v59 }
 0xcfa   :  { %v16599_v26 = vpop.f32.mrf.mxu1  ;;  %v16601_v2 = vadd.f32 %v7073_v58, %v6690_v1 }
 0xcff   :  { %v16605_v27 = vpop.f32.mrf.mxu0 }
 0xd02   :  { %v16607_v6 = vpop.f32.mrf.mxu1 }
 0xd07   :  { %v6695_v15 = vpop.f32.mrf.mxu0 }
 0xd08   :  { %v6696_v25 = vadd.f32 %v6695_v15, %v6589_v31 }
 0xd0a   :  { %v16609_v62 = vpop.f32.mrf.mxu1  ;;  %v16611_v32 = vadd.f32 %v7079_v30, %v6696_v25 }
 0xd0f   :  { %v16613_v33 = vpop.f32.mrf.mxu0 }
 0xd12   :  { %v7001_v63 = vpop.f32.mrf.mxu1 }
 0xd17   :  { %v6982_v8 = vpop.f32.mrf.mxu0 }
 0xd18   :  { %v7002_v31 = vadd.f32 %v7001_v63, %v6982_v8  ;;  %v12737_v8 = vld [vmem:[%s18086_s14 + $0xd0] sm:$0xff] }
 0xd1a   :  { %v7003_v11 = vpop.f32.mrf.mxu1 }
 0xd1f   :  { %v6984_v19 = vpop.f32.mrf.mxu0 }
 0xd20   :  { %v7004_v35 = vadd.f32 %v7003_v11, %v6984_v19 }
 0xd22   :  { %v7006_v34 = vpop.f32.mrf.mxu1 }
 0xd27   :  { %v6987_v47 = vpop.f32.mrf.mxu0 }
 0xd28   :  { %v7007_v59 = vadd.f32 %v7006_v34, %v6987_v47 }
 0xd2a   :  { %v7008_v13 = vpop.f32.mrf.mxu1 }
 0xd2f   :  { %v6989_v57 = vpop.f32.mrf.mxu0 }
 0xd30   :  { %v7009_v21 = vadd.f32 %v7008_v13, %v6989_v57 }
 0xd32   :  { %v7363_v23 = vpop.f32.mrf.mxu1  ;;  %7097 = vmatpush.msra.mxu3 %v7009_v21  ;;  %v12741_v21 = vld [vmem:[%s18086_s14 + $0xf0] sm:$0xff] }
 0xd34   :  { %7098 = vmatpush.msra.mxu3 %v7007_v59  ;;  %v12742_v59 = vld [vmem:[%s18086_s14 + $0xf8] sm:$0xff] }
 0xd36   :  { %7099 = vmatpush.msra.mxu3 %v7004_v35 }
 0xd37   :  { %v7344_v3 = vpop.f32.mrf.mxu0 }
 0xd38   :  { %7100 = vmatpush.msra.mxu3 %v7002_v31  ;;  %v7364_v15 = vadd.f32 %v7363_v23, %v7344_v3 }
 0xd39   :  { %12599 = vmatmul.msk.f32.vlgmr.msra.gmra.mxu3 %vm5640_vm3, %v16424_v39 }
 0xd3a   :  { %v7365_v54 = vpop.f32.mrf.mxu1 }
 0xd3f   :  { %v7346_v7 = vpop.f32.mrf.mxu0 }
 0xd40   :  { %v7366_v39 = vadd.f32 %v7365_v54, %v7346_v7  ;;  %v7082_v7 = vpop.f32.mrf.mxu2 }
 0xd41   :  { %12600 = vmatmul.msk.f32.gmra.mxu3 %vm5640_vm3, %v16436_v41  ;;  %v12735_v41 = vld [vmem:[%s18086_s14 + $0xc0] sm:$0xff] }
 0xd42   :  { %v7368_v56 = vpop.f32.mrf.mxu1 }
 0xd47   :  { %v7349_v55 = vpop.f32.mrf.mxu0 }
 0xd48   :  { %v7369_v22 = vadd.f32 %v7368_v56, %v7349_v55  ;;  %v6731_v55 = vadd.f32 %v16597_v10, %v16553_v12 }
 0xd49   :  { %12601 = vmatmul.msk.f32.gmra.mxu3 %vm5640_vm3, %v16448_v52 }
 0xd4a   :  { %v7370_v0 = vpop.f32.mrf.mxu1 }
 0xd4f   :  { %v7351_v16 = vpop.f32.mrf.mxu0 }
 0xd50   :  { %v7371_v58 = vadd.f32 %v7370_v0, %v7351_v16 }
 0xd51   :  { %12602 = vmatmul.msk.f32.gmra.mxu3 %vm5640_vm3, %v16460_v50  ;;  %v12736_v50 = vld [vmem:[%s18086_s14 + $0xc8] sm:$0xff] }
 0xd52   :  { %v7401_v1 = vpop.f32.mrf.mxu1  ;;  %7456 = vmatpush.msrb.mxu2 %v7371_v58 }
 0xd54   :  { %7457 = vmatpush.msrb.mxu2 %v7369_v22 }
 0xd56   :  { %7458 = vmatpush.msrb.mxu2 %v7366_v39 }
 0xd57   :  { %v7382_v30 = vpop.f32.mrf.mxu0 }
 0xd58   :  { %7459 = vmatpush.msrb.mxu2 %v7364_v15  ;;  %v7402_v57 = vadd.f32 %v7401_v1, %v7382_v30 }
 0xd59   :  { %12603 = vmatmul.msk.f32.gmra.mxu3 %vm5640_vm3, %v16472_v14  ;;  %12743 = vmatmul.msk.f32.vlgmr.msrb.gmra.mxu2 %vm5640_vm3, %v12735_v41  ;;  %v12738_v14 = vld [vmem:[%s18086_s14 + $0xd8] sm:$0xff] }
 0xd5a   :  { %v7403_v52 = vpop.f32.mrf.mxu1 }
 0xd5f   :  { %v7384_v25 = vpop.f32.mrf.mxu0 }
 0xd60   :  { %v7404_v13 = vadd.f32 %v7403_v52, %v7384_v25 }
 0xd61   :  { %12604 = vmatmul.msk.f32.gmra.mxu3 %vm5640_vm3, %v16484_v43  ;;  %12744 = vmatmul.msk.f32.gmra.mxu2 %vm5640_vm3, %v12736_v50 }
 0xd62   :  { %v7406_v63 = vpop.f32.mrf.mxu1 }
 0xd67   :  { %v7387_v11 = vpop.f32.mrf.mxu0 }
 0xd68   :  { %v7407_v47 = vadd.f32 %v7406_v63, %v7387_v11  ;;  %v6699_v11 = vadd.f32 %v16613_v33, %v16567_v20 }
 0xd69   :  { %12605 = vmatmul.msk.f32.gmra.mxu3 %vm5640_vm3, %v16496_v28  ;;  %12745 = vmatmul.msk.f32.gmra.mxu2 %vm5640_vm3, %v12737_v8  ;;  %v12739_v28 = vld [vmem:[%s18086_s14 + $0xe0] sm:$0xff] }
 0xd6a   :  { %v7408_v19 = vpop.f32.mrf.mxu1 }
 0xd6f   :  { %v7389_v34 = vpop.f32.mrf.mxu0 }
 0xd70   :  { %v7409_v43 = vadd.f32 %v7408_v19, %v7389_v34 }
 0xd71   :  { %12606 = vmatmul.msk.f32.gmra.mxu3 %vm5640_vm3, %v16508_v29  ;;  %12746 = vmatmul.msk.f32.gmra.mxu2 %vm5640_vm3, %v12738_v14  ;;  %v12740_v29 = vld [vmem:[%s18086_s14 + $0xe8] sm:$0xff] }
 0xd72   :  { %7497 = vmatpush.msrb.mxu3 %v7409_v43  ;;  %v6687_v43 = vadd.f32 %v16595_v5, %v16551_v40 }
 0xd74   :  { %7498 = vmatpush.msrb.mxu3 %v7407_v47 }
 0xd76   :  { %7499 = vmatpush.msrb.mxu3 %v7404_v13 }
 0xd78   :  { %7500 = vmatpush.msrb.mxu3 %v7402_v57 }
 0xd79   :  { %12747 = vmatmul.msk.f32.gmra.mxu2 %vm5640_vm3, %v12739_v28  ;;  %12751 = vmatmul.msk.f32.vlgmr.msrb.gmra.mxu3 %vm5640_vm3, %v12735_v41 }
 0xd81   :  { %12748 = vmatmul.msk.f32.gmra.mxu2 %vm5640_vm3, %v12740_v29  ;;  %12752 = vmatmul.msk.f32.gmra.mxu3 %vm5640_vm3, %v12736_v50 }
 0xd89   :  { %12749 = vmatmul.msk.f32.gmra.mxu2 %vm5640_vm3, %v12741_v21  ;;  %12753 = vmatmul.msk.f32.gmra.mxu3 %vm5640_vm3, %v12737_v8 }
 0xd91   :  { %12750 = vmatmul.msk.f32.gmra.mxu2 %vm5640_vm3, %v12742_v59  ;;  %12754 = vmatmul.msk.f32.gmra.mxu3 %vm5640_vm3, %v12738_v14 }
 0xd99   :  { %12755 = vmatmul.msk.f32.gmra.mxu3 %vm5640_vm3, %v12739_v28 }
 0xda1   :  { %12756 = vmatmul.msk.f32.gmra.mxu3 %vm5640_vm3, %v12740_v29 }
 0xda9   :  { %12757 = vmatmul.msk.f32.gmra.mxu3 %vm5640_vm3, %v12741_v21 }
 0xdb1   :  { %12758 = vmatmul.msk.f32.gmra.mxu3 %vm5640_vm3, %v12742_v59  ;;  %v6740_v59 = vadd.f32 %v16609_v62, %v16564_v42  ;;  %v16768_v42 = vld [vmem:[#allocation13 + $0xf8] sm:$0xff]  ;;  %v16772_v62 = vld [vmem:[#allocation13 + $0xe0] sm:$0xff] }
 0xdbc   :  { %v7102_v23 = vpop.f32.mrf.mxu3 }
 0xdbd   :  { %v7127_v35 = vadd.f32 %v7102_v23, %v16570_v45 }
 0xdc4   :  { %v16672_v31 = vpop.f32.mrf.mxu3 }
 0xdcc   :  { %v7108_v3 = vpop.f32.mrf.mxu3 }
 0xdcd   :  { %v16675_v54 = vadd.f32 %v7108_v3, %v16584_v38  ;;  %v6737_v38 = vadd.f32 %v16607_v6, %v16561_v60  ;;  %v6693_v60 = vadd.f32 %v16605_v27, %v16559_v53  ;;  %v7140_v6 = vadd.f32 %v7082_v7, %v6699_v11  ;;  %v16819_v11 = vld [vmem:[#allocation13 + $0xb8] sm:$0xff] }
 0xdce   :  { %v6681_v53 = vadd.f32 %v16581_v44, %v16541_v4  ;;  %v7132_v27 = vadd.f32 %v16588_v17, %v6687_v43  ;;  %v6734_v7 = vadd.f32 %v16599_v26, %v16556_v61 }
 0xdcf   :  { %v7136_v47 = vadd.f32 %v16603_v48, %v6693_v60  ;;  %v16830_v60 = vld [vmem:[#allocation13 + $0xa0] sm:$0xff] }
 0xdd0   :  { %v7128_v48 = vadd.f32 %v16573_v9, %v6681_v53  ;;  %v16862_v53 = vld [vmem:[#allocation13 + $0x88] sm:$0xff] }
 0xdd4   :  { %v16677_v56 = vpop.f32.mrf.mxu3 }
 0xddc   :  { %v7114_v0 = vpop.f32.mrf.mxu3  ;;  %v7461_v16 = vpop.f32.mrf.mxu2 }
 0xddd   :  { %v16681_v58 = vadd.f32 %v7114_v0, %v6731_v55  ;;  %v16684_v22 = vadd.f32 %v7461_v16, %v16578_v37  ;;  %v16764_v0 = vld [vmem:[#allocation13 + $0xf0] sm:$0xff] }
 0xdde   :  { %v16766_v16 = vld [vmem:[#allocation13 + $0x1f0] sm:$0xff]  ;;  %7706 = vmatpush.msra.mxu2 %v16764_v0 }
 0xddf   :  { %v7650_v23 = vmul.f32 %v16684_v22, %v16684_v22  ;;  %7726 = vmatpush.msra.mxu3 %v16766_v16 }
 0xde0   :  { %7707 = vmatpush.msra.mxu2 %v16772_v62 }
 0xde4   :  { %v16686_v45 = vpop.f32.mrf.mxu3  ;;  %v7464_v1 = vpop.f32.mrf.mxu2 }
 0xde5   :  { %v16733_v4 = vadd.f32 %v7464_v1, %v7128_v48  ;;  %v16774_v1 = vld [vmem:[#allocation13 + $0x1e0] sm:$0xff]  ;;  %v7137_v61 = vadd.f32 %v16686_v45, %v6734_v7  ;;  %v6728_v45 = vadd.f32 %v16590_v49, %v16548_v24  ;;  %v16815_v49 = vld [vmem:[#allocation13 + $0xb0] sm:$0xff]  ;;  %v16876_v48 = vld [vmem:[#allocation13 + $0x78] sm:$0xff] }
 0xde6   :  { %7727 = vmatpush.msra.mxu3 %v16774_v1  ;;  %v16915_v7 = vld [vmem:[#allocation13 + $0x30] sm:$0xff] }
 0xde7   :  { %v7652_v21 = vmul.f32 %v16733_v4, %v16733_v4 }
 0xdec   :  { %v7120_v39 = vpop.f32.mrf.mxu3  ;;  %v7467_v15 = vpop.f32.mrf.mxu2 }
 0xded   :  { %v16690_v41 = vadd.f32 %v7120_v39, %v6737_v38  ;;  %v16782_v38 = vld [vmem:[#allocation13 + $0xe8] sm:$0xff]  ;;  %v16786_v39 = vld [vmem:[#allocation13 + $0xd0] sm:$0xff] }
 0xdee   :  { %7708 = vmatpush.msra.mxu2 %v16786_v39 }
 0xdf4   :  { %v7123_v30 = vpop.f32.mrf.mxu3  ;;  %v7470_v52 = vpop.f32.mrf.mxu2 }
 0xdf5   :  { %v16725_v5 = vadd.f32 %v7470_v52, %v7132_v27  ;;  %v16800_v52 = vld [vmem:[#allocation13 + $0xc0] sm:$0xff]  ;;  %v16870_v27 = vld [vmem:[#allocation13 + $0x70] sm:$0xff] }
 0xdf6   :  { %7709 = vmatpush.msra.mxu2 %v16800_v52 }
 0xdf7   :  { %v7656_v28 = vmul.f32 %v16725_v5, %v16725_v5 }
 0xdf8   :  { %7710 = vmatpush.msra.mxu2 %v16815_v49 }
 0xdfa   :  { %7711 = vmatpush.msra.mxu2 %v16830_v60 }
 0xdfc   :  { %v7473_v12 = vpop.f32.mrf.mxu2  ;;  %v7502_v10 = vpop.f32.mrf.mxu3 }
 0xdfd   :  { %v16692_v50 = vadd.f32 %v7502_v10, %v7127_v35  ;;  %v16720_v33 = vadd.f32 %v7473_v12, %v16601_v2  ;;  %v7141_v35 = vadd.f32 %v7123_v30, %v6740_v59  ;;  %v16790_v30 = vld [vmem:[#allocation13 + $0xd8] sm:$0xff]  ;;  %v16802_v12 = vld [vmem:[#allocation13 + $0x1c0] sm:$0xff]  ;;  %v16804_v10 = vld [vmem:[#allocation13 + $0xc8] sm:$0xff] }
 0xdfe   :  { %v16904_v59 = vld [vmem:[#allocation13 + $0x40] sm:$0xff] }
 0xdff   :  { %v7658_v2 = vmul.f32 %v16720_v33, %v16720_v33 }
 0xe04   :  { %v7476_v25 = vpop.f32.mrf.mxu2  ;;  %v16694_v63 = vpop.f32.mrf.mxu3 }
 0xe05   :  { %v16713_v20 = vadd.f32 %v7476_v25, %v7136_v47  ;;  %v7133_v25 = vadd.f32 %v16677_v56, %v6728_v45  ;;  %v6722_v56 = vadd.f32 %v16576_v18, %v16538_v51  ;;  %v16845_v18 = vld [vmem:[#allocation13 + $0x90] sm:$0xff]  ;;  %v16849_v47 = vld [vmem:[#allocation13 + $0x98] sm:$0xff] }
 0xe06   :  { %7712 = vmatpush.msra.mxu2 %v16845_v18  ;;  %v16921_v45 = vld [vmem:[#allocation13 + $0x38] sm:$0xff] }
 0xe07   :  { %v7129_v43 = vadd.f32 %v16672_v31, %v6722_v56  ;;  %v16926_v56 = vld [vmem:[#allocation13 + $0x20] sm:$0xff] }
 0xe09   :  { %v16852_v31 = vadd.f32 %v16694_v63, %v7129_v43  ;;  %v16928_v43 = vld [vmem:[#allocation13 + $0x120] sm:$0xff] }
 0xe0c   :  { %v7479_v37 = vpop.f32.mrf.mxu2  ;;  %v16696_v8 = vpop.f32.mrf.mxu3 }
 0xe0d   :  { %v16710_v13 = vadd.f32 %v7479_v37, %v16611_v32  ;;  %v16730_v32 = vadd.f32 %v7467_v15, %v16592_v46  ;;  %v7660_v46 = vmul.f32 %v16713_v20, %v16713_v20  ;;  %v16788_v15 = vld [vmem:[#allocation13 + $0x1d0] sm:$0xff]  ;;  %v16839_v51 = vadd.f32 %v16696_v8, %v16675_v54  ;;  %v16858_v54 = vld [vmem:[#allocation13 + $0x80] sm:$0xff] }
 0xe0e   :  { %7728 = vmatpush.msra.mxu3 %v16788_v15  ;;  %v16817_v37 = vld [vmem:[#allocation13 + $0x1b0] sm:$0xff]  ;;  %v16860_v8 = vld [vmem:[#allocation13 + $0x180] sm:$0xff]  ;;  %7713 = vmatpush.msra.mxu2 %v16858_v54 }
 0xe0f   :  { %18131 = vst [vmem:[#allocation21_spill] sm:$0xff] %v16710_v13  ;;  %v7662_v9 = vmul.f32 %v16710_v13, %v16710_v13  ;;  %v7654_v29 = vmul.f32 %v16730_v32, %v16730_v32 }
 0xe10   :  { %7729 = vmatpush.msra.mxu3 %v16802_v12  ;;  %7714 = vmatpush.msra.mxu2 %v16870_v27 }
 0xe12   :  { %7730 = vmatpush.msra.mxu3 %v16817_v37 }
 0xe14   :  { %v7482_v14 = vpop.f32.mrf.mxu2  ;;  %v16702_v19 = vpop.f32.mrf.mxu3 }
 0xe15   :  { %v16704_v34 = vadd.f32 %v7482_v14, %v7140_v6  ;;  %v16832_v6 = vld [vmem:[#allocation13 + $0x1a0] sm:$0xff]  ;;  %v16834_v14 = vld [vmem:[#allocation13 + $0xa8] sm:$0xff] }
 0xe16   :  { %7731 = vmatpush.msra.mxu3 %v16832_v6 }
 0xe17   :  { %18130 = vst [vmem:[#allocation20_spill] sm:$0xff] %v16704_v34  ;;  %7618 = vmatpush.msra.mxu0 %v16704_v34  ;;  %v7664_v44 = vmul.f32 %v16704_v34, %v16704_v34  ;;  %v16957_v34 = vld [vmem:[#allocation13 + $0x8] sm:$0xff] }
 0xe19   :  { %7619 = vmatpush.msra.mxu0 %v16710_v13  ;;  %v16961_v13 = vld [vmem:[#allocation13 + $0x1e8] sm:$0xff] }
 0xe1b   :  { %7620 = vmatpush.msra.mxu0 %v16713_v20 }
 0xe1c   :  { %v16723_v40 = vpop.f32.mrf.mxu3 }
 0xe1d   :  { %7621 = vmatpush.msra.mxu0 %v16720_v33  ;;  %v16809_v24 = vadd.f32 %v16723_v40, %v16681_v58  ;;  %v16824_v58 = vadd.f32 %v16702_v19, %v7133_v25  ;;  %v16847_v19 = vld [vmem:[#allocation13 + $0x190] sm:$0xff]  ;;  %v7655_v25 = vmul.f32 %v16839_v51, %v16839_v51 }
 0xe1e   :  { %7732 = vmatpush.msra.mxu3 %v16847_v19  ;;  %v16872_v40 = vld [vmem:[#allocation13 + $0x170] sm:$0xff] }
 0xe1f   :  { %7622 = vmatpush.msra.mxu0 %v16725_v5 }
 0xe20   :  { %7733 = vmatpush.msra.mxu3 %v16860_v8 }
 0xe21   :  { %7623 = vmatpush.msra.mxu0 %v16730_v32 }
 0xe22   :  { %7734 = vmatpush.msra.mxu3 %v16872_v40 }
 0xe23   :  { %7624 = vmatpush.msra.mxu0 %v16733_v4 }
 0xe24   :  { %v7517_v17 = vpop.f32.mrf.mxu3 }
 0xe25   :  { %7625 = vmatpush.msra.mxu0 %v16684_v22 }
 0xe26   :  { %12759 = vmatmul.msk.f32.vlgmr.msra.gmra.mxu0 %vm7607_vm11, %v18101_v36 }
 0xe27   :  { %7674 = vmatpush.msrb.mxu0 %v7664_v44 }
 0xe29   :  { %7675 = vmatpush.msrb.mxu0 %v7662_v9  ;;  %v16883_v9 = vld [vmem:[#allocation13 + $0x160] sm:$0xff] }
 0xe2a   :  { %7735 = vmatpush.msra.mxu3 %v16883_v9 }
 0xe2b   :  { %7676 = vmatpush.msrb.mxu0 %v7660_v46  ;;  %v16888_v46 = vld [vmem:[#allocation13 + $0x68] sm:$0xff] }
 0xe2c   :  { %v7520_v57 = vpop.f32.mrf.mxu3 }
 0xe2d   :  { %7677 = vmatpush.msrb.mxu0 %v7658_v2  ;;  %v16778_v26 = vadd.f32 %v7520_v57, %v16690_v41  ;;  %v16794_v41 = vadd.f32 %v7517_v17, %v7137_v61  ;;  %v16881_v17 = vld [vmem:[#allocation13 + $0x60] sm:$0xff]  ;;  %v16893_v57 = vld [vmem:[#allocation13 + $0x50] sm:$0xff] }
 0xe2e   :  { %7715 = vmatpush.msra.mxu2 %v16881_v17  ;;  %v16917_v61 = vld [vmem:[#allocation13 + $0x130] sm:$0xff] }
 0xe2f   :  { %7678 = vmatpush.msrb.mxu0 %v7656_v28  ;;  %18133 = vst [vmem:[#allocation23_spill] sm:$0xff] %v16778_v26  ;;  %v7663_v44 = vmul.f32 %v16778_v26, %v16778_v26  ;;  %v7661_v2 = vmul.f32 %v16794_v41, %v16794_v41  ;;  %v16895_v28 = vld [vmem:[#allocation13 + $0x150] sm:$0xff] }
 0xe30   :  { %18134 = vst [vmem:[#allocation24_spill] sm:$0xff] %v16794_v41  ;;  %7716 = vmatpush.msra.mxu2 %v16893_v57  ;;  %7736 = vmatpush.msra.mxu3 %v16895_v28 }
 0xe31   :  { %7679 = vmatpush.msrb.mxu0 %v7654_v29  ;;  %v16899_v29 = vld [vmem:[#allocation13 + $0x58] sm:$0xff] }
 0xe32   :  { %7717 = vmatpush.msra.mxu2 %v16904_v59 }
 0xe33   :  { %7680 = vmatpush.msrb.mxu0 %v7652_v21  ;;  %v7659_v21 = vmul.f32 %v16809_v24, %v16809_v24 }
 0xe34   :  { %v7523_v3 = vpop.f32.mrf.mxu3  ;;  %7718 = vmatpush.msra.mxu2 %v16915_v7 }
 0xe35   :  { %7681 = vmatpush.msrb.mxu0 %v7650_v23  ;;  %v16760_v55 = vadd.f32 %v7523_v3, %v7141_v35  ;;  %v16906_v23 = vld [vmem:[#allocation13 + $0x140] sm:$0xff]  ;;  %v16910_v35 = vld [vmem:[#allocation13 + $0x48] sm:$0xff]  ;;  %v7657_v3 = vmul.f32 %v16824_v58, %v16824_v58 }
 0xe36   :  { %12761 = vmatmul.msk.f32.vlgmr.msrb.gmra.mxu0 %vm7607_vm11, %v18101_v36  ;;  %7737 = vmatpush.msra.mxu3 %v16906_v23 }
 0xe37   :  { %18132 = vst [vmem:[#allocation22_spill] sm:$0xff] %v16760_v55  ;;  %7638 = vmatpush.msra.mxu1 %v16760_v55  ;;  %7746 = vmatpush.msra.mxu0 %v16768_v42  ;;  %v7665_v63 = vmul.f32 %v16760_v55, %v16760_v55  ;;  %v16950_v55 = vld [vmem:[#allocation13 + $0x1f8] sm:$0xff] }
 0xe38   :  { %7738 = vmatpush.msra.mxu3 %v16917_v61  ;;  %7719 = vmatpush.msra.mxu2 %v16926_v56 }
 0xe39   :  { %7639 = vmatpush.msra.mxu1 %v16778_v26  ;;  %7747 = vmatpush.msra.mxu0 %v16782_v38  ;;  %v16954_v26 = vld [vmem:[#allocation13 + $0x100] sm:$0xff] }
 0xe3a   :  { %7739 = vmatpush.msra.mxu3 %v16928_v43 }
 0xe3b   :  { %7640 = vmatpush.msra.mxu1 %v16794_v41  ;;  %7748 = vmatpush.msra.mxu0 %v16790_v30  ;;  %v16966_v41 = vld [vmem:[#allocation13 + $0x1d8] sm:$0xff] }
 0xe3d   :  { %7641 = vmatpush.msra.mxu1 %v16809_v24  ;;  %7749 = vmatpush.msra.mxu0 %v16804_v10 }
 0xe3f   :  { %7642 = vmatpush.msra.mxu1 %v16824_v58  ;;  %7750 = vmatpush.msra.mxu0 %v16819_v11 }
 0xe41   :  { %7643 = vmatpush.msra.mxu1 %v16839_v51  ;;  %7751 = vmatpush.msra.mxu0 %v16834_v14 }
 0xe43   :  { %7644 = vmatpush.msra.mxu1 %v16852_v31  ;;  %7752 = vmatpush.msra.mxu0 %v16849_v47 }
 0xe45   :  { %7645 = vmatpush.msra.mxu1 %v16692_v50  ;;  %7753 = vmatpush.msra.mxu0 %v16862_v53 }
 0xe46   :  { %12760 = vmatmul.msk.f32.vlgmr.msra.gmra.mxu1 %vm7607_vm11, %v18101_v36  ;;  %v7651_v36 = vmul.f32 %v16692_v50, %v16692_v50 }
 0xe47   :  { %7694 = vmatpush.msrb.mxu1 %v7665_v63  ;;  %7754 = vmatpush.msra.mxu0 %v16876_v48  ;;  %v16932_v63 = vld [vmem:[#allocation13 + $0x28] sm:$0xff] }
 0xe49   :  { %7695 = vmatpush.msrb.mxu1 %v7663_v44  ;;  %7755 = vmatpush.msra.mxu0 %v16888_v46  ;;  %v7653_v44 = vmul.f32 %v16852_v31, %v16852_v31 }
 0xe4b   :  { %7696 = vmatpush.msrb.mxu1 %v7661_v2  ;;  %7756 = vmatpush.msra.mxu0 %v16899_v29  ;;  %v16937_v2 = vld [vmem:[#allocation13 + $0x10] sm:$0xff] }
 0xe4c   :  { %7720 = vmatpush.msra.mxu2 %v16937_v2 }
 0xe4d   :  { %7697 = vmatpush.msrb.mxu1 %v7659_v21  ;;  %7757 = vmatpush.msra.mxu0 %v16910_v35  ;;  %v16939_v21 = vld [vmem:[#allocation13 + $0x110] sm:$0xff] }
 0xe4e   :  { %7740 = vmatpush.msra.mxu3 %v16939_v21 }
 0xe4f   :  { %7698 = vmatpush.msrb.mxu1 %v7657_v3  ;;  %7758 = vmatpush.msra.mxu0 %v16921_v45  ;;  %v16943_v3 = vld [vmem:[#allocation13 + $0x18] sm:$0xff] }
 0xe50   :  { %7741 = vmatpush.msra.mxu3 %v16954_v26 }
 0xe51   :  { %7699 = vmatpush.msrb.mxu1 %v7655_v25  ;;  %7759 = vmatpush.msra.mxu0 %v16932_v63  ;;  %v16948_v25 = vld [vmem:[#allocation13] sm:$0xff] }
 0xe52   :  { %7721 = vmatpush.msra.mxu2 %v16948_v25  ;;  %7808 = vmatpush.msrb.mxu3 %v16766_v16  ;;  %v16990_v16 = vld [vmem:[#allocation13 + $0x198] sm:$0xff] }
 0xe53   :  { %7700 = vmatpush.msrb.mxu1 %v7653_v44  ;;  %7760 = vmatpush.msra.mxu0 %v16943_v3  ;;  %v18135_v44 = vmov 1.0  }
 0xe54   :  { %7788 = vmatpush.msrb.mxu2 %v16764_v0  ;;  %7809 = vmatpush.msrb.mxu3 %v16774_v1  ;;  %v16984_v0 = vld [vmem:[#allocation13 + $0x1a8] sm:$0xff] }
 0xe55   :  { %7701 = vmatpush.msrb.mxu1 %v7651_v36  ;;  %7761 = vmatpush.msra.mxu0 %v16957_v34  ;;  %v16972_v36 = vld [vmem:[#allocation13 + $0x1c8] sm:$0xff] }
 0xe56   :  { %12762 = vmatmul.msk.f32.vlgmr.msrb.gmra.mxu1 %vm7607_vm11, %v18135_v44  ;;  %7789 = vmatpush.msrb.mxu2 %v16772_v62  ;;  %v16978_v44 = vld [vmem:[#allocation13 + $0x1b8] sm:$0xff]  ;;  %v7588_v1 = vld [vmem:[#allocation13 + $0x168] sm:$0xff] }
 0xe57   :  { %7766 = vmatpush.msra.mxu1 %v16950_v55  ;;  %7828 = vmatpush.msrb.mxu0 %v16768_v42  ;;  %v7592_v42 = vld [vmem:[#allocation13 + $0x188] sm:$0xff]  ;;  %v7590_v62 = vld [vmem:[#allocation13 + $0x178] sm:$0xff] }
 0xe58   :  { %7790 = vmatpush.msrb.mxu2 %v16786_v39  ;;  %7810 = vmatpush.msrb.mxu3 %v16788_v15  ;;  %v7584_v39 = vld [vmem:[#allocation13 + $0x148] sm:$0xff]  ;;  %v7582_v15 = vld [vmem:[#allocation13 + $0x138] sm:$0xff] }
 0xe59   :  { %7767 = vmatpush.msra.mxu1 %v16961_v13  ;;  %7829 = vmatpush.msrb.mxu0 %v16782_v38  ;;  %v7586_v38 = vld [vmem:[#allocation13 + $0x158] sm:$0xff] }
 0xe5a   :  { %7791 = vmatpush.msrb.mxu2 %v16800_v52  ;;  %7811 = vmatpush.msrb.mxu3 %v16802_v12  ;;  %v7578_v52 = vld [vmem:[#allocation13 + $0x118] sm:$0xff]  ;;  %v7576_v12 = vld [vmem:[#allocation13 + $0x108] sm:$0xff] }
 0xe5b   :  { %7768 = vmatpush.msra.mxu1 %v16966_v41  ;;  %7830 = vmatpush.msrb.mxu0 %v16790_v30  ;;  %v7580_v30 = vld [vmem:[#allocation13 + $0x128] sm:$0xff] }
 0xe5c   :  { %7792 = vmatpush.msrb.mxu2 %v16815_v49  ;;  %7812 = vmatpush.msrb.mxu3 %v16817_v37  ;;  %v12821_v49 = vld [vmem:[#allocation12 + $0x70] sm:$0xf]  ;;  %v14074_v37 = vld [vmem:[#allocation12 + $0x74] sm:$0xf0] }
 0xe5d   :  { %7769 = vmatpush.msra.mxu1 %v16972_v36  ;;  %7831 = vmatpush.msrb.mxu0 %v16804_v10 }
 0xe5e   :  { %7793 = vmatpush.msrb.mxu2 %v16830_v60  ;;  %7813 = vmatpush.msrb.mxu3 %v16832_v6  ;;  %v12822_v60 = vor.u32 %v14074_v37, %v12821_v49  ;;  %v14090_v6 = vld [vmem:[#allocation12 + $0xf4] sm:$0xf0]  ;;  %v14067_v37 = vld [vmem:[#allocation12 + $0x44] sm:$0xf] }
 0xe5f   :  { %7770 = vmatpush.msra.mxu1 %v16978_v44  ;;  %7832 = vmatpush.msrb.mxu0 %v16819_v11  ;;  %v12885_v11 = vld [vmem:[#allocation12 + $0xf0] sm:$0xf] }
 0xe60   :  { %7794 = vmatpush.msrb.mxu2 %v16845_v18  ;;  %7814 = vmatpush.msrb.mxu3 %v16847_v19  ;;  %v12823_v18 = vld [vmem:[#allocation12 + $0x78] sm:$0xf0]  ;;  %v12886_v19 = vor.u32 %v14090_v6, %v12885_v11  ;;  %v12799_v11 = vld [vmem:[#allocation12 + $0x48] sm:$0xf0] }
 0xe61   :  { %7771 = vmatpush.msra.mxu1 %v16984_v0  ;;  %7833 = vmatpush.msrb.mxu0 %v16834_v14  ;;  %v14073_v14 = vld [vmem:[#allocation12 + $0x74] sm:$0xf] }
 0xe62   :  { %7795 = vmatpush.msrb.mxu2 %v16858_v54  ;;  %7815 = vmatpush.msrb.mxu3 %v16860_v8  ;;  %v14089_v54 = vld [vmem:[#allocation12 + $0xf4] sm:$0xf]  ;;  %v12887_v8 = vld [vmem:[#allocation12 + $0xf8] sm:$0xf0] }
 0xe63   :  { %7772 = vmatpush.msra.mxu1 %v16990_v16  ;;  %7834 = vmatpush.msrb.mxu0 %v16849_v47  ;;  %v12826_v47 = vor.u32 %v14073_v14, %v12823_v18  ;;  %v12802_v14 = vor.u32 %v14067_v37, %v12799_v11  ;;  %v12863_v18 = vld [vmem:[#allocation12 + $0xc8] sm:$0xf0] }
 0xe64   :  { %7796 = vmatpush.msrb.mxu2 %v16870_v27  ;;  %7816 = vmatpush.msrb.mxu3 %v16872_v40  ;;  %v12890_v27 = vor.u32 %v14089_v54, %v12887_v8  ;;  %v12789_v54 = vld [vmem:[#allocation12 + $0x30] sm:$0xf]  ;;  %v14066_v8 = vld [vmem:[#allocation12 + $0x34] sm:$0xf0] }
 0xe65   :  { %7773 = vmatpush.msra.mxu1 %v7592_v42  ;;  %7835 = vmatpush.msrb.mxu0 %v16862_v53 }
 0xe66   :  { %7797 = vmatpush.msrb.mxu2 %v16881_v17  ;;  %7817 = vmatpush.msrb.mxu3 %v16883_v9  ;;  %v14072_v17 = vld [vmem:[#allocation12 + $0x64] sm:$0xf0]  ;;  %v12877_v9 = vld [vmem:[#allocation12 + $0xe0] sm:$0xf] }
 0xe67   :  { %7774 = vmatpush.msra.mxu1 %v7590_v62  ;;  %7836 = vmatpush.msrb.mxu0 %v16876_v48  ;;  %v12813_v48 = vld [vmem:[#allocation12 + $0x60] sm:$0xf] }
 0xe68   :  { %7798 = vmatpush.msrb.mxu2 %v16893_v57  ;;  %7818 = vmatpush.msrb.mxu3 %v16895_v28  ;;  %v14088_v57 = vld [vmem:[#allocation12 + $0xe4] sm:$0xf0]  ;;  %v14071_v28 = vld [vmem:[#allocation12 + $0x64] sm:$0xf] }
 0xe69   :  { %7775 = vmatpush.msra.mxu1 %v7588_v1  ;;  %7837 = vmatpush.msrb.mxu0 %v16888_v46  ;;  %v12814_v46 = vor.u32 %v14072_v17, %v12813_v48  ;;  %v12790_v48 = vor.u32 %v14066_v8, %v12789_v54  ;;  %v14082_v17 = vld [vmem:[#allocation12 + $0xb4] sm:$0xf0]  ;;  %v14059_v54 = vld [vmem:[#allocation12 + $0x4] sm:$0xf]  ;;  %v12767_v8 = vld [vmem:[#allocation12 + $0x8] sm:$0xf0] }
 0xe6a   :  { %7799 = vmatpush.msrb.mxu2 %v16904_v59  ;;  %7819 = vmatpush.msrb.mxu3 %v16906_v23  ;;  %v12878_v59 = vor.u32 %v14088_v57, %v12877_v9  ;;  %v12815_v23 = vld [vmem:[#allocation12 + $0x68] sm:$0xf0]  ;;  %v14065_v9 = vld [vmem:[#allocation12 + $0x34] sm:$0xf] }
 0xe6b   :  { %7776 = vmatpush.msra.mxu1 %v7586_v38  ;;  %7838 = vmatpush.msrb.mxu0 %v16899_v29 }
 0xe6c   :  { %7800 = vmatpush.msrb.mxu2 %v16915_v7  ;;  %7820 = vmatpush.msrb.mxu3 %v16917_v61  ;;  %v12818_v61 = vor.u32 %v14071_v28, %v12815_v23  ;;  %v12791_v28 = vld [vmem:[#allocation12 + $0x38] sm:$0xf0] }
 0xe6d   :  { %7777 = vmatpush.msra.mxu1 %v7584_v39  ;;  %7839 = vmatpush.msrb.mxu0 %v16910_v35  ;;  %v14087_v35 = vld [vmem:[#allocation12 + $0xe4] sm:$0xf] }
 0xe6e   :  { %7801 = vmatpush.msrb.mxu2 %v16926_v56  ;;  %7821 = vmatpush.msrb.mxu3 %v16928_v43 }
 0xe6f   :  { %7778 = vmatpush.msra.mxu1 %v7582_v15  ;;  %7840 = vmatpush.msrb.mxu0 %v16921_v45  ;;  %v12879_v45 = vld [vmem:[#allocation12 + $0xe8] sm:$0xf0] }
 0xe70   :  { %7802 = vmatpush.msrb.mxu2 %v16937_v2  ;;  %7822 = vmatpush.msrb.mxu3 %v16939_v21  ;;  %v12882_v43 = vor.u32 %v14087_v35, %v12879_v45  ;;  %v14070_v2 = vld [vmem:[#allocation12 + $0x54] sm:$0xf0]  ;;  %v12869_v21 = vld [vmem:[#allocation12 + $0xd0] sm:$0xf] }
 0xe71   :  { %7779 = vmatpush.msra.mxu1 %v7580_v30  ;;  %7841 = vmatpush.msrb.mxu0 %v16932_v63  ;;  %v12805_v63 = vld [vmem:[#allocation12 + $0x50] sm:$0xf] }
 0xe72   :  { %7803 = vmatpush.msrb.mxu2 %v16948_v25  ;;  %7823 = vmatpush.msrb.mxu3 %v16954_v26  ;;  %v12806_v25 = vor.u32 %v14070_v2, %v12805_v63  ;;  %v12845_v63 = vld [vmem:[#allocation12 + $0xa0] sm:$0xf] }
 0xe73   :  { %7780 = vmatpush.msra.mxu1 %v7578_v52  ;;  %7842 = vmatpush.msrb.mxu0 %v16943_v3 }
 0xe75   :  { %7781 = vmatpush.msra.mxu1 %v7576_v12  ;;  %7843 = vmatpush.msrb.mxu0 %v16957_v34 }
 0xe77   :  { %7848 = vmatpush.msrb.mxu1 %v16950_v55 }
 0xe79   :  { %7849 = vmatpush.msrb.mxu1 %v16961_v13 }
 0xe7b   :  { %7850 = vmatpush.msrb.mxu1 %v16966_v41 }
 0xe7d   :  { %7851 = vmatpush.msrb.mxu1 %v16972_v36  ;;  %v14086_v36 = vld [vmem:[#allocation12 + $0xd4] sm:$0xf0] }
 0xe7f   :  { %7852 = vmatpush.msrb.mxu1 %v16978_v44  ;;  %v14069_v44 = vld [vmem:[#allocation12 + $0x54] sm:$0xf] }
 0xe81   :  { %7853 = vmatpush.msrb.mxu1 %v16984_v0  ;;  %v12807_v0 = vld [vmem:[#allocation12 + $0x58] sm:$0xf0] }
 0xe83   :  { %7854 = vmatpush.msrb.mxu1 %v16990_v16 }
 0xe85   :  { %7855 = vmatpush.msrb.mxu1 %v7592_v42  ;;  %v12870_v42 = vor.u32 %v14086_v36, %v12869_v21  ;;  %v12783_v36 = vld [vmem:[#allocation12 + $0x28] sm:$0xf0] }
 0xe87   :  { %7856 = vmatpush.msrb.mxu1 %v7590_v62  ;;  %v12810_v62 = vor.u32 %v14069_v44, %v12807_v0 }
 0xe89   :  { %7857 = vmatpush.msrb.mxu1 %v7588_v1  ;;  %v14085_v1 = vld [vmem:[#allocation12 + $0xd4] sm:$0xf] }
 0xe8b   :  { %7858 = vmatpush.msrb.mxu1 %v7586_v38  ;;  %v12871_v38 = vld [vmem:[#allocation12 + $0xd8] sm:$0xf0] }
 0xe8d   :  { %7859 = vmatpush.msrb.mxu1 %v7584_v39 }
 0xe8f   :  { %7860 = vmatpush.msrb.mxu1 %v7582_v15  ;;  %v12874_v15 = vor.u32 %v14085_v1, %v12871_v38  ;;  %v12773_v38 = vld [vmem:[#allocation12 + $0x10] sm:$0xf] }
 0xe91   :  { %7861 = vmatpush.msrb.mxu1 %v7580_v30  ;;  %v12797_v30 = vld [vmem:[#allocation12 + $0x40] sm:$0xf] }
 0xe93   :  { %7862 = vmatpush.msrb.mxu1 %v7578_v52  ;;  %v14068_v52 = vld [vmem:[#allocation12 + $0x44] sm:$0xf0] }
 0xe95   :  { %7863 = vmatpush.msrb.mxu1 %v7576_v12 }
 0xea3   :  { %v7627_v34 = vpop.f32.mrf.mxu0 }
 0xea4   :  { %7722 = vmatmul.f32.vlgmr.msra.gmra.mxu2 %v7627_v34  ;;  %7762 = vmatmul.f32.vlgmr.msra.gmra.mxu0 %v7627_v34 }
 0xea5   :  { %8171 = vmatpush.bf16.msra.mxu2 %v12822_v60  ;;  %8229 = vmatpush.bf16.msra.mxu0 %v12826_v47  ;;  %v14083_v60 = vld [vmem:[#allocation12 + $0xc4] sm:$0xf] }
 0xea6   :  { %v12866_v47 = vor.u32 %v14083_v60, %v12863_v18  ;;  %v12765_v60 = vld [vmem:[#allocation12] sm:$0xf] }
 0xea9   :  { %8172 = vmatpush.bf16.msra.mxu2 %v12814_v46  ;;  %8230 = vmatpush.bf16.msra.mxu0 %v12818_v61  ;;  %v12794_v61 = vor.u32 %v14065_v9, %v12791_v28 }
 0xead   :  { %8173 = vmatpush.bf16.msra.mxu2 %v12806_v25  ;;  %8231 = vmatpush.bf16.msra.mxu0 %v12810_v62  ;;  %v14063_v25 = vld [vmem:[#allocation12 + $0x24] sm:$0xf] }
 0xeae   :  { %v12786_v0 = vor.u32 %v14063_v25, %v12783_v36 }
 0xeb1   :  { %8232 = vmatpush.bf16.msra.mxu0 %v12802_v14  ;;  %v12829_v14 = vld [vmem:[#allocation12 + $0x80] sm:$0xf] }
 0xeb3   :  { %v7683_v13 = vpop.f32.mrf.mxu0 }
 0xeb4   :  { %7804 = vmatmul.f32.vlgmr.msrb.gmra.mxu2 %v7683_v13  ;;  %7844 = vmatmul.f32.vlgmr.msrb.gmra.mxu0 %v7683_v13 }
 0xeb5   :  { %8233 = vmatpush.bf16.msra.mxu0 %v12794_v61 }
 0xeb9   :  { %8234 = vmatpush.bf16.msra.mxu0 %v12786_v0 }
 0xec3   :  { %v7647_v55 = vpop.f32.mrf.mxu1 }
 0xec4   :  { %7742 = vmatmul.f32.vlgmr.msra.gmra.mxu3 %v7647_v55  ;;  %7782 = vmatmul.f32.vlgmr.msra.gmra.mxu1 %v7647_v55  ;;  %v12798_v55 = vor.u32 %v14068_v52, %v12797_v30 }
 0xec5   :  { %8200 = vmatpush.bf16.msra.mxu3 %v12886_v19  ;;  %8258 = vmatpush.bf16.msra.mxu1 %v12890_v27 }
 0xec6   :  { %8174 = vmatpush.bf16.msra.mxu2 %v12798_v55 }
 0xec9   :  { %8201 = vmatpush.bf16.msra.mxu3 %v12878_v59  ;;  %8259 = vmatpush.bf16.msra.mxu1 %v12882_v43  ;;  %v12855_v59 = vld [vmem:[#allocation12 + $0xb8] sm:$0xf0]  ;;  %v14064_v43 = vld [vmem:[#allocation12 + $0x24] sm:$0xf0] }
 0xeca   :  { %8175 = vmatpush.bf16.msra.mxu2 %v12790_v48  ;;  %v12831_v48 = vld [vmem:[#allocation12 + $0x88] sm:$0xf0] }
 0xecd   :  { %8202 = vmatpush.bf16.msra.mxu3 %v12870_v42  ;;  %8260 = vmatpush.bf16.msra.mxu1 %v12874_v15  ;;  %v12847_v42 = vld [vmem:[#allocation12 + $0xa8] sm:$0xf0]  ;;  %v12837_v15 = vld [vmem:[#allocation12 + $0x90] sm:$0xf] }
 0xed1   :  { %8261 = vmatpush.bf16.msra.mxu1 %v12866_v47  ;;  %v14076_v47 = vld [vmem:[#allocation12 + $0x84] sm:$0xf0] }
 0xed3   :  { %v7703_v26 = vpop.f32.mrf.mxu1 }
 0xed4   :  { %7824 = vmatmul.f32.vlgmr.msrb.gmra.mxu3 %v7703_v26  ;;  %7864 = vmatmul.f32.vlgmr.msrb.gmra.mxu1 %v7703_v26  ;;  %v12861_v26 = vld [vmem:[#allocation12 + $0xc0] sm:$0xf] }
 0xf21   :  { %v7763_v41 = vpop.f32.mrf.mxu0 }
 0xf27   :  { %v7723_v40 = vpop.f32.mrf.mxu2 }
 0xf31   :  { %v7845_v56 = vpop.f32.mrf.mxu0 }
 0xf41   :  { %v7783_v10 = vpop.f32.mrf.mxu1 }
 0xf42   :  { %v7784_v53 = vadd.f32 %v7783_v10, %v7763_v41  ;;  %v14084_v41 = vld [vmem:[#allocation12 + $0xc4] sm:$0xf0]  ;;  %v7805_v10 = vpop.f32.mrf.mxu2 }
 0xf43   :  { %v12862_v49 = vor.u32 %v14084_v41, %v12861_v26  ;;  %v12775_v26 = vld [vmem:[#allocation12 + $0x18] sm:$0xf0]  ;;  %v14077_v41 = vld [vmem:[#allocation12 + $0x94] sm:$0xf] }
 0xf44   :  { %v17038_v7 = vmul.f32 0.00048828125, %v7784_v53  ;;  %v12853_v53 = vld [vmem:[#allocation12 + $0xb0] sm:$0xf] }
 0xf45   :  { %8203 = vmatpush.bf16.msra.mxu3 %v12862_v49  ;;  %v12854_v57 = vor.u32 %v14082_v17, %v12853_v53  ;;  %v12830_v53 = vor.u32 %v14076_v47, %v12829_v14  ;;  %v13013_v14 = vld [vmem:[#allocation12 + $0x1f0] sm:$0xf] }
 0xf46   :  { %v7871_v12 = vmul.f32 %v17038_v7, %v17038_v7 }
 0xf47   :  { %v7743_v29 = vpop.f32.mrf.mxu3 }
 0xf48   :  { %v7744_v3 = vadd.f32 %v7743_v29, %v7723_v40  ;;  %v14081_v29 = vld [vmem:[#allocation12 + $0xb4] sm:$0xf] }
 0xf49   :  { %v12858_v45 = vor.u32 %v14081_v29, %v12855_v59  ;;  %8204 = vmatpush.bf16.msra.mxu3 %v12854_v57 }
 0xf4a   :  { %v17042_v34 = vmul.f32 0.00048828125, %v7744_v3  ;;  %v14080_v3 = vld [vmem:[#allocation12 + $0xa4] sm:$0xf0] }
 0xf4b   :  { %8262 = vmatpush.bf16.msra.mxu1 %v12858_v45  ;;  %v12846_v44 = vor.u32 %v14080_v3, %v12845_v63 }
 0xf4c   :  { %v7870_v46 = vmul.f32 %v17042_v34, %v17042_v34 }
 0xf4d   :  { %8205 = vmatpush.bf16.msra.mxu3 %v12846_v44 }
 0xf51   :  { %v7865_v16 = vpop.f32.mrf.mxu1 }
 0xf52   :  { %v7866_v39 = vadd.f32 %v7865_v16, %v7845_v56  ;;  %v12781_v56 = vld [vmem:[#allocation12 + $0x20] sm:$0xf]  ;;  %v14079_v16 = vld [vmem:[#allocation12 + $0xa4] sm:$0xf] }
 0xf53   :  { %v12782_v21 = vor.u32 %v14064_v43, %v12781_v56  ;;  %v12850_v1 = vor.u32 %v14079_v16, %v12847_v42 }
 0xf54   :  { %v7869_v13 = vmul.f32 0.00048828125, %v7866_v39  ;;  %v14062_v39 = vld [vmem:[#allocation12 + $0x14] sm:$0xf0] }
 0xf55   :  { %8176 = vmatpush.bf16.msra.mxu2 %v12782_v21  ;;  %v12774_v52 = vor.u32 %v14062_v39, %v12773_v38  ;;  %8263 = vmatpush.bf16.msra.mxu1 %v12850_v1 }
 0xf56   :  { %v7873_v6 = vsub.f32 %v7869_v13, %v7871_v12  ;;  %v14078_v12 = vld [vmem:[#allocation12 + $0x94] sm:$0xf0]  ;;  %v14061_v13 = vld [vmem:[#allocation12 + $0x14] sm:$0xf] }
 0xf57   :  { %v7825_v19 = vpop.f32.mrf.mxu3  ;;  %v12838_v55 = vor.u32 %v14078_v12, %v12837_v15  ;;  %v12778_v37 = vor.u32 %v14061_v13, %v12775_v26 }
 0xf58   :  { %v7875_v27 = vmax.f32 %v7873_v6, 0.0  ;;  %v7826_v40 = vadd.f32 %v7825_v19, %v7805_v10  ;;  %v12839_v10 = vld [vmem:[#allocation12 + $0x98] sm:$0xf0]  ;;  %v14060_v6 = vld [vmem:[#allocation12 + $0x4] sm:$0xf0] }
 0xf59   :  { %8177 = vmatpush.bf16.msra.mxu2 %v12774_v52  ;;  %v12842_v11 = vor.u32 %v14077_v41, %v12839_v10  ;;  %8206 = vmatpush.bf16.msra.mxu3 %v12838_v55  ;;  %v12766_v19 = vor.u32 %v14060_v6, %v12765_v60 }
 0xf5a   :  { %v17046_v23 = vadd.f32 1e-05, %v7875_v27  ;;  %v7868_v35 = vmul.f32 0.00048828125, %v7826_v40  ;;  %8235 = vmatpush.bf16.msra.mxu0 %v12778_v37  ;;  %v12770_v27 = vor.u32 %v14059_v54, %v12767_v8  ;;  %v14075_v40 = vld [vmem:[#allocation12 + $0x84] sm:$0xf] }
 0xf5b   :  { %8264 = vmatpush.bf16.msra.mxu1 %v12842_v11  ;;  %v12834_v9 = vor.u32 %v14075_v40, %v12831_v48  ;;  %v14121_v40 = vld [vmem:[#allocation12 + $0x1f4] sm:$0xf]  ;;  %v13015_v48 = vld [vmem:[#allocation12 + $0x1f8] sm:$0xf0] }
 0xf5c   :  { %14214 = vrsqrt.f32 %v17046_v23  ;;  %v7872_v2 = vsub.f32 %v7868_v35, %v7870_v46  ;;  %v7542_v46 = vld [vmem:[%s18091_s19] sm:$0xf]  ;;  %vm7894_vm13 = vweird.f32 %v17046_v23 }
 0xf5d   :  { %8178 = vmatpush.bf16.msra.mxu2 %v12766_v19  ;;  %8207 = vmatpush.bf16.msra.mxu3 %v12830_v53  ;;  %v7900_v35 = vperm.slane %v7542_v46, 2  ;;  %v7899_v21 = vperm.slane %v7542_v46, 0  ;;  %v14105_v19 = vld [vmem:[#allocation12 + $0x174] sm:$0xf] }
 0xf5e   :  { %v7874_v62 = vmax.f32 %v7872_v2, 0.0  ;;  %8236 = vmatpush.bf16.msra.mxu0 %v12770_v27  ;;  %v12951_v27 = vld [vmem:[#allocation12 + $0x178] sm:$0xf0] }
 0xf5f   :  { %8265 = vmatpush.bf16.msra.mxu1 %v12834_v9  ;;  %v12954_v9 = vor.u32 %v14105_v19, %v12951_v27 }
 0xf60   :  { %v7876_v30 = vadd.f32 1e-05, %v7874_v62 }
 0xf62   :  { %v14215_v49 = vpop.eup %14214  ;;  %14216 = vrsqrt.f32 %v7876_v30  ;;  %vm7884_vm0 = vweird.f32 %v7876_v30  ;;  %8554 = vmatpush.bf16.msrb.mxu0 %v12954_v9  ;;  %v14097_v9 = vld [vmem:[#allocation12 + $0x134] sm:$0xf] }
 0xf63   :  { %v7889_v18 = vmul.f32 %v14215_v49, %v17046_v23  ;;  %vm7895_vm12 = vweird.f32 %v14215_v49 }
 0xf64   :  { %vm7896_vm14 = vmor %vm7894_vm13, %vm7895_vm12 }
 0xf65   :  { %v7890_v17 = vmul.f32 %v14215_v49, %v7889_v18  ;;  %v14122_v18 = vld [vmem:[#allocation12 + $0x1f4] sm:$0xf0] }
 0xf66   :  { %v13014_v53 = vor.u32 %v14122_v18, %v13013_v14 }
 0xf67   :  { %v7891_v57 = vmul.f32 0.5, %v7890_v17 }
 0xf68   :  { %v14217_v28 = vpop.eup %14216  ;;  %8525 = vmatpush.bf16.msrb.mxu3 %v13014_v53  ;;  %v12981_v53 = vld [vmem:[#allocation12 + $0x1b0] sm:$0xf] }
 0xf69   :  { %v7892_v29 = vsub.f32 1.5, %v7891_v57  ;;  %v7879_v59 = vmul.f32 %v14217_v28, %v7876_v30  ;;  %vm7885_vm15 = vweird.f32 %v14217_v28  ;;  %v12941_v57 = vld [vmem:[#allocation12 + $0x160] sm:$0xf] }
 0xf6a   :  { %vm7886_vm1 = vmor %vm7884_vm0, %vm7885_vm15 }
 0xf6b   :  { %v7893_v61 = vmul.f32 %v14215_v49, %v7892_v29  ;;  %v7880_v45 = vmul.f32 %v14217_v28, %v7879_v59  ;;  %v13005_v29 = vld [vmem:[#allocation12 + $0x1e0] sm:$0xf] }
 0xf6d   :  { %v7897_v56 = vsel %vm7896_vm14, %v14215_v49, %v7893_v61  ;;  %v7881_v43 = vmul.f32 0.5, %v7880_v45  ;;  %v14103_v61 = vld [vmem:[#allocation12 + $0x164] sm:$0xf]  ;;  %v12943_v45 = vld [vmem:[#allocation12 + $0x168] sm:$0xf0] }
 0xf6e   :  { %v7904_v63 = vmul.f32 %v7900_v35, %v7897_v56  ;;  %v14120_v35 = vld [vmem:[#allocation12 + $0x1e4] sm:$0xf0] }
 0xf6f   :  { %v7882_v2 = vsub.f32 1.5, %v7881_v43  ;;  %v12946_v43 = vor.u32 %v14103_v61, %v12943_v45  ;;  %v12973_v61 = vld [vmem:[#allocation12 + $0x1a0] sm:$0xf]  ;;  %v14112_v45 = vld [vmem:[#allocation12 + $0x1a4] sm:$0xf0] }
 0xf70   :  { %v7906_v25 = vmul.f32 %v7904_v63, %v17038_v7  ;;  %v17057_v62 = vperm.slane %v7904_v63, 0  ;;  %v14119_v63 = vld [vmem:[#allocation12 + $0x1e4] sm:$0xf] }
 0xf71   :  { %v7883_v3 = vmul.f32 %v14217_v28, %v7882_v2  ;;  %v13007_v2 = vld [vmem:[#allocation12 + $0x1e8] sm:$0xf0]  ;;  %8555 = vmatpush.bf16.msrb.mxu0 %v12946_v43  ;;  %v14095_v43 = vld [vmem:[#allocation12 + $0x124] sm:$0xf] }
 0xf72   :  { %v7909_v0 = vrot.slane %v7906_v25, 6  ;;  %v7917_v30 = vmul.f32 %v17057_v62, %v16692_v50  ;;  %v7919_v7 = vmul.f32 %v17057_v62, %v16852_v31  ;;  %v7921_v8 = vmul.f32 %v17057_v62, %v16839_v51  ;;  %v14102_v25 = vld [vmem:[#allocation12 + $0x154] sm:$0xf0] }
 0xf73   :  { %v7887_v36 = vsel %vm7886_vm1, %v14217_v28, %v7883_v3  ;;  %v7923_v17 = vmul.f32 %v17057_v62, %v16824_v58  ;;  %v14104_v28 = vld [vmem:[#allocation12 + $0x164] sm:$0xf0]  ;;  %v13006_v58 = vor.u32 %v14120_v35, %v13005_v29  ;;  %v13010_v3 = vor.u32 %v14119_v63, %v13007_v2  ;;  %v12911_v63 = vld [vmem:[#allocation12 + $0x128] sm:$0xf0]  ;;  %v14111_v2 = vld [vmem:[#allocation12 + $0x1a4] sm:$0xf] }
 0xf74   :  { %v7903_v44 = vmul.f32 %v7899_v21, %v7887_v36  ;;  %v12942_v51 = vor.u32 %v14104_v28, %v12941_v57  ;;  %v12933_v21 = vld [vmem:[#allocation12 + $0x150] sm:$0xf]  ;;  %v14096_v35 = vld [vmem:[#allocation12 + $0x124] sm:$0xf0] }
 0xf75   :  { %v12997_v36 = vld [vmem:[#allocation12 + $0x1d0] sm:$0xf]  ;;  %8526 = vmatpush.bf16.msrb.mxu3 %v13006_v58 }
 0xf76   :  { %v7905_v16 = vmul.f32 %v7903_v44, %v17042_v34  ;;  %v17059_v38 = vperm.slane %v7903_v44, 0  ;;  %v14118_v44 = vld [vmem:[#allocation12 + $0x1d4] sm:$0xf0] }
 0xf78   :  { %v7910_v23 = vsel %vm2099_vm4, %v7905_v16, %v7909_v0  ;;  %v7916_v34 = vmul.f32 %v17059_v38, %v16684_v22  ;;  %v7918_v13 = vmul.f32 %v17059_v38, %v16733_v4  ;;  %v12949_v22 = vld [vmem:[#allocation12 + $0x170] sm:$0xf]  ;;  %v14106_v4 = vld [vmem:[#allocation12 + $0x174] sm:$0xf0]  ;;  %v7920_v47 = vmul.f32 %v17059_v38, %v16730_v32  ;;  %v14101_v16 = vld [vmem:[#allocation12 + $0x154] sm:$0xf] }
 0xf79   :  { %v7911_v42 = vrot.slane %v7910_v23, 7  ;;  %v12950_v6 = vor.u32 %v14106_v4, %v12949_v22  ;;  %v7922_v54 = vmul.f32 %v17059_v38, %v16725_v5  ;;  %v12934_v0 = vor.u32 %v14102_v25, %v12933_v21  ;;  %v12935_v23 = vld [vmem:[#allocation12 + $0x158] sm:$0xf0]  ;;  %v12991_v22 = vld [vmem:[#allocation12 + $0x1c8] sm:$0xf0] }
 0xf7a   :  { %v7924_v27 = vmul.f32 %v17059_v38, %v16720_v33  ;;  %v7926_v57 = vmul.f32 %v17059_v38, %v16713_v20  ;;  %v18136_v33 = vld [vmem:[#allocation24_spill] sm:$0xff]  ;;  %v12974_v25 = vor.u32 %v14112_v45, %v12973_v61 }
 0xf7b   :  { %v7913_v1 = vsub.f32 %v7542_v46, %v7911_v42  ;;  %8496 = vmatpush.bf16.msrb.mxu2 %v12950_v6  ;;  %v13018_v46 = vor.u32 %v14121_v40, %v13015_v48  ;;  %v14117_v42 = vld [vmem:[#allocation12 + $0x1d4] sm:$0xf]  ;;  %v7925_v40 = vmul.f32 %v17057_v62, %v16809_v24 }
 0xf7d   :  { %v7933_v39 = vperm.slane %v7913_v1, 1  ;;  %v7934_v15 = vperm.slane %v7913_v1, 3  ;;  %8583 = vmatpush.bf16.msrb.mxu1 %v13018_v46  ;;  %v12919_v46 = vld [vmem:[#allocation12 + $0x138] sm:$0xf0] }
 0xf7e   :  { %v12922_v29 = vor.u32 %v14097_v9, %v12919_v46  ;;  %v18137_v9 = vld [vmem:[#allocation21_spill] sm:$0xff] }
 0xf7f   :  { %v17065_v52 = vperm.slane %v7933_v39, 1  ;;  %v17067_v12 = vperm.slane %v7934_v15, 1  ;;  %8497 = vmatpush.bf16.msrb.mxu2 %v12942_v51  ;;  %v12998_v15 = vor.u32 %v14118_v44, %v12997_v36  ;;  %v7927_v51 = vmul.f32 %v17057_v62, %v18136_v33  ;;  %v12975_v36 = vld [vmem:[#allocation12 + $0x1a8] sm:$0xf0]  ;;  %v12901_v44 = vld [vmem:[#allocation12 + $0x110] sm:$0xf] }
 0xf80   :  { %v7928_v46 = vmul.f32 %v17059_v38, %v18137_v9 }
 0xf81   :  { %v7939_v55 = vadd.f32 %v17065_v52, %v7916_v34  ;;  %v7941_v26 = vadd.f32 %v17065_v52, %v7918_v13  ;;  %v7940_v41 = vadd.f32 %v17067_v12, %v7917_v30  ;;  %v7942_v50 = vadd.f32 %v17067_v12, %v7919_v7  ;;  %v12999_v30 = vld [vmem:[#allocation12 + $0x1d8] sm:$0xf0]  ;;  %8584 = vmatpush.bf16.msrb.mxu1 %v13010_v3 }
 0xf82   :  { %v7943_v32 = vadd.f32 %v17065_v52, %v7920_v47  ;;  %v7945_v5 = vadd.f32 %v17065_v52, %v7922_v54  ;;  %v7944_v59 = vadd.f32 %v17067_v12, %v7921_v8  ;;  %v7946_v56 = vadd.f32 %v17067_v12, %v7923_v17  ;;  %8527 = vmatpush.bf16.msrb.mxu3 %v12998_v15  ;;  %v12917_v54 = vld [vmem:[#allocation12 + $0x130] sm:$0xf]  ;;  %v14098_v8 = vld [vmem:[#allocation12 + $0x134] sm:$0xf0]  ;;  %v12903_v15 = vld [vmem:[#allocation12 + $0x118] sm:$0xf0] }
 0xf83   :  { %v7955_v10 = vmax.f32 %v7939_v55, 0.0  ;;  %v7957_v31 = vmax.f32 %v7941_v26, 0.0  ;;  %v7956_v49 = vmax.f32 %v7940_v41, 0.0  ;;  %v7958_v37 = vmax.f32 %v7942_v50, 0.0  ;;  %v12925_v26 = vld [vmem:[#allocation12 + $0x140] sm:$0xf]  ;;  %8498 = vmatpush.bf16.msrb.mxu2 %v12934_v0 }
 0xf84   :  { %v7959_v1 = vmax.f32 %v7943_v32, 0.0  ;;  %v7961_v39 = vmax.f32 %v7945_v5, 0.0  ;;  %v7960_v7 = vmax.f32 %v7944_v59, 0.0  ;;  %v7962_v34 = vmax.f32 %v7946_v56, 0.0  ;;  %v14100_v41 = vld [vmem:[#allocation12 + $0x144] sm:$0xf0] }
 0xf85   :  { %v17077_v11 = vpack.c.bf16 %v7957_v31, %v7955_v10  ;;  %v17079_v60 = vpack.c.bf16 %v7958_v37, %v7956_v49  ;;  %v12938_v13 = vor.u32 %v14101_v16, %v12935_v23  ;;  %v13002_v55 = vor.u32 %v14117_v42, %v12999_v30  ;;  %v12989_v50 = vld [vmem:[#allocation12 + $0x1c0] sm:$0xf]  ;;  %v14116_v10 = vld [vmem:[#allocation12 + $0x1c4] sm:$0xf0]  ;;  %v14099_v31 = vld [vmem:[#allocation12 + $0x144] sm:$0xf] }
 0xf86   :  { %v12927_v49 = vld [vmem:[#allocation12 + $0x148] sm:$0xf0]  ;;  %v14115_v37 = vld [vmem:[#allocation12 + $0x1c4] sm:$0xf]  ;;  %v17097_v4 = vpack.c.bf16 %v7961_v39, %v7959_v1  ;;  %v17099_v6 = vpack.c.bf16 %v7962_v34, %v7960_v7  ;;  %v12926_v14 = vor.u32 %v14100_v41, %v12925_v26  ;;  %v12990_v18 = vor.u32 %v14116_v10, %v12989_v50  ;;  %v14114_v17 = vld [vmem:[#allocation12 + $0x1b4] sm:$0xf0] }
 0xf87   :  { %8179 = vmatmul.bf16.vlgmr.msra.gmra.mxu2 %v17077_v11  ;;  %8208 = vmatmul.bf16.vlgmr.msra.gmra.mxu3 %v17079_v60  ;;  %v12930_v19 = vor.u32 %v14099_v31, %v12927_v49  ;;  %v12994_v47 = vor.u32 %v14115_v37, %v12991_v22  ;;  %v12918_v48 = vor.u32 %v14098_v8, %v12917_v54  ;;  %v14113_v32 = vld [vmem:[#allocation12 + $0x1b4] sm:$0xf]  ;;  %v12983_v5 = vld [vmem:[#allocation12 + $0x1b8] sm:$0xf0]  ;;  %v12909_v59 = vld [vmem:[#allocation12 + $0x120] sm:$0xf] }
 0xf88   :  { %8237 = vmatmul.bf16.vlgmr.msra.gmra.mxu0 %v17077_v11  ;;  %8266 = vmatmul.bf16.vlgmr.msra.gmra.mxu1 %v17079_v60  ;;  %v12982_v28 = vor.u32 %v14114_v17, %v12981_v53  ;;  %v12986_v24 = vor.u32 %v14113_v32, %v12983_v5  ;;  %v7947_v56 = vadd.f32 %v17065_v52, %v7924_v27  ;;  %v14094_v0 = vld [vmem:[#allocation12 + $0x114] sm:$0xf0]  ;;  %v12965_v42 = vld [vmem:[#allocation12 + $0x190] sm:$0xf]  ;;  %v14093_v39 = vld [vmem:[#allocation12 + $0x114] sm:$0xf] }
 0xf89   :  { %8556 = vmatpush.bf16.msrb.mxu0 %v12938_v13  ;;  %8585 = vmatpush.bf16.msrb.mxu1 %v13002_v55  ;;  %v7949_v58 = vadd.f32 %v17065_v52, %v7926_v57  ;;  %v7948_v20 = vadd.f32 %v17067_v12, %v7925_v40  ;;  %v7950_v21 = vadd.f32 %v17067_v12, %v7927_v51  ;;  %v14110_v1 = vld [vmem:[#allocation12 + $0x194] sm:$0xf0]  ;;  %v14109_v30 = vld [vmem:[#allocation12 + $0x194] sm:$0xf]  ;;  %v12967_v7 = vld [vmem:[#allocation12 + $0x198] sm:$0xf0] }
 0xf8a   :  { %8499 = vmatpush.bf16.msrb.mxu2 %v12926_v14  ;;  %8528 = vmatpush.bf16.msrb.mxu3 %v12990_v18  ;;  %v12910_v3 = vor.u32 %v14096_v35, %v12909_v59  ;;  %v12914_v16 = vor.u32 %v14095_v43, %v12911_v63  ;;  %v12978_v23 = vor.u32 %v14111_v2, %v12975_v36  ;;  %v7963_v34 = vmax.f32 %v7947_v56, 0.0  ;;  %v12893_v10 = vld [vmem:[#allocation12 + $0x100] sm:$0xf]  ;;  %v14092_v31 = vld [vmem:[#allocation12 + $0x104] sm:$0xf0]  ;;  %v18140_v5 = vld [vmem:[#allocation22_spill] sm:$0xff] }
 0xf8b   :  { %v7965_v13 = vmax.f32 %v7949_v58, 0.0  ;;  %v7964_v55 = vmax.f32 %v7948_v20, 0.0  ;;  %v7966_v26 = vmax.f32 %v7950_v21, 0.0  ;;  %v12902_v41 = vor.u32 %v14094_v0, %v12901_v44  ;;  %v12957_v22 = vld [vmem:[#allocation12 + $0x180] sm:$0xf] }
 0xf8c   :  { %v12966_v50 = vor.u32 %v14110_v1, %v12965_v42  ;;  %v12906_v49 = vor.u32 %v14093_v39, %v12903_v15  ;;  %v12970_v37 = vor.u32 %v14109_v30, %v12967_v7  ;;  %v14108_v14 = vld [vmem:[#allocation12 + $0x184] sm:$0xf0]  ;;  %v14091_v18 = vld [vmem:[#allocation12 + $0x104] sm:$0xf]  ;;  %v12959_v54 = vld [vmem:[#allocation12 + $0x188] sm:$0xf0]  ;;  %v12894_v27 = vor.u32 %v14092_v31, %v12893_v10 }
 0xf8d   :  { %8557 = vmatpush.bf16.msrb.mxu0 %v12930_v19  ;;  %8586 = vmatpush.bf16.msrb.mxu1 %v12994_v47  ;;  %v12895_v19 = vld [vmem:[#allocation12 + $0x108] sm:$0xf0]  ;;  %v14107_v47 = vld [vmem:[#allocation12 + $0x184] sm:$0xf]  ;;  %v17117_v8 = vpack.c.bf16 %v7965_v13, %v7963_v34  ;;  %v17119_v53 = vpack.c.bf16 %v7966_v26, %v7964_v55  ;;  %v12958_v40 = vor.u32 %v14108_v14, %v12957_v22 }
 0xf8e   :  { %8500 = vmatpush.bf16.msrb.mxu2 %v12918_v48  ;;  %8529 = vmatpush.bf16.msrb.mxu3 %v12982_v28  ;;  %v12898_v48 = vor.u32 %v14091_v18, %v12895_v19  ;;  %v12962_v17 = vor.u32 %v14107_v47, %v12959_v54  ;;  %v18138_v57 = vld [vmem:[#allocation20_spill] sm:$0xff]  ;;  %v7931_v59 = vmul.f32 %v17057_v62, %v18140_v5 }
 0xf8f   :  { %v7930_v28 = vmul.f32 %v17059_v38, %v18138_v57  ;;  %v7951_v33 = vadd.f32 %v17065_v52, %v7928_v46 }
 0xf90   :  { %v7954_v35 = vadd.f32 %v17067_v12, %v7931_v59 }
 0xf91   :  { %8558 = vmatpush.bf16.msrb.mxu0 %v12922_v29  ;;  %8587 = vmatpush.bf16.msrb.mxu1 %v12986_v24  ;;  %v18139_v29 = vld [vmem:[#allocation23_spill] sm:$0xff]  ;;  %v7953_v51 = vadd.f32 %v17065_v52, %v7930_v28  ;;  %v7967_v61 = vmax.f32 %v7951_v33, 0.0 }
 0xf92   :  { %8501 = vmatpush.bf16.msrb.mxu2 %v12910_v3  ;;  %8530 = vmatpush.bf16.msrb.mxu3 %v12974_v25  ;;  %v7929_v32 = vmul.f32 %v17057_v62, %v18139_v29  ;;  %v7970_v58 = vmax.f32 %v7954_v35, 0.0  ;;  %v8287_v35 = vld [vmem:[%s18090_s18] sm:$0xff] }
 0xf93   :  { %v7969_v45 = vmax.f32 %v7953_v51, 0.0 }
 0xf94   :  { %v7952_v24 = vadd.f32 %v17067_v12, %v7929_v32 }
 0xf95   :  { %8559 = vmatpush.bf16.msrb.mxu0 %v12914_v16  ;;  %8588 = vmatpush.bf16.msrb.mxu1 %v12978_v23  ;;  %v17137_v20 = vpack.c.bf16 %v7969_v45, %v7967_v61 }
 0xf96   :  { %8502 = vmatpush.bf16.msrb.mxu2 %v12902_v41  ;;  %8531 = vmatpush.bf16.msrb.mxu3 %v12966_v50  ;;  %v7968_v56 = vmax.f32 %v7952_v24, 0.0 }
 0xf97   :  { %8184 = vmatmul.bf16.gmra.mxu2 %v17097_v4  ;;  %8213 = vmatmul.bf16.gmra.mxu3 %v17099_v6 }
 0xf98   :  { %8242 = vmatmul.bf16.gmra.mxu0 %v17097_v4  ;;  %8271 = vmatmul.bf16.gmra.mxu1 %v17099_v6  ;;  %v17139_v38 = vpack.c.bf16 %v7970_v58, %v7968_v56 }
 0xf99   :  { %8560 = vmatpush.bf16.msrb.mxu0 %v12906_v49  ;;  %8589 = vmatpush.bf16.msrb.mxu1 %v12970_v37 }
 0xf9a   :  { %8503 = vmatpush.bf16.msrb.mxu2 %v12894_v27  ;;  %8532 = vmatpush.bf16.msrb.mxu3 %v12958_v40 }
 0xf9d   :  { %8561 = vmatpush.bf16.msrb.mxu0 %v12898_v48  ;;  %8590 = vmatpush.bf16.msrb.mxu1 %v12962_v17 }
 0xfa7   :  { %8189 = vmatmul.bf16.gmra.mxu2 %v17117_v8  ;;  %8218 = vmatmul.bf16.gmra.mxu3 %v17119_v53 }
 0xfa8   :  { %8247 = vmatmul.bf16.gmra.mxu0 %v17117_v8  ;;  %8276 = vmatmul.bf16.gmra.mxu1 %v17119_v53 }
 0xfb7   :  { %8194 = vmatmul.bf16.gmra.mxu2 %v17137_v20  ;;  %8223 = vmatmul.bf16.gmra.mxu3 %v17139_v38 }
 0xfb8   :  { %8252 = vmatmul.bf16.gmra.mxu0 %v17137_v20  ;;  %8281 = vmatmul.bf16.gmra.mxu1 %v17139_v38 }
 0xfc7   :  { %8504 = vmatmul.bf16.vlgmr.msrb.gmra.mxu2 %v17077_v11  ;;  %8533 = vmatmul.bf16.vlgmr.msrb.gmra.mxu3 %v17079_v60 }
 0xfc8   :  { %8562 = vmatmul.bf16.vlgmr.msrb.gmra.mxu0 %v17077_v11  ;;  %8591 = vmatmul.bf16.vlgmr.msrb.gmra.mxu1 %v17079_v60 }
 0xfd7   :  { %8509 = vmatmul.bf16.gmra.mxu2 %v17097_v4  ;;  %8538 = vmatmul.bf16.gmra.mxu3 %v17099_v6 }
 0xfd8   :  { %8567 = vmatmul.bf16.gmra.mxu0 %v17097_v4  ;;  %8596 = vmatmul.bf16.gmra.mxu1 %v17099_v6 }
 0xfe7   :  { %8514 = vmatmul.bf16.gmra.mxu2 %v17117_v8  ;;  %8543 = vmatmul.bf16.gmra.mxu3 %v17119_v53 }
 0xfe8   :  { %8572 = vmatmul.bf16.gmra.mxu0 %v17117_v8  ;;  %8601 = vmatmul.bf16.gmra.mxu1 %v17119_v53 }
 0xff7   :  { %8519 = vmatmul.bf16.gmra.mxu2 %v17137_v20  ;;  %8548 = vmatmul.bf16.gmra.mxu3 %v17139_v38 }
 0xff8   :  { %8577 = vmatmul.bf16.gmra.mxu0 %v17137_v20  ;;  %8606 = vmatmul.bf16.gmra.mxu1 %v17139_v38 }
0x1005   :  { %v8238_v62 = vpop.f32.mrf.mxu0  ;;  %v8267_v52 = vpop.f32.mrf.mxu1 }
0x1006   :  { %v8268_v24 = vadd.f32 %v8267_v52, %v8238_v62 }
0x100a   :  { %v17161_v12 = vpop.f32.mrf.mxu2  ;;  %v17163_v43 = vpop.f32.mrf.mxu3 }
0x100d   :  { %v8240_v63 = vpop.f32.mrf.mxu0  ;;  %v8269_v2 = vpop.f32.mrf.mxu1 }
0x100e   :  { %v8270_v32 = vadd.f32 %v8269_v2, %v8240_v63  ;;  %v8210_v63 = vadd.f32 %v17163_v43, %v17161_v12  ;;  %v8288_v2 = vld [vmem:[%s18090_s18 + $0x8] sm:$0xff]  ;;  %v8289_v12 = vld [vmem:[%s18090_s18 + $0x10] sm:$0xff] }
0x1012   :  { %v8182_v21 = vpop.f32.mrf.mxu2  ;;  %v8211_v3 = vpop.f32.mrf.mxu3 }
0x1013   :  { %v8212_v58 = vadd.f32 %v8211_v3, %v8182_v21 }
0x1015   :  { %v8243_v25 = vpop.f32.mrf.mxu0  ;;  %v8272_v36 = vpop.f32.mrf.mxu1 }
0x1016   :  { %v8273_v28 = vadd.f32 %v8272_v36, %v8243_v25 }
0x101a   :  { %v8185_v44 = vpop.f32.mrf.mxu2  ;;  %v8214_v0 = vpop.f32.mrf.mxu3 }
0x101b   :  { %v8215_v61 = vadd.f32 %v8214_v0, %v8185_v44 }
0x101d   :  { %v8245_v16 = vpop.f32.mrf.mxu0  ;;  %v8274_v23 = vpop.f32.mrf.mxu1 }
0x101e   :  { %v8275_v9 = vadd.f32 %v8274_v23, %v8245_v16  ;;  %v8290_v23 = vld [vmem:[%s18090_s18 + $0x18] sm:$0xff] }
0x1022   :  { %v8187_v42 = vpop.f32.mrf.mxu2  ;;  %v8216_v1 = vpop.f32.mrf.mxu3 }
0x1023   :  { %v8217_v33 = vadd.f32 %v8216_v1, %v8187_v42 }
0x1025   :  { %v8248_v39 = vpop.f32.mrf.mxu0  ;;  %v8277_v15 = vpop.f32.mrf.mxu1 }
0x1026   :  { %v8278_v27 = vadd.f32 %v8277_v15, %v8248_v39 }
0x102a   :  { %v8190_v30 = vpop.f32.mrf.mxu2  ;;  %v8219_v7 = vpop.f32.mrf.mxu3 }
0x102b   :  { %v8220_v29 = vadd.f32 %v8219_v7, %v8190_v30  ;;  %v8291_v30 = vld [vmem:[%s18090_s18 + $0x20] sm:$0xff] }
0x102d   :  { %v8250_v34 = vpop.f32.mrf.mxu0  ;;  %v8279_v13 = vpop.f32.mrf.mxu1 }
0x102e   :  { %v8280_v18 = vadd.f32 %v8279_v13, %v8250_v34 }
0x1032   :  { %v8192_v55 = vpop.f32.mrf.mxu2  ;;  %v8221_v26 = vpop.f32.mrf.mxu3 }
0x1033   :  { %v8222_v57 = vadd.f32 %v8221_v26, %v8192_v55  ;;  %v8292_v26 = vld [vmem:[%s18090_s18 + $0x28] sm:$0xff] }
0x1035   :  { %v8253_v41 = vpop.f32.mrf.mxu0  ;;  %v8282_v50 = vpop.f32.mrf.mxu1 }
0x1036   :  { %v8283_v14 = vadd.f32 %v8282_v50, %v8253_v41 }
0x103a   :  { %v8195_v10 = vpop.f32.mrf.mxu2  ;;  %v8224_v31 = vpop.f32.mrf.mxu3 }
0x103b   :  { %v8225_v40 = vadd.f32 %v8224_v31, %v8195_v10 }
0x103d   :  { %v8255_v49 = vpop.f32.mrf.mxu0  ;;  %v8284_v37 = vpop.f32.mrf.mxu1 }
0x103e   :  { %v8285_v22 = vadd.f32 %v8284_v37, %v8255_v49  ;;  %v8293_v49 = vld [vmem:[%s18090_s18 + $0x30] sm:$0xff] }
0x1040   :  { %8928 = vmatpush.msra.mxu1 %v8285_v22 }
0x1042   :  { %8929 = vmatpush.msra.mxu1 %v8283_v14  ;;  %v8197_v19 = vpop.f32.mrf.mxu2  ;;  %v8226_v47 = vpop.f32.mrf.mxu3 }
0x1043   :  { %v8227_v54 = vadd.f32 %v8226_v47, %v8197_v19 }
0x1044   :  { %8930 = vmatpush.msra.mxu1 %v8280_v18 }
0x1045   :  { %v8563_v48 = vpop.f32.mrf.mxu0  ;;  %v8592_v17 = vpop.f32.mrf.mxu1  ;;  %8863 = vmatpush.msra.mxu0 %v8227_v54 }
0x1046   :  { %v17165_v46 = vadd.f32 %v8592_v17, %v8563_v48  ;;  %8931 = vmatpush.msra.mxu1 %v8278_v27  ;;  %v8294_v48 = vld [vmem:[%s18090_s18 + $0x38] sm:$0xff] }
0x1047   :  { %8864 = vmatpush.msra.mxu0 %v8225_v40 }
0x1048   :  { %8932 = vmatpush.msra.mxu1 %v8275_v9 }
0x1049   :  { %8865 = vmatpush.msra.mxu0 %v8222_v57 }
0x104a   :  { %8933 = vmatpush.msra.mxu1 %v8273_v28  ;;  %v8505_v5 = vpop.f32.mrf.mxu2  ;;  %v8534_v59 = vpop.f32.mrf.mxu3 }
0x104b   :  { %v17167_v51 = vadd.f32 %v8534_v59, %v8505_v5  ;;  %8866 = vmatpush.msra.mxu0 %v8220_v29  ;;  %v13019_v59 = vld [vmem:[%s18090_s18 + $0x80] sm:$0xff] }
0x104c   :  { %8934 = vmatpush.msra.mxu1 %v8270_v32 }
0x104d   :  { %v17172_v45 = vpop.f32.mrf.mxu0  ;;  %v17174_v56 = vpop.f32.mrf.mxu1  ;;  %8867 = vmatpush.msra.mxu0 %v8217_v33  ;;  %v8295_v33 = vld [vmem:[%s18090_s18 + $0x40] sm:$0xff] }
0x104e   :  { %8935 = vmatpush.msra.mxu1 %v8268_v24  ;;  %v8595_v32 = vadd.f32 %v17174_v56, %v17172_v45 }
0x104f   :  { %13083 = vmatmul.msk.f32.vlgmr.msra.gmra.mxu1 %vm7607_vm11, %v8287_v35  ;;  %8868 = vmatpush.msra.mxu0 %v8215_v61  ;;  %v13223_v61 = vld [vmem:[#allocation12 + $0x2f8] sm:$0xf0] }
0x1051   :  { %8869 = vmatpush.msra.mxu0 %v8212_v58  ;;  %v14151_v58 = vld [vmem:[#allocation12 + $0x2e4] sm:$0xf] }
0x1052   :  { %v17179_v62 = vpop.f32.mrf.mxu2  ;;  %v17181_v52 = vpop.f32.mrf.mxu3 }
0x1053   :  { %8870 = vmatpush.msra.mxu0 %v8210_v63  ;;  %v8537_v45 = vadd.f32 %v17181_v52, %v17179_v62  ;;  %v13215_v63 = vld [vmem:[#allocation12 + $0x2e8] sm:$0xf0]  ;;  %v14137_v62 = vld [vmem:[#allocation12 + $0x274] sm:$0xf]  ;;  %v13159_v52 = vld [vmem:[#allocation12 + $0x278] sm:$0xf0] }
0x1054   :  { %13067 = vmatmul.msk.f32.vlgmr.msra.gmra.mxu0 %vm7607_vm11, %v8287_v35  ;;  %v14153_v35 = vld [vmem:[#allocation12 + $0x2f4] sm:$0xf] }
0x1055   :  { %v8568_v25 = vpop.f32.mrf.mxu0  ;;  %v8597_v21 = vpop.f32.mrf.mxu1  ;;  %v13226_v56 = vor.u32 %v14153_v35, %v13223_v61  ;;  %v14125_v61 = vld [vmem:[#allocation12 + $0x214] sm:$0xf] }
0x1056   :  { %v8598_v28 = vadd.f32 %v8597_v21, %v8568_v25  ;;  %v8296_v25 = vld [vmem:[%s18090_s18 + $0x48] sm:$0xff]  ;;  %v13162_v21 = vor.u32 %v14137_v62, %v13159_v52  ;;  %v13149_v62 = vld [vmem:[#allocation12 + $0x260] sm:$0xf] }
0x1057   :  { %13084 = vmatmul.msk.f32.gmra.mxu1 %vm7607_vm11, %v8288_v2  ;;  %v14136_v52 = vld [vmem:[#allocation12 + $0x264] sm:$0xf0] }
0x1058   :  { %9265 = vmatpush.bf16.msrb.mxu1 %v13226_v56  ;;  %9236 = vmatpush.bf16.msrb.mxu0 %v13162_v21  ;;  %v13213_v21 = vld [vmem:[#allocation12 + $0x2e0] sm:$0xf] }
0x105a   :  { %v17188_v3 = vpop.f32.mrf.mxu2  ;;  %v17190_v36 = vpop.f32.mrf.mxu3 }
0x105b   :  { %v8540_v24 = vadd.f32 %v17190_v36, %v17188_v3  ;;  %v13207_v3 = vld [vmem:[#allocation12 + $0x2d8] sm:$0xf0] }
0x105c   :  { %13068 = vmatmul.msk.f32.gmra.mxu0 %vm7607_vm11, %v8288_v2  ;;  %v13218_v2 = vor.u32 %v14151_v58, %v13215_v63  ;;  %v14123_v58 = vld [vmem:[#allocation12 + $0x204] sm:$0xf]  ;;  %v13103_v63 = vld [vmem:[#allocation12 + $0x208] sm:$0xf0] }
0x105d   :  { %v8570_v43 = vpop.f32.mrf.mxu0  ;;  %v8599_v44 = vpop.f32.mrf.mxu1 }
0x105e   :  { %v8600_v9 = vadd.f32 %v8599_v44, %v8570_v43  ;;  %9266 = vmatpush.bf16.msrb.mxu1 %v13218_v2  ;;  %v13151_v43 = vld [vmem:[#allocation12 + $0x268] sm:$0xf0]  ;;  %v14147_v44 = vld [vmem:[#allocation12 + $0x2c4] sm:$0xf]  ;;  %v13106_v2 = vor.u32 %v14123_v58, %v13103_v63  ;;  %v13189_v58 = vld [vmem:[#allocation12 + $0x2b0] sm:$0xf] }
0x105f   :  { %13085 = vmatmul.msk.f32.gmra.mxu1 %vm7607_vm11, %v8289_v12  ;;  %v14146_v63 = vld [vmem:[#allocation12 + $0x2b4] sm:$0xf0] }
0x1062   :  { %v8512_v0 = vpop.f32.mrf.mxu2  ;;  %v8541_v16 = vpop.f32.mrf.mxu3 }
0x1063   :  { %v8542_v5 = vadd.f32 %v8541_v16, %v8512_v0  ;;  %v13199_v16 = vld [vmem:[#allocation12 + $0x2c8] sm:$0xf0] }
0x1064   :  { %13069 = vmatmul.msk.f32.gmra.mxu0 %vm7607_vm11, %v8289_v12  ;;  %v14135_v12 = vld [vmem:[#allocation12 + $0x264] sm:$0xf] }
0x1065   :  { %v8573_v42 = vpop.f32.mrf.mxu0  ;;  %v8602_v1 = vpop.f32.mrf.mxu1  ;;  %v13154_v0 = vor.u32 %v14135_v12, %v13151_v43  ;;  %v13025_v12 = vld [vmem:[%s18090_s18 + $0xb0] sm:$0xff] }
0x1066   :  { %v8603_v40 = vadd.f32 %v8602_v1, %v8573_v42  ;;  %v13021_v42 = vld [vmem:[%s18090_s18 + $0x90] sm:$0xff] }
0x1067   :  { %13086 = vmatmul.msk.f32.gmra.mxu1 %vm7607_vm11, %v8290_v23  ;;  %v8297_v1 = vld [vmem:[%s18090_s18 + $0x50] sm:$0xff]  ;;  %9237 = vmatpush.bf16.msrb.mxu0 %v13154_v0  ;;  %v8302_v0 = vld [vmem:[%s18090_s18 + $0x78] sm:$0xff] }
0x1068   :  { %v8301_v43 = vld [vmem:[%s18090_s18 + $0x70] sm:$0xff] }
0x106a   :  { %v8515_v39 = vpop.f32.mrf.mxu2  ;;  %v8544_v15 = vpop.f32.mrf.mxu3 }
0x106b   :  { %v8545_v29 = vadd.f32 %v8544_v15, %v8515_v39  ;;  %v14133_v39 = vld [vmem:[#allocation12 + $0x254] sm:$0xf]  ;;  %v13143_v15 = vld [vmem:[#allocation12 + $0x258] sm:$0xf0] }
0x106c   :  { %13070 = vmatmul.msk.f32.gmra.mxu0 %vm7607_vm11, %v8290_v23  ;;  %v13202_v23 = vor.u32 %v14147_v44, %v13199_v16  ;;  %v13026_v44 = vld [vmem:[%s18090_s18 + $0xb8] sm:$0xff]  ;;  %v13141_v16 = vld [vmem:[#allocation12 + $0x250] sm:$0xf] }
0x106d   :  { %v8575_v7 = vpop.f32.mrf.mxu0  ;;  %v8604_v34 = vpop.f32.mrf.mxu1 }
0x106e   :  { %v8605_v19 = vadd.f32 %v8604_v34, %v8575_v7  ;;  %v14145_v7 = vld [vmem:[#allocation12 + $0x2b4] sm:$0xf]  ;;  %v13191_v34 = vld [vmem:[#allocation12 + $0x2b8] sm:$0xf0] }
0x106f   :  { %13087 = vmatmul.msk.f32.gmra.mxu1 %vm7607_vm11, %v8291_v30 }
0x1072   :  { %v8517_v13 = vpop.f32.mrf.mxu2  ;;  %v8546_v55 = vpop.f32.mrf.mxu3 }
0x1073   :  { %v8547_v57 = vadd.f32 %v8546_v55, %v8517_v13  ;;  %v13194_v13 = vor.u32 %v14145_v7, %v13191_v34  ;;  %v14131_v55 = vld [vmem:[#allocation12 + $0x244] sm:$0xf]  ;;  %v13397_v34 = vld [vmem:[#allocation12 + $0x3f0] sm:$0xf] }
0x1074   :  { %13071 = vmatmul.msk.f32.gmra.mxu0 %vm7607_vm11, %v8291_v30  ;;  %v13146_v30 = vor.u32 %v14133_v39, %v13143_v15  ;;  %v14150_v39 = vld [vmem:[#allocation12 + $0x2d4] sm:$0xf0]  ;;  %v13027_v7 = vld [vmem:[%s18090_s18 + $0xc0] sm:$0xff] }
0x1075   :  { %v8578_v41 = vpop.f32.mrf.mxu0  ;;  %v8607_v50 = vpop.f32.mrf.mxu1 }
0x1076   :  { %v8608_v18 = vadd.f32 %v8607_v50, %v8578_v41  ;;  %v14143_v41 = vld [vmem:[#allocation12 + $0x2a4] sm:$0xf]  ;;  %9238 = vmatpush.bf16.msrb.mxu0 %v13146_v30 }
0x1077   :  { %13088 = vmatmul.msk.f32.gmra.mxu1 %vm7607_vm11, %v8292_v26 }
0x107a   :  { %v8520_v10 = vpop.f32.mrf.mxu2  ;;  %v8549_v31 = vpop.f32.mrf.mxu3 }
0x107b   :  { %v8550_v17 = vadd.f32 %v8549_v31, %v8520_v10  ;;  %v13183_v10 = vld [vmem:[#allocation12 + $0x2a8] sm:$0xf0] }
0x107c   :  { %13072 = vmatmul.msk.f32.gmra.mxu0 %vm7607_vm11, %v8292_v26  ;;  %v13135_v26 = vld [vmem:[#allocation12 + $0x248] sm:$0xf0]  ;;  %v13186_v31 = vor.u32 %v14143_v41, %v13183_v10  ;;  %v13389_v10 = vld [vmem:[#allocation12 + $0x3e0] sm:$0xf] }
0x107d   :  { %v8580_v37 = vpop.f32.mrf.mxu0  ;;  %v8609_v22 = vpop.f32.mrf.mxu1  ;;  %v13138_v50 = vor.u32 %v14131_v55, %v13135_v26 }
0x107e   :  { %v8610_v14 = vadd.f32 %v8609_v22, %v8580_v37  ;;  %v8298_v37 = vld [vmem:[%s18090_s18 + $0x58] sm:$0xff]  ;;  %v14129_v22 = vld [vmem:[#allocation12 + $0x234] sm:$0xf] }
0x107f   :  { %13089 = vmatmul.msk.f32.gmra.mxu1 %vm7607_vm11, %v8293_v49  ;;  %9239 = vmatpush.bf16.msrb.mxu0 %v13138_v50  ;;  %v13028_v50 = vld [vmem:[%s18090_s18 + $0xc8] sm:$0xff] }
0x1080   :  { %8750 = vmatpush.msra.mxu3 %v8610_v14  ;;  %v13127_v14 = vld [vmem:[#allocation12 + $0x238] sm:$0xf0] }
0x1082   :  { %8751 = vmatpush.msra.mxu3 %v8608_v18  ;;  %v8522_v47 = vpop.f32.mrf.mxu2  ;;  %v8551_v54 = vpop.f32.mrf.mxu3  ;;  %v13130_v18 = vor.u32 %v14129_v22, %v13127_v14  ;;  %v14170_v22 = vld [vmem:[#allocation12 + $0x374] sm:$0xf0] }
0x1083   :  { %v8552_v27 = vadd.f32 %v8551_v54, %v8522_v47  ;;  %v14138_v47 = vld [vmem:[#allocation12 + $0x274] sm:$0xf0] }
0x1084   :  { %8752 = vmatpush.msra.mxu3 %v8605_v19  ;;  %13073 = vmatmul.msk.f32.gmra.mxu0 %vm7607_vm11, %v8293_v49  ;;  %v13022_v49 = vld [vmem:[%s18090_s18 + $0x98] sm:$0xff]  ;;  %v13157_v19 = vld [vmem:[#allocation12 + $0x270] sm:$0xf] }
0x1085   :  { %8685 = vmatpush.msra.mxu2 %v8552_v27  ;;  %v13158_v54 = vor.u32 %v14138_v47, %v13157_v19  ;;  %v13221_v27 = vld [vmem:[#allocation12 + $0x2f0] sm:$0xf]  ;;  %9240 = vmatpush.bf16.msrb.mxu0 %v13130_v18  ;;  %v13133_v18 = vld [vmem:[#allocation12 + $0x240] sm:$0xf]  ;;  %v14132_v19 = vld [vmem:[#allocation12 + $0x244] sm:$0xf0] }
0x1086   :  { %8753 = vmatpush.msra.mxu3 %v8603_v40  ;;  %v14154_v40 = vld [vmem:[#allocation12 + $0x2f4] sm:$0xf0]  ;;  %v13197_v47 = vld [vmem:[#allocation12 + $0x2c0] sm:$0xf] }
0x1087   :  { %13090 = vmatmul.msk.f32.gmra.mxu1 %vm7607_vm11, %v8294_v48  ;;  %8686 = vmatpush.msra.mxu2 %v8550_v17  ;;  %v13222_v17 = vor.u32 %v14154_v40, %v13221_v27  ;;  %v14148_v27 = vld [vmem:[#allocation12 + $0x2c4] sm:$0xf0]  ;;  %v13381_v40 = vld [vmem:[#allocation12 + $0x3d0] sm:$0xf] }
0x1088   :  { %8754 = vmatpush.msra.mxu3 %v8600_v9  ;;  %v13175_v9 = vld [vmem:[#allocation12 + $0x298] sm:$0xf0] }
0x1089   :  { %8687 = vmatpush.msra.mxu2 %v8547_v57  ;;  %v14127_v57 = vld [vmem:[#allocation12 + $0x224] sm:$0xf] }
0x108a   :  { %8755 = vmatpush.msra.mxu3 %v8598_v28  ;;  %v13119_v28 = vld [vmem:[#allocation12 + $0x228] sm:$0xf0] }
0x108b   :  { %8688 = vmatpush.msra.mxu2 %v8545_v29 }
0x108c   :  { %8756 = vmatpush.msra.mxu3 %v8595_v32  ;;  %13074 = vmatmul.msk.f32.gmra.mxu0 %vm7607_vm11, %v8294_v48  ;;  %v14141_v48 = vld [vmem:[#allocation12 + $0x294] sm:$0xf]  ;;  %v13122_v32 = vor.u32 %v14127_v57, %v13119_v28  ;;  %v13325_v28 = vld [vmem:[#allocation12 + $0x360] sm:$0xf] }
0x108d   :  { %8689 = vmatpush.msra.mxu2 %v8542_v5  ;;  %v13178_v29 = vor.u32 %v14141_v48, %v13175_v9  ;;  %v13023_v5 = vld [vmem:[%s18090_s18 + $0xa0] sm:$0xff]  ;;  %v14182_v48 = vld [vmem:[#allocation12 + $0x3d4] sm:$0xf0]  ;;  %v13198_v9 = vor.u32 %v14148_v27, %v13197_v47 }
0x108e   :  { %8757 = vmatpush.msra.mxu3 %v17165_v46  ;;  %v13020_v46 = vld [vmem:[%s18090_s18 + $0x88] sm:$0xff]  ;;  %9241 = vmatpush.bf16.msrb.mxu0 %v13122_v32  ;;  %v13382_v57 = vor.u32 %v14182_v48, %v13381_v40  ;;  %v13031_v27 = vld [vmem:[%s18090_s18 + $0xe0] sm:$0xff] }
0x108f   :  { %13051 = vmatmul.msk.f32.vlgmr.msra.gmra.mxu3 %vm7607_vm11, %v13019_v59  ;;  %13091 = vmatmul.msk.f32.gmra.mxu1 %vm7607_vm11, %v8295_v33 }
0x1090   :  { %8690 = vmatpush.msra.mxu2 %v8540_v24  ;;  %9207 = vmatpush.bf16.msrb.mxu3 %v13222_v17  ;;  %v13167_v24 = vld [vmem:[#allocation12 + $0x288] sm:$0xf0] }
0x1092   :  { %8691 = vmatpush.msra.mxu2 %v8537_v45  ;;  %v13111_v45 = vld [vmem:[#allocation12 + $0x218] sm:$0xf0] }
0x1093   :  { %v13114_v56 = vor.u32 %v14125_v61, %v13111_v45  ;;  %v13317_v61 = vld [vmem:[#allocation12 + $0x350] sm:$0xf]  ;;  %v14166_v45 = vld [vmem:[#allocation12 + $0x354] sm:$0xf0] }
0x1094   :  { %8692 = vmatpush.msra.mxu2 %v17167_v51  ;;  %13075 = vmatmul.msk.f32.gmra.mxu0 %vm7607_vm11, %v8295_v33  ;;  %v14149_v51 = vld [vmem:[#allocation12 + $0x2d4] sm:$0xf]  ;;  %v14139_v33 = vld [vmem:[#allocation12 + $0x284] sm:$0xf] }
0x1095   :  { %13035 = vmatmul.msk.f32.vlgmr.msra.gmra.mxu2 %vm7607_vm11, %v13019_v59  ;;  %v13210_v36 = vor.u32 %v14149_v51, %v13207_v3  ;;  %v8299_v59 = vld [vmem:[%s18090_s18 + $0x60] sm:$0xff]  ;;  %v13170_v35 = vor.u32 %v14139_v33, %v13167_v24  ;;  %9242 = vmatpush.bf16.msrb.mxu0 %v13114_v56  ;;  %v13150_v51 = vor.u32 %v14136_v52, %v13149_v62  ;;  %v14152_v3 = vld [vmem:[#allocation12 + $0x2e4] sm:$0xf0] }
0x1096   :  { %9178 = vmatpush.bf16.msrb.mxu2 %v13158_v54  ;;  %v13134_v54 = vor.u32 %v14132_v19, %v13133_v18  ;;  %v13373_v33 = vld [vmem:[#allocation12 + $0x3c0] sm:$0xf]  ;;  %v14180_v24 = vld [vmem:[#allocation12 + $0x3c4] sm:$0xf0]  ;;  %v13318_v56 = vor.u32 %v14166_v45, %v13317_v61  ;;  %v13285_v61 = vld [vmem:[#allocation12 + $0x310] sm:$0xf] }
0x1097   :  { %13052 = vmatmul.msk.f32.gmra.mxu3 %vm7607_vm11, %v13020_v46  ;;  %13092 = vmatmul.msk.f32.gmra.mxu1 %vm7607_vm11, %v8296_v25  ;;  %v14128_v18 = vld [vmem:[#allocation12 + $0x224] sm:$0xf0]  ;;  %v13293_v19 = vld [vmem:[#allocation12 + $0x320] sm:$0xf]  ;;  %v14158_v45 = vld [vmem:[#allocation12 + $0x314] sm:$0xf0] }
0x1098   :  { %9267 = vmatpush.bf16.msrb.mxu1 %v13210_v36  ;;  %v13214_v36 = vor.u32 %v14152_v3, %v13213_v21  ;;  %v13309_v21 = vld [vmem:[#allocation12 + $0x340] sm:$0xf] }
0x1099   :  { %9243 = vmatpush.bf16.msrb.mxu0 %v13106_v2  ;;  %v13365_v2 = vld [vmem:[#allocation12 + $0x3b0] sm:$0xf] }
0x109a   :  { %9179 = vmatpush.bf16.msrb.mxu2 %v13150_v51  ;;  %9208 = vmatpush.bf16.msrb.mxu3 %v13214_v36  ;;  %v14164_v51 = vld [vmem:[#allocation12 + $0x344] sm:$0xf0]  ;;  %v13030_v36 = vld [vmem:[%s18090_s18 + $0xd8] sm:$0xff] }
0x109b   :  { %v13310_v3 = vor.u32 %v14164_v51, %v13309_v21  ;;  %v14156_v51 = vld [vmem:[#allocation12 + $0x304] sm:$0xf0] }
0x109c   :  { %13076 = vmatmul.msk.f32.gmra.mxu0 %vm7607_vm11, %v8296_v25  ;;  %9268 = vmatpush.bf16.msrb.mxu1 %v13202_v23  ;;  %v8300_v25 = vld [vmem:[%s18090_s18 + $0x68] sm:$0xff]  ;;  %v14134_v23 = vld [vmem:[#allocation12 + $0x254] sm:$0xf0] }
0x109d   :  { %13036 = vmatmul.msk.f32.gmra.mxu2 %vm7607_vm11, %v13020_v46  ;;  %v13024_v46 = vld [vmem:[%s18090_s18 + $0xa8] sm:$0xff] }
0x109f   :  { %13053 = vmatmul.msk.f32.gmra.mxu3 %vm7607_vm11, %v13021_v42  ;;  %13093 = vmatmul.msk.f32.gmra.mxu1 %vm7607_vm11, %v8297_v1 }
0x10a0   :  { %9269 = vmatpush.bf16.msrb.mxu1 %v13194_v13  ;;  %v14186_v13 = vld [vmem:[#allocation12 + $0x3f4] sm:$0xf0] }
0x10a1   :  { %v13398_v55 = vor.u32 %v14186_v13, %v13397_v34  ;;  %v14162_v34 = vld [vmem:[#allocation12 + $0x334] sm:$0xf0] }
0x10a4   :  { %13077 = vmatmul.msk.f32.gmra.mxu0 %vm7607_vm11, %v8297_v1  ;;  %9270 = vmatpush.bf16.msrb.mxu1 %v13186_v31  ;;  %v13142_v1 = vor.u32 %v14134_v23, %v13141_v16  ;;  %v14184_v31 = vld [vmem:[#allocation12 + $0x3e4] sm:$0xf0] }
0x10a5   :  { %13037 = vmatmul.msk.f32.gmra.mxu2 %vm7607_vm11, %v13021_v42  ;;  %v13205_v42 = vld [vmem:[#allocation12 + $0x2d0] sm:$0xf]  ;;  %v14176_v23 = vld [vmem:[#allocation12 + $0x3a4] sm:$0xf0] }
0x10a6   :  { %v13206_v15 = vor.u32 %v14150_v39, %v13205_v42  ;;  %9180 = vmatpush.bf16.msrb.mxu2 %v13142_v1  ;;  %v13125_v42 = vld [vmem:[#allocation12 + $0x230] sm:$0xf]  ;;  %v14130_v1 = vld [vmem:[#allocation12 + $0x234] sm:$0xf0] }
0x10a7   :  { %13054 = vmatmul.msk.f32.gmra.mxu3 %vm7607_vm11, %v13022_v49  ;;  %13094 = vmatmul.msk.f32.gmra.mxu1 %vm7607_vm11, %v8298_v37 }
0x10a8   :  { %9271 = vmatpush.bf16.msrb.mxu1 %v13178_v29  ;;  %9209 = vmatpush.bf16.msrb.mxu3 %v13206_v15  ;;  %v14168_v29 = vld [vmem:[#allocation12 + $0x364] sm:$0xf0]  ;;  %v13126_v15 = vor.u32 %v14130_v1, %v13125_v42 }
0x10a9   :  { %v13326_v32 = vor.u32 %v14168_v29, %v13325_v28  ;;  %v13341_v28 = vld [vmem:[#allocation12 + $0x380] sm:$0xf] }
0x10aa   :  { %9181 = vmatpush.bf16.msrb.mxu2 %v13134_v54  ;;  %v14160_v54 = vld [vmem:[#allocation12 + $0x324] sm:$0xf0] }
0x10ab   :  { %v13294_v40 = vor.u32 %v14160_v54, %v13293_v19  ;;  %v13383_v54 = vld [vmem:[#allocation12 + $0x3d8] sm:$0xf0] }
0x10ac   :  { %13078 = vmatmul.msk.f32.gmra.mxu0 %vm7607_vm11, %v8298_v37  ;;  %9272 = vmatpush.bf16.msrb.mxu1 %v13170_v35  ;;  %v13333_v37 = vld [vmem:[#allocation12 + $0x370] sm:$0xf]  ;;  %v13374_v35 = vor.u32 %v14180_v24, %v13373_v33  ;;  %v14126_v33 = vld [vmem:[#allocation12 + $0x214] sm:$0xf0] }
0x10ad   :  { %13038 = vmatmul.msk.f32.gmra.mxu2 %vm7607_vm11, %v13022_v49  ;;  %v13390_v49 = vor.u32 %v14184_v31, %v13389_v10  ;;  %v13334_v14 = vor.u32 %v14170_v22, %v13333_v37  ;;  %9210 = vmatpush.bf16.msrb.mxu3 %v13198_v9  ;;  %v13349_v10 = vld [vmem:[#allocation12 + $0x390] sm:$0xf]  ;;  %v13165_v9 = vld [vmem:[#allocation12 + $0x280] sm:$0xf] }
0x10ae   :  { %9182 = vmatpush.bf16.msrb.mxu2 %v13126_v15  ;;  %v14185_v15 = vld [vmem:[#allocation12 + $0x3f4] sm:$0xf] }
0x10af   :  { %13055 = vmatmul.msk.f32.gmra.mxu3 %vm7607_vm11, %v13023_v5  ;;  %13095 = vmatmul.msk.f32.gmra.mxu1 %vm7607_vm11, %v8299_v59 }
0x10b0   :  { %9743 = vmatpush.bf16.msra.mxu1 %v13398_v55  ;;  %9714 = vmatpush.bf16.msra.mxu0 %v13334_v14  ;;  %v13173_v55 = vld [vmem:[#allocation12 + $0x290] sm:$0xf]  ;;  %v13117_v14 = vld [vmem:[#allocation12 + $0x220] sm:$0xf] }
0x10b1   :  { %v13118_v47 = vor.u32 %v14128_v18, %v13117_v14 }
0x10b3   :  { %9183 = vmatpush.bf16.msrb.mxu2 %v13118_v47  ;;  %v14181_v47 = vld [vmem:[#allocation12 + $0x3d4] sm:$0xf] }
0x10b4   :  { %13079 = vmatmul.msk.f32.gmra.mxu0 %vm7607_vm11, %v8299_v59  ;;  %9744 = vmatpush.bf16.msra.mxu1 %v13390_v49  ;;  %v13029_v59 = vld [vmem:[%s18090_s18 + $0xd0] sm:$0xff]  ;;  %v14174_v49 = vld [vmem:[#allocation12 + $0x394] sm:$0xf0] }
0x10b5   :  { %13039 = vmatmul.msk.f32.gmra.mxu2 %vm7607_vm11, %v13023_v5  ;;  %9715 = vmatpush.bf16.msra.mxu0 %v13326_v32  ;;  %v13350_v22 = vor.u32 %v14174_v49, %v13349_v10  ;;  %v14172_v32 = vld [vmem:[#allocation12 + $0x384] sm:$0xf0]  ;;  %v13391_v10 = vld [vmem:[#allocation12 + $0x3e8] sm:$0xf0]  ;;  %v14169_v49 = vld [vmem:[#allocation12 + $0x374] sm:$0xf] }
0x10b6   :  { %v13342_v24 = vor.u32 %v14172_v32, %v13341_v28  ;;  %v14179_v32 = vld [vmem:[#allocation12 + $0x3c4] sm:$0xf] }
0x10b7   :  { %13056 = vmatmul.msk.f32.gmra.mxu3 %vm7607_vm11, %v13024_v46  ;;  %13096 = vmatmul.msk.f32.gmra.mxu1 %vm7607_vm11, %v8300_v25 }
0x10b8   :  { %9745 = vmatpush.bf16.msra.mxu1 %v13382_v57  ;;  %v14140_v57 = vld [vmem:[#allocation12 + $0x284] sm:$0xf0] }
0x10b9   :  { %9716 = vmatpush.bf16.msra.mxu0 %v13318_v56  ;;  %v13166_v29 = vor.u32 %v14140_v57, %v13165_v9  ;;  %v13286_v56 = vor.u32 %v14158_v45, %v13285_v61  ;;  %v14167_v9 = vld [vmem:[#allocation12 + $0x364] sm:$0xf]  ;;  %v13327_v57 = vld [vmem:[#allocation12 + $0x368] sm:$0xf0] }
0x10bc   :  { %13080 = vmatmul.msk.f32.gmra.mxu0 %vm7607_vm11, %v8300_v25  ;;  %9746 = vmatpush.bf16.msra.mxu1 %v13374_v35  ;;  %v14178_v25 = vld [vmem:[#allocation12 + $0x3b4] sm:$0xf0] }
0x10bd   :  { %13040 = vmatmul.msk.f32.gmra.mxu2 %vm7607_vm11, %v13024_v46  ;;  %v13190_v46 = vor.u32 %v14146_v63, %v13189_v58  ;;  %v13366_v52 = vor.u32 %v14178_v25, %v13365_v2  ;;  %9717 = vmatpush.bf16.msra.mxu0 %v13310_v3  ;;  %v13101_v63 = vld [vmem:[#allocation12 + $0x200] sm:$0xf]  ;;  %v14124_v2 = vld [vmem:[#allocation12 + $0x204] sm:$0xf0] }
0x10be   :  { %v13102_v21 = vor.u32 %v14124_v2, %v13101_v63  ;;  %v14177_v63 = vld [vmem:[#allocation12 + $0x3b4] sm:$0xf]  ;;  %v13367_v2 = vld [vmem:[#allocation12 + $0x3b8] sm:$0xf0] }
0x10bf   :  { %13057 = vmatmul.msk.f32.gmra.mxu3 %vm7607_vm11, %v13025_v12  ;;  %13097 = vmatmul.msk.f32.gmra.mxu1 %vm7607_vm11, %v8301_v43 }
0x10c0   :  { %9211 = vmatpush.bf16.msrb.mxu3 %v13190_v46  ;;  %9747 = vmatpush.bf16.msra.mxu1 %v13366_v52  ;;  %v13277_v46 = vld [vmem:[#allocation12 + $0x300] sm:$0xf]  ;;  %v13032_v52 = vld [vmem:[%s18090_s18 + $0xe8] sm:$0xff] }
0x10c1   :  { %v13278_v3 = vor.u32 %v14156_v51, %v13277_v46  ;;  %v13311_v51 = vld [vmem:[#allocation12 + $0x348] sm:$0xf0] }
0x10c4   :  { %13081 = vmatmul.msk.f32.gmra.mxu0 %vm7607_vm11, %v8301_v43  ;;  %v13181_v43 = vld [vmem:[#allocation12 + $0x2a0] sm:$0xf] }
0x10c5   :  { %13041 = vmatmul.msk.f32.gmra.mxu2 %vm7607_vm11, %v13025_v12 }
0x10c7   :  { %13058 = vmatmul.msk.f32.gmra.mxu3 %vm7607_vm11, %v13026_v44  ;;  %13098 = vmatmul.msk.f32.gmra.mxu1 %vm7607_vm11, %v8302_v0 }
0x10cc   :  { %v17309_v30 = vpop.f32.mrf.mxu1  ;;  %13082 = vmatmul.msk.f32.gmra.mxu0 %vm7607_vm11, %v8302_v0  ;;  %v13357_v0 = vld [vmem:[#allocation12 + $0x3a0] sm:$0xf] }
0x10cd   :  { %13042 = vmatmul.msk.f32.gmra.mxu2 %vm7607_vm11, %v13026_v44  ;;  %v14144_v44 = vld [vmem:[#allocation12 + $0x2a4] sm:$0xf0]  ;;  %v13358_v39 = vor.u32 %v14176_v23, %v13357_v0  ;;  %v13034_v23 = vld [vmem:[%s18090_s18 + $0xf8] sm:$0xff] }
0x10ce   :  { %v13182_v16 = vor.u32 %v14144_v44, %v13181_v43  ;;  %v13033_v44 = vld [vmem:[%s18090_s18 + $0xf0] sm:$0xff] }
0x10cf   :  { %13059 = vmatmul.msk.f32.gmra.mxu3 %vm7607_vm11, %v13027_v7  ;;  %9273 = vmatmul.bf16.vlgmr.msrb.gmra.mxu1 %v17079_v60 }
0x10d0   :  { %9212 = vmatpush.bf16.msrb.mxu3 %v13182_v16  ;;  %9748 = vmatpush.bf16.msra.mxu1 %v13358_v39 }
0x10d1   :  { %v17318_v26 = vpop.f32.mrf.mxu0 }
0x10d2   :  { %18141 = vst [vmem:[#allocation24_spill] sm:$0xff] %v17318_v26 }
0x10d4   :  { %v17320_v41 = vpop.f32.mrf.mxu1  ;;  %9244 = vmatmul.bf16.vlgmr.msrb.gmra.mxu0 %v17077_v11  ;;  %9749 = vmatpush.bf16.msra.mxu1 %v13350_v22  ;;  %v13335_v22 = vld [vmem:[#allocation12 + $0x378] sm:$0xf0] }
0x10d5   :  { %13043 = vmatmul.msk.f32.gmra.mxu2 %vm7607_vm11, %v13027_v7  ;;  %v13301_v7 = vld [vmem:[#allocation12 + $0x330] sm:$0xf]  ;;  %v13338_v14 = vor.u32 %v14169_v49, %v13335_v22  ;;  %v14173_v22 = vld [vmem:[#allocation12 + $0x394] sm:$0xf] }
0x10d6   :  { %v13302_v13 = vor.u32 %v14162_v34, %v13301_v7  ;;  %v13399_v7 = vld [vmem:[#allocation12 + $0x3f8] sm:$0xf0] }
0x10d7   :  { %13060 = vmatmul.msk.f32.gmra.mxu3 %vm7607_vm11, %v13028_v50 }
0x10d8   :  { %9718 = vmatpush.bf16.msra.mxu0 %v13302_v13  ;;  %9750 = vmatpush.bf16.msra.mxu1 %v13342_v24  ;;  %v13402_v13 = vor.u32 %v14185_v15, %v13399_v7  ;;  %v13359_v15 = vld [vmem:[#allocation12 + $0x3a8] sm:$0xf0] }
0x10d9   :  { %v17328_v17 = vpop.f32.mrf.mxu0 }
0x10da   :  { %18142 = vst [vmem:[#allocation21_spill] sm:$0xff] %v17328_v17 }
0x10dc   :  { %v17330_v5 = vpop.f32.mrf.mxu1  ;;  %9719 = vmatpush.bf16.msra.mxu0 %v13294_v40  ;;  %9801 = vmatpush.bf16.msrb.mxu1 %v13402_v13  ;;  %v13386_v40 = vor.u32 %v14181_v47, %v13383_v54  ;;  %v14161_v13 = vld [vmem:[#allocation12 + $0x334] sm:$0xf] }
0x10dd   :  { %13044 = vmatmul.msk.f32.gmra.mxu2 %vm7607_vm11, %v13028_v50  ;;  %v14142_v50 = vld [vmem:[#allocation12 + $0x294] sm:$0xf0] }
0x10de   :  { %v13174_v31 = vor.u32 %v14142_v50, %v13173_v55  ;;  %v14183_v50 = vld [vmem:[#allocation12 + $0x3e4] sm:$0xf] }
0x10df   :  { %13061 = vmatmul.msk.f32.gmra.mxu3 %vm7607_vm11, %v13029_v59  ;;  %9278 = vmatmul.bf16.gmra.mxu1 %v17099_v6 }
0x10e0   :  { %9213 = vmatpush.bf16.msrb.mxu3 %v13174_v31  ;;  %9720 = vmatpush.bf16.msra.mxu0 %v13286_v56  ;;  %v13394_v31 = vor.u32 %v14183_v50, %v13391_v10  ;;  %v13303_v50 = vld [vmem:[#allocation12 + $0x338] sm:$0xf0] }
0x10e1   :  { %v17338_v62 = vpop.f32.mrf.mxu0  ;;  %v13306_v10 = vor.u32 %v14161_v13, %v13303_v50 }
0x10e2   :  { %18143 = vst [vmem:[#allocation20_spill] sm:$0xff] %v17338_v62  ;;  %9802 = vmatpush.bf16.msrb.mxu1 %v13394_v31 }
0x10e4   :  { %v17343_v12 = vpop.f32.mrf.mxu1  ;;  %9249 = vmatmul.bf16.gmra.mxu0 %v17097_v4  ;;  %9214 = vmatpush.bf16.msrb.mxu3 %v13166_v29  ;;  %v13330_v29 = vor.u32 %v14167_v9, %v13327_v57  ;;  %v13295_v9 = vld [vmem:[#allocation12 + $0x328] sm:$0xf0] }
0x10e5   :  { %13045 = vmatmul.msk.f32.gmra.mxu2 %vm7607_vm11, %v13029_v59  ;;  %v13109_v59 = vld [vmem:[#allocation12 + $0x210] sm:$0xf]  ;;  %9721 = vmatpush.bf16.msra.mxu0 %v13278_v3 }
0x10e6   :  { %v13110_v35 = vor.u32 %v14126_v33, %v13109_v59  ;;  %9803 = vmatpush.bf16.msrb.mxu1 %v13386_v40  ;;  %v13375_v59 = vld [vmem:[#allocation12 + $0x3c8] sm:$0xf0]  ;;  %v14165_v33 = vld [vmem:[#allocation12 + $0x354] sm:$0xf]  ;;  %v14159_v40 = vld [vmem:[#allocation12 + $0x324] sm:$0xf] }
0x10e7   :  { %13062 = vmatmul.msk.f32.gmra.mxu3 %vm7607_vm11, %v13030_v36  ;;  %v13378_v24 = vor.u32 %v14179_v32, %v13375_v59  ;;  %v14171_v32 = vld [vmem:[#allocation12 + $0x384] sm:$0xf]  ;;  %v13343_v59 = vld [vmem:[#allocation12 + $0x388] sm:$0xf0] }
0x10e8   :  { %9184 = vmatpush.bf16.msrb.mxu2 %v13110_v35  ;;  %v13319_v35 = vld [vmem:[#allocation12 + $0x358] sm:$0xf0] }
0x10e9   :  { %v17348_v37 = vpop.f32.mrf.mxu0  ;;  %9772 = vmatpush.bf16.msrb.mxu0 %v13338_v14  ;;  %v13322_v61 = vor.u32 %v14165_v33, %v13319_v35  ;;  %v13351_v14 = vld [vmem:[#allocation12 + $0x398] sm:$0xf0]  ;;  %v14157_v33 = vld [vmem:[#allocation12 + $0x314] sm:$0xf] }
0x10ea   :  { %18144 = vst [vmem:[#allocation23_spill] sm:$0xff] %v17348_v37  ;;  %9804 = vmatpush.bf16.msrb.mxu1 %v13378_v24  ;;  %v13354_v54 = vor.u32 %v14173_v22, %v13351_v14  ;;  %v13346_v24 = vor.u32 %v14171_v32, %v13343_v59  ;;  %v13287_v35 = vld [vmem:[#allocation12 + $0x318] sm:$0xf0]  ;;  %v17572_v37 = vld [vmem:[%s18090_s18 + $0x130] sm:$0xff] }
0x10ec   :  { %v17353_v48 = vpop.f32.mrf.mxu1  ;;  %9185 = vmatpush.bf16.msrb.mxu2 %v13102_v21  ;;  %v14163_v21 = vld [vmem:[#allocation12 + $0x344] sm:$0xf] }
0x10ed   :  { %13046 = vmatmul.msk.f32.gmra.mxu2 %vm7607_vm11, %v13030_v36  ;;  %9773 = vmatpush.bf16.msrb.mxu0 %v13330_v29  ;;  %v13298_v29 = vor.u32 %v14159_v40, %v13295_v9 }
0x10ef   :  { %13063 = vmatmul.msk.f32.gmra.mxu3 %vm7607_vm11, %v13031_v27  ;;  %9283 = vmatmul.bf16.gmra.mxu1 %v17119_v53 }
0x10f1   :  { %v17358_v58 = vpop.f32.mrf.mxu0  ;;  %9774 = vmatpush.bf16.msrb.mxu0 %v13322_v61  ;;  %v13290_v61 = vor.u32 %v14157_v33, %v13287_v35 }
0x10f2   :  { %18145 = vst [vmem:[#allocation22_spill] sm:$0xff] %v17358_v58 }
0x10f4   :  { %v17360_v25 = vpop.f32.mrf.mxu1  ;;  %9254 = vmatmul.bf16.gmra.mxu0 %v17117_v8 }
0x10f5   :  { %13047 = vmatmul.msk.f32.gmra.mxu2 %vm7607_vm11, %v13031_v27 }
0x10f7   :  { %13064 = vmatmul.msk.f32.gmra.mxu3 %vm7607_vm11, %v13032_v52 }
0x10f9   :  { %v17368_v36 = vpop.f32.mrf.mxu0 }
0x10fa   :  { %18146 = vst [vmem:[#allocation25_spill] sm:$0xff] %v17368_v36 }
0x10fc   :  { %v17370_v43 = vpop.f32.mrf.mxu1 }
0x10fd   :  { %13048 = vmatmul.msk.f32.gmra.mxu2 %vm7607_vm11, %v13032_v52  ;;  %v13370_v52 = vor.u32 %v14177_v63, %v13367_v2 }
0x10ff   :  { %13065 = vmatmul.msk.f32.gmra.mxu3 %vm7607_vm11, %v13033_v44  ;;  %9288 = vmatmul.bf16.gmra.mxu1 %v17139_v38 }
0x1100   :  { %9805 = vmatpush.bf16.msrb.mxu1 %v13370_v52 }
0x1101   :  { %v17378_v0 = vpop.f32.mrf.mxu0 }
0x1102   :  { %18147 = vst [vmem:[#allocation26_spill] sm:$0xff] %v17378_v0 }
0x1104   :  { %v17380_v16 = vpop.f32.mrf.mxu1  ;;  %9259 = vmatmul.bf16.gmra.mxu0 %v17137_v20 }
0x1105   :  { %13049 = vmatmul.msk.f32.gmra.mxu2 %vm7607_vm11, %v13033_v44  ;;  %v13314_v44 = vor.u32 %v14163_v21, %v13311_v51  ;;  %v14155_v21 = vld [vmem:[#allocation12 + $0x304] sm:$0xf]  ;;  %v13279_v51 = vld [vmem:[#allocation12 + $0x308] sm:$0xf0] }
0x1107   :  { %13066 = vmatmul.msk.f32.gmra.mxu3 %vm7607_vm11, %v13034_v23  ;;  %9775 = vmatpush.bf16.msrb.mxu0 %v13314_v44 }
0x1109   :  { %v17388_v42 = vpop.f32.mrf.mxu0 }
0x110a   :  { %18148 = vst [vmem:[#allocation27_spill] sm:$0xff] %v17388_v42 }
0x110b   :  { %9776 = vmatpush.bf16.msrb.mxu0 %v13306_v10 }
0x110c   :  { %v17390_v1 = vpop.f32.mrf.mxu1 }
0x110d   :  { %13050 = vmatmul.msk.f32.gmra.mxu2 %vm7607_vm11, %v13034_v23  ;;  %v14175_v23 = vld [vmem:[#allocation12 + $0x3a4] sm:$0xf] }
0x110e   :  { %v13362_v7 = vor.u32 %v14175_v23, %v13359_v15  ;;  %v13282_v23 = vor.u32 %v14155_v21, %v13279_v51 }
0x110f   :  { %9215 = vmatmul.bf16.vlgmr.msrb.gmra.mxu3 %v17079_v60  ;;  %9751 = vmatmul.bf16.vlgmr.msra.gmra.mxu1 %v17079_v60 }
0x1110   :  { %9806 = vmatpush.bf16.msrb.mxu1 %v13362_v7  ;;  %9777 = vmatpush.bf16.msrb.mxu0 %v13298_v29 }
0x1111   :  { %v17395_v39 = vpop.f32.mrf.mxu0 }
0x1112   :  { %18149 = vst [vmem:[#allocation28_spill] sm:$0xff] %v17395_v39  ;;  %v17397_v34 = vpop.f32.mrf.mxu3 }
0x1114   :  { %v17399_v55 = vpop.f32.mrf.mxu1  ;;  %9722 = vmatmul.bf16.vlgmr.msra.gmra.mxu0 %v17077_v11  ;;  %9807 = vmatpush.bf16.msrb.mxu1 %v13354_v54 }
0x1115   :  { %18150 = vst [vmem:[#allocation29_spill] sm:$0xff] %v17399_v55  ;;  %9186 = vmatmul.bf16.vlgmr.msrb.gmra.mxu2 %v17077_v11  ;;  %9778 = vmatpush.bf16.msrb.mxu0 %v13290_v61 }
0x1118   :  { %v17403_v18 = vpop.f32.mrf.mxu2  ;;  %9808 = vmatpush.bf16.msrb.mxu1 %v13346_v24 }
0x1119   :  { %18151 = vst [vmem:[#allocation30_spill] sm:$0xff] %v17403_v18  ;;  %v17405_v19 = vpop.f32.mrf.mxu0  ;;  %9779 = vmatpush.bf16.msrb.mxu0 %v13282_v23  ;;  %v17590_v18 = vld [vmem:[%s18090_s18 + $0x140] sm:$0xff] }
0x111a   :  { %18152 = vst [vmem:[#allocation31_spill] sm:$0xff] %v17405_v19  ;;  %v17407_v27 = vpop.f32.mrf.mxu3 }
0x111c   :  { %v17409_v28 = vpop.f32.mrf.mxu1 }
0x111d   :  { %18153 = vst [vmem:[#allocation32_spill] sm:$0xff] %v17409_v28 }
0x111f   :  { %9220 = vmatmul.bf16.gmra.mxu3 %v17099_v6  ;;  %9756 = vmatmul.bf16.gmra.mxu1 %v17099_v6 }
0x1120   :  { %v17413_v45 = vpop.f32.mrf.mxu2 }
0x1121   :  { %18154 = vst [vmem:[#allocation33_spill] sm:$0xff] %v17413_v45  ;;  %v17415_v56 = vpop.f32.mrf.mxu0 }
0x1122   :  { %18155 = vst [vmem:[#allocation34_spill] sm:$0xff] %v17415_v56  ;;  %v17417_v46 = vpop.f32.mrf.mxu3 }
0x1124   :  { %v17419_v3 = vpop.f32.mrf.mxu1  ;;  %9727 = vmatmul.bf16.gmra.mxu0 %v17097_v4 }
0x1125   :  { %18156 = vst [vmem:[#allocation35_spill] sm:$0xff] %v17419_v3  ;;  %9191 = vmatmul.bf16.gmra.mxu2 %v17097_v4 }
0x1128   :  { %v17423_v31 = vpop.f32.mrf.mxu2 }
0x1129   :  { %18157 = vst [vmem:[#allocation36_spill] sm:$0xff] %v17423_v31  ;;  %v17425_v49 = vpop.f32.mrf.mxu0  ;;  %v17579_v31 = vld [vmem:[%s18090_s18 + $0x138] sm:$0xff] }
0x112a   :  { %18158 = vst [vmem:[#allocation37_spill] sm:$0xff] %v17425_v49  ;;  %v17427_v47 = vpop.f32.mrf.mxu3 }
0x112c   :  { %v17429_v57 = vpop.f32.mrf.mxu1 }
0x112d   :  { %18159 = vst [vmem:[#allocation38_spill] sm:$0xff] %v17429_v57 }
0x112f   :  { %9225 = vmatmul.bf16.gmra.mxu3 %v17119_v53  ;;  %9761 = vmatmul.bf16.gmra.mxu1 %v17119_v53 }
0x1130   :  { %v17433_v63 = vpop.f32.mrf.mxu2 }
0x1131   :  { %18160 = vst [vmem:[#allocation39_spill] sm:$0xff] %v17433_v63  ;;  %v17435_v2 = vpop.f32.mrf.mxu0 }
0x1132   :  { %18161 = vst [vmem:[#allocation40_spill] sm:$0xff] %v17435_v2  ;;  %v17437_v52 = vpop.f32.mrf.mxu3 }
0x1134   :  { %v17439_v44 = vpop.f32.mrf.mxu1  ;;  %9732 = vmatmul.bf16.gmra.mxu0 %v17117_v8 }
0x1135   :  { %18162 = vst [vmem:[#allocation41_spill] sm:$0xff] %v17439_v44  ;;  %9196 = vmatmul.bf16.gmra.mxu2 %v17117_v8 }
0x1138   :  { %v17443_v15 = vpop.f32.mrf.mxu2 }
0x1139   :  { %18163 = vst [vmem:[#allocation42_spill] sm:$0xff] %v17443_v15  ;;  %v17445_v7 = vpop.f32.mrf.mxu0 }
0x113a   :  { %18164 = vst [vmem:[#allocation43_spill] sm:$0xff] %v17445_v7  ;;  %v17447_v13 = vpop.f32.mrf.mxu3 }
0x113c   :  { %v17449_v50 = vpop.f32.mrf.mxu1 }
0x113d   :  { %18165 = vst [vmem:[#allocation44_spill] sm:$0xff] %v17449_v50 }
0x113f   :  { %9230 = vmatmul.bf16.gmra.mxu3 %v17139_v38  ;;  %9766 = vmatmul.bf16.gmra.mxu1 %v17139_v38 }
0x1140   :  { %v17453_v10 = vpop.f32.mrf.mxu2 }
0x1141   :  { %18166 = vst [vmem:[#allocation45_spill] sm:$0xff] %v17453_v10  ;;  %v17455_v22 = vpop.f32.mrf.mxu0 }
0x1142   :  { %18167 = vst [vmem:[#allocation46_spill] sm:$0xff] %v17455_v22  ;;  %v17457_v14 = vpop.f32.mrf.mxu3 }
0x1144   :  { %v17459_v54 = vpop.f32.mrf.mxu1  ;;  %9737 = vmatmul.bf16.gmra.mxu0 %v17137_v20 }
0x1145   :  { %18168 = vst [vmem:[#allocation47_spill] sm:$0xff] %v17459_v54  ;;  %9201 = vmatmul.bf16.gmra.mxu2 %v17137_v20 }
0x1148   :  { %v17463_v40 = vpop.f32.mrf.mxu2 }
0x1149   :  { %18169 = vst [vmem:[#allocation48_spill] sm:$0xff] %v17463_v40  ;;  %v17465_v9 = vpop.f32.mrf.mxu0 }
0x114a   :  { %18170 = vst [vmem:[#allocation49_spill] sm:$0xff] %v17465_v9  ;;  %v17467_v29 = vpop.f32.mrf.mxu3 }
0x114c   :  { %v9274_v32 = vpop.f32.mrf.mxu1 }
0x114f   :  { %9809 = vmatmul.bf16.vlgmr.msrb.gmra.mxu1 %v17079_v60 }
0x1150   :  { %v17470_v59 = vpop.f32.mrf.mxu2 }
0x1151   :  { %18171 = vst [vmem:[#allocation50_spill] sm:$0xff] %v17470_v59  ;;  %v9245_v33 = vpop.f32.mrf.mxu0 }
0x1152   :  { %v17472_v24 = vpop.f32.mrf.mxu3  ;;  %v9275_v35 = vadd.f32 %v9274_v32, %v9245_v33 }
0x1154   :  { %v9276_v61 = vpop.f32.mrf.mxu1  ;;  %9780 = vmatmul.bf16.vlgmr.msrb.gmra.mxu0 %v17077_v11 }
0x1158   :  { %v17475_v21 = vpop.f32.mrf.mxu2 }
0x1159   :  { %18172 = vst [vmem:[#allocation51_spill] sm:$0xff] %v17475_v21  ;;  %v9247_v51 = vpop.f32.mrf.mxu0 }
0x115a   :  { %v17477_v23 = vpop.f32.mrf.mxu3 }
0x115b   :  { %18173 = vst [vmem:[#allocation52_spill] sm:$0xff] %v17477_v23 }
0x115c   :  { %v9279_v9 = vpop.f32.mrf.mxu1 }
0x115f   :  { %9814 = vmatmul.bf16.gmra.mxu1 %v17099_v6 }
0x1160   :  { %v17480_v22 = vpop.f32.mrf.mxu2 }
0x1161   :  { %18174 = vst [vmem:[#allocation53_spill] sm:$0xff] %v17480_v22  ;;  %v9250_v60 = vpop.f32.mrf.mxu0 }
0x1162   :  { %v17482_v7 = vpop.f32.mrf.mxu3 }
0x1163   :  { %18175 = vst [vmem:[#allocation54_spill] sm:$0xff] %v17482_v7 }
0x1164   :  { %v9281_v2 = vpop.f32.mrf.mxu1  ;;  %9785 = vmatmul.bf16.gmra.mxu0 %v17097_v4 }
0x1168   :  { %v17485_v32 = vpop.f32.mrf.mxu2 }
0x1169   :  { %18176 = vst [vmem:[#allocation55_spill] sm:$0xff] %v17485_v32  ;;  %v9252_v33 = vpop.f32.mrf.mxu0 }
0x116a   :  { %v17487_v11 = vpop.f32.mrf.mxu3 }
0x116b   :  { %18177 = vst [vmem:[#allocation56_spill] sm:$0xff] %v17487_v11 }
0x116c   :  { %v9284_v49 = vpop.f32.mrf.mxu1 }
0x116f   :  { %9819 = vmatmul.bf16.gmra.mxu1 %v17119_v53 }
0x1170   :  { %v17490_v56 = vpop.f32.mrf.mxu2 }
0x1171   :  { %18178 = vst [vmem:[#allocation57_spill] sm:$0xff] %v17490_v56  ;;  %v9255_v19 = vpop.f32.mrf.mxu0 }
0x1172   :  { %v17492_v6 = vpop.f32.mrf.mxu3 }
0x1173   :  { %18179 = vst [vmem:[#allocation58_spill] sm:$0xff] %v17492_v6 }
0x1174   :  { %v9286_v22 = vpop.f32.mrf.mxu1  ;;  %9790 = vmatmul.bf16.gmra.mxu0 %v17117_v8 }
0x1178   :  { %v17495_v39 = vpop.f32.mrf.mxu2 }
0x1179   :  { %18180 = vst [vmem:[#allocation59_spill] sm:$0xff] %v17495_v39  ;;  %v9257_v21 = vpop.f32.mrf.mxu0 }
0x117a   :  { %v17497_v4 = vpop.f32.mrf.mxu3  ;;  %v9287_v36 = vadd.f32 %v9286_v22, %v9257_v21 }
0x117b   :  { %18181 = vst [vmem:[#allocation60_spill] sm:$0xff] %v17497_v4 }
0x117c   :  { %v9289_v32 = vpop.f32.mrf.mxu1 }
0x117f   :  { %9824 = vmatmul.bf16.gmra.mxu1 %v17139_v38  ;;  %v9285_v38 = vadd.f32 %v9284_v49, %v9255_v19 }
0x1180   :  { %v17500_v42 = vpop.f32.mrf.mxu2 }
0x1181   :  { %18182 = vst [vmem:[#allocation61_spill] sm:$0xff] %v17500_v42  ;;  %v9260_v59 = vpop.f32.mrf.mxu0 }
0x1182   :  { %v17502_v53 = vpop.f32.mrf.mxu3  ;;  %v9290_v40 = vadd.f32 %v9289_v32, %v9260_v59  ;;  %v17551_v32 = vld [vmem:[%s18090_s18 + $0x118] sm:$0xff] }
0x1183   :  { %18183 = vst [vmem:[#allocation62_spill] sm:$0xff] %v17502_v53  ;;  %v9282_v53 = vadd.f32 %v9281_v2, %v9252_v33 }
0x1184   :  { %v9291_v56 = vpop.f32.mrf.mxu1  ;;  %9795 = vmatmul.bf16.gmra.mxu0 %v17137_v20 }
0x1188   :  { %v17505_v54 = vpop.f32.mrf.mxu2 }
0x1189   :  { %18184 = vst [vmem:[#allocation63_spill] sm:$0xff] %v17505_v54  ;;  %v9262_v0 = vpop.f32.mrf.mxu0  ;;  %v9280_v54 = vadd.f32 %v9279_v9, %v9250_v60 }
0x118a   :  { %v17507_v8 = vpop.f32.mrf.mxu3  ;;  %v9292_v39 = vadd.f32 %v9291_v56, %v9262_v0  ;;  %v9277_v0 = vadd.f32 %v9276_v61, %v9247_v51 }
0x118b   :  { %18185 = vst [vmem:[#allocation64_spill] sm:$0xff] %v17507_v8  ;;  %v17565_v8 = vld [vmem:[%s18090_s18 + $0x128] sm:$0xff] }
0x118c   :  { %v9752_v50 = vpop.f32.mrf.mxu1  ;;  %9432 = vmatpush.msra.mxu3 %v9292_v39  ;;  %v17520_v39 = vld [vmem:[%s18090_s18 + $0x100] sm:$0xff] }
0x118e   :  { %9433 = vmatpush.msra.mxu3 %v9290_v40 }
0x1190   :  { %v17509_v10 = vpop.f32.mrf.mxu2  ;;  %9434 = vmatpush.msra.mxu3 %v9287_v36 }
0x1191   :  { %18186 = vst [vmem:[#allocation65_spill] sm:$0xff] %v17509_v10  ;;  %v9723_v42 = vpop.f32.mrf.mxu0 }
0x1192   :  { %v17511_v44 = vpop.f32.mrf.mxu3  ;;  %v17513_v20 = vadd.f32 %v9752_v50, %v9723_v42  ;;  %9435 = vmatpush.msra.mxu3 %v9285_v38  ;;  %v17531_v50 = vld [vmem:[%s18090_s18 + $0x108] sm:$0xff] }
0x1194   :  { %v9754_v4 = vpop.f32.mrf.mxu1  ;;  %9436 = vmatpush.msra.mxu3 %v9282_v53 }
0x1196   :  { %9437 = vmatpush.msra.mxu3 %v9280_v54 }
0x1198   :  { %v17515_v56 = vpop.f32.mrf.mxu2  ;;  %9438 = vmatpush.msra.mxu3 %v9277_v0  ;;  %v17558_v0 = vld [vmem:[%s18090_s18 + $0x120] sm:$0xff] }
0x1199   :  { %v9725_v36 = vpop.f32.mrf.mxu0 }
0x119a   :  { %v17522_v19 = vpop.f32.mrf.mxu3  ;;  %v17524_v49 = vadd.f32 %v9754_v4, %v9725_v36  ;;  %9439 = vmatpush.msra.mxu3 %v9275_v35  ;;  %v17542_v35 = vld [vmem:[%s18090_s18 + $0x110] sm:$0xff] }
0x119b   :  { %13259 = vmatmul.msk.f32.vlgmr.msra.gmra.mxu3 %vm7607_vm11, %v17520_v39 }
0x119c   :  { %v9757_v42 = vpop.f32.mrf.mxu1 }
0x11a0   :  { %v9189_v2 = vpop.f32.mrf.mxu2 }
0x11a1   :  { %v9728_v22 = vpop.f32.mrf.mxu0 }
0x11a2   :  { %v9221_v54 = vpop.f32.mrf.mxu3  ;;  %v17533_v40 = vadd.f32 %v9757_v42, %v9728_v22 }
0x11a3   :  { %13260 = vmatmul.msk.f32.gmra.mxu3 %vm7607_vm11, %v17531_v50 }
0x11a4   :  { %v17537_v9 = vpop.f32.mrf.mxu1 }
0x11a8   :  { %v9192_v59 = vpop.f32.mrf.mxu2 }
0x11a9   :  { %v17544_v61 = vpop.f32.mrf.mxu0 }
0x11aa   :  { %v9223_v21 = vpop.f32.mrf.mxu3 }
0x11ab   :  { %13261 = vmatmul.msk.f32.gmra.mxu3 %vm7607_vm11, %v17542_v35 }
0x11ac   :  { %v9762_v51 = vpop.f32.mrf.mxu1 }
0x11b0   :  { %v9194_v60 = vpop.f32.mrf.mxu2 }
0x11b1   :  { %v9733_v33 = vpop.f32.mrf.mxu0 }
0x11b2   :  { %v9226_v4 = vpop.f32.mrf.mxu3 }
0x11b3   :  { %13262 = vmatmul.msk.f32.gmra.mxu3 %vm7607_vm11, %v17551_v32 }
0x11b4   :  { %v9764_v53 = vpop.f32.mrf.mxu1 }
0x11b8   :  { %v9197_v38 = vpop.f32.mrf.mxu2 }
0x11b9   :  { %v9735_v36 = vpop.f32.mrf.mxu0  ;;  %v9227_v26 = vadd.f32 %v9226_v4, %v9197_v38  ;;  %v13403_v38 = vld [vmem:[%s18090_s18 + $0x180] sm:$0xff] }
0x11ba   :  { %v9228_v42 = vpop.f32.mrf.mxu3 }
0x11bb   :  { %13263 = vmatmul.msk.f32.gmra.mxu3 %vm7607_vm11, %v17558_v0 }
0x11bc   :  { %v9767_v22 = vpop.f32.mrf.mxu1 }
0x11c0   :  { %v9199_v10 = vpop.f32.mrf.mxu2 }
0x11c1   :  { %v9738_v58 = vpop.f32.mrf.mxu0  ;;  %v9229_v23 = vadd.f32 %v9228_v42, %v9199_v10  ;;  %v17602_v10 = vld [vmem:[%s18090_s18 + $0x148] sm:$0xff] }
0x11c2   :  { %v9231_v57 = vpop.f32.mrf.mxu3 }
0x11c3   :  { %13264 = vmatmul.msk.f32.gmra.mxu3 %vm7607_vm11, %v17565_v8 }
0x11c4   :  { %v9769_v15 = vpop.f32.mrf.mxu1 }
0x11c8   :  { %v9202_v6 = vpop.f32.mrf.mxu2 }
0x11c9   :  { %v9740_v63 = vpop.f32.mrf.mxu0  ;;  %v9232_v45 = vadd.f32 %v9231_v57, %v9202_v6  ;;  %v9222_v57 = vadd.f32 %v9221_v54, %v9192_v59  ;;  %v17634_v54 = vld [vmem:[%s18090_s18 + $0x160] sm:$0xff]  ;;  %v17652_v59 = vld [vmem:[%s18090_s18 + $0x170] sm:$0xff] }
0x11ca   :  { %v9233_v11 = vpop.f32.mrf.mxu3 }
0x11cb   :  { %13265 = vmatmul.msk.f32.gmra.mxu3 %vm7607_vm11, %v17572_v37 }
0x11cc   :  { %v9810_v3 = vpop.f32.mrf.mxu1 }
0x11d0   :  { %v9204_v62 = vpop.f32.mrf.mxu2 }
0x11d1   :  { %v9234_v28 = vadd.f32 %v9233_v11, %v9204_v62  ;;  %v9781_v7 = vpop.f32.mrf.mxu0  ;;  %v9224_v62 = vadd.f32 %v9223_v21, %v9194_v60  ;;  %v9768_v11 = vadd.f32 %v9767_v22, %v9738_v58 }
0x11d2   :  { %v17581_v17 = vadd.f32 %v9810_v3, %v9781_v7  ;;  %v9219_v7 = vadd.f32 %v17522_v19, %v9189_v2  ;;  %v9765_v19 = vadd.f32 %v9764_v53, %v9735_v36 }
0x11d3   :  { %9367 = vmatpush.msra.mxu2 %v9234_v28  ;;  %13266 = vmatmul.msk.f32.gmra.mxu3 %vm7607_vm11, %v17579_v31 }
0x11d4   :  { %v17585_v55 = vpop.f32.mrf.mxu1 }
0x11d5   :  { %9368 = vmatpush.msra.mxu2 %v9232_v45  ;;  %v9217_v45 = vadd.f32 %v17511_v44, %v17515_v56  ;;  %v9763_v44 = vadd.f32 %v9762_v51, %v9733_v33  ;;  %v17611_v56 = vld [vmem:[%s18090_s18 + $0x150] sm:$0xff]  ;;  %v13242_v33 = vld [vmem:[%s18090_s18 + $0x178] sm:$0xff] }
0x11d7   :  { %9369 = vmatpush.msra.mxu2 %v9229_v23 }
0x11d9   :  { %9370 = vmatpush.msra.mxu2 %v9227_v26  ;;  %v17592_v3 = vpop.f32.mrf.mxu0  ;;  %v9770_v26 = vadd.f32 %v9769_v15, %v9740_v63  ;;  %v9760_v63 = vadd.f32 %v17537_v9, %v17544_v61 }
0x11da   :  { %v9813_v53 = vadd.f32 %v17585_v55, %v17592_v3  ;;  %v13404_v55 = vld [vmem:[%s18090_s18 + $0x188] sm:$0xff] }
0x11db   :  { %9371 = vmatpush.msra.mxu2 %v9224_v62  ;;  %13267 = vmatmul.msk.f32.gmra.mxu3 %vm7607_vm11, %v17590_v18 }
0x11dc   :  { %v9815_v28 = vpop.f32.mrf.mxu1 }
0x11dd   :  { %9372 = vmatpush.msra.mxu2 %v9222_v57 }
0x11df   :  { %9373 = vmatpush.msra.mxu2 %v9219_v7 }
0x11e1   :  { %9374 = vmatpush.msra.mxu2 %v9217_v45  ;;  %v9786_v23 = vpop.f32.mrf.mxu0 }
0x11e2   :  { %13243 = vmatmul.msk.f32.vlgmr.msra.gmra.mxu2 %vm7607_vm11, %v17520_v39  ;;  %v17624_v39 = vld [vmem:[%s18090_s18 + $0x158] sm:$0xff] }
0x11e3   :  { %9903 = vmatpush.msrb.mxu2 %v9770_v26  ;;  %13268 = vmatmul.msk.f32.gmra.mxu3 %vm7607_vm11, %v17602_v10 }
0x11e4   :  { %v9817_v6 = vpop.f32.mrf.mxu1 }
0x11e5   :  { %9904 = vmatpush.msrb.mxu2 %v9768_v11 }
0x11e7   :  { %9905 = vmatpush.msrb.mxu2 %v9765_v19 }
0x11e9   :  { %9906 = vmatpush.msrb.mxu2 %v9763_v44  ;;  %v9788_v15 = vpop.f32.mrf.mxu0  ;;  %v18188_v44 = vld [vmem:[#allocation24_spill] sm:$0xff] }
0x11ea   :  { %13244 = vmatmul.msk.f32.gmra.mxu2 %vm7607_vm11, %v17531_v50  ;;  %v9818_v4 = vadd.f32 %v9817_v6, %v9788_v15  ;;  %v18190_v15 = vld [vmem:[#allocation29_spill] sm:$0xff] }
0x11eb   :  { %9907 = vmatpush.msrb.mxu2 %v9760_v63  ;;  %13269 = vmatmul.msk.f32.gmra.mxu3 %vm7607_vm11, %v17611_v56  ;;  %v18189_v63 = vld [vmem:[#allocation52_spill] sm:$0xff] }
0x11ec   :  { %v9820_v58 = vpop.f32.mrf.mxu1 }
0x11ed   :  { %9908 = vmatpush.msrb.mxu2 %v17533_v40  ;;  %v17643_v40 = vld [vmem:[%s18090_s18 + $0x168] sm:$0xff] }
0x11ef   :  { %9909 = vmatpush.msrb.mxu2 %v17524_v49 }
0x11f1   :  { %9910 = vmatpush.msrb.mxu2 %v17513_v20  ;;  %v9791_v2 = vpop.f32.mrf.mxu0 }
0x11f2   :  { %13245 = vmatmul.msk.f32.gmra.mxu2 %vm7607_vm11, %v17542_v35 }
0x11f3   :  { %13270 = vmatmul.msk.f32.gmra.mxu3 %vm7607_vm11, %v17624_v39 }
0x11f4   :  { %v9822_v50 = vpop.f32.mrf.mxu1 }
0x11f9   :  { %v9793_v49 = vpop.f32.mrf.mxu0 }
0x11fa   :  { %13246 = vmatmul.msk.f32.gmra.mxu2 %vm7607_vm11, %v17551_v32  ;;  %v9823_v60 = vadd.f32 %v9822_v50, %v9793_v49  ;;  %v9821_v32 = vadd.f32 %v9820_v58, %v9791_v2  ;;  %v8965_v58 = vadd.f32 %v18190_v15, %v18189_v63  ;;  %v17793_v50 = vld [vmem:[%s18090_s18 + $0x1d0] sm:$0xff]  ;;  %v18192_v49 = vld [vmem:[#allocation21_spill] sm:$0xff] }
0x11fb   :  { %13271 = vmatmul.msk.f32.gmra.mxu3 %vm7607_vm11, %v17634_v54 }
0x11fc   :  { %v9825_v20 = vpop.f32.mrf.mxu1 }
0x1201   :  { %v9796_v9 = vpop.f32.mrf.mxu0 }
0x1202   :  { %13247 = vmatmul.msk.f32.gmra.mxu2 %vm7607_vm11, %v17558_v0  ;;  %v9826_v51 = vadd.f32 %v9825_v20, %v9796_v9  ;;  %v18194_v9 = vld [vmem:[#allocation32_spill] sm:$0xff] }
0x1203   :  { %13272 = vmatmul.msk.f32.gmra.mxu3 %vm7607_vm11, %v17643_v40 }
0x1204   :  { %v9827_v35 = vpop.f32.mrf.mxu1 }
0x1209   :  { %v9798_v61 = vpop.f32.mrf.mxu0 }
0x120a   :  { %13248 = vmatmul.msk.f32.gmra.mxu2 %vm7607_vm11, %v17565_v8  ;;  %v9828_v21 = vadd.f32 %v9827_v35, %v9798_v61  ;;  %v9816_v8 = vadd.f32 %v9815_v28, %v9786_v23 }
0x120b   :  { %13273 = vmatmul.msk.f32.gmra.mxu3 %vm7607_vm11, %v17652_v59 }
0x120c   :  { %9968 = vmatpush.msrb.mxu3 %v9828_v21 }
0x120e   :  { %9969 = vmatpush.msrb.mxu3 %v9826_v51 }
0x1210   :  { %9970 = vmatpush.msrb.mxu3 %v9823_v60  ;;  %v17809_v60 = vld [vmem:[%s18090_s18 + $0x1d8] sm:$0xff] }
0x1212   :  { %13249 = vmatmul.msk.f32.gmra.mxu2 %vm7607_vm11, %v17572_v37  ;;  %9971 = vmatpush.msrb.mxu3 %v9821_v32  ;;  %v8938_v37 = vadd.f32 %v17309_v30, %v17397_v34  ;;  %v13405_v30 = vld [vmem:[%s18090_s18 + $0x190] sm:$0xff]  ;;  %v8944_v34 = vadd.f32 %v17330_v5, %v17417_v46  ;;  %v17713_v5 = vld [vmem:[%s18090_s18 + $0x1a0] sm:$0xff]  ;;  %v8950_v46 = vadd.f32 %v17353_v48, %v17437_v52 }
0x1213   :  { %13274 = vmatmul.msk.f32.gmra.mxu3 %vm7607_vm11, %v13242_v33  ;;  %v17739_v48 = vld [vmem:[%s18090_s18 + $0x1b0] sm:$0xff]  ;;  %v8956_v52 = vadd.f32 %v17370_v43, %v17457_v14  ;;  %v17765_v43 = vld [vmem:[%s18090_s18 + $0x1c0] sm:$0xff]  ;;  %v8962_v14 = vadd.f32 %v17390_v1, %v17472_v24 }
0x1214   :  { %9972 = vmatpush.msrb.mxu3 %v9818_v4  ;;  %v18195_v32 = vld [vmem:[#allocation36_spill] sm:$0xff] }
0x1216   :  { %9973 = vmatpush.msrb.mxu3 %v9816_v8  ;;  %v18197_v8 = vld [vmem:[#allocation56_spill] sm:$0xff] }
0x1218   :  { %9974 = vmatpush.msrb.mxu3 %v9813_v53  ;;  %v18198_v53 = vld [vmem:[#allocation35_spill] sm:$0xff] }
0x121a   :  { %13250 = vmatmul.msk.f32.gmra.mxu2 %vm7607_vm11, %v17579_v31  ;;  %9975 = vmatpush.msrb.mxu3 %v17581_v17  ;;  %v8941_v17 = vadd.f32 %v17320_v41, %v17407_v27  ;;  %v17700_v41 = vld [vmem:[%s18090_s18 + $0x198] sm:$0xff]  ;;  %v8947_v27 = vadd.f32 %v17343_v12, %v17427_v47  ;;  %v17726_v12 = vld [vmem:[%s18090_s18 + $0x1a8] sm:$0xff]  ;;  %v8953_v47 = vadd.f32 %v17360_v25, %v17447_v13 }
0x121b   :  { %13435 = vmatmul.msk.f32.vlgmr.msrb.gmra.mxu3 %vm7607_vm11, %v13403_v38  ;;  %v17752_v25 = vld [vmem:[%s18090_s18 + $0x1b8] sm:$0xff]  ;;  %v8959_v13 = vadd.f32 %v17380_v16, %v17467_v29  ;;  %v17777_v16 = vld [vmem:[%s18090_s18 + $0x1c8] sm:$0xff]  ;;  %v18187_v29 = vld [vmem:[#allocation30_spill] sm:$0xff] }
0x121e   :  { %v9441_v0 = vpop.f32.mrf.mxu3 }
0x121f   :  { %v17675_v36 = vadd.f32 %v9441_v0, %v8938_v37 }
0x1222   :  { %13251 = vmatmul.msk.f32.gmra.mxu2 %vm7607_vm11, %v17590_v18 }
0x1223   :  { %13436 = vmatmul.msk.f32.gmra.mxu3 %vm7607_vm11, %v13404_v55 }
0x1226   :  { %v9444_v31 = vpop.f32.mrf.mxu3 }
0x1227   :  { %v17685_v42 = vadd.f32 %v9444_v31, %v8941_v17  ;;  %v17825_v31 = vld [vmem:[%s18090_s18 + $0x1e0] sm:$0xff] }
0x122a   :  { %13252 = vmatmul.msk.f32.gmra.mxu2 %vm7607_vm11, %v17602_v10 }
0x122b   :  { %13437 = vmatmul.msk.f32.gmra.mxu3 %vm7607_vm11, %v13405_v30 }
0x122e   :  { %v9447_v18 = vpop.f32.mrf.mxu3 }
0x122f   :  { %v17695_v22 = vadd.f32 %v9447_v18, %v8944_v34  ;;  %v18200_v34 = vld [vmem:[#allocation23_spill] sm:$0xff] }
0x1232   :  { %13253 = vmatmul.msk.f32.gmra.mxu2 %vm7607_vm11, %v17611_v56  ;;  %v8873_v56 = vadd.f32 %v18188_v44, %v18187_v29 }
0x1233   :  { %13438 = vmatmul.msk.f32.gmra.mxu3 %vm7607_vm11, %v17700_v41 }
0x1236   :  { %v9450_v62 = vpop.f32.mrf.mxu3 }
0x1237   :  { %v17708_v3 = vadd.f32 %v9450_v62, %v8947_v27  ;;  %v18201_v27 = vld [vmem:[#allocation58_spill] sm:$0xff] }
0x1238   :  { %v18202_v62 = vld [vmem:[#allocation38_spill] sm:$0xff] }
0x123a   :  { %13254 = vmatmul.msk.f32.gmra.mxu2 %vm7607_vm11, %v17624_v39 }
0x123b   :  { %13439 = vmatmul.msk.f32.gmra.mxu3 %vm7607_vm11, %v17713_v5 }
0x123e   :  { %v9453_v57 = vpop.f32.mrf.mxu3 }
0x123f   :  { %v17721_v28 = vadd.f32 %v9453_v57, %v8950_v46  ;;  %v8974_v46 = vadd.f32 %v18202_v62, %v18201_v27 }
0x1242   :  { %13255 = vmatmul.msk.f32.gmra.mxu2 %vm7607_vm11, %v17634_v54  ;;  %v18191_v54 = vld [vmem:[#allocation33_spill] sm:$0xff] }
0x1243   :  { %13440 = vmatmul.msk.f32.gmra.mxu3 %vm7607_vm11, %v17726_v12  ;;  %v8876_v20 = vadd.f32 %v18192_v49, %v18191_v54  ;;  %v18209_v54 = vld [vmem:[#allocation62_spill] sm:$0xff]  ;;  %v18210_v49 = vld [vmem:[#allocation44_spill] sm:$0xff] }
0x1246   :  { %v9456_v7 = vpop.f32.mrf.mxu3 }
0x1247   :  { %v17734_v45 = vadd.f32 %v9456_v7, %v8953_v47 }
0x124a   :  { %13256 = vmatmul.msk.f32.gmra.mxu2 %vm7607_vm11, %v17643_v40  ;;  %v18193_v40 = vld [vmem:[#allocation54_spill] sm:$0xff] }
0x124b   :  { %13441 = vmatmul.msk.f32.gmra.mxu3 %vm7607_vm11, %v17739_v48 }
0x124e   :  { %v9459_v10 = vpop.f32.mrf.mxu3 }
0x124f   :  { %v17747_v26 = vadd.f32 %v9459_v10, %v8956_v52  ;;  %v17842_v10 = vld [vmem:[%s18090_s18 + $0x1e8] sm:$0xff] }
0x1252   :  { %13257 = vmatmul.msk.f32.gmra.mxu2 %vm7607_vm11, %v17652_v59  ;;  %v8968_v59 = vadd.f32 %v18194_v9, %v18193_v40 }
0x1253   :  { %13442 = vmatmul.msk.f32.gmra.mxu3 %vm7607_vm11, %v17752_v25 }
0x1256   :  { %v9462_v23 = vpop.f32.mrf.mxu3 }
0x1257   :  { %v17760_v11 = vadd.f32 %v9462_v23, %v8959_v13  ;;  %v18204_v13 = vld [vmem:[#allocation22_spill] sm:$0xff] }
0x125a   :  { %13258 = vmatmul.msk.f32.gmra.mxu2 %vm7607_vm11, %v13242_v33  ;;  %v18196_v33 = vld [vmem:[#allocation20_spill] sm:$0xff] }
0x125b   :  { %13443 = vmatmul.msk.f32.gmra.mxu3 %vm7607_vm11, %v17765_v43  ;;  %v8879_v4 = vadd.f32 %v18196_v33, %v18195_v32  ;;  %v18212_v32 = vld [vmem:[#allocation26_spill] sm:$0xff] }
0x125e   :  { %v9465_v6 = vpop.f32.mrf.mxu3 }
0x125f   :  { %v17772_v19 = vadd.f32 %v9465_v6, %v8962_v14  ;;  %v18205_v14 = vld [vmem:[#allocation60_spill] sm:$0xff]  ;;  %v18206_v6 = vld [vmem:[#allocation41_spill] sm:$0xff] }
0x1260   :  { %v8977_v29 = vadd.f32 %v18206_v6, %v18205_v14 }
0x1262   :  { %13419 = vmatmul.msk.f32.vlgmr.msrb.gmra.mxu2 %vm7607_vm11, %v13403_v38  ;;  %v8971_v38 = vadd.f32 %v18198_v53, %v18197_v8  ;;  %v18214_v8 = vld [vmem:[#allocation47_spill] sm:$0xff] }
0x1263   :  { %13444 = vmatmul.msk.f32.gmra.mxu3 %vm7607_vm11, %v17777_v16 }
0x1265   :  { %v9376_v1 = vpop.f32.mrf.mxu2 }
0x1266   :  { %v17786_v24 = vadd.f32 %v9376_v1, %v8873_v56  ;;  %v9468_v39 = vpop.f32.mrf.mxu3  ;;  %v18208_v1 = vld [vmem:[#allocation25_spill] sm:$0xff] }
0x1267   :  { %v17788_v2 = vadd.f32 %v9468_v39, %v8965_v58  ;;  %v17859_v58 = vld [vmem:[%s18090_s18 + $0x1f0] sm:$0xff] }
0x126a   :  { %13420 = vmatmul.msk.f32.gmra.mxu2 %vm7607_vm11, %v13404_v55 }
0x126b   :  { %13445 = vmatmul.msk.f32.gmra.mxu3 %vm7607_vm11, %v17793_v50 }
0x126d   :  { %v9379_v35 = vpop.f32.mrf.mxu2 }
0x126e   :  { %v17802_v61 = vadd.f32 %v9379_v35, %v8876_v20  ;;  %v9471_v21 = vpop.f32.mrf.mxu3  ;;  %v8980_v20 = vadd.f32 %v18210_v49, %v18209_v54 }
0x126f   :  { %v17804_v51 = vadd.f32 %v9471_v21, %v8968_v59  ;;  %v17876_v21 = vld [vmem:[%s18090_s18 + $0x1f8] sm:$0xff] }
0x1272   :  { %13421 = vmatmul.msk.f32.gmra.mxu2 %vm7607_vm11, %v13405_v30  ;;  %v18199_v30 = vld [vmem:[#allocation39_spill] sm:$0xff] }
0x1273   :  { %13446 = vmatmul.msk.f32.gmra.mxu3 %vm7607_vm11, %v17809_v60  ;;  %v8882_v18 = vadd.f32 %v18200_v34, %v18199_v30  ;;  %v18215_v34 = vld [vmem:[#allocation50_spill] sm:$0xff] }
0x1275   :  { %v9382_v37 = vpop.f32.mrf.mxu2 }
0x1276   :  { %v17818_v0 = vadd.f32 %v9382_v37, %v8879_v4  ;;  %v9474_v55 = vpop.f32.mrf.mxu3  ;;  %v18213_v4 = vld [vmem:[#allocation64_spill] sm:$0xff] }
0x1277   :  { %v17820_v17 = vadd.f32 %v9474_v55, %v8971_v38  ;;  %v8983_v53 = vadd.f32 %v18214_v8, %v18213_v4 }
0x127a   :  { %13422 = vmatmul.msk.f32.gmra.mxu2 %vm7607_vm11, %v17700_v41  ;;  %v18203_v41 = vld [vmem:[#allocation42_spill] sm:$0xff] }
0x127b   :  { %13447 = vmatmul.msk.f32.gmra.mxu3 %vm7607_vm11, %v17825_v31  ;;  %v8885_v23 = vadd.f32 %v18204_v13, %v18203_v41  ;;  %v18218_v41 = vld [vmem:[#allocation28_spill] sm:$0xff] }
0x127d   :  { %v9385_v57 = vpop.f32.mrf.mxu2 }
0x127e   :  { %v17835_v47 = vadd.f32 %v9385_v57, %v8882_v18  ;;  %v9477_v7 = vpop.f32.mrf.mxu3 }
0x127f   :  { %v17837_v52 = vadd.f32 %v9477_v7, %v8974_v46  ;;  %v18217_v7 = vld [vmem:[#allocation51_spill] sm:$0xff] }
0x1280   :  { %v8897_v13 = vadd.f32 %v18218_v41, %v18217_v7 }
0x1282   :  { %13423 = vmatmul.msk.f32.gmra.mxu2 %vm7607_vm11, %v17713_v5  ;;  %v18207_v5 = vld [vmem:[#allocation45_spill] sm:$0xff] }
0x1283   :  { %13448 = vmatmul.msk.f32.gmra.mxu3 %vm7607_vm11, %v17842_v10  ;;  %v8888_v39 = vadd.f32 %v18208_v1, %v18207_v5 }
0x1285   :  { %v9388_v44 = vpop.f32.mrf.mxu2 }
0x1286   :  { %v17852_v56 = vadd.f32 %v9388_v44, %v8885_v23  ;;  %v9480_v63 = vpop.f32.mrf.mxu3 }
0x1287   :  { %v17854_v15 = vadd.f32 %v9480_v63, %v8977_v29 }
0x128a   :  { %13424 = vmatmul.msk.f32.gmra.mxu2 %vm7607_vm11, %v17726_v12  ;;  %v18211_v12 = vld [vmem:[#allocation48_spill] sm:$0xff] }
0x128b   :  { %13449 = vmatmul.msk.f32.gmra.mxu3 %vm7607_vm11, %v17859_v58  ;;  %v8891_v33 = vadd.f32 %v18212_v32, %v18211_v12 }
0x128d   :  { %v9391_v40 = vpop.f32.mrf.mxu2 }
0x128e   :  { %v17869_v9 = vadd.f32 %v9391_v40, %v8888_v39  ;;  %v9483_v59 = vpop.f32.mrf.mxu3 }
0x128f   :  { %v17871_v35 = vadd.f32 %v9483_v59, %v8980_v20 }
0x1292   :  { %13425 = vmatmul.msk.f32.gmra.mxu2 %vm7607_vm11, %v17739_v48  ;;  %v18216_v48 = vld [vmem:[#allocation27_spill] sm:$0xff] }
0x1293   :  { %13450 = vmatmul.msk.f32.gmra.mxu3 %vm7607_vm11, %v17876_v21  ;;  %v8894_v18 = vadd.f32 %v18216_v48, %v18215_v34 }
0x1295   :  { %v9394_v38 = vpop.f32.mrf.mxu2 }
0x1296   :  { %v17886_v37 = vadd.f32 %v9394_v38, %v8891_v33  ;;  %v9486_v55 = vpop.f32.mrf.mxu3 }
0x1297   :  { %v17888_v30 = vadd.f32 %v9486_v55, %v8983_v53 }
0x129a   :  { %13426 = vmatmul.msk.f32.gmra.mxu2 %vm7607_vm11, %v17752_v25 }
0x129d   :  { %v9397_v27 = vpop.f32.mrf.mxu2 }
0x129e   :  { %v17894_v62 = vadd.f32 %v9397_v27, %v8894_v18  ;;  %v9977_v46 = vpop.f32.mrf.mxu3 }
0x129f   :  { %v10026_v57 = vadd.f32 %v9977_v46, %v17675_v36  ;;  %v18219_v36 = vld [vmem:[#allocation53_spill] sm:$0xff] }
0x12a1   :  { %14218 = vtanh.f32 %v10026_v57 }
0x12a2   :  { %13427 = vmatmul.msk.f32.gmra.mxu2 %vm7607_vm11, %v17765_v43  ;;  %v18220_v43 = vld [vmem:[#allocation31_spill] sm:$0xff] }
0x12a3   :  { %v8900_v44 = vadd.f32 %v18220_v43, %v18219_v36 }
0x12a5   :  { %v9400_v23 = vpop.f32.mrf.mxu2 }
0x12a6   :  { %v17901_v14 = vadd.f32 %v9400_v23, %v8897_v13  ;;  %v9980_v25 = vpop.f32.mrf.mxu3 }
0x12a7   :  { %v14219_v6 = vpop.eup %14218  ;;  %v10028_v29 = vadd.f32 %v9980_v25, %v17685_v42  ;;  %v18221_v42 = vld [vmem:[#allocation55_spill] sm:$0xff] }
0x12a8   :  { %10090 = vst [vmem:[%s18093_s21 + $0x8] sm:$0xff] %v14219_v6 }
0x12a9   :  { %14220 = vtanh.f32 %v10028_v29 }
0x12aa   :  { %13428 = vmatmul.msk.f32.gmra.mxu2 %vm7607_vm11, %v17777_v16  ;;  %v18222_v16 = vld [vmem:[#allocation34_spill] sm:$0xff] }
0x12ab   :  { %v8903_v49 = vadd.f32 %v18222_v16, %v18221_v42 }
0x12ad   :  { %v9403_v63 = vpop.f32.mrf.mxu2 }
0x12ae   :  { %v17911_v5 = vadd.f32 %v9403_v63, %v8900_v44  ;;  %v9983_v1 = vpop.f32.mrf.mxu3 }
0x12af   :  { %v14221_v39 = vpop.eup %14220  ;;  %v10030_v54 = vadd.f32 %v9983_v1, %v17695_v22  ;;  %v18223_v22 = vld [vmem:[#allocation57_spill] sm:$0xff] }
0x12b0   :  { %10092 = vst [vmem:[%s18093_s21 + $0x18] sm:$0xff] %v14221_v39 }
0x12b1   :  { %14222 = vtanh.f32 %v10030_v54 }
0x12b2   :  { %13429 = vmatmul.msk.f32.gmra.mxu2 %vm7607_vm11, %v17793_v50  ;;  %v18224_v50 = vld [vmem:[#allocation37_spill] sm:$0xff] }
0x12b3   :  { %v8906_v33 = vadd.f32 %v18224_v50, %v18223_v22 }
0x12b5   :  { %v9406_v20 = vpop.f32.mrf.mxu2 }
0x12b6   :  { %v17921_v40 = vadd.f32 %v9406_v20, %v8903_v49  ;;  %v9986_v59 = vpop.f32.mrf.mxu3 }
0x12b7   :  { %v14223_v12 = vpop.eup %14222  ;;  %v10032_v32 = vadd.f32 %v9986_v59, %v17708_v3  ;;  %v18225_v3 = vld [vmem:[#allocation59_spill] sm:$0xff] }
0x12b8   :  { %10094 = vst [vmem:[%s18093_s21 + $0x28] sm:$0xff] %v14223_v12 }
0x12b9   :  { %14224 = vtanh.f32 %v10032_v32 }
0x12ba   :  { %13430 = vmatmul.msk.f32.gmra.mxu2 %vm7607_vm11, %v17809_v60  ;;  %v18226_v60 = vld [vmem:[#allocation40_spill] sm:$0xff] }
0x12bb   :  { %v8909_v34 = vadd.f32 %v18226_v60, %v18225_v3 }
0x12bd   :  { %v9409_v4 = vpop.f32.mrf.mxu2 }
0x12be   :  { %v17931_v8 = vadd.f32 %v9409_v4, %v8906_v33  ;;  %v9989_v53 = vpop.f32.mrf.mxu3 }
0x12bf   :  { %v14225_v38 = vpop.eup %14224  ;;  %v10034_v55 = vadd.f32 %v9989_v53, %v17721_v28  ;;  %v18227_v28 = vld [vmem:[#allocation61_spill] sm:$0xff] }
0x12c0   :  { %10096 = vst [vmem:[%s18093_s21 + $0x38] sm:$0xff] %v14225_v38 }
0x12c1   :  { %14226 = vtanh.f32 %v10034_v55 }
0x12c2   :  { %13431 = vmatmul.msk.f32.gmra.mxu2 %vm7607_vm11, %v17825_v31  ;;  %v18228_v31 = vld [vmem:[#allocation43_spill] sm:$0xff] }
0x12c3   :  { %v8912_v7 = vadd.f32 %v18228_v31, %v18227_v28 }
0x12c5   :  { %v9412_v48 = vpop.f32.mrf.mxu2 }
0x12c6   :  { %v17941_v18 = vadd.f32 %v9412_v48, %v8909_v34  ;;  %v9992_v27 = vpop.f32.mrf.mxu3 }
0x12c7   :  { %v14227_v46 = vpop.eup %14226  ;;  %v10036_v57 = vadd.f32 %v9992_v27, %v17734_v45  ;;  %v18229_v45 = vld [vmem:[#allocation63_spill] sm:$0xff] }
0x12c8   :  { %10098 = vst [vmem:[%s18093_s21 + $0x48] sm:$0xff] %v14227_v46 }
0x12c9   :  { %14228 = vtanh.f32 %v10036_v57 }
0x12ca   :  { %13432 = vmatmul.msk.f32.gmra.mxu2 %vm7607_vm11, %v17842_v10  ;;  %v18230_v10 = vld [vmem:[#allocation46_spill] sm:$0xff] }
0x12cb   :  { %v8915_v29 = vadd.f32 %v18230_v10, %v18229_v45 }
0x12cd   :  { %v9415_v41 = vpop.f32.mrf.mxu2 }
0x12ce   :  { %v17951_v13 = vadd.f32 %v9415_v41, %v8912_v7  ;;  %v9995_v23 = vpop.f32.mrf.mxu3 }
0x12cf   :  { %v14229_v25 = vpop.eup %14228  ;;  %v10038_v6 = vadd.f32 %v9995_v23, %v17747_v26  ;;  %v18231_v26 = vld [vmem:[#allocation65_spill] sm:$0xff] }
0x12d0   :  { %10100 = vst [vmem:[%s18093_s21 + $0x58] sm:$0xff] %v14229_v25 }
0x12d1   :  { %14230 = vtanh.f32 %v10038_v6 }
0x12d2   :  { %13433 = vmatmul.msk.f32.gmra.mxu2 %vm7607_vm11, %v17859_v58  ;;  %v18232_v58 = vld [vmem:[#allocation49_spill] sm:$0xff] }
0x12d3   :  { %v8918_v39 = vadd.f32 %v18232_v58, %v18231_v26 }
0x12d5   :  { %v9418_v36 = vpop.f32.mrf.mxu2 }
0x12d6   :  { %v17961_v43 = vadd.f32 %v9418_v36, %v8915_v29  ;;  %v9998_v44 = vpop.f32.mrf.mxu3 }
0x12d7   :  { %v14231_v63 = vpop.eup %14230  ;;  %v10040_v1 = vadd.f32 %v9998_v44, %v17760_v11 }
0x12d8   :  { %10102 = vst [vmem:[%s18093_s21 + $0x68] sm:$0xff] %v14231_v63 }
0x12d9   :  { %14232 = vtanh.f32 %v10040_v1 }
0x12da   :  { %13434 = vmatmul.msk.f32.gmra.mxu2 %vm7607_vm11, %v17876_v21 }
0x12dd   :  { %v9421_v54 = vpop.f32.mrf.mxu2 }
0x12de   :  { %v17971_v42 = vadd.f32 %v9421_v54, %v8918_v39  ;;  %v10001_v16 = vpop.f32.mrf.mxu3 }
0x12df   :  { %v14233_v49 = vpop.eup %14232  ;;  %v10042_v20 = vadd.f32 %v10001_v16, %v17772_v19 }
0x12e0   :  { %10104 = vst [vmem:[%s18093_s21 + $0x78] sm:$0xff] %v14233_v49 }
0x12e1   :  { %14234 = vtanh.f32 %v10042_v20 }
0x12e5   :  { %v9912_v11 = vpop.f32.mrf.mxu2 }
0x12e6   :  { %v10025_v59 = vadd.f32 %v9912_v11, %v17786_v24  ;;  %v10004_v12 = vpop.f32.mrf.mxu3 }
0x12e7   :  { %v14235_v21 = vpop.eup %14234  ;;  %v10044_v32 = vadd.f32 %v10004_v12, %v17788_v2 }
0x12e8   :  { %10106 = vst [vmem:[%s18093_s21 + $0x88] sm:$0xff] %v14235_v21  ;;  %14236 = vtanh.f32 %v10025_v59 }
0x12e9   :  { %14238 = vtanh.f32 %v10044_v32 }
0x12ed   :  { %v9915_v22 = vpop.f32.mrf.mxu2 }
0x12ee   :  { %v14237_v19 = vpop.eup %14236  ;;  %v10027_v50 = vadd.f32 %v9915_v22, %v17802_v61  ;;  %v10007_v33 = vpop.f32.mrf.mxu3 }
0x12ef   :  { %v14239_v4 = vpop.eup %14238  ;;  %10089 = vst [vmem:[%s18093_s21] sm:$0xff] %v14237_v19  ;;  %v10046_v24 = vadd.f32 %v10007_v33, %v17804_v51 }
0x12f0   :  { %10108 = vst [vmem:[%s18093_s21 + $0x98] sm:$0xff] %v14239_v4  ;;  %14240 = vtanh.f32 %v10027_v50 }
0x12f1   :  { %14242 = vtanh.f32 %v10046_v24 }
0x12f5   :  { %v9918_v2 = vpop.f32.mrf.mxu2 }
0x12f6   :  { %v14241_v53 = vpop.eup %14240  ;;  %v10029_v38 = vadd.f32 %v9918_v2, %v17818_v0  ;;  %v10010_v55 = vpop.f32.mrf.mxu3 }
0x12f7   :  { %v14243_v61 = vpop.eup %14242  ;;  %10091 = vst [vmem:[%s18093_s21 + $0x10] sm:$0xff] %v14241_v53  ;;  %v10048_v3 = vadd.f32 %v10010_v55, %v17820_v17 }
0x12f8   :  { %10110 = vst [vmem:[%s18093_s21 + $0xa8] sm:$0xff] %v14243_v61  ;;  %14244 = vtanh.f32 %v10029_v38 }
0x12f9   :  { %14246 = vtanh.f32 %v10048_v3 }
0x12fd   :  { %v9921_v51 = vpop.f32.mrf.mxu2 }
0x12fe   :  { %v14245_v60 = vpop.eup %14244  ;;  %v10031_v34 = vadd.f32 %v9921_v51, %v17835_v47  ;;  %v10013_v48 = vpop.f32.mrf.mxu3 }
0x12ff   :  { %v14247_v0 = vpop.eup %14246  ;;  %10093 = vst [vmem:[%s18093_s21 + $0x20] sm:$0xff] %v14245_v60  ;;  %v10050_v27 = vadd.f32 %v10013_v48, %v17837_v52 }
0x1300   :  { %10112 = vst [vmem:[%s18093_s21 + $0xb8] sm:$0xff] %v14247_v0  ;;  %14248 = vtanh.f32 %v10031_v34 }
0x1301   :  { %14250 = vtanh.f32 %v10050_v27 }
0x1305   :  { %v9924_v17 = vpop.f32.mrf.mxu2 }
0x1306   :  { %v14249_v46 = vpop.eup %14248  ;;  %v10033_v57 = vadd.f32 %v9924_v17, %v17852_v56  ;;  %v10016_v28 = vpop.f32.mrf.mxu3 }
0x1307   :  { %v14251_v47 = vpop.eup %14250  ;;  %10095 = vst [vmem:[%s18093_s21 + $0x30] sm:$0xff] %v14249_v46  ;;  %v10052_v31 = vadd.f32 %v10016_v28, %v17854_v15 }
0x1308   :  { %10114 = vst [vmem:[%s18093_s21 + $0xc8] sm:$0xff] %v14251_v47  ;;  %14252 = vtanh.f32 %v10033_v57 }
0x1309   :  { %14254 = vtanh.f32 %v10052_v31 }
0x130d   :  { %v9927_v52 = vpop.f32.mrf.mxu2 }
0x130e   :  { %v14253_v7 = vpop.eup %14252  ;;  %v10035_v41 = vadd.f32 %v9927_v52, %v17869_v9  ;;  %v10019_v23 = vpop.f32.mrf.mxu3 }
0x130f   :  { %v14255_v56 = vpop.eup %14254  ;;  %10097 = vst [vmem:[%s18093_s21 + $0x40] sm:$0xff] %v14253_v7  ;;  %v10054_v25 = vadd.f32 %v10019_v23, %v17871_v35 }
0x1310   :  { %10116 = vst [vmem:[%s18093_s21 + $0xd8] sm:$0xff] %v14255_v56  ;;  %14256 = vtanh.f32 %v10035_v41 }
0x1311   :  { %14258 = vtanh.f32 %v10054_v25 }
0x1315   :  { %v9930_v15 = vpop.f32.mrf.mxu2 }
0x1316   :  { %v14257_v6 = vpop.eup %14256  ;;  %v10037_v45 = vadd.f32 %v9930_v15, %v17886_v37  ;;  %v10022_v10 = vpop.f32.mrf.mxu3 }
0x1317   :  { %v14259_v9 = vpop.eup %14258  ;;  %10099 = vst [vmem:[%s18093_s21 + $0x50] sm:$0xff] %v14257_v6  ;;  %v10056_v29 = vadd.f32 %v10022_v10, %v17888_v30 }
0x1318   :  { %10118 = vst [vmem:[%s18093_s21 + $0xe8] sm:$0xff] %v14259_v9  ;;  %14260 = vtanh.f32 %v10037_v45 }
0x1319   :  { %14262 = vtanh.f32 %v10056_v29 }
0x131d   :  { %v9933_v35 = vpop.f32.mrf.mxu2 }
0x131e   :  { %v14261_v36 = vpop.eup %14260  ;;  %v10039_v44 = vadd.f32 %v9933_v35, %v17894_v62 }
0x131f   :  { %v14263_v63 = vpop.eup %14262  ;;  %10101 = vst [vmem:[%s18093_s21 + $0x60] sm:$0xff] %v14261_v36 }
0x1320   :  { %10120 = vst [vmem:[%s18093_s21 + $0xf8] sm:$0xff] %v14263_v63  ;;  %14264 = vtanh.f32 %v10039_v44 }
0x1325   :  { %v9936_v37 = vpop.f32.mrf.mxu2 }
0x1326   :  { %v14265_v30 = vpop.eup %14264  ;;  %v10041_v1 = vadd.f32 %v9936_v37, %v17901_v14 }
0x1327   :  { %10103 = vst [vmem:[%s18093_s21 + $0x70] sm:$0xff] %v14265_v30 }
0x1328   :  { %14266 = vtanh.f32 %v10041_v1 }
0x132d   :  { %v9939_v62 = vpop.f32.mrf.mxu2 }
0x132e   :  { %v14267_v26 = vpop.eup %14266  ;;  %v10043_v58 = vadd.f32 %v9939_v62, %v17911_v5 }
0x132f   :  { %10105 = vst [vmem:[%s18093_s21 + $0x80] sm:$0xff] %v14267_v26 }
0x1330   :  { %14268 = vtanh.f32 %v10043_v58 }
0x1335   :  { %v9942_v39 = vpop.f32.mrf.mxu2 }
0x1336   :  { %v14269_v54 = vpop.eup %14268  ;;  %v10045_v16 = vadd.f32 %v9942_v39, %v17921_v40 }
0x1337   :  { %10107 = vst [vmem:[%s18093_s21 + $0x90] sm:$0xff] %v14269_v54 }
0x1338   :  { %14270 = vtanh.f32 %v10045_v16 }
0x133d   :  { %v9945_v14 = vpop.f32.mrf.mxu2 }
0x133e   :  { %v14271_v49 = vpop.eup %14270  ;;  %v10047_v20 = vadd.f32 %v9945_v14, %v17931_v8 }
0x133f   :  { %10109 = vst [vmem:[%s18093_s21 + $0xa0] sm:$0xff] %v14271_v49 }
0x1340   :  { %14272 = vtanh.f32 %v10047_v20 }
0x1345   :  { %v9948_v5 = vpop.f32.mrf.mxu2 }
0x1346   :  { %v14273_v11 = vpop.eup %14272  ;;  %v10049_v59 = vadd.f32 %v9948_v5, %v17941_v18 }
0x1347   :  { %10111 = vst [vmem:[%s18093_s21 + $0xb0] sm:$0xff] %v14273_v11 }
0x1348   :  { %14274 = vtanh.f32 %v10049_v59 }
0x134d   :  { %v9951_v40 = vpop.f32.mrf.mxu2 }
0x134e   :  { %v14275_v12 = vpop.eup %14274  ;;  %v10051_v21 = vadd.f32 %v9951_v40, %v17951_v13 }
0x134f   :  { %10113 = vst [vmem:[%s18093_s21 + $0xc0] sm:$0xff] %v14275_v12 }
0x1350   :  { %14276 = vtanh.f32 %v10051_v21 }
0x1355   :  { %v9954_v8 = vpop.f32.mrf.mxu2 }
0x1356   :  { %v14277_v32 = vpop.eup %14276  ;;  %v10053_v22 = vadd.f32 %v9954_v8, %v17961_v43 }
0x1357   :  { %10115 = vst [vmem:[%s18093_s21 + $0xd0] sm:$0xff] %v14277_v32 }
0x1358   :  { %14278 = vtanh.f32 %v10053_v22 }
0x135d   :  { %v9957_v18 = vpop.f32.mrf.mxu2 }
0x135e   :  { %v14279_v19 = vpop.eup %14278  ;;  %v10055_v50 = vadd.f32 %v9957_v18, %v17971_v42 }
0x135f   :  { %10117 = vst [vmem:[%s18093_s21 + $0xe0] sm:$0xff] %v14279_v19 }
0x1360   :  { %14280 = vtanh.f32 %v10055_v50 }
0x1366   :  { %v14281_v13 = vpop.eup %14280 }
0x1367   :  { %10119 = vst [vmem:[%s18093_s21 + $0xf0] sm:$0xff] %v14281_v13 }
0x1368   :  { %10125 = vsyncpa [#allocation3], 1 }
0x1369   :  { %10126 = vsyncpa [#allocation5], 1 }
0x136a   :  { %10127 = vsyncpa [#allocation8], 1 }
0x136b   :  { %10128 = vsyncpa [#allocation11], 1 }
0x136c   :  { %10129 = vsyncpa [#allocation14], 1 }

</bundles_post_ra>
